<compile_context>
chip_gen: v7x
topology: tpu7x:2x2x1
jax: 0.10.0
libtpu: 0.0.40
codegen_flags: <defaults>
</compile_context>

<pallas_src>
import jax
import jax.numpy as jnp
from jax.experimental import pallas as pl
from jax.experimental.pallas import tpu as pltpu

LANE = 128


def _round_up(n, m):
    return ((n + m - 1) // m) * m


# ----------------------------- fused kernel -----------------------------
def _fused_kernel(x_ref, wfc1_ref, bfc1_ref, w1_ref, b1_ref, w2_ref, b2_ref,
                  w3_ref, b3_ref, wf_ref, bf_ref, o_ref):
    f32 = jnp.float32
    cdt = w1_ref.dtype                      # bf16 conv-matmul dtype
    g1 = w1_ref.shape[1] // 2               # 128-aligned pool-1 phase-group width (2304)
    g2 = w2_ref.shape[1] // 3               # 256
    g3 = w3_ref.shape[1] // 3               # 128

    # fc1 + tanh   (dropout p=0.1 is identity in eval mode)
    h = jnp.tanh(
        jnp.dot(x_ref[...], wfc1_ref[...], preferred_element_type=f32) + bfc1_ref[...])

    # conv1 as one banded matmul; columns are pre-grouped by pool-1 phase and padded
    # to 128-lane multiples, so pool1 is an elementwise max of two lane-aligned slices.
    # ReLU is folded into the pool: maxpool(relu(y)) == max(phase0, phase1, 0).
    y1 = jnp.dot(h.astype(cdt), w1_ref[...], preferred_element_type=f32) + b1_ref[...]
    z1 = jnp.maximum(jnp.maximum(y1[:, :g1], y1[:, g1:]), 0.0)               # (TB, 2304)

    # conv2 + pool2 (3 aligned phase groups)
    y2 = jnp.dot(z1.astype(cdt), w2_ref[...], preferred_element_type=f32) + b2_ref[...]
    z2 = jnp.maximum(
        jnp.maximum(jnp.maximum(y2[:, :g2], y2[:, g2:2 * g2]), y2[:, 2 * g2:]), 0.0)  # (TB, 256)

    # conv3 + pool3 (3 aligned phase groups); z3 columns = channel-major flatten order.
    y3 = jnp.dot(z2.astype(cdt), w3_ref[...], preferred_element_type=f32) + b3_ref[...]
    z3 = jnp.maximum(
        jnp.maximum(jnp.maximum(y3[:, :g3], y3[:, g3:2 * g3]), y3[:, 2 * g3:]), 0.0)  # (TB, 128)

    # final fc   (dropouts are identity in eval mode)
    o_ref[...] = (jnp.dot(z3, wf_ref[...], preferred_element_type=f32)
                  + bf_ref[...]).astype(o_ref.dtype)


# ----------------- one-time weight preparation (hoisted) -----------------
def _conv_pool_matmul_weights(w, b, in_width, pool, rows_pad=None, group_pad=None):
    """Banded (Toeplitz) matmul weight for a 1-D 'valid' conv whose output columns are
    grouped by floor-mode max-pool phase.

    Rows:    c * in_width + p              (input channel c, input position p),
             zero-padded to `rows_pad` so K matches the previous stage's padded width.
    Columns: r * group_pad + o * U + u     (pool phase r, out channel o, pooled pos u),
             conv output position t = pool*u + r; each phase group zero-padded to
             `group_pad` columns so in-kernel pool slices are 128-lane aligned.
    """
    C_out, C_in, K = w.shape
    n_conv = in_width - K + 1
    U = n_conv // pool                      # floor-mode pooling drops the tail
    G = C_out * U
    rows = C_in * in_width
    rows_p = rows if rows_pad is None else rows_pad
    Gp = G if group_pad is None else group_pad

    c = jnp.arange(C_in).reshape(C_in, 1, 1, 1, 1)
    p = jnp.arange(in_width).reshape(1, in_width, 1, 1, 1)
    r = jnp.arange(pool).reshape(1, 1, pool, 1, 1)
    o = jnp.arange(C_out).reshape(1, 1, 1, C_out, 1)
    u = jnp.arange(U).reshape(1, 1, 1, 1, U)
    k = p - (pool * u + r)                  # conv tap index; valid when 0 <= k < K
    valid = (k >= 0) & (k < K)
    vals = jnp.where(valid, w[o, c, jnp.clip(k, 0, K - 1)], 0.0)  # (C_in,W,pool,C_out,U)
    W = vals.reshape(rows, pool, G)
    W = jnp.pad(W, ((0, rows_p - rows), (0, 0), (0, Gp - G))).reshape(rows_p, pool * Gp)
    bias = jnp.broadcast_to(b.reshape(1, C_out, 1), (pool, C_out, U)).reshape(pool, G)
    bias = jnp.pad(bias, ((0, 0), (0, Gp - G))).reshape(1, pool * Gp)
    return W, bias


def prepare_params(params, conv_dtype=jnp.bfloat16):
    """Build matmul-layout weights once (hoisted out of the forward path)."""
    f32 = jnp.float32
    w1 = params["conv1_w"].reshape(30, 1, 150).astype(f32)
    w2 = params["conv2_w"].reshape(10, 30, 5).astype(f32)
    w3 = params["conv3_w"].reshape(5, 10, 5).astype(f32)

    # Phase-group widths padded to 128-lane multiples. Padded lanes stay exactly 0
    # through relu/max and hit zero weight rows in the next stage.
    g1 = _round_up(30 * 75, LANE)   # 2250 -> 2304
    g2 = _round_up(10 * 23, LANE)   # 230  -> 256
    g3 = _round_up(5 * 6, LANE)     # 30   -> 128

    W1, B1 = _conv_pool_matmul_weights(w1, params["conv1_b"].astype(f32), 300, 2,
                                       rows_pad=300, group_pad=g1)   # (300, 4608)
    W2, B2 = _conv_pool_matmul_weights(w2, params["conv2_b"].astype(f32), 75, 3,
                                       rows_pad=g1, group_pad=g2)    # (2304, 768)
    W3, B3 = _conv_pool_matmul_weights(w3, params["conv3_b"].astype(f32), 23, 3,
                                       rows_pad=g2, group_pad=g3)    # (256, 384)
    wf = jnp.pad(params["final_w"].T.astype(f32), ((0, g3 - 30), (0, 0)))  # (128, 1)
    return {
        "wfc1": params["fc1_w"].T.astype(f32),                 # (D, 300)
        "bfc1": params["fc1_b"].reshape(1, 300).astype(f32),
        "w1": W1.astype(conv_dtype), "b1": B1.astype(f32),
        "w2": W2.astype(conv_dtype), "b2": B2.astype(f32),
        "w3": W3.astype(conv_dtype), "b3": B3.astype(f32),
        "wf": wf,
        "bf": params["final_b"].reshape(1, 1).astype(f32),
    }


# ------------------------------ forward ------------------------------
def combined_mlp_forward(x, prep, tile_b=256):
    """Fused forward pass; `tile_b` samples per grid step (~22 MiB VMEM at 256)."""
    B, D = x.shape
    f32 = jnp.float32
    x = x.astype(f32)

    tb = min(tile_b, _round_up(B, 8))
    Bp = _round_up(B, tb)
    if Bp != B:
        x = jnp.pad(x, ((0, Bp - B), (0, 0)))

    def full(a):
        return pl.BlockSpec(a.shape, lambda i: (0, 0))

    out = pl.pallas_call(
        _fused_kernel,
        out_shape=jax.ShapeDtypeStruct((Bp, 1), f32),
        grid=(Bp // tb,),
        in_specs=[
            pl.BlockSpec((tb, D), lambda i: (i, 0)),
            full(prep["wfc1"]), full(prep["bfc1"]),
            full(prep["w1"]), full(prep["b1"]),
            full(prep["w2"]), full(prep["b2"]),
            full(prep["w3"]), full(prep["b3"]),
            full(prep["wf"]), full(prep["bf"]),
        ],
        out_specs=pl.BlockSpec((tb, 1), lambda i: (i, 0)),
        compiler_params=pltpu.CompilerParams(
            dimension_semantics=("parallel",),
            vmem_limit_bytes=48 * 1024 * 1024,
        ),
    )(x, prep["wfc1"], prep["bfc1"], prep["w1"], prep["b1"],
      prep["w2"], prep["b2"], prep["w3"], prep["b3"], prep["wf"], prep["bf"])
    return out[:B]


# ------------------------- deterministic params -------------------------
def init_params(key, input_dim):
    ks = jax.random.split(key, 10)

    def u(k, shape, fan_in):
        bound = 1.0 / jnp.sqrt(jnp.float32(fan_in))
        return jax.random.uniform(k, shape, jnp.float32, -bound, bound)

    return {
        "fc1_w": u(ks[0], (300, input_dim), input_dim),
        "fc1_b": u(ks[1], (300,), input_dim),
        "conv1_w": u(ks[2], (30, 1, 1, 150), 1 * 150),
        "conv1_b": u(ks[3], (30,), 1 * 150),
        "conv2_w": u(ks[4], (10, 30, 1, 5), 30 * 5),
        "conv2_b": u(ks[5], (10,), 30 * 5),
        "conv3_w": u(ks[6], (5, 10, 1, 5), 10 * 5),
        "conv3_b": u(ks[7], (5,), 10 * 5),
        "final_w": u(ks[8], (1, 30), 30),
        "final_b": u(ks[9], (1,), 30),
    }


# ------------------------- pure-JAX reference -------------------------
def reference_forward(x, p):
    h = jnp.tanh(x @ p["fc1_w"].T + p["fc1_b"])
    a = h[:, None, None, :]                          # NCHW: (B, 1, 1, 300)
    dn = ("NCHW", "OIHW", "NCHW")

    def conv_relu(a, w, b):
        y = jax.lax.conv_general_dilated(a, w, (1, 1), "VALID", dimension_numbers=dn)
        return jnp.maximum(y + b[None, :, None, None], 0.0)

    def pool(a, k):
        return jax.lax.reduce_window(a, -jnp.inf, jax.lax.max,
                                     (1, 1, 1, k), (1, 1, 1, k), "VALID")

    a = pool(conv_relu(a, p["conv1_w"], p["conv1_b"]), 2)
    a = pool(conv_relu(a, p["conv2_w"], p["conv2_b"]), 3)
    a = pool(conv_relu(a, p["conv3_w"], p["conv3_b"]), 3)
    flat = a.reshape(a.shape[0], -1)                 # (B, 30)
    return flat @ p["final_w"].T + p["final_b"]


if __name__ == "__main__":
    key = jax.random.PRNGKey(0)
    pkey, xkey, xkey2, xkey3 = jax.random.split(key, 4)
    input_dim = 32
    batch = 2
    params = init_params(pkey, input_dim)
    prepped = prepare_params(params)

    # bf16 MXU conv inputs (f32 accumulation) give ~1e-3 absolute deviation from the
    # all-f32 reference, hence the 2e-2 tolerance below.
    TOL = dict(rtol=2e-2, atol=2e-2)

    # Check 1: tiny batch (pads to one 8-row tile, grid = 1).
    x = jax.random.normal(xkey, (batch, input_dim), jnp.float32)
    out = jax.block_until_ready(combined_mlp_forward(x, prepped))
    ref = reference_forward(x, params)
    assert out.shape == (batch, 1), out.shape
    if not jnp.allclose(out, ref, **TOL):
        raise AssertionError(
            f"Pallas/reference mismatch (max |diff|={jnp.max(jnp.abs(out - ref))}):\n{out}\nvs\n{ref}")

    # Check 2: multi-tile path (batch padded 200 -> 256, grid = 4, parallel axis).
    x2 = jax.random.normal(xkey2, (200, input_dim), jnp.float32)
    out2 = jax.block_until_ready(combined_mlp_forward(x2, prepped, tile_b=64))
    ref2 = reference_forward(x2, params)
    assert out2.shape == (200, 1), out2.shape
    if not jnp.allclose(out2, ref2, **TOL):
        raise AssertionError(
            f"Pallas/reference mismatch on tiled batch (max |diff|="
            f"{jnp.max(jnp.abs(out2 - ref2))})")

    # Check 3: default tile_b=256 path (batch padded 300 -> 512, grid = 2).
    x3 = jax.random.normal(xkey3, (300, input_dim), jnp.float32)
    out3 = jax.block_until_ready(combined_mlp_forward(x3, prepped))
    ref3 = reference_forward(x3, params)
    assert out3.shape == (300, 1), out3.shape
    if not jnp.allclose(out3, ref3, **TOL):
        raise AssertionError(
            f"Pallas/reference mismatch on 256-row tiles (max |diff|="
            f"{jnp.max(jnp.abs(out3 - ref3))})")

    print("KERNEL_OK")
</pallas_src>

<mosaic_0001>
module attributes {stable_mosaic.version = 11 : i64} {
  func.func @_fused_kernel(%arg0: i32, %arg1: memref<8x32xf32, #tpu.memory_space<vmem>>, %arg2: memref<32x300xf32, #tpu.memory_space<vmem>>, %arg3: memref<1x300xf32, #tpu.memory_space<vmem>>, %arg4: memref<300x4608xbf16, #tpu.memory_space<vmem>>, %arg5: memref<1x4608xf32, #tpu.memory_space<vmem>>, %arg6: memref<2304x768xbf16, #tpu.memory_space<vmem>>, %arg7: memref<1x768xf32, #tpu.memory_space<vmem>>, %arg8: memref<256x384xbf16, #tpu.memory_space<vmem>>, %arg9: memref<1x384xf32, #tpu.memory_space<vmem>>, %arg10: memref<128x1xf32, #tpu.memory_space<vmem>>, %arg11: memref<1x1xf32, #tpu.memory_space<vmem>>, %arg12: memref<8x1xf32, #tpu.memory_space<vmem>>) attributes {dimension_semantics = [#tpu.dimension_semantics<parallel>], iteration_bounds = array<i64: 1>, scalar_prefetch = 0 : i64, scratch_operands = 0 : i64, tpu.core_type = #tpu.core_type<tc>, window_params = [{transform_indices = @transform_0, window_bounds = array<i64: 8, 32>}, {pipeline_mode = #tpu.pipeline_mode<synchronous>, transform_indices = @transform_1, window_bounds = array<i64: 32, 300>}, {pipeline_mode = #tpu.pipeline_mode<synchronous>, transform_indices = @transform_2, window_bounds = array<i64: 1, 300>}, {pipeline_mode = #tpu.pipeline_mode<synchronous>, transform_indices = @transform_3, window_bounds = array<i64: 300, 4608>}, {pipeline_mode = #tpu.pipeline_mode<synchronous>, transform_indices = @transform_4, window_bounds = array<i64: 1, 4608>}, {pipeline_mode = #tpu.pipeline_mode<synchronous>, transform_indices = @transform_5, window_bounds = array<i64: 2304, 768>}, {pipeline_mode = #tpu.pipeline_mode<synchronous>, transform_indices = @transform_6, window_bounds = array<i64: 1, 768>}, {pipeline_mode = #tpu.pipeline_mode<synchronous>, transform_indices = @transform_7, window_bounds = array<i64: 256, 384>}, {pipeline_mode = #tpu.pipeline_mode<synchronous>, transform_indices = @transform_8, window_bounds = array<i64: 1, 384>}, {pipeline_mode = #tpu.pipeline_mode<synchronous>, transform_indices = @transform_9, window_bounds = array<i64: 128, 1>}, {pipeline_mode = #tpu.pipeline_mode<synchronous>, transform_indices = @transform_10, window_bounds = array<i64: 1, 1>}, {transform_indices = @transform_11, window_bounds = array<i64: 8, 1>}]} {
    %c0 = arith.constant 0 : index
    %c0_0 = arith.constant 0 : index
    %0 = vector.load %arg1[%c0, %c0_0] : memref<8x32xf32, #tpu.memory_space<vmem>>, vector<8x32xf32>
    %c0_1 = arith.constant 0 : index
    %c0_2 = arith.constant 0 : index
    %1 = vector.load %arg2[%c0_1, %c0_2] : memref<32x300xf32, #tpu.memory_space<vmem>>, vector<32x300xf32>
    %cst = arith.constant dense<0.000000e+00> : vector<8x300xf32>
    %2 = tpu.matmul %0, %1, %cst {dimension_numbers = #tpu.dot_dimension_numbers<[1], [0], [0], [1], [0, 0, 1, 1], [], []>} : vector<8x32xf32>, vector<32x300xf32>, vector<8x300xf32> -> vector<8x300xf32>
    %c0_3 = arith.constant 0 : index
    %c0_4 = arith.constant 0 : index
    %3 = vector.load %arg3[%c0_3, %c0_4] : memref<1x300xf32, #tpu.memory_space<vmem>>, vector<1x300xf32>
    %4 = vector.broadcast %3 : vector<1x300xf32> to vector<8x300xf32>
    %5 = arith.addf %2, %4 : vector<8x300xf32>
    %6 = math.tanh %5 : vector<8x300xf32>
    %7 = arith.truncf %6 : vector<8x300xf32> to vector<8x300xbf16>
    %c0_5 = arith.constant 0 : index
    %c0_6 = arith.constant 0 : index
    %8 = vector.load %arg4[%c0_5, %c0_6] : memref<300x4608xbf16, #tpu.memory_space<vmem>>, vector<300x4608xbf16>
    %cst_7 = arith.constant dense<0.000000e+00> : vector<8x4608xf32>
    %9 = tpu.matmul %7, %8, %cst_7 {dimension_numbers = #tpu.dot_dimension_numbers<[1], [0], [0], [1], [0, 0, 1, 1], [], []>} : vector<8x300xbf16>, vector<300x4608xbf16>, vector<8x4608xf32> -> vector<8x4608xf32>
    %c0_8 = arith.constant 0 : index
    %c0_9 = arith.constant 0 : index
    %10 = vector.load %arg5[%c0_8, %c0_9] : memref<1x4608xf32, #tpu.memory_space<vmem>>, vector<1x4608xf32>
    %11 = vector.broadcast %10 : vector<1x4608xf32> to vector<8x4608xf32>
    %12 = arith.addf %9, %11 : vector<8x4608xf32>
    %13 = vector.extract_strided_slice %12 {offsets = [0, 0], sizes = [8, 2304], strides = [1, 1]} : vector<8x4608xf32> to vector<8x2304xf32>
    %14 = vector.extract_strided_slice %12 {offsets = [0, 2304], sizes = [8, 2304], strides = [1, 1]} : vector<8x4608xf32> to vector<8x2304xf32>
    %15 = arith.maximumf %13, %14 : vector<8x2304xf32>
    %cst_10 = arith.constant 0.000000e+00 : f32
    %16 = vector.broadcast %cst_10 : f32 to vector<8x2304xf32>
    %17 = arith.maximumf %15, %16 : vector<8x2304xf32>
    %18 = arith.truncf %17 : vector<8x2304xf32> to vector<8x2304xbf16>
    %c0_11 = arith.constant 0 : index
    %c0_12 = arith.constant 0 : index
    %19 = vector.load %arg6[%c0_11, %c0_12] : memref<2304x768xbf16, #tpu.memory_space<vmem>>, vector<2304x768xbf16>
    %cst_13 = arith.constant dense<0.000000e+00> : vector<8x768xf32>
    %20 = tpu.matmul %18, %19, %cst_13 {dimension_numbers = #tpu.dot_dimension_numbers<[1], [0], [0], [1], [0, 0, 1, 1], [], []>} : vector<8x2304xbf16>, vector<2304x768xbf16>, vector<8x768xf32> -> vector<8x768xf32>
    %c0_14 = arith.constant 0 : index
    %c0_15 = arith.constant 0 : index
    %21 = vector.load %arg7[%c0_14, %c0_15] : memref<1x768xf32, #tpu.memory_space<vmem>>, vector<1x768xf32>
    %22 = vector.broadcast %21 : vector<1x768xf32> to vector<8x768xf32>
    %23 = arith.addf %20, %22 : vector<8x768xf32>
    %24 = vector.extract_strided_slice %23 {offsets = [0, 0], sizes = [8, 256], strides = [1, 1]} : vector<8x768xf32> to vector<8x256xf32>
    %25 = vector.extract_strided_slice %23 {offsets = [0, 256], sizes = [8, 256], strides = [1, 1]} : vector<8x768xf32> to vector<8x256xf32>
    %26 = arith.maximumf %24, %25 : vector<8x256xf32>
    %27 = vector.extract_strided_slice %23 {offsets = [0, 512], sizes = [8, 256], strides = [1, 1]} : vector<8x768xf32> to vector<8x256xf32>
    %28 = arith.maximumf %26, %27 : vector<8x256xf32>
    %cst_16 = arith.constant 0.000000e+00 : f32
    %29 = vector.broadcast %cst_16 : f32 to vector<8x256xf32>
    %30 = arith.maximumf %28, %29 : vector<8x256xf32>
    %31 = arith.truncf %30 : vector<8x256xf32> to vector<8x256xbf16>
    %c0_17 = arith.constant 0 : index
    %c0_18 = arith.constant 0 : index
    %32 = vector.load %arg8[%c0_17, %c0_18] : memref<256x384xbf16, #tpu.memory_space<vmem>>, vector<256x384xbf16>
    %cst_19 = arith.constant dense<0.000000e+00> : vector<8x384xf32>
    %33 = tpu.matmul %31, %32, %cst_19 {dimension_numbers = #tpu.dot_dimension_numbers<[1], [0], [0], [1], [0, 0, 1, 1], [], []>} : vector<8x256xbf16>, vector<256x384xbf16>, vector<8x384xf32> -> vector<8x384xf32>
    %c0_20 = arith.constant 0 : index
    %c0_21 = arith.constant 0 : index
    %34 = vector.load %arg9[%c0_20, %c0_21] : memref<1x384xf32, #tpu.memory_space<vmem>>, vector<1x384xf32>
    %35 = vector.broadcast %34 : vector<1x384xf32> to vector<8x384xf32>
    %36 = arith.addf %33, %35 : vector<8x384xf32>
    %37 = vector.extract_strided_slice %36 {offsets = [0, 0], sizes = [8, 128], strides = [1, 1]} : vector<8x384xf32> to vector<8x128xf32>
    %38 = vector.extract_strided_slice %36 {offsets = [0, 128], sizes = [8, 128], strides = [1, 1]} : vector<8x384xf32> to vector<8x128xf32>
    %39 = arith.maximumf %37, %38 : vector<8x128xf32>
    %40 = vector.extract_strided_slice %36 {offsets = [0, 256], sizes = [8, 128], strides = [1, 1]} : vector<8x384xf32> to vector<8x128xf32>
    %41 = arith.maximumf %39, %40 : vector<8x128xf32>
    %cst_22 = arith.constant 0.000000e+00 : f32
    %42 = vector.broadcast %cst_22 : f32 to vector<8x128xf32>
    %43 = arith.maximumf %41, %42 : vector<8x128xf32>
    %c0_23 = arith.constant 0 : index
    %c0_24 = arith.constant 0 : index
    %44 = vector.load %arg10[%c0_23, %c0_24] : memref<128x1xf32, #tpu.memory_space<vmem>>, vector<128x1xf32>
    %cst_25 = arith.constant dense<0.000000e+00> : vector<8x1xf32>
    %45 = tpu.matmul %43, %44, %cst_25 {dimension_numbers = #tpu.dot_dimension_numbers<[1], [0], [0], [1], [0, 0, 1, 1], [], []>} : vector<8x128xf32>, vector<128x1xf32>, vector<8x1xf32> -> vector<8x1xf32>
    %c0_26 = arith.constant 0 : index
    %c0_27 = arith.constant 0 : index
    %46 = vector.load %arg11[%c0_26, %c0_27] : memref<1x1xf32, #tpu.memory_space<vmem>>, vector<1x1xf32>
    %47 = vector.broadcast %46 : vector<1x1xf32> to vector<8x1xf32>
    %48 = arith.addf %45, %47 : vector<8x1xf32>
    %c0_28 = arith.constant 0 : index
    %c0_29 = arith.constant 0 : index
    %49 = vector.load %arg12[%c0_28, %c0_29] : memref<8x1xf32, #tpu.memory_space<vmem>>, vector<8x1xf32>
    tpu.vector_store %arg12[%c0_28, %c0_29], %48 {strides = array<i32>} : memref<8x1xf32, #tpu.memory_space<vmem>>, vector<8x1xf32>,
    return
  }
  func.func @transform_0(%arg0: i32) -> (i32, i32) {
    %c0_i32 = arith.constant 0 : i32
    %c0_i32_0 = arith.constant 0 : i32
    return %arg0, %c0_i32 : i32, i32
  }
  func.func @transform_1(%arg0: i32) -> (i32, i32) {
    %c0_i32 = arith.constant 0 : i32
    %c0_i32_0 = arith.constant 0 : i32
    %c0_i32_1 = arith.constant 0 : i32
    return %c0_i32, %c0_i32_0 : i32, i32
  }
  func.func @transform_2(%arg0: i32) -> (i32, i32) {
    %c0_i32 = arith.constant 0 : i32
    %c0_i32_0 = arith.constant 0 : i32
    %c0_i32_1 = arith.constant 0 : i32
    return %c0_i32, %c0_i32_0 : i32, i32
  }
  func.func @transform_3(%arg0: i32) -> (i32, i32) {
    %c0_i32 = arith.constant 0 : i32
    %c0_i32_0 = arith.constant 0 : i32
    %c0_i32_1 = arith.constant 0 : i32
    return %c0_i32, %c0_i32_0 : i32, i32
  }
  func.func @transform_4(%arg0: i32) -> (i32, i32) {
    %c0_i32 = arith.constant 0 : i32
    %c0_i32_0 = arith.constant 0 : i32
    %c0_i32_1 = arith.constant 0 : i32
    return %c0_i32, %c0_i32_0 : i32, i32
  }
  func.func @transform_5(%arg0: i32) -> (i32, i32) {
    %c0_i32 = arith.constant 0 : i32
    %c0_i32_0 = arith.constant 0 : i32
    %c0_i32_1 = arith.constant 0 : i32
    return %c0_i32, %c0_i32_0 : i32, i32
  }
  func.func @transform_6(%arg0: i32) -> (i32, i32) {
    %c0_i32 = arith.constant 0 : i32
    %c0_i32_0 = arith.constant 0 : i32
    %c0_i32_1 = arith.constant 0 : i32
    return %c0_i32, %c0_i32_0 : i32, i32
  }
  func.func @transform_7(%arg0: i32) -> (i32, i32) {
    %c0_i32 = arith.constant 0 : i32
    %c0_i32_0 = arith.constant 0 : i32
    %c0_i32_1 = arith.constant 0 : i32
    return %c0_i32, %c0_i32_0 : i32, i32
  }
  func.func @transform_8(%arg0: i32) -> (i32, i32) {
    %c0_i32 = arith.constant 0 : i32
    %c0_i32_0 = arith.constant 0 : i32
    %c0_i32_1 = arith.constant 0 : i32
    return %c0_i32, %c0_i32_0 : i32, i32
  }
  func.func @transform_9(%arg0: i32) -> (i32, i32) {
    %c0_i32 = arith.constant 0 : i32
    %c0_i32_0 = arith.constant 0 : i32
    %c0_i32_1 = arith.constant 0 : i32
    return %c0_i32, %c0_i32_0 : i32, i32
  }
  func.func @transform_10(%arg0: i32) -> (i32, i32) {
    %c0_i32 = arith.constant 0 : i32
    %c0_i32_0 = arith.constant 0 : i32
    %c0_i32_1 = arith.constant 0 : i32
    return %c0_i32, %c0_i32_0 : i32, i32
  }
  func.func @transform_11(%arg0: i32) -> (i32, i32) {
    %c0_i32 = arith.constant 0 : i32
    %c0_i32_0 = arith.constant 0 : i32
    return %arg0, %c0_i32 : i32, i32
  }
}

</mosaic_0001>

<bundles_post_ra>
// kernel: tpu_custom_call.1
= control target key start
LH: loop header
LB: loop body
LE: loop exit
PB: predicated region body
PF: predicated region fallthrough
CT: control target
= control target key end

     0   :  { %s18501_s0 = inlined_call_operand.hbm [shape: f32[8,32], index: 0, kind: input, shape index: {}]   ;;  %s18502_s1 = inlined_call_operand.hbm [shape: f32[32,300], index: 1, kind: input, shape index: {}]   ;;  %s18503_s2 = inlined_call_operand.hbm [shape: f32[1,300], index: 2, kind: input, shape index: {}]   ;;  %s18504_s3 = inlined_call_operand.hbm [shape: bf16[300,4608], index: 3, kind: input, shape index: {}]   ;;  %s18505_s4 = inlined_call_operand.hbm [shape: f32[1,4608], index: 4, kind: input, shape index: {}]   ;;  %s18506_s5 = inlined_call_operand.hbm [shape: bf16[2304,768], index: 5, kind: input, shape index: {}]   ;;  %s18507_s6 = inlined_call_operand.hbm [shape: f32[1,768], index: 6, kind: input, shape index: {}]   ;;  %s18508_s7 = inlined_call_operand.hbm [shape: bf16[256,384], index: 7, kind: input, shape index: {}]   ;;  %s18509_s8 = inlined_call_operand.hbm [shape: f32[1,384], index: 8, kind: input, shape index: {}]   ;;  %s18510_s9 = inlined_call_operand.vmem [shape: f32[128,1], index: 9, kind: input, shape index: {}]   ;;  %s18511_s10 = inlined_call_operand.<no memory space> [shape: f32[1,1], index: 10, kind: input, shape index: {}]   ;;  %s18512_s11 = inlined_call_operand.vmem [shape: f32[8,1], index: 11, kind: output, shape index: {}]  }
   0x1   :  { %v16_v0 = vstv %s18511_s10 }
   0x2   :  { %17 = vst [vmem:[#allocation2] sm:$0x1] %v16_v0 }
   0x3   :  { %18 = vsyncpa [#allocation4], 0 }
   0x4   :  { %19 = vsyncpa [#allocation6], 0 }
   0x5   :  { %20 = vsyncpa [#allocation9], 0 }
   0x6   :  { %21 = vsyncpa [#allocation12], 0 }
   0x7   :  { %22 = vsyncpa [#allocation15], 0  ;;  %s17687_s19 = smov [#allocation5]   ;;  %s17479_s23 = scalar_lea.hbm %s18502_s1, 1536 }
   0x8   :  { %s38_s20 = sshll.u32 %s17687_s19, 4  ;;  %p17480_p0 = scmp.ne.s32.totalorder %s18502_s1, %s17479_s23  ;;  %s39_s20 = int_to_ptr.vmem [resolvable:$true] %s38_s20 }
   0x9   :  { %p17483_p1 = scmp.lt.u32.totalorder %s17479_s23, %s18502_s1 }
   0xb   :  { %p17485_p2 = pnand %p17483_p1, %p17480_p0 }
   0xd   :  { %17488 = shalt.err (!%p17485_p2)
}
   0xe   :  { %s17489_s10 = scalar_lea.vmem %s39_s20, 1536  ;;  %p17494_p4 = scmp.lt.s32.totalorder %s39_s20, %s39_s20 }
   0xf   :  { %p17490_p3 = scmp.ne.s32.totalorder %s39_s20, %s17489_s10  ;;  %p17495_p5 = scmp.lt.s32.totalorder %s17489_s10, %s17489_s10 }
  0x11   :  { %p17496_p6 = por %p17495_p5, %p17494_p4 }
  0x13   :  { %p17497_p7 = pnand %p17496_p6, %p17490_p3 }
  0x15   :  { %17500 = shalt.err (!%p17497_p7)
}
  0x16   :  { %s17688_s28 = smov 384   ;;  %s17689_s29 = smov 24  }
  0x17   :  { %44 = dma.hbm_to_vmem [thread:$0]  %s18502_s1, 1536, %s39_s20, [#allocation6], %s17688_s28, %s17688_s28, %s17689_s29  }
  0x18   :  { %s17690_s13 = smov [#allocation8]   ;;  %s17501_s17 = scalar_lea.hbm %s18504_s3, 87552 }
  0x19   :  { %s60_s14 = sshll.u32 %s17690_s13, 4  ;;  %p17502_p8 = scmp.ne.s32.totalorder %s18504_s3, %s17501_s17  ;;  %s61_s14 = int_to_ptr.vmem [resolvable:$true] %s60_s14 }
  0x1a   :  { %p17505_p9 = scmp.lt.u32.totalorder %s17501_s17, %s18504_s3 }
  0x1c   :  { %p17507_p10 = pnand %p17505_p9, %p17502_p8 }
  0x1e   :  { %17510 = shalt.err (!%p17507_p10)
}
  0x1f   :  { %s17511_s23 = scalar_lea.vmem %s61_s14, 87552  ;;  %p17516_p12 = scmp.lt.s32.totalorder %s61_s14, %s61_s14 }
  0x20   :  { %p17512_p11 = scmp.ne.s32.totalorder %s61_s14, %s17511_s23  ;;  %p17517_p13 = scmp.lt.s32.totalorder %s17511_s23, %s17511_s23 }
  0x22   :  { %p17518_p0 = por %p17517_p13, %p17516_p12 }
  0x24   :  { %p17519_p1 = pnand %p17518_p0, %p17512_p11 }
  0x26   :  { %17522 = shalt.err (!%p17519_p1)
}
  0x27   :  { %s17691_s1 = smov 2304   ;;  %s17692_s20 = smov 144  }
  0x28   :  { %66 = dma.hbm_to_vmem [thread:$0]  %s18504_s3, 87552, %s61_s14, [#allocation9], %s17691_s1, %s17691_s1, %s17692_s20  }
  0x29   :  { %s17693_s26 = smov [#allocation11]   ;;  %s17694_s10 = smov [#allocation14]  }
  0x2a   :  { %s82_s27 = sshll.u32 %s17693_s26, 4  ;;  %s104_s30 = sshll.u32 %s17694_s10, 4  ;;  %s83_s27 = int_to_ptr.vmem [resolvable:$true] %s82_s27  ;;  %s17796_s30 = int_to_ptr.vmem [resolvable:$true] %s104_s30 }
  0x2b   :  { %s17523_s15 = scalar_lea.hbm %s18506_s5, 110592 }
  0x2c   :  { %p17524_p2 = scmp.ne.s32.totalorder %s18506_s5, %s17523_s15  ;;  %p17527_p3 = scmp.lt.u32.totalorder %s17523_s15, %s18506_s5 }
  0x2e   :  { %p17529_p4 = pnand %p17527_p3, %p17524_p2 }
  0x30   :  { %17532 = shalt.err (!%p17529_p4)
}
  0x31   :  { %s17533_s3 = scalar_lea.vmem %s83_s27, 110592  ;;  %p17538_p6 = scmp.lt.s32.totalorder %s83_s27, %s83_s27 }
  0x32   :  { %p17534_p5 = scmp.ne.s32.totalorder %s83_s27, %s17533_s3  ;;  %p17539_p7 = scmp.lt.s32.totalorder %s17533_s3, %s17533_s3 }
  0x34   :  { %p17540_p8 = por %p17539_p7, %p17538_p6 }
  0x36   :  { %p17541_p9 = pnand %p17540_p8, %p17534_p5 }
  0x38   :  { %17544 = shalt.err (!%p17541_p9)
}
  0x39   :  { %88 = dma.hbm_to_vmem [thread:$0]  %s18506_s5, 110592, %s83_s27, [#allocation12], %s17688_s28, %s17688_s28, %s17689_s29  }
  0x3a   :  { %s17545_s1 = scalar_lea.hbm %s18508_s7, 6144 }
  0x3b   :  { %p17546_p10 = scmp.ne.s32.totalorder %s18508_s7, %s17545_s1  ;;  %p17549_p11 = scmp.lt.u32.totalorder %s17545_s1, %s18508_s7 }
  0x3d   :  { %p17551_p12 = pnand %p17549_p11, %p17546_p10 }
  0x3f   :  { %17554 = shalt.err (!%p17551_p12)
}
  0x40   :  { %s17555_s10 = scalar_lea.vmem %s17796_s30, 6144  ;;  %p17560_p0 = scmp.lt.s32.totalorder %s17796_s30, %s17796_s30 }
  0x41   :  { %p17556_p13 = scmp.ne.s32.totalorder %s17796_s30, %s17555_s10  ;;  %p17561_p1 = scmp.lt.s32.totalorder %s17555_s10, %s17555_s10 }
  0x43   :  { %p17562_p2 = por %p17561_p1, %p17560_p0 }
  0x45   :  { %p17563_p3 = pnand %p17562_p2, %p17556_p13 }
  0x47   :  { %17566 = shalt.err (!%p17563_p3)
}
  0x48   :  { %s17695_s5 = smov 192   ;;  %s17696_s28 = smov 12  }
  0x49   :  { %110 = dma.hbm_to_vmem [thread:$0]  %s18508_s7, 6144, %s17796_s30, [#allocation15], %s17695_s5, %s17695_s5, %s17696_s28  }
  0x4a   :  { %s17697_s12 = smov [#allocation3]   ;;  %s17698_s15 = smov [#allocation7]  }
  0x4b   :  { %s29_s13 = sshll.u32 %s17697_s12, 4  ;;  %s51_s16 = sshll.u32 %s17698_s15, 4  ;;  %s30_s13 = int_to_ptr.vmem [resolvable:$true] %s29_s13  ;;  %s52_s16 = int_to_ptr.vmem [resolvable:$true] %s51_s16 }
  0x4c   :  { %s17567_s19 = scalar_lea.hbm %s18501_s0, 128 }
  0x4d   :  { %p17568_p4 = scmp.ne.s32.totalorder %s18501_s0, %s17567_s19  ;;  %p17571_p5 = scmp.lt.u32.totalorder %s17567_s19, %s18501_s0 }
  0x4f   :  { %p17573_p6 = pnand %p17571_p5, %p17568_p4 }
  0x51   :  { %17576 = shalt.err (!%p17573_p6)
}
  0x52   :  { %s17577_s7 = scalar_lea.vmem %s30_s13, 128  ;;  %p17582_p8 = scmp.lt.s32.totalorder %s30_s13, %s30_s13 }
  0x53   :  { %p17578_p7 = scmp.ne.s32.totalorder %s30_s13, %s17577_s7  ;;  %p17583_p9 = scmp.lt.s32.totalorder %s17577_s7, %s17577_s7 }
  0x55   :  { %p17584_p10 = por %p17583_p9, %p17582_p8 }
  0x57   :  { %p17585_p11 = pnand %p17584_p10, %p17578_p7 }
  0x59   :  { %17588 = shalt.err (!%p17585_p11)
}
  0x5a   :  { %32 = dma.hbm_to_vmem [thread:$0]  %s18501_s0, 128, %s30_s13, [#allocation4]  }
  0x5b   :  { %s17589_s24 = scalar_lea.hbm %s18503_s2, 48 }
  0x5c   :  { %p17590_p12 = scmp.ne.s32.totalorder %s18503_s2, %s17589_s24  ;;  %p17593_p13 = scmp.lt.u32.totalorder %s17589_s24, %s18503_s2 }
  0x5e   :  { %p17595_p0 = pnand %p17593_p13, %p17590_p12 }
  0x60   :  { %17598 = shalt.err (!%p17595_p0)
}
  0x61   :  { %s17599_s28 = scalar_lea.vmem %s52_s16, 48  ;;  %s17603_s29 = scalar_lea.vmem %s52_s16, 64 }
  0x62   :  { %p17600_p1 = scmp.ne.s32.totalorder %s52_s16, %s17599_s28  ;;  %p17604_p2 = scmp.lt.s32.totalorder %s52_s16, %s52_s16 }
  0x63   :  { %p17605_p3 = scmp.lt.s32.totalorder %s17603_s29, %s17599_s28 }
  0x65   :  { %p17606_p4 = por %p17605_p3, %p17604_p2 }
  0x67   :  { %p17607_p5 = pnand %p17606_p4, %p17600_p1 }
  0x69   :  { %17610 = shalt.err (!%p17607_p5)
}
  0x6a   :  { %54 = dma.hbm_to_vmem [thread:$0]  %s18503_s2, 48, %s52_s16, [#allocation6]  }
  0x6b   :  { %s17699_s12 = smov [#allocation10]   ;;  %s17700_s15 = smov [#allocation13]  }
  0x6c   :  { %s73_s13 = sshll.u32 %s17699_s12, 4  ;;  %s95_s17 = sshll.u32 %s17700_s15, 4  ;;  %s74_s13 = int_to_ptr.vmem [resolvable:$true] %s73_s13  ;;  %s96_s17 = int_to_ptr.vmem [resolvable:$true] %s95_s17 }
  0x6d   :  { %s17611_s3 = scalar_lea.hbm %s18505_s4, 576 }
  0x6e   :  { %p17612_p6 = scmp.ne.s32.totalorder %s18505_s4, %s17611_s3  ;;  %p17615_p7 = scmp.lt.u32.totalorder %s17611_s3, %s18505_s4 }
  0x70   :  { %p17617_p8 = pnand %p17615_p7, %p17612_p6 }
  0x72   :  { %17620 = shalt.err (!%p17617_p8)
}
  0x73   :  { %s17621_s2 = scalar_lea.vmem %s74_s13, 576  ;;  %p17626_p10 = scmp.lt.s32.totalorder %s74_s13, %s74_s13 }
  0x74   :  { %p17622_p9 = scmp.ne.s32.totalorder %s74_s13, %s17621_s2  ;;  %p17627_p11 = scmp.lt.s32.totalorder %s17621_s2, %s17621_s2 }
  0x76   :  { %p17628_p12 = por %p17627_p11, %p17626_p10 }
  0x78   :  { %p17629_p13 = pnand %p17628_p12, %p17622_p9 }
  0x7a   :  { %17632 = shalt.err (!%p17629_p13)
}
  0x7b   :  { %76 = dma.hbm_to_vmem [thread:$0]  %s18505_s4, 576, %s74_s13, [#allocation9]  }
  0x7c   :  { %s17633_s20 = scalar_lea.hbm %s18507_s6, 96 }
  0x7d   :  { %p17634_p0 = scmp.ne.s32.totalorder %s18507_s6, %s17633_s20  ;;  %p17637_p1 = scmp.lt.u32.totalorder %s17633_s20, %s18507_s6 }
  0x7f   :  { %p17639_p2 = pnand %p17637_p1, %p17634_p0 }
  0x81   :  { %17642 = shalt.err (!%p17639_p2)
}
  0x82   :  { %s17643_s5 = scalar_lea.vmem %s96_s17, 96  ;;  %p17648_p4 = scmp.lt.s32.totalorder %s96_s17, %s96_s17 }
  0x83   :  { %p17644_p3 = scmp.ne.s32.totalorder %s96_s17, %s17643_s5  ;;  %p17649_p5 = scmp.lt.s32.totalorder %s17643_s5, %s17643_s5 }
  0x85   :  { %p17650_p6 = por %p17649_p5, %p17648_p4 }
  0x87   :  { %p17651_p7 = pnand %p17650_p6, %p17644_p3 }
  0x89   :  { %17654 = shalt.err (!%p17651_p7)
}
  0x8a   :  { %98 = dma.hbm_to_vmem [thread:$0]  %s18507_s6, 96, %s96_s17, [#allocation12]  }
  0x8b   :  { %s17701_s29 = smov [#allocation16]   ;;  %s17655_s13 = scalar_lea.hbm %s18509_s8, 48 }
  0x8c   :  { %s117_s0 = sshll.u32 %s17701_s29, 4  ;;  %p17656_p8 = scmp.ne.s32.totalorder %s18509_s8, %s17655_s13  ;;  %s118_s0 = int_to_ptr.vmem [resolvable:$true] %s117_s0 }
  0x8d   :  { %p17659_p9 = scmp.lt.u32.totalorder %s17655_s13, %s18509_s8 }
  0x8f   :  { %p17661_p10 = pnand %p17659_p9, %p17656_p8 }
  0x91   :  { %17664 = shalt.err (!%p17661_p10)
}
  0x92   :  { %s17665_s14 = scalar_lea.vmem %s118_s0, 48  ;;  %s17669_s6 = scalar_lea.vmem %s118_s0, 64 }
  0x93   :  { %p17666_p11 = scmp.ne.s32.totalorder %s118_s0, %s17665_s14  ;;  %p17670_p12 = scmp.lt.s32.totalorder %s118_s0, %s118_s0 }
  0x94   :  { %p17671_p13 = scmp.lt.s32.totalorder %s17669_s6, %s17665_s14 }
  0x96   :  { %p17672_p0 = por %p17671_p13, %p17670_p12 }
  0x98   :  { %p17673_p1 = pnand %p17672_p0, %p17666_p11 }
  0x9a   :  { %17676 = shalt.err (!%p17673_p1)
}
  0x9b   :  { %120 = dma.hbm_to_vmem [thread:$0]  %s18509_s8, 48, %s118_s0, [#allocation15]  }
  0x9c   :  { %17677 = dma.done.wait [#allocation4], 128  }
  0x9d   :  { %17678 = vsyncadd [#allocation4], 4294967168 }
  0x9e   :  { %17679 = dma.done.wait [#allocation6], 1584  }
  0x9f   :  { %17680 = vsyncadd [#allocation6], 4294965712 }
  0xa0   :  { %17681 = dma.done.wait [#allocation9], 88128  }
  0xa1   :  { %17682 = vsyncadd [#allocation9], 4294879168 }
  0xa2   :  { %17683 = dma.done.wait [#allocation12], 110688  }
  0xa3   :  { %17684 = vsyncadd [#allocation12], 4294856608 }
  0xa4   :  { %17685 = dma.done.wait [#allocation15], 6192  }
  0xa5   :  { %17686 = vsyncadd [#allocation15], 4294961104  ;;  %v18513_v1 = vmov 0.0   ;;  %v155_v2 = vld [vmem:[#allocation5 + $0x8] sm:$0xff]  ;;  %v158_v3 = vld [vmem:[#allocation5 + $0x20] sm:$0xff]  ;;  %vm183_vm0 = vcmask 261120   ;;  %v168_v0 = vlaneseq }
  0xa6   :  { %251 = vmatprep.mubr.f32.mxu1 %v18513_v1  ;;  %v154_v4 = vld [vmem:[#allocation5] sm:$0xff]  ;;  %v14816_v5 = vpack.c.bf16 %v158_v3, %v155_v2  ;;  %v157_v6 = vld [vmem:[#allocation5 + $0x18] sm:$0xff]  ;;  %v164_v8 = vld [vmem:[#allocation5 + $0x50] sm:$0xff]  ;;  %v18514_v18 = vmov 0.0|0.0   ;;  %vm17704_vm1 = vmmov 0   ;;  %vm4596_vm2 = vcmask 1045504  }
  0xa7   :  { %v161_v7 = vld [vmem:[#allocation5 + $0x38] sm:$0xff]  ;;  %v14818_v9 = vpack.c.bf16 %v157_v6, %v154_v4  ;;  %v160_v11 = vld [vmem:[#allocation5 + $0x30] sm:$0xff]  ;;  %v163_v12 = vld [vmem:[#allocation5 + $0x48] sm:$0xff]  ;;  %v17705_v63 = vmov 0   ;;  %v17900_v2 = vshrl.u32 %v168_v0, 7  ;;  %vm4592_vm3 = vcmask 359424  }
  0xa8   :  { %v14820_v10 = vpack.c.bf16 %v164_v8, %v161_v7  ;;  %14817 = vmatprep.subr.bf16.mxu1 %v14816_v5  ;;  %v14822_v13 = vpack.c.bf16 %v163_v12, %v160_v11  ;;  %v156_v14 = vld [vmem:[#allocation5 + $0x10] sm:$0xff]  ;;  %v159_v15 = vld [vmem:[#allocation5 + $0x28] sm:$0xff]  ;;  %v153_v16 = vld [vmem:[#allocation3] sm:$0xff]  ;;  %5106 = vmatprep.mubr.bf16.mxu0 %v17705_v63  ;;  %vm13080_vm4 = vcmask 7168  }
  0xa9   :  { %14819 = vmatpush1.bf16.msra.mxu1 %v14818_v9  ;;  %v14825_v17 = vpack.c.bf16 %v159_v15, %v156_v14  ;;  %v162_v19 = vld [vmem:[#allocation5 + $0x40] sm:$0xff]  ;;  %v165_v20 = vld [vmem:[#allocation5 + $0x58] sm:$0xff]  ;;  %v17903_v3 = vsub.s32 0, %v17900_v2  ;;  %v17906_v5 = vsub.s32 1, %v17900_v2  ;;  %v17911_v11 = vsub.s32 2, %v17900_v2 }
  0xaa   :  { %14821 = vmatprep.subr.bf16.mxu1 %v14820_v10  ;;  %v14828_v21 = vpack.c.bf16 %v165_v20, %v162_v19  ;;  %v15083_v22 = vld [vmem:[#allocation8 + $0x4] ss:$144 sps:$4 sm:$0xff]   ;;  %v15081_v23 = vld [vmem:[#allocation8] ss:$144 sps:$4 sm:$0xff]   ;;  %v166_v4 = vld [vmem:[#allocation7] sm:$0x7] }
  0xab   :  { %v15086_v24 = vld [vmem:[#allocation8 + $0x124] ss:$144 sps:$4 sm:$0xff]   ;;  %v15084_v25 = vld [vmem:[#allocation8 + $0x120] ss:$144 sps:$4 sm:$0xff]   ;;  %v171_v6 = vrot.slane %v166_v4, %v17903_v3  ;;  %v175_v7 = vrot.slane %v166_v4, %v17906_v5 }
  0xac   :  { %v15089_v26 = vld [vmem:[#allocation8 + $0x244] ss:$144 sps:$4 sm:$0xff]   ;;  %v15087_v27 = vld [vmem:[#allocation8 + $0x240] ss:$144 sps:$4 sm:$0xff]  }
  0xad   :  { %14823 = vmatpush1.bf16.msra.mxu1 %v14822_v13  ;;  %v15092_v28 = vld [vmem:[#allocation8 + $0x364] ss:$144 sps:$4 sm:$0xff]   ;;  %v15090_v29 = vld [vmem:[#allocation8 + $0x360] ss:$144 sps:$4 sm:$0xff]   ;;  %v179_v13 = vrot.slane %v166_v4, %v17911_v11 }
  0xae   :  { %14824 = vmatprep.subr.bf16.mxu1 %v18514_v18  ;;  %v15095_v30 = vld [vmem:[#allocation8 + $0x484] ss:$144 sps:$4 sm:$0xff]   ;;  %v15093_v31 = vld [vmem:[#allocation8 + $0x480] ss:$144 sps:$4 sm:$0xff]  }
  0xaf   :  { %v15098_v32 = vld [vmem:[#allocation8 + $0x5a4] ss:$144 sps:$4 sm:$0xff]   ;;  %v15096_v33 = vld [vmem:[#allocation8 + $0x5a0] ss:$144 sps:$4 sm:$0xff]  }
  0xb0   :  { %13091 = vmatmul.mubr.msk.f32.vlgmr.msra.gmra.mrb[0].mxu1 %vm183_vm0, %v153_v16  ;;  %v15101_v34 = vld [vmem:[#allocation8 + $0x6c4] ss:$144 sps:$4 sm:$0xff]   ;;  %v15099_v35 = vld [vmem:[#allocation8 + $0x6c0] ss:$144 sps:$4 sm:$0xff]  }
  0xb1   :  { %14826 = vmatpush3.bf16.msra.mxu1 %v14825_v17  ;;  %14778 = vmatprep.mubr.msk.f32.mxu1 %vm17704_vm1, %v18513_v1  ;;  %v15104_v36 = vld [vmem:[#allocation8 + $0x7e4] ss:$144 sps:$4 sm:$0xff]   ;;  %v15102_v37 = vld [vmem:[#allocation8 + $0x7e0] ss:$144 sps:$4 sm:$0xff]  }
  0xb2   :  { %14827 = vmatprep.subr.bf16.mxu1 %v18514_v18  ;;  %v15107_v38 = vld [vmem:[#allocation8 + $0x904] ss:$144 sps:$4 sm:$0xff]   ;;  %v15105_v39 = vld [vmem:[#allocation8 + $0x900] ss:$144 sps:$4 sm:$0xff]   ;;  %v16086_v18 = vld [vmem:[#allocation8 + $0x1278] ss:$144 sps:$4 sm:$0xff]  }
  0xb3   :  { %v15110_v40 = vld [vmem:[#allocation8 + $0xa24] ss:$144 sps:$4 sm:$0xff]   ;;  %v15108_v41 = vld [vmem:[#allocation8 + $0xa20] ss:$144 sps:$4 sm:$0xff]  }
  0xb4   :  { %v15113_v42 = vld [vmem:[#allocation8 + $0xb44] ss:$144 sps:$4 sm:$0xff]   ;;  %v15111_v43 = vld [vmem:[#allocation8 + $0xb40] ss:$144 sps:$4 sm:$0xff]  }
  0xb5   :  { %14829 = vmatpush3.bf16.msra.mxu1 %v14828_v21  ;;  %v15116_v44 = vld [vmem:[#allocation8 + $0xc64] ss:$144 sps:$4 sm:$0xff]   ;;  %v15114_v45 = vld [vmem:[#allocation8 + $0xc60] ss:$144 sps:$4 sm:$0xff]  }
  0xb6   :  { %4705 = vmatprep.subr.bf16.mxu1 %v15083_v22  ;;  %v15119_v46 = vld [vmem:[#allocation8 + $0xd84] ss:$144 sps:$4 sm:$0xff]   ;;  %v15117_v47 = vld [vmem:[#allocation8 + $0xd80] ss:$144 sps:$4 sm:$0xff]  }
  0xb7   :  { %v15122_v48 = vld [vmem:[#allocation8 + $0xea4] ss:$144 sps:$4 sm:$0xff]   ;;  %v15120_v49 = vld [vmem:[#allocation8 + $0xea0] ss:$144 sps:$4 sm:$0xff]  }
  0xb8   :  { %14779 = vmatmul.mubr.msk.f32.vlgmr.msra.gmra.mrb[2].mxu1 %vm183_vm0, %v153_v16  ;;  %v15125_v50 = vld [vmem:[#allocation8 + $0xfc4] ss:$144 sps:$4 sm:$0xff]   ;;  %v15123_v51 = vld [vmem:[#allocation8 + $0xfc0] ss:$144 sps:$4 sm:$0xff]  }
  0xb9   :  { %4706 = vmatpush1.bf16.msra.mxu1 %v15081_v23  ;;  %v15126_v52 = vld [vmem:[#allocation8 + $0x1224] ss:$144 sps:$4 sm:$0xff]   ;;  %v15128_v53 = vld [vmem:[#allocation8 + $0x1220] ss:$144 sps:$4 sm:$0xff]  }
  0xba   :  { %4707 = vmatprep.subr.bf16.mxu1 %v15086_v24  ;;  %5074 = vmatprep.subr.bf16.mxu0 %v15126_v52  ;;  %v15131_v54 = vld [vmem:[#allocation8 + $0x10e4] ss:$144 sps:$4 sm:$0xff]   ;;  %v15129_v55 = vld [vmem:[#allocation8 + $0x10e0] ss:$144 sps:$4 sm:$0xff]   ;;  %v15185_v52 = vld [vmem:[#allocation8 + $0x5ac] ss:$144 sps:$4 sm:$0xff]  }
  0xbb   :  { %5075 = vmatpush1.bf16.msra.mxu0 %v15128_v53  ;;  %v15132_v56 = vld [vmem:[#allocation8 + $0x1344] ss:$144 sps:$4 sm:$0xff]   ;;  %v15134_v57 = vld [vmem:[#allocation8 + $0x1340] ss:$144 sps:$4 sm:$0xff]  }
  0xbc   :  { %5076 = vmatprep.subr.bf16.mxu0 %v15132_v56  ;;  %v15137_v58 = vld [vmem:[#allocation8 + $0x1204] ss:$144 sps:$4 sm:$0xff]   ;;  %v15140_v60 = vld [vmem:[#allocation8 + $0x1460] ss:$144 sps:$4 sm:$0x3f]  }
  0xbd   :  { %4708 = vmatpush1.bf16.msra.mxu1 %v15084_v25  ;;  %v15138_v59 = vld [vmem:[#allocation8 + $0x1464] ss:$144 sps:$4 sm:$0x3f]   ;;  %v4622_v61 = vsel %vm4596_vm2, %v15140_v60, 0  ;;  %v15135_v21 = vld [vmem:[#allocation8 + $0x1200] ss:$144 sps:$4 sm:$0xff]  }
  0xbe   :  { %4709 = vmatprep.subr.bf16.mxu1 %v15089_v26  ;;  %v15146_v62 = vld [vmem:[#allocation8 + $0x34] ss:$144 sps:$4 sm:$0xff]   ;;  %v15141_v24 = vld [vmem:[#allocation8 + $0x1320] ss:$144 sps:$4 sm:$0xff]  }
  0xbf   :  { %5077 = vmatpush1.bf16.msra.mxu0 %v15134_v57  ;;  %v15143_v23 = vld [vmem:[#allocation8 + $0x1324] ss:$144 sps:$4 sm:$0xff]   ;;  %v15149_v26 = vld [vmem:[#allocation8 + $0x1440] ss:$144 sps:$4 sm:$0x3f]  }
  0xc0   :  { %13785 = vmatprep.subr.msk.bf16.mxu0 %vm4596_vm2, %v15138_v59  ;;  %v15147_v25 = vld [vmem:[#allocation8 + $0x1444] ss:$144 sps:$4 sm:$0x3f]   ;;  %v15180_v53 = vld [vmem:[#allocation8 + $0x6f0] ss:$144 sps:$4 sm:$0xff]  }
  0xc1   :  { %4710 = vmatpush1.bf16.msra.mxu1 %v15087_v27  ;;  %v15186_v56 = vld [vmem:[#allocation8 + $0x810] ss:$144 sps:$4 sm:$0xff]   ;;  %v15191_v57 = vld [vmem:[#allocation8 + $0x6cc] ss:$144 sps:$4 sm:$0xff]   ;;  %v15194_v59 = vld [vmem:[#allocation8 + $0x934] ss:$144 sps:$4 sm:$0xff]  }
  0xc2   :  { %4711 = vmatprep.subr.bf16.mxu1 %v15092_v28  ;;  %v15144_v28 = vld [vmem:[#allocation8 + $0x30] ss:$144 sps:$4 sm:$0xff]   ;;  %v15200_v0 = vld [vmem:[#allocation8 + $0xa54] ss:$144 sps:$4 sm:$0xff]  }
  0xc3   :  { %5079 = vmatpush1.bf16.msra.mxu0 %v4622_v61  ;;  %v15192_v60 = vld [vmem:[#allocation8 + $0x930] ss:$144 sps:$4 sm:$0xff]   ;;  %v15197_v61 = vld [vmem:[#allocation8 + $0x7ec] ss:$144 sps:$4 sm:$0xff]  }
  0xc4   :  { %5197 = vmatprep.subr.bf16.mxu0 %v15146_v62  ;;  %v15195_v62 = vld [vmem:[#allocation8 + $0x7e8] ss:$144 sps:$4 sm:$0xff]   ;;  %v15198_v4 = vld [vmem:[#allocation8 + $0xa50] ss:$144 sps:$4 sm:$0xff]  }
  0xc5   :  { %4712 = vmatpush1.bf16.msra.mxu1 %v15090_v29 }
  0xc6   :  { %4713 = vmatprep.subr.bf16.mxu1 %v15095_v30  ;;  %v15152_v30 = vld [vmem:[#allocation8 + $0x154] ss:$144 sps:$4 sm:$0xff]  }
  0xc9   :  { %4714 = vmatpush1.bf16.msra.mxu1 %v15093_v31  ;;  %v4598_v31 = vsel %vm4596_vm2, %v15149_v26, 0  ;;  %v15227_v26 = vld [vmem:[#allocation8 + $0xd8c] ss:$144 sps:$4 sm:$0xff]  }
  0xca   :  { %4715 = vmatprep.subr.bf16.mxu1 %v15098_v32  ;;  %v15155_v32 = vld [vmem:[#allocation8 + $0xc] ss:$144 sps:$4 sm:$0xff]  }
  0xcd   :  { %4716 = vmatpush1.bf16.msra.mxu1 %v15096_v33  ;;  %v15150_v33 = vld [vmem:[#allocation8 + $0x150] ss:$144 sps:$4 sm:$0xff]  }
  0xce   :  { %4717 = vmatprep.subr.bf16.mxu1 %v15101_v34  ;;  %v15158_v34 = vld [vmem:[#allocation8 + $0x274] ss:$144 sps:$4 sm:$0xff]  }
  0xd1   :  { %4718 = vmatpush1.bf16.msra.mxu1 %v15099_v35  ;;  %v15153_v35 = vld [vmem:[#allocation8 + $0x8] ss:$144 sps:$4 sm:$0xff]  }
  0xd2   :  { %4719 = vmatprep.subr.bf16.mxu1 %v15104_v36  ;;  %v15161_v36 = vld [vmem:[#allocation8 + $0x12c] ss:$144 sps:$4 sm:$0xff]  }
  0xd5   :  { %4720 = vmatpush1.bf16.msra.mxu1 %v15102_v37  ;;  %v15156_v37 = vld [vmem:[#allocation8 + $0x270] ss:$144 sps:$4 sm:$0xff]  }
  0xd6   :  { %4721 = vmatprep.subr.bf16.mxu1 %v15107_v38  ;;  %v15164_v38 = vld [vmem:[#allocation8 + $0x394] ss:$144 sps:$4 sm:$0xff]  }
  0xd9   :  { %4722 = vmatpush1.bf16.msra.mxu1 %v15105_v39  ;;  %v15159_v39 = vld [vmem:[#allocation8 + $0x128] ss:$144 sps:$4 sm:$0xff]  }
  0xda   :  { %4723 = vmatprep.subr.bf16.mxu1 %v15110_v40  ;;  %v15167_v40 = vld [vmem:[#allocation8 + $0x24c] ss:$144 sps:$4 sm:$0xff]  }
  0xdd   :  { %4724 = vmatpush1.bf16.msra.mxu1 %v15108_v41  ;;  %v15162_v41 = vld [vmem:[#allocation8 + $0x390] ss:$144 sps:$4 sm:$0xff]  }
  0xde   :  { %4725 = vmatprep.subr.bf16.mxu1 %v15113_v42  ;;  %v15170_v42 = vld [vmem:[#allocation8 + $0x4b4] ss:$144 sps:$4 sm:$0xff]  }
  0xe1   :  { %4726 = vmatpush1.bf16.msra.mxu1 %v15111_v43  ;;  %v15165_v43 = vld [vmem:[#allocation8 + $0x248] ss:$144 sps:$4 sm:$0xff]  }
  0xe2   :  { %4727 = vmatprep.subr.bf16.mxu1 %v15116_v44  ;;  %v15173_v44 = vld [vmem:[#allocation8 + $0x36c] ss:$144 sps:$4 sm:$0xff]  }
  0xe5   :  { %4728 = vmatpush1.bf16.msra.mxu1 %v15114_v45  ;;  %v15168_v45 = vld [vmem:[#allocation8 + $0x4b0] ss:$144 sps:$4 sm:$0xff]  }
  0xe6   :  { %4729 = vmatprep.subr.bf16.mxu1 %v15119_v46  ;;  %v15176_v46 = vld [vmem:[#allocation8 + $0x5d4] ss:$144 sps:$4 sm:$0xff]  }
  0xe9   :  { %4730 = vmatpush1.bf16.msra.mxu1 %v15117_v47  ;;  %v15171_v47 = vld [vmem:[#allocation8 + $0x368] ss:$144 sps:$4 sm:$0xff]  }
  0xea   :  { %4731 = vmatprep.subr.bf16.mxu1 %v15122_v48  ;;  %v15179_v48 = vld [vmem:[#allocation8 + $0x48c] ss:$144 sps:$4 sm:$0xff]  }
  0xed   :  { %4732 = vmatpush1.bf16.msra.mxu1 %v15120_v49  ;;  %v15174_v49 = vld [vmem:[#allocation8 + $0x5d0] ss:$144 sps:$4 sm:$0xff]  }
  0xee   :  { %4733 = vmatprep.subr.bf16.mxu1 %v15125_v50  ;;  %v15177_v50 = vld [vmem:[#allocation8 + $0x488] ss:$144 sps:$4 sm:$0xff]  }
  0xf1   :  { %4734 = vmatpush1.bf16.msra.mxu1 %v15123_v51  ;;  %v15182_v51 = vld [vmem:[#allocation8 + $0x6f4] ss:$144 sps:$4 sm:$0xff]  }
  0xf2   :  { %4735 = vmatprep.subr.bf16.mxu1 %v15131_v54  ;;  %v15188_v54 = vld [vmem:[#allocation8 + $0x814] ss:$144 sps:$4 sm:$0xff]  }
  0xf5   :  { %4736 = vmatpush1.bf16.msra.mxu1 %v15129_v55  ;;  %v15183_v55 = vld [vmem:[#allocation8 + $0x5a8] ss:$144 sps:$4 sm:$0xff]  }
  0xf6   :  { %4746 = vmatprep.subr.bf16.mxu1 %v15137_v58  ;;  %v15189_v58 = vld [vmem:[#allocation8 + $0x6c8] ss:$144 sps:$4 sm:$0xff]  }
 0x183   :  { %v253_v8 = vpop.f32.mrb[0].mxu1 }
 0x184   :  { %v254_v9 = vadd.f32 %v253_v8, %v171_v6  ;;  %v255_v10 = vpop.f32.mrb[1].mxu1  ;;  %v15203_v6 = vld [vmem:[#allocation8 + $0x90c] ss:$144 sps:$4 sm:$0xff]   ;;  %v15206_v8 = vld [vmem:[#allocation8 + $0xb74] ss:$144 sps:$4 sm:$0xff]  }
 0x185   :  { %v256_v12 = vadd.f32 %v255_v10, %v175_v7  ;;  %v15201_v7 = vld [vmem:[#allocation8 + $0x908] ss:$144 sps:$4 sm:$0xff]   ;;  %v15209_v10 = vld [vmem:[#allocation8 + $0xa2c] ss:$144 sps:$4 sm:$0xff]  }
 0x186   :  { %17467 = vtanh.f32 %v254_v9  ;;  %v15204_v9 = vld [vmem:[#allocation8 + $0xb70] ss:$144 sps:$4 sm:$0xff]  }
 0x187   :  { %17469 = vtanh.f32 %v256_v12  ;;  %v15207_v12 = vld [vmem:[#allocation8 + $0xa28] ss:$144 sps:$4 sm:$0xff]  }
 0x18b   :  { %v324_v14 = vpop.f32.mrb[2].mxu1 }
 0x18c   :  { %v325_v15 = vadd.f32 %v324_v14, %v179_v13  ;;  %v14780_v16 = vpop.f32.mrb[3].mxu1  ;;  %v15212_v13 = vld [vmem:[#allocation8 + $0xc94] ss:$144 sps:$4 sm:$0xff]   ;;  %v15210_v14 = vld [vmem:[#allocation8 + $0xc90] ss:$144 sps:$4 sm:$0xff]  }
 0x18d   :  { %v15213_v16 = vld [vmem:[#allocation8 + $0xb48] ss:$144 sps:$4 sm:$0xff]  }
 0x18e   :  { %17471 = vtanh.f32 %v325_v15  ;;  %v15215_v15 = vld [vmem:[#allocation8 + $0xb4c] ss:$144 sps:$4 sm:$0xff]  }
 0x190   :  { %v17468_v17 = vpop.eup %17467 }
 0x191   :  { %v17470_v19 = vpop.eup %17469  ;;  %v17916_v22 = vpack.c.bf16 %v17468_v17, %v17468_v17  ;;  %v15218_v17 = vld [vmem:[#allocation8 + $0xdb4] ss:$144 sps:$4 sm:$0xff]  }
 0x192   :  { %v17914_v20 = vpack.c.bf16 %v17470_v19, %v17470_v19  ;;  %v15216_v19 = vld [vmem:[#allocation8 + $0xdb0] ss:$144 sps:$4 sm:$0xff]  }
 0x194   :  { %4737 = vmatprep.mubr.bf16.mxu1 %v17914_v20 }
 0x195   :  { %4738 = vmatmul.mubr.bf16.vlgmr.msra.gmra.mrb[4].mxu1 %v17916_v22 }
 0x196   :  { %4747 = vmatpush1.bf16.msra.mxu1 %v15135_v21  ;;  %4778 = vmatprep.mubr.bf16.mxu1 %v17705_v63  ;;  %v15221_v21 = vld [vmem:[#allocation8 + $0xc6c] ss:$144 sps:$4 sm:$0xff]  }
 0x197   :  { %4748 = vmatprep.subr.bf16.mxu1 %v15143_v23  ;;  %v15219_v23 = vld [vmem:[#allocation8 + $0xc68] ss:$144 sps:$4 sm:$0xff]  }
 0x198   :  { %v17472_v27 = vpop.eup %17471 }
 0x199   :  { %v17921_v29 = vpack.c.bf16 %v17472_v27, %v17472_v27  ;;  %v15225_v27 = vld [vmem:[#allocation8 + $0xd88] ss:$144 sps:$4 sm:$0xff]  }
 0x19a   :  { %4749 = vmatpush1.bf16.msra.mxu1 %v15141_v24  ;;  %v15224_v24 = vld [vmem:[#allocation8 + $0xed4] ss:$144 sps:$4 sm:$0xff]  }
 0x19b   :  { %13786 = vmatmul.mubr.msk.bf16.vlgmr.msra.gmra.mrb[0].mxu0 %vm4592_vm3, %v17921_v29  ;;  %13777 = vmatprep.subr.msk.bf16.mxu1 %vm4596_vm2, %v15147_v25  ;;  %v15222_v25 = vld [vmem:[#allocation8 + $0xed0] ss:$144 sps:$4 sm:$0xff]  }
 0x19c   :  { %5198 = vmatpush1.bf16.msra.mxu0 %v15144_v28  ;;  %5229 = vmatprep.mubr.bf16.mxu0 %v17914_v20  ;;  %v15230_v28 = vld [vmem:[#allocation8 + $0xff4] ss:$144 sps:$4 sm:$0xff]  }
 0x19d   :  { %5199 = vmatprep.subr.bf16.mxu0 %v15152_v30  ;;  %v15228_v30 = vld [vmem:[#allocation8 + $0xff0] ss:$144 sps:$4 sm:$0xff]  }
 0x19e   :  { %4751 = vmatpush1.bf16.msra.mxu1 %v4598_v31  ;;  %v15233_v31 = vld [vmem:[#allocation8 + $0xeac] ss:$144 sps:$4 sm:$0xff]  }
 0x19f   :  { %4787 = vmatprep.subr.bf16.mxu1 %v15155_v32  ;;  %v15231_v32 = vld [vmem:[#allocation8 + $0xea8] ss:$144 sps:$4 sm:$0xff]  }
 0x1a0   :  { %5200 = vmatpush1.bf16.msra.mxu0 %v15150_v33  ;;  %v15236_v33 = vld [vmem:[#allocation8 + $0x1114] ss:$144 sps:$4 sm:$0xff]  }
 0x1a1   :  { %13778 = vmatmul.mubr.msk.bf16.vlgmr.msra.gmra.mrb[4].mxu1 %vm4592_vm3, %v17921_v29  ;;  %5201 = vmatprep.subr.bf16.mxu0 %v15158_v34  ;;  %v15234_v34 = vld [vmem:[#allocation8 + $0x1110] ss:$144 sps:$4 sm:$0xff]  }
 0x1a2   :  { %4788 = vmatpush1.bf16.msra.mxu1 %v15153_v35  ;;  %4819 = vmatprep.mubr.bf16.mxu1 %v17914_v20  ;;  %v15239_v35 = vld [vmem:[#allocation8 + $0xfcc] ss:$144 sps:$4 sm:$0xff]  }
 0x1a3   :  { %4789 = vmatprep.subr.bf16.mxu1 %v15161_v36  ;;  %v15237_v36 = vld [vmem:[#allocation8 + $0xfc8] ss:$144 sps:$4 sm:$0xff]  }
 0x1a4   :  { %5202 = vmatpush1.bf16.msra.mxu0 %v15156_v37  ;;  %v15242_v37 = vld [vmem:[#allocation8 + $0x1234] ss:$144 sps:$4 sm:$0xff]  }
 0x1a5   :  { %5203 = vmatprep.subr.bf16.mxu0 %v15164_v38  ;;  %v15240_v38 = vld [vmem:[#allocation8 + $0x1230] ss:$144 sps:$4 sm:$0xff]  }
 0x1a6   :  { %4790 = vmatpush1.bf16.msra.mxu1 %v15159_v39  ;;  %v15245_v39 = vld [vmem:[#allocation8 + $0x10ec] ss:$144 sps:$4 sm:$0xff]  }
 0x1a7   :  { %4791 = vmatprep.subr.bf16.mxu1 %v15167_v40  ;;  %v15243_v40 = vld [vmem:[#allocation8 + $0x10e8] ss:$144 sps:$4 sm:$0xff]  }
 0x1a8   :  { %5204 = vmatpush1.bf16.msra.mxu0 %v15162_v41  ;;  %v15248_v41 = vld [vmem:[#allocation8 + $0x1354] ss:$144 sps:$4 sm:$0xff]  }
 0x1a9   :  { %5205 = vmatprep.subr.bf16.mxu0 %v15170_v42  ;;  %v15246_v42 = vld [vmem:[#allocation8 + $0x1350] ss:$144 sps:$4 sm:$0xff]  }
 0x1aa   :  { %4792 = vmatpush1.bf16.msra.mxu1 %v15165_v43  ;;  %v15251_v43 = vld [vmem:[#allocation8 + $0x120c] ss:$144 sps:$4 sm:$0xff]  }
 0x1ab   :  { %4793 = vmatprep.subr.bf16.mxu1 %v15173_v44  ;;  %v15252_v44 = vld [vmem:[#allocation8 + $0x1474] ss:$144 sps:$4 sm:$0x3f]  }
 0x1ac   :  { %5206 = vmatpush1.bf16.msra.mxu0 %v15168_v45  ;;  %v15254_v45 = vld [vmem:[#allocation8 + $0x1470] ss:$144 sps:$4 sm:$0x3f]  }
 0x1ad   :  { %5207 = vmatprep.subr.bf16.mxu0 %v15176_v46  ;;  %v15249_v46 = vld [vmem:[#allocation8 + $0x1208] ss:$144 sps:$4 sm:$0xff]  }
 0x1ae   :  { %4794 = vmatpush1.bf16.msra.mxu1 %v15171_v47  ;;  %v15257_v47 = vld [vmem:[#allocation8 + $0x132c] ss:$144 sps:$4 sm:$0xff]  }
 0x1af   :  { %4795 = vmatprep.subr.bf16.mxu1 %v15179_v48  ;;  %v15255_v48 = vld [vmem:[#allocation8 + $0x1328] ss:$144 sps:$4 sm:$0xff]  }
 0x1b0   :  { %5208 = vmatpush1.bf16.msra.mxu0 %v15174_v49  ;;  %v4634_v49 = vsel %vm4596_vm2, %v15254_v45, 0  ;;  %v15332_v45 = vld [vmem:[#allocation8 + $0xdc4] ss:$144 sps:$4 sm:$0xff]  }
 0x1b1   :  { %5209 = vmatprep.subr.bf16.mxu0 %v15182_v51  ;;  %v15261_v51 = vld [vmem:[#allocation8 + $0x144c] ss:$144 sps:$4 sm:$0x3f]  }
 0x1b2   :  { %4796 = vmatpush1.bf16.msra.mxu1 %v15177_v50  ;;  %v15260_v50 = vld [vmem:[#allocation8 + $0x44] ss:$144 sps:$4 sm:$0xff]  }
 0x1b3   :  { %4797 = vmatprep.subr.bf16.mxu1 %v15185_v52  ;;  %v15263_v52 = vld [vmem:[#allocation8 + $0x1448] ss:$144 sps:$4 sm:$0x3f]  }
 0x1b4   :  { %5210 = vmatpush1.bf16.msra.mxu0 %v15180_v53  ;;  %v15258_v53 = vld [vmem:[#allocation8 + $0x40] ss:$144 sps:$4 sm:$0xff]  }
 0x1b5   :  { %5211 = vmatprep.subr.bf16.mxu0 %v15188_v54  ;;  %v15266_v54 = vld [vmem:[#allocation8 + $0x164] ss:$144 sps:$4 sm:$0xff]  }
 0x1b6   :  { %4798 = vmatpush1.bf16.msra.mxu1 %v15183_v55  ;;  %v4604_v55 = vsel %vm4596_vm2, %v15263_v52, 0  ;;  %v15339_v52 = vld [vmem:[#allocation8 + $0xd90] ss:$144 sps:$4 sm:$0xff]  }
 0x1b7   :  { %4799 = vmatprep.subr.bf16.mxu1 %v15191_v57  ;;  %v15264_v57 = vld [vmem:[#allocation8 + $0x160] ss:$144 sps:$4 sm:$0xff]  }
 0x1b8   :  { %5212 = vmatpush1.bf16.msra.mxu0 %v15186_v56  ;;  %v15269_v56 = vld [vmem:[#allocation8 + $0x14] ss:$144 sps:$4 sm:$0xff]  }
 0x1b9   :  { %5213 = vmatprep.subr.bf16.mxu0 %v15194_v59  ;;  %v15267_v59 = vld [vmem:[#allocation8 + $0x10] ss:$144 sps:$4 sm:$0xff]  }
 0x1ba   :  { %4800 = vmatpush1.bf16.msra.mxu1 %v15189_v58  ;;  %v15272_v58 = vld [vmem:[#allocation8 + $0x284] ss:$144 sps:$4 sm:$0xff]  }
 0x1bb   :  { %4801 = vmatprep.subr.bf16.mxu1 %v15197_v61  ;;  %v15270_v61 = vld [vmem:[#allocation8 + $0x280] ss:$144 sps:$4 sm:$0xff]  }
 0x1bc   :  { %5214 = vmatpush1.bf16.msra.mxu0 %v15192_v60  ;;  %v15275_v60 = vld [vmem:[#allocation8 + $0x134] ss:$144 sps:$4 sm:$0xff]  }
 0x1bd   :  { %5215 = vmatprep.subr.bf16.mxu0 %v15200_v0  ;;  %v15273_v0 = vld [vmem:[#allocation8 + $0x130] ss:$144 sps:$4 sm:$0xff]  }
 0x1be   :  { %4802 = vmatpush1.bf16.msra.mxu1 %v15195_v62  ;;  %v15278_v62 = vld [vmem:[#allocation8 + $0x3a4] ss:$144 sps:$4 sm:$0xff]  }
 0x1bf   :  { %4803 = vmatprep.subr.bf16.mxu1 %v15203_v6  ;;  %v15276_v6 = vld [vmem:[#allocation8 + $0x3a0] ss:$144 sps:$4 sm:$0xff]  }
 0x1c0   :  { %5216 = vmatpush1.bf16.msra.mxu0 %v15198_v4  ;;  %v15281_v4 = vld [vmem:[#allocation8 + $0x254] ss:$144 sps:$4 sm:$0xff]  }
 0x1c1   :  { %5217 = vmatprep.subr.bf16.mxu0 %v15206_v8  ;;  %v15279_v8 = vld [vmem:[#allocation8 + $0x250] ss:$144 sps:$4 sm:$0xff]  }
 0x1c2   :  { %4804 = vmatpush1.bf16.msra.mxu1 %v15201_v7  ;;  %v15284_v7 = vld [vmem:[#allocation8 + $0x4c4] ss:$144 sps:$4 sm:$0xff]  }
 0x1c3   :  { %4805 = vmatprep.subr.bf16.mxu1 %v15209_v10  ;;  %v15282_v10 = vld [vmem:[#allocation8 + $0x4c0] ss:$144 sps:$4 sm:$0xff]  }
 0x1c4   :  { %5218 = vmatpush1.bf16.msra.mxu0 %v15204_v9  ;;  %v15287_v9 = vld [vmem:[#allocation8 + $0x374] ss:$144 sps:$4 sm:$0xff]  }
 0x1c5   :  { %5219 = vmatprep.subr.bf16.mxu0 %v15212_v13  ;;  %v15285_v13 = vld [vmem:[#allocation8 + $0x370] ss:$144 sps:$4 sm:$0xff]  }
 0x1c6   :  { %4806 = vmatpush1.bf16.msra.mxu1 %v15207_v12  ;;  %v15290_v12 = vld [vmem:[#allocation8 + $0x5e4] ss:$144 sps:$4 sm:$0xff]  }
 0x1c7   :  { %4807 = vmatprep.subr.bf16.mxu1 %v15215_v15  ;;  %v15288_v15 = vld [vmem:[#allocation8 + $0x5e0] ss:$144 sps:$4 sm:$0xff]  }
 0x1c8   :  { %5220 = vmatpush1.bf16.msra.mxu0 %v15210_v14  ;;  %v15293_v14 = vld [vmem:[#allocation8 + $0x494] ss:$144 sps:$4 sm:$0xff]  }
 0x1c9   :  { %5221 = vmatprep.subr.bf16.mxu0 %v15218_v17  ;;  %v15296_v17 = vld [vmem:[#allocation8 + $0x704] ss:$144 sps:$4 sm:$0xff]  }
 0x1ca   :  { %4808 = vmatpush1.bf16.msra.mxu1 %v15213_v16  ;;  %v15291_v16 = vld [vmem:[#allocation8 + $0x490] ss:$144 sps:$4 sm:$0xff]  }
 0x1cb   :  { %4809 = vmatprep.subr.bf16.mxu1 %v15221_v21  ;;  %v15294_v21 = vld [vmem:[#allocation8 + $0x700] ss:$144 sps:$4 sm:$0xff]  }
 0x1cc   :  { %5222 = vmatpush1.bf16.msra.mxu0 %v15216_v19  ;;  %v15299_v19 = vld [vmem:[#allocation8 + $0x5b4] ss:$144 sps:$4 sm:$0xff]  }
 0x1cd   :  { %5223 = vmatprep.subr.bf16.mxu0 %v15224_v24  ;;  %v15297_v24 = vld [vmem:[#allocation8 + $0x5b0] ss:$144 sps:$4 sm:$0xff]  }
 0x1ce   :  { %4810 = vmatpush1.bf16.msra.mxu1 %v15219_v23  ;;  %v15302_v23 = vld [vmem:[#allocation8 + $0x824] ss:$144 sps:$4 sm:$0xff]  }
 0x1cf   :  { %4811 = vmatprep.subr.bf16.mxu1 %v15227_v26  ;;  %v15305_v26 = vld [vmem:[#allocation8 + $0x6d4] ss:$144 sps:$4 sm:$0xff]  }
 0x1d0   :  { %5224 = vmatpush1.bf16.msra.mxu0 %v15222_v25  ;;  %v15300_v25 = vld [vmem:[#allocation8 + $0x820] ss:$144 sps:$4 sm:$0xff]  }
 0x1d1   :  { %5225 = vmatprep.subr.bf16.mxu0 %v15230_v28  ;;  %v15308_v28 = vld [vmem:[#allocation8 + $0x944] ss:$144 sps:$4 sm:$0xff]  }
 0x1d2   :  { %4812 = vmatpush1.bf16.msra.mxu1 %v15225_v27  ;;  %v15303_v27 = vld [vmem:[#allocation8 + $0x6d0] ss:$144 sps:$4 sm:$0xff]  }
 0x1d3   :  { %4813 = vmatprep.subr.bf16.mxu1 %v15233_v31  ;;  %v15311_v31 = vld [vmem:[#allocation8 + $0x7f4] ss:$144 sps:$4 sm:$0xff]  }
 0x1d4   :  { %5226 = vmatpush1.bf16.msra.mxu0 %v15228_v30  ;;  %v15306_v30 = vld [vmem:[#allocation8 + $0x940] ss:$144 sps:$4 sm:$0xff]  }
 0x1d5   :  { %5227 = vmatprep.subr.bf16.mxu0 %v15236_v33  ;;  %v15314_v33 = vld [vmem:[#allocation8 + $0xa64] ss:$144 sps:$4 sm:$0xff]  }
 0x1d6   :  { %4814 = vmatpush1.bf16.msra.mxu1 %v15231_v32  ;;  %v15309_v32 = vld [vmem:[#allocation8 + $0x7f0] ss:$144 sps:$4 sm:$0xff]  }
 0x1d7   :  { %4815 = vmatprep.subr.bf16.mxu1 %v15239_v35  ;;  %v15317_v35 = vld [vmem:[#allocation8 + $0x914] ss:$144 sps:$4 sm:$0xff]  }
 0x1d8   :  { %5228 = vmatpush1.bf16.msra.mxu0 %v15234_v34  ;;  %v15312_v34 = vld [vmem:[#allocation8 + $0xa60] ss:$144 sps:$4 sm:$0xff]  }
 0x1d9   :  { %5238 = vmatprep.subr.bf16.mxu0 %v15242_v37  ;;  %v15320_v37 = vld [vmem:[#allocation8 + $0xb84] ss:$144 sps:$4 sm:$0xff]  }
 0x1da   :  { %4816 = vmatpush1.bf16.msra.mxu1 %v15237_v36  ;;  %v15315_v36 = vld [vmem:[#allocation8 + $0x910] ss:$144 sps:$4 sm:$0xff]  }
 0x1db   :  { %5230 = vmatmul.mubr.bf16.vlgmr.msra.gmra.mrb[4].mxu0 %v17916_v22  ;;  %4817 = vmatprep.subr.bf16.mxu1 %v15245_v39  ;;  %v15323_v39 = vld [vmem:[#allocation8 + $0xa34] ss:$144 sps:$4 sm:$0xff]  }
 0x1dc   :  { %5239 = vmatpush1.bf16.msra.mxu0 %v15240_v38  ;;  %5270 = vmatprep.mubr.bf16.mxu0 %v17705_v63  ;;  %v15318_v38 = vld [vmem:[#allocation8 + $0xb80] ss:$144 sps:$4 sm:$0xff]  }
 0x1dd   :  { %5240 = vmatprep.subr.bf16.mxu0 %v15248_v41  ;;  %v15326_v41 = vld [vmem:[#allocation8 + $0xca4] ss:$144 sps:$4 sm:$0xff]  }
 0x1de   :  { %4818 = vmatpush1.bf16.msra.mxu1 %v15243_v40  ;;  %v15321_v40 = vld [vmem:[#allocation8 + $0xa30] ss:$144 sps:$4 sm:$0xff]  }
 0x1df   :  { %4828 = vmatprep.subr.bf16.mxu1 %v15251_v43  ;;  %v15329_v43 = vld [vmem:[#allocation8 + $0xb54] ss:$144 sps:$4 sm:$0xff]  }
 0x1e0   :  { %5241 = vmatpush1.bf16.msra.mxu0 %v15246_v42  ;;  %v15324_v42 = vld [vmem:[#allocation8 + $0xca0] ss:$144 sps:$4 sm:$0xff]  }
 0x1e1   :  { %4820 = vmatmul.mubr.bf16.vlgmr.msra.gmra.mrb[8].mxu1 %v17916_v22  ;;  %13789 = vmatprep.subr.msk.bf16.mxu0 %vm4596_vm2, %v15252_v44  ;;  %v15327_v44 = vld [vmem:[#allocation8 + $0xb50] ss:$144 sps:$4 sm:$0xff]  }
 0x1e2   :  { %4829 = vmatpush1.bf16.msra.mxu1 %v15249_v46  ;;  %4860 = vmatprep.mubr.bf16.mxu1 %v17705_v63  ;;  %v15330_v46 = vld [vmem:[#allocation8 + $0xdc0] ss:$144 sps:$4 sm:$0xff]  }
 0x1e3   :  { %4830 = vmatprep.subr.bf16.mxu1 %v15257_v47  ;;  %v15335_v47 = vld [vmem:[#allocation8 + $0xc74] ss:$144 sps:$4 sm:$0xff]  }
 0x1e4   :  { %5243 = vmatpush1.bf16.msra.mxu0 %v4634_v49  ;;  %v15338_v49 = vld [vmem:[#allocation8 + $0xee4] ss:$144 sps:$4 sm:$0xff]  }
 0x1e5   :  { %5361 = vmatprep.subr.bf16.mxu0 %v15260_v50  ;;  %v15336_v50 = vld [vmem:[#allocation8 + $0xee0] ss:$144 sps:$4 sm:$0xff]  }
 0x1e6   :  { %4831 = vmatpush1.bf16.msra.mxu1 %v15255_v48  ;;  %v15333_v48 = vld [vmem:[#allocation8 + $0xc70] ss:$144 sps:$4 sm:$0xff]  }
 0x1e7   :  { %13790 = vmatmul.mubr.msk.bf16.vlgmr.msra.gmra.mrb[4].mxu0 %vm4592_vm3, %v17921_v29  ;;  %13779 = vmatprep.subr.msk.bf16.mxu1 %vm4596_vm2, %v15261_v51  ;;  %v15341_v51 = vld [vmem:[#allocation8 + $0xd94] ss:$144 sps:$4 sm:$0xff]  }
 0x1e8   :  { %5362 = vmatpush1.bf16.msra.mxu0 %v15258_v53  ;;  %5393 = vmatprep.mubr.bf16.mxu0 %v17914_v20  ;;  %v15344_v53 = vld [vmem:[#allocation8 + $0x1004] ss:$144 sps:$4 sm:$0xff]  }
 0x1e9   :  { %5363 = vmatprep.subr.bf16.mxu0 %v15266_v54  ;;  %v15342_v54 = vld [vmem:[#allocation8 + $0x1000] ss:$144 sps:$4 sm:$0xff]  }
 0x1ea   :  { %4833 = vmatpush1.bf16.msra.mxu1 %v4604_v55  ;;  %v15347_v55 = vld [vmem:[#allocation8 + $0xeb4] ss:$144 sps:$4 sm:$0xff]  }
 0x1eb   :  { %4869 = vmatprep.subr.bf16.mxu1 %v15269_v56  ;;  %v15345_v56 = vld [vmem:[#allocation8 + $0xeb0] ss:$144 sps:$4 sm:$0xff]  }
 0x1ec   :  { %5364 = vmatpush1.bf16.msra.mxu0 %v15264_v57  ;;  %v15350_v57 = vld [vmem:[#allocation8 + $0x1124] ss:$144 sps:$4 sm:$0xff]  }
 0x1ed   :  { %13780 = vmatmul.mubr.msk.bf16.vlgmr.msra.gmra.mrb[8].mxu1 %vm4592_vm3, %v17921_v29  ;;  %5365 = vmatprep.subr.bf16.mxu0 %v15272_v58  ;;  %v15348_v58 = vld [vmem:[#allocation8 + $0x1120] ss:$144 sps:$4 sm:$0xff]  }
 0x1ee   :  { %4870 = vmatpush1.bf16.msra.mxu1 %v15267_v59  ;;  %4901 = vmatprep.mubr.bf16.mxu1 %v17914_v20  ;;  %v15353_v59 = vld [vmem:[#allocation8 + $0xfd4] ss:$144 sps:$4 sm:$0xff]  }
 0x1ef   :  { %4871 = vmatprep.subr.bf16.mxu1 %v15275_v60  ;;  %v15351_v60 = vld [vmem:[#allocation8 + $0xfd0] ss:$144 sps:$4 sm:$0xff]  }
 0x1f0   :  { %5366 = vmatpush1.bf16.msra.mxu0 %v15270_v61  ;;  %v15356_v61 = vld [vmem:[#allocation8 + $0x1244] ss:$144 sps:$4 sm:$0xff]  }
 0x1f1   :  { %5367 = vmatprep.subr.bf16.mxu0 %v15278_v62  ;;  %v15354_v62 = vld [vmem:[#allocation8 + $0x1240] ss:$144 sps:$4 sm:$0xff]  }
 0x1f2   :  { %4872 = vmatpush1.bf16.msra.mxu1 %v15273_v0  ;;  %v15359_v0 = vld [vmem:[#allocation8 + $0x10f4] ss:$144 sps:$4 sm:$0xff]  }
 0x1f3   :  { %4873 = vmatprep.subr.bf16.mxu1 %v15281_v4  ;;  %v15357_v4 = vld [vmem:[#allocation8 + $0x10f0] ss:$144 sps:$4 sm:$0xff]  }
 0x1f4   :  { %5368 = vmatpush1.bf16.msra.mxu0 %v15276_v6  ;;  %v15362_v6 = vld [vmem:[#allocation8 + $0x1364] ss:$144 sps:$4 sm:$0xff]  }
 0x1f5   :  { %5369 = vmatprep.subr.bf16.mxu0 %v15284_v7  ;;  %v15360_v7 = vld [vmem:[#allocation8 + $0x1360] ss:$144 sps:$4 sm:$0xff]  }
 0x1f6   :  { %4874 = vmatpush1.bf16.msra.mxu1 %v15279_v8  ;;  %v15365_v8 = vld [vmem:[#allocation8 + $0x1214] ss:$144 sps:$4 sm:$0xff]  }
 0x1f7   :  { %4875 = vmatprep.subr.bf16.mxu1 %v15287_v9  ;;  %v15366_v9 = vld [vmem:[#allocation8 + $0x1484] ss:$144 sps:$4 sm:$0x3f]  }
 0x1f8   :  { %5370 = vmatpush1.bf16.msra.mxu0 %v15282_v10  ;;  %v15368_v10 = vld [vmem:[#allocation8 + $0x1480] ss:$144 sps:$4 sm:$0x3f]  }
 0x1f9   :  { %5371 = vmatprep.subr.bf16.mxu0 %v15290_v12  ;;  %v15363_v12 = vld [vmem:[#allocation8 + $0x1210] ss:$144 sps:$4 sm:$0xff]  }
 0x1fa   :  { %4876 = vmatpush1.bf16.msra.mxu1 %v15285_v13  ;;  %v15371_v13 = vld [vmem:[#allocation8 + $0x1334] ss:$144 sps:$4 sm:$0xff]  }
 0x1fb   :  { %4877 = vmatprep.subr.bf16.mxu1 %v15293_v14  ;;  %v15369_v14 = vld [vmem:[#allocation8 + $0x1330] ss:$144 sps:$4 sm:$0xff]  }
 0x1fc   :  { %5372 = vmatpush1.bf16.msra.mxu0 %v15288_v15  ;;  %v4646_v15 = vsel %vm4596_vm2, %v15368_v10, 0  ;;  %v15446_v10 = vld [vmem:[#allocation8 + $0xdd4] ss:$144 sps:$4 sm:$0xff]  }
 0x1fd   :  { %5373 = vmatprep.subr.bf16.mxu0 %v15296_v17  ;;  %v15375_v17 = vld [vmem:[#allocation8 + $0x1454] ss:$144 sps:$4 sm:$0x3f]  }
 0x1fe   :  { %4878 = vmatpush1.bf16.msra.mxu1 %v15291_v16  ;;  %v15374_v16 = vld [vmem:[#allocation8 + $0x54] ss:$144 sps:$4 sm:$0xff]  }
 0x1ff   :  { %4879 = vmatprep.subr.bf16.mxu1 %v15299_v19  ;;  %v15377_v19 = vld [vmem:[#allocation8 + $0x1450] ss:$144 sps:$4 sm:$0x3f]  }
 0x200   :  { %5374 = vmatpush1.bf16.msra.mxu0 %v15294_v21  ;;  %v15372_v21 = vld [vmem:[#allocation8 + $0x50] ss:$144 sps:$4 sm:$0xff]  }
 0x201   :  { %5375 = vmatprep.subr.bf16.mxu0 %v15302_v23  ;;  %v15380_v23 = vld [vmem:[#allocation8 + $0x174] ss:$144 sps:$4 sm:$0xff]  }
 0x202   :  { %4880 = vmatpush1.bf16.msra.mxu1 %v15297_v24  ;;  %v4610_v24 = vsel %vm4596_vm2, %v15377_v19, 0  ;;  %v15453_v19 = vld [vmem:[#allocation8 + $0xd98] ss:$144 sps:$4 sm:$0xff]  }
 0x203   :  { %4881 = vmatprep.subr.bf16.mxu1 %v15305_v26  ;;  %v15378_v26 = vld [vmem:[#allocation8 + $0x170] ss:$144 sps:$4 sm:$0xff]  }
 0x204   :  { %5376 = vmatpush1.bf16.msra.mxu0 %v15300_v25  ;;  %v15383_v25 = vld [vmem:[#allocation8 + $0x1c] ss:$144 sps:$4 sm:$0xff]  }
 0x205   :  { %5377 = vmatprep.subr.bf16.mxu0 %v15308_v28  ;;  %v15381_v28 = vld [vmem:[#allocation8 + $0x18] ss:$144 sps:$4 sm:$0xff]  }
 0x206   :  { %4882 = vmatpush1.bf16.msra.mxu1 %v15303_v27  ;;  %v15386_v27 = vld [vmem:[#allocation8 + $0x294] ss:$144 sps:$4 sm:$0xff]  }
 0x207   :  { %4883 = vmatprep.subr.bf16.mxu1 %v15311_v31  ;;  %v15384_v31 = vld [vmem:[#allocation8 + $0x290] ss:$144 sps:$4 sm:$0xff]  }
 0x208   :  { %5378 = vmatpush1.bf16.msra.mxu0 %v15306_v30  ;;  %v15389_v30 = vld [vmem:[#allocation8 + $0x13c] ss:$144 sps:$4 sm:$0xff]  }
 0x209   :  { %5379 = vmatprep.subr.bf16.mxu0 %v15314_v33  ;;  %v15387_v33 = vld [vmem:[#allocation8 + $0x138] ss:$144 sps:$4 sm:$0xff]  }
 0x20a   :  { %4884 = vmatpush1.bf16.msra.mxu1 %v15309_v32  ;;  %v15392_v32 = vld [vmem:[#allocation8 + $0x3b4] ss:$144 sps:$4 sm:$0xff]  }
 0x20b   :  { %4885 = vmatprep.subr.bf16.mxu1 %v15317_v35  ;;  %v15390_v35 = vld [vmem:[#allocation8 + $0x3b0] ss:$144 sps:$4 sm:$0xff]  }
 0x20c   :  { %5380 = vmatpush1.bf16.msra.mxu0 %v15312_v34  ;;  %v15395_v34 = vld [vmem:[#allocation8 + $0x25c] ss:$144 sps:$4 sm:$0xff]  }
 0x20d   :  { %5381 = vmatprep.subr.bf16.mxu0 %v15320_v37  ;;  %v15393_v37 = vld [vmem:[#allocation8 + $0x258] ss:$144 sps:$4 sm:$0xff]  }
 0x20e   :  { %4886 = vmatpush1.bf16.msra.mxu1 %v15315_v36  ;;  %v15398_v36 = vld [vmem:[#allocation8 + $0x4d4] ss:$144 sps:$4 sm:$0xff]  }
 0x20f   :  { %4887 = vmatprep.subr.bf16.mxu1 %v15323_v39  ;;  %v15396_v39 = vld [vmem:[#allocation8 + $0x4d0] ss:$144 sps:$4 sm:$0xff]  }
 0x210   :  { %5382 = vmatpush1.bf16.msra.mxu0 %v15318_v38  ;;  %v15401_v38 = vld [vmem:[#allocation8 + $0x37c] ss:$144 sps:$4 sm:$0xff]  }
 0x211   :  { %5383 = vmatprep.subr.bf16.mxu0 %v15326_v41  ;;  %v15399_v41 = vld [vmem:[#allocation8 + $0x378] ss:$144 sps:$4 sm:$0xff]  }
 0x212   :  { %4888 = vmatpush1.bf16.msra.mxu1 %v15321_v40  ;;  %v15404_v40 = vld [vmem:[#allocation8 + $0x5f4] ss:$144 sps:$4 sm:$0xff]  }
 0x213   :  { %4889 = vmatprep.subr.bf16.mxu1 %v15329_v43  ;;  %v15402_v43 = vld [vmem:[#allocation8 + $0x5f0] ss:$144 sps:$4 sm:$0xff]  }
 0x214   :  { %5384 = vmatpush1.bf16.msra.mxu0 %v15324_v42  ;;  %v15407_v42 = vld [vmem:[#allocation8 + $0x49c] ss:$144 sps:$4 sm:$0xff]  }
 0x215   :  { %5385 = vmatprep.subr.bf16.mxu0 %v15332_v45  ;;  %v15410_v45 = vld [vmem:[#allocation8 + $0x714] ss:$144 sps:$4 sm:$0xff]  }
 0x216   :  { %4890 = vmatpush1.bf16.msra.mxu1 %v15327_v44  ;;  %v15405_v44 = vld [vmem:[#allocation8 + $0x498] ss:$144 sps:$4 sm:$0xff]  }
 0x217   :  { %4891 = vmatprep.subr.bf16.mxu1 %v15335_v47  ;;  %v15413_v47 = vld [vmem:[#allocation8 + $0x5bc] ss:$144 sps:$4 sm:$0xff]  }
 0x218   :  { %5386 = vmatpush1.bf16.msra.mxu0 %v15330_v46  ;;  %v15408_v46 = vld [vmem:[#allocation8 + $0x710] ss:$144 sps:$4 sm:$0xff]  }
 0x219   :  { %5387 = vmatprep.subr.bf16.mxu0 %v15338_v49  ;;  %v15416_v49 = vld [vmem:[#allocation8 + $0x834] ss:$144 sps:$4 sm:$0xff]  }
 0x21a   :  { %4892 = vmatpush1.bf16.msra.mxu1 %v15333_v48  ;;  %v15411_v48 = vld [vmem:[#allocation8 + $0x5b8] ss:$144 sps:$4 sm:$0xff]  }
 0x21b   :  { %4893 = vmatprep.subr.bf16.mxu1 %v15341_v51  ;;  %v15419_v51 = vld [vmem:[#allocation8 + $0x6dc] ss:$144 sps:$4 sm:$0xff]  }
 0x21c   :  { %5388 = vmatpush1.bf16.msra.mxu0 %v15336_v50  ;;  %v15414_v50 = vld [vmem:[#allocation8 + $0x830] ss:$144 sps:$4 sm:$0xff]  }
 0x21d   :  { %5389 = vmatprep.subr.bf16.mxu0 %v15344_v53  ;;  %v15422_v53 = vld [vmem:[#allocation8 + $0x954] ss:$144 sps:$4 sm:$0xff]  }
 0x21e   :  { %4894 = vmatpush1.bf16.msra.mxu1 %v15339_v52  ;;  %v15417_v52 = vld [vmem:[#allocation8 + $0x6d8] ss:$144 sps:$4 sm:$0xff]  }
 0x21f   :  { %4895 = vmatprep.subr.bf16.mxu1 %v15347_v55  ;;  %v15425_v55 = vld [vmem:[#allocation8 + $0x7fc] ss:$144 sps:$4 sm:$0xff]  }
 0x220   :  { %5390 = vmatpush1.bf16.msra.mxu0 %v15342_v54  ;;  %v15420_v54 = vld [vmem:[#allocation8 + $0x950] ss:$144 sps:$4 sm:$0xff]  }
 0x221   :  { %5391 = vmatprep.subr.bf16.mxu0 %v15350_v57  ;;  %v15428_v57 = vld [vmem:[#allocation8 + $0xa74] ss:$144 sps:$4 sm:$0xff]  }
 0x222   :  { %4896 = vmatpush1.bf16.msra.mxu1 %v15345_v56  ;;  %v15423_v56 = vld [vmem:[#allocation8 + $0x7f8] ss:$144 sps:$4 sm:$0xff]  }
 0x223   :  { %4897 = vmatprep.subr.bf16.mxu1 %v15353_v59  ;;  %v15431_v59 = vld [vmem:[#allocation8 + $0x91c] ss:$144 sps:$4 sm:$0xff]  }
 0x224   :  { %5392 = vmatpush1.bf16.msra.mxu0 %v15348_v58  ;;  %v15426_v58 = vld [vmem:[#allocation8 + $0xa70] ss:$144 sps:$4 sm:$0xff]  }
 0x225   :  { %5402 = vmatprep.subr.bf16.mxu0 %v15356_v61  ;;  %v15434_v61 = vld [vmem:[#allocation8 + $0xb94] ss:$144 sps:$4 sm:$0xff]  }
 0x226   :  { %4898 = vmatpush1.bf16.msra.mxu1 %v15351_v60  ;;  %v15429_v60 = vld [vmem:[#allocation8 + $0x918] ss:$144 sps:$4 sm:$0xff]  }
 0x227   :  { %5394 = vmatmul.mubr.bf16.vlgmr.msra.gmra.mrb[8].mxu0 %v17916_v22  ;;  %4899 = vmatprep.subr.bf16.mxu1 %v15359_v0  ;;  %v15437_v0 = vld [vmem:[#allocation8 + $0xa3c] ss:$144 sps:$4 sm:$0xff]  }
 0x228   :  { %5403 = vmatpush1.bf16.msra.mxu0 %v15354_v62  ;;  %5434 = vmatprep.mubr.bf16.mxu0 %v17705_v63  ;;  %v15432_v62 = vld [vmem:[#allocation8 + $0xb90] ss:$144 sps:$4 sm:$0xff]  }
 0x229   :  { %5404 = vmatprep.subr.bf16.mxu0 %v15362_v6  ;;  %v15440_v6 = vld [vmem:[#allocation8 + $0xcb4] ss:$144 sps:$4 sm:$0xff]  }
 0x22a   :  { %4900 = vmatpush1.bf16.msra.mxu1 %v15357_v4  ;;  %v15435_v4 = vld [vmem:[#allocation8 + $0xa38] ss:$144 sps:$4 sm:$0xff]  }
 0x22b   :  { %4910 = vmatprep.subr.bf16.mxu1 %v15365_v8  ;;  %v15443_v8 = vld [vmem:[#allocation8 + $0xb5c] ss:$144 sps:$4 sm:$0xff]  }
 0x22c   :  { %5405 = vmatpush1.bf16.msra.mxu0 %v15360_v7  ;;  %v15438_v7 = vld [vmem:[#allocation8 + $0xcb0] ss:$144 sps:$4 sm:$0xff]  }
 0x22d   :  { %4902 = vmatmul.mubr.bf16.vlgmr.msra.gmra.mrb[12].mxu1 %v17916_v22  ;;  %13793 = vmatprep.subr.msk.bf16.mxu0 %vm4596_vm2, %v15366_v9  ;;  %v15441_v9 = vld [vmem:[#allocation8 + $0xb58] ss:$144 sps:$4 sm:$0xff]  }
 0x22e   :  { %4911 = vmatpush1.bf16.msra.mxu1 %v15363_v12  ;;  %4942 = vmatprep.mubr.bf16.mxu1 %v17705_v63  ;;  %v15444_v12 = vld [vmem:[#allocation8 + $0xdd0] ss:$144 sps:$4 sm:$0xff]  }
 0x22f   :  { %4912 = vmatprep.subr.bf16.mxu1 %v15371_v13  ;;  %v15449_v13 = vld [vmem:[#allocation8 + $0xc7c] ss:$144 sps:$4 sm:$0xff]  }
 0x230   :  { %5407 = vmatpush1.bf16.msra.mxu0 %v4646_v15  ;;  %v15452_v15 = vld [vmem:[#allocation8 + $0xef4] ss:$144 sps:$4 sm:$0xff]  }
 0x231   :  { %5525 = vmatprep.subr.bf16.mxu0 %v15374_v16  ;;  %v15450_v16 = vld [vmem:[#allocation8 + $0xef0] ss:$144 sps:$4 sm:$0xff]  }
 0x232   :  { %4913 = vmatpush1.bf16.msra.mxu1 %v15369_v14  ;;  %v15447_v14 = vld [vmem:[#allocation8 + $0xc78] ss:$144 sps:$4 sm:$0xff]  }
 0x233   :  { %13794 = vmatmul.mubr.msk.bf16.vlgmr.msra.gmra.mrb[8].mxu0 %vm4592_vm3, %v17921_v29  ;;  %13781 = vmatprep.subr.msk.bf16.mxu1 %vm4596_vm2, %v15375_v17  ;;  %v15455_v17 = vld [vmem:[#allocation8 + $0xd9c] ss:$144 sps:$4 sm:$0xff]  }
 0x234   :  { %5526 = vmatpush1.bf16.msra.mxu0 %v15372_v21  ;;  %5557 = vmatprep.mubr.bf16.mxu0 %v17914_v20  ;;  %v15458_v21 = vld [vmem:[#allocation8 + $0x1014] ss:$144 sps:$4 sm:$0xff]  }
 0x235   :  { %5527 = vmatprep.subr.bf16.mxu0 %v15380_v23  ;;  %v15456_v23 = vld [vmem:[#allocation8 + $0x1010] ss:$144 sps:$4 sm:$0xff]  }
 0x236   :  { %4915 = vmatpush1.bf16.msra.mxu1 %v4610_v24  ;;  %v15461_v24 = vld [vmem:[#allocation8 + $0xebc] ss:$144 sps:$4 sm:$0xff]  }
 0x237   :  { %4951 = vmatprep.subr.bf16.mxu1 %v15383_v25  ;;  %v15459_v25 = vld [vmem:[#allocation8 + $0xeb8] ss:$144 sps:$4 sm:$0xff]  }
 0x238   :  { %5528 = vmatpush1.bf16.msra.mxu0 %v15378_v26  ;;  %v15464_v26 = vld [vmem:[#allocation8 + $0x1134] ss:$144 sps:$4 sm:$0xff]  }
 0x239   :  { %13782 = vmatmul.mubr.msk.bf16.vlgmr.msra.gmra.mrb[12].mxu1 %vm4592_vm3, %v17921_v29  ;;  %5529 = vmatprep.subr.bf16.mxu0 %v15386_v27  ;;  %v15462_v27 = vld [vmem:[#allocation8 + $0x1130] ss:$144 sps:$4 sm:$0xff]  }
 0x23a   :  { %4952 = vmatpush1.bf16.msra.mxu1 %v15381_v28  ;;  %4983 = vmatprep.mubr.bf16.mxu1 %v17914_v20  ;;  %v15467_v28 = vld [vmem:[#allocation8 + $0xfdc] ss:$144 sps:$4 sm:$0xff]  }
 0x23b   :  { %4953 = vmatprep.subr.bf16.mxu1 %v15389_v30  ;;  %v15465_v30 = vld [vmem:[#allocation8 + $0xfd8] ss:$144 sps:$4 sm:$0xff]  }
 0x23c   :  { %5530 = vmatpush1.bf16.msra.mxu0 %v15384_v31  ;;  %v15470_v31 = vld [vmem:[#allocation8 + $0x1254] ss:$144 sps:$4 sm:$0xff]  }
 0x23d   :  { %5531 = vmatprep.subr.bf16.mxu0 %v15392_v32 }
 0x23e   :  { %4954 = vmatpush1.bf16.msra.mxu1 %v15387_v33  ;;  %v15468_v33 = vld [vmem:[#allocation8 + $0x1250] ss:$144 sps:$4 sm:$0xff]  }
 0x23f   :  { %4955 = vmatprep.subr.bf16.mxu1 %v15395_v34 }
 0x240   :  { %5532 = vmatpush1.bf16.msra.mxu0 %v15390_v35  ;;  %v15473_v35 = vld [vmem:[#allocation8 + $0x10fc] ss:$144 sps:$4 sm:$0xff]  }
 0x241   :  { %5533 = vmatprep.subr.bf16.mxu0 %v15398_v36 }
 0x242   :  { %4956 = vmatpush1.bf16.msra.mxu1 %v15393_v37  ;;  %v15471_v37 = vld [vmem:[#allocation8 + $0x10f8] ss:$144 sps:$4 sm:$0xff]  }
 0x243   :  { %4957 = vmatprep.subr.bf16.mxu1 %v15401_v38 }
 0x244   :  { %5534 = vmatpush1.bf16.msra.mxu0 %v15396_v39  ;;  %v15476_v39 = vld [vmem:[#allocation8 + $0x1374] ss:$144 sps:$4 sm:$0xff]  }
 0x245   :  { %5535 = vmatprep.subr.bf16.mxu0 %v15404_v40  ;;  %v15474_v40 = vld [vmem:[#allocation8 + $0x1370] ss:$144 sps:$4 sm:$0xff]  }
 0x246   :  { %4958 = vmatpush1.bf16.msra.mxu1 %v15399_v41  ;;  %v15479_v41 = vld [vmem:[#allocation8 + $0x121c] ss:$144 sps:$4 sm:$0xff]  }
 0x247   :  { %4959 = vmatprep.subr.bf16.mxu1 %v15407_v42 }
 0x248   :  { %5536 = vmatpush1.bf16.msra.mxu0 %v15402_v43  ;;  %v15480_v43 = vld [vmem:[#allocation8 + $0x1494] ss:$144 sps:$4 sm:$0x3f]  }
 0x249   :  { %5537 = vmatprep.subr.bf16.mxu0 %v15410_v45  ;;  %v15482_v45 = vld [vmem:[#allocation8 + $0x1490] ss:$144 sps:$4 sm:$0x3f]  }
 0x24a   :  { %4960 = vmatpush1.bf16.msra.mxu1 %v15405_v44 }
 0x24b   :  { %4961 = vmatprep.subr.bf16.mxu1 %v15413_v47  ;;  %v15477_v47 = vld [vmem:[#allocation8 + $0x1218] ss:$144 sps:$4 sm:$0xff]  }
 0x24c   :  { %5538 = vmatpush1.bf16.msra.mxu0 %v15408_v46 }
 0x24d   :  { %5539 = vmatprep.subr.bf16.mxu0 %v15416_v49  ;;  %v15485_v49 = vld [vmem:[#allocation8 + $0x133c] ss:$144 sps:$4 sm:$0xff]  }
 0x24e   :  { %4962 = vmatpush1.bf16.msra.mxu1 %v15411_v48 }
 0x24f   :  { %4963 = vmatprep.subr.bf16.mxu1 %v15419_v51  ;;  %v4658_v51 = vsel %vm4596_vm2, %v15482_v45, 0  ;;  %v15551_v45 = vld [vmem:[#allocation8 + $0xa44] ss:$144 sps:$4 sm:$0xff]  }
 0x250   :  { %5540 = vmatpush1.bf16.msra.mxu0 %v15414_v50  ;;  %v15483_v50 = vld [vmem:[#allocation8 + $0x1338] ss:$144 sps:$4 sm:$0xff]  }
 0x251   :  { %5541 = vmatprep.subr.bf16.mxu0 %v15422_v53  ;;  %v15489_v53 = vld [vmem:[#allocation8 + $0x145c] ss:$144 sps:$4 sm:$0x3f]  }
 0x252   :  { %4964 = vmatpush1.bf16.msra.mxu1 %v15417_v52  ;;  %v15488_v52 = vld [vmem:[#allocation8 + $0x64] ss:$144 sps:$4 sm:$0xff]  }
 0x253   :  { %4965 = vmatprep.subr.bf16.mxu1 %v15425_v55  ;;  %v15486_v55 = vld [vmem:[#allocation8 + $0x60] ss:$144 sps:$4 sm:$0xff]  }
 0x254   :  { %5542 = vmatpush1.bf16.msra.mxu0 %v15420_v54  ;;  %v15491_v54 = vld [vmem:[#allocation8 + $0x1458] ss:$144 sps:$4 sm:$0x3f]  }
 0x255   :  { %5543 = vmatprep.subr.bf16.mxu0 %v15428_v57  ;;  %v4616_v57 = vsel %vm4596_vm2, %v15491_v54, 0  ;;  %v15561_v54 = vld [vmem:[#allocation8 + $0xc80] ss:$144 sps:$4 sm:$0xff]  }
 0x256   :  { %4966 = vmatpush1.bf16.msra.mxu1 %v15423_v56  ;;  %v15494_v56 = vld [vmem:[#allocation8 + $0x184] ss:$144 sps:$4 sm:$0xff]  }
 0x257   :  { %4967 = vmatprep.subr.bf16.mxu1 %v15431_v59  ;;  %v15492_v59 = vld [vmem:[#allocation8 + $0x180] ss:$144 sps:$4 sm:$0xff]  }
 0x258   :  { %5544 = vmatpush1.bf16.msra.mxu0 %v15426_v58  ;;  %v15497_v58 = vld [vmem:[#allocation8 + $0x24] ss:$144 sps:$4 sm:$0xff]  }
 0x259   :  { %5545 = vmatprep.subr.bf16.mxu0 %v15434_v61  ;;  %v15495_v61 = vld [vmem:[#allocation8 + $0x20] ss:$144 sps:$4 sm:$0xff]  }
 0x25a   :  { %4968 = vmatpush1.bf16.msra.mxu1 %v15429_v60  ;;  %v15500_v60 = vld [vmem:[#allocation8 + $0x2a4] ss:$144 sps:$4 sm:$0xff]  }
 0x25b   :  { %4969 = vmatprep.subr.bf16.mxu1 %v15437_v0  ;;  %v15498_v0 = vld [vmem:[#allocation8 + $0x2a0] ss:$144 sps:$4 sm:$0xff]  }
 0x25c   :  { %5546 = vmatpush1.bf16.msra.mxu0 %v15432_v62  ;;  %v15503_v62 = vld [vmem:[#allocation8 + $0x144] ss:$144 sps:$4 sm:$0xff]  }
 0x25d   :  { %5547 = vmatprep.subr.bf16.mxu0 %v15440_v6  ;;  %v15501_v6 = vld [vmem:[#allocation8 + $0x140] ss:$144 sps:$4 sm:$0xff]  }
 0x25e   :  { %4970 = vmatpush1.bf16.msra.mxu1 %v15435_v4  ;;  %v15506_v4 = vld [vmem:[#allocation8 + $0x3c4] ss:$144 sps:$4 sm:$0xff]  }
 0x25f   :  { %4971 = vmatprep.subr.bf16.mxu1 %v15443_v8  ;;  %v15504_v8 = vld [vmem:[#allocation8 + $0x3c0] ss:$144 sps:$4 sm:$0xff]  }
 0x260   :  { %5548 = vmatpush1.bf16.msra.mxu0 %v15438_v7  ;;  %v15509_v7 = vld [vmem:[#allocation8 + $0x264] ss:$144 sps:$4 sm:$0xff]  }
 0x261   :  { %5549 = vmatprep.subr.bf16.mxu0 %v15446_v10  ;;  %v15507_v10 = vld [vmem:[#allocation8 + $0x260] ss:$144 sps:$4 sm:$0xff]  }
 0x262   :  { %4972 = vmatpush1.bf16.msra.mxu1 %v15441_v9  ;;  %v15512_v9 = vld [vmem:[#allocation8 + $0x4e4] ss:$144 sps:$4 sm:$0xff]  }
 0x263   :  { %4973 = vmatprep.subr.bf16.mxu1 %v15449_v13  ;;  %v15515_v13 = vld [vmem:[#allocation8 + $0x384] ss:$144 sps:$4 sm:$0xff]  }
 0x264   :  { %5550 = vmatpush1.bf16.msra.mxu0 %v15444_v12  ;;  %v15510_v12 = vld [vmem:[#allocation8 + $0x4e0] ss:$144 sps:$4 sm:$0xff]  }
 0x265   :  { %5551 = vmatprep.subr.bf16.mxu0 %v15452_v15  ;;  %v15513_v15 = vld [vmem:[#allocation8 + $0x380] ss:$144 sps:$4 sm:$0xff]  }
 0x266   :  { %4974 = vmatpush1.bf16.msra.mxu1 %v15447_v14  ;;  %v15518_v14 = vld [vmem:[#allocation8 + $0x604] ss:$144 sps:$4 sm:$0xff]  }
 0x267   :  { %4975 = vmatprep.subr.bf16.mxu1 %v15455_v17  ;;  %v15516_v17 = vld [vmem:[#allocation8 + $0x600] ss:$144 sps:$4 sm:$0xff]  }
 0x268   :  { %5552 = vmatpush1.bf16.msra.mxu0 %v15450_v16  ;;  %v15521_v16 = vld [vmem:[#allocation8 + $0x4a4] ss:$144 sps:$4 sm:$0xff]  }
 0x269   :  { %5553 = vmatprep.subr.bf16.mxu0 %v15458_v21  ;;  %v15524_v21 = vld [vmem:[#allocation8 + $0x724] ss:$144 sps:$4 sm:$0xff]  }
 0x26a   :  { %4976 = vmatpush1.bf16.msra.mxu1 %v15453_v19  ;;  %v15519_v19 = vld [vmem:[#allocation8 + $0x4a0] ss:$144 sps:$4 sm:$0xff]  }
 0x26b   :  { %4977 = vmatprep.subr.bf16.mxu1 %v15461_v24  ;;  %v15527_v24 = vld [vmem:[#allocation8 + $0x5c4] ss:$144 sps:$4 sm:$0xff]  }
 0x26c   :  { %5554 = vmatpush1.bf16.msra.mxu0 %v15456_v23  ;;  %v15522_v23 = vld [vmem:[#allocation8 + $0x720] ss:$144 sps:$4 sm:$0xff]  }
 0x26d   :  { %5555 = vmatprep.subr.bf16.mxu0 %v15464_v26  ;;  %v15530_v26 = vld [vmem:[#allocation8 + $0x844] ss:$144 sps:$4 sm:$0xff]  }
 0x26e   :  { %4978 = vmatpush1.bf16.msra.mxu1 %v15459_v25  ;;  %v17959_v32 = vpop.f32.mrb[0].mxu0  ;;  %v15525_v25 = vld [vmem:[#allocation8 + $0x5c0] ss:$144 sps:$4 sm:$0xff]  }
 0x26f   :  { %4979 = vmatprep.subr.bf16.mxu1 %v15467_v28  ;;  %v17961_v34 = vpop.f32.mrb[1].mxu0  ;;  %v15533_v28 = vld [vmem:[#allocation8 + $0x6e4] ss:$144 sps:$4 sm:$0xff]  }
 0x270   :  { %5556 = vmatpush1.bf16.msra.mxu0 %v15462_v27  ;;  %v5112_v36 = vpop.f32.mrb[2].mxu0  ;;  %v15528_v27 = vld [vmem:[#allocation8 + $0x840] ss:$144 sps:$4 sm:$0xff]  }
 0x271   :  { %5566 = vmatprep.subr.bf16.mxu0 %v15470_v31  ;;  %v5113_v38 = vpop.f32.mrb[3].mxu0  ;;  %v15536_v31 = vld [vmem:[#allocation8 + $0x964] ss:$144 sps:$4 sm:$0xff]   ;;  %v15537_v36 = vld [vmem:[#allocation8 + $0x800] ss:$144 sps:$4 sm:$0xff]  }
 0x272   :  { %4980 = vmatpush1.bf16.msra.mxu1 %v15465_v30  ;;  %v15531_v30 = vld [vmem:[#allocation8 + $0x6e0] ss:$144 sps:$4 sm:$0xff]  }
 0x273   :  { %5558 = vmatmul.mubr.bf16.vlgmr.msra.gmra.mrb[12].mxu0 %v17916_v22  ;;  %4981 = vmatprep.subr.bf16.mxu1 %v15473_v35  ;;  %v15539_v35 = vld [vmem:[#allocation8 + $0x804] ss:$144 sps:$4 sm:$0xff]   ;;  %v15540_v38 = vld [vmem:[#allocation8 + $0xa80] ss:$144 sps:$4 sm:$0xff]  }
 0x274   :  { %5567 = vmatpush1.bf16.msra.mxu0 %v15468_v33  ;;  %v17964_v42 = vpop.f32.mrb[4].mxu1  ;;  %5598 = vmatprep.mubr.bf16.mxu0 %v17705_v63  ;;  %v15534_v33 = vld [vmem:[#allocation8 + $0x960] ss:$144 sps:$4 sm:$0xff]  }
 0x275   :  { %v17967_v44 = vpop.f32.mrb[5].mxu1  ;;  %5568 = vmatprep.subr.bf16.mxu0 %v15476_v39  ;;  %v15545_v39 = vld [vmem:[#allocation8 + $0x924] ss:$144 sps:$4 sm:$0xff]  }
 0x276   :  { %4982 = vmatpush1.bf16.msra.mxu1 %v15471_v37  ;;  %v4784_v46 = vpop.f32.mrb[6].mxu1  ;;  %v15542_v37 = vld [vmem:[#allocation8 + $0xa84] ss:$144 sps:$4 sm:$0xff]  }
 0x277   :  { %v4785_v48 = vpop.f32.mrb[7].mxu1  ;;  %4992 = vmatprep.subr.bf16.mxu1 %v15479_v41  ;;  %v15548_v41 = vld [vmem:[#allocation8 + $0xba4] ss:$144 sps:$4 sm:$0xff]   ;;  %v15549_v46 = vld [vmem:[#allocation8 + $0xa40] ss:$144 sps:$4 sm:$0xff]  }
 0x278   :  { %5569 = vmatpush1.bf16.msra.mxu0 %v15474_v40  ;;  %v15543_v40 = vld [vmem:[#allocation8 + $0x920] ss:$144 sps:$4 sm:$0xff]  }
 0x279   :  { %4984 = vmatmul.mubr.bf16.vlgmr.msra.gmra.mrb[16].mxu1 %v17916_v22  ;;  %13797 = vmatprep.subr.msk.bf16.mxu0 %vm4596_vm2, %v15480_v43  ;;  %v15546_v43 = vld [vmem:[#allocation8 + $0xba0] ss:$144 sps:$4 sm:$0xff]  }
 0x27a   :  { %4993 = vmatpush1.bf16.msra.mxu1 %v15477_v47  ;;  %5024 = vmatprep.mubr.bf16.mxu1 %v17705_v63  ;;  %v15554_v47 = vld [vmem:[#allocation8 + $0xcc4] ss:$144 sps:$4 sm:$0xff]   ;;  %v15552_v48 = vld [vmem:[#allocation8 + $0xcc0] ss:$144 sps:$4 sm:$0xff]  }
 0x27b   :  { %4994 = vmatprep.subr.bf16.mxu1 %v15485_v49  ;;  %v15557_v49 = vld [vmem:[#allocation8 + $0xb64] ss:$144 sps:$4 sm:$0xff]  }
 0x27c   :  { %5571 = vmatpush1.bf16.msra.mxu0 %v4658_v51  ;;  %v15560_v51 = vld [vmem:[#allocation8 + $0xde4] ss:$144 sps:$4 sm:$0xff]  }
 0x27d   :  { %5689 = vmatprep.subr.bf16.mxu0 %v15488_v52  ;;  %v15558_v52 = vld [vmem:[#allocation8 + $0xde0] ss:$144 sps:$4 sm:$0xff]  }
 0x27e   :  { %4995 = vmatpush1.bf16.msra.mxu1 %v15483_v50  ;;  %v15555_v50 = vld [vmem:[#allocation8 + $0xb60] ss:$144 sps:$4 sm:$0xff]  }
 0x27f   :  { %13798 = vmatmul.mubr.msk.bf16.vlgmr.msra.gmra.mrb[12].mxu0 %vm4592_vm3, %v17921_v29  ;;  %13783 = vmatprep.subr.msk.bf16.mxu1 %vm4596_vm2, %v15489_v53  ;;  %v15563_v53 = vld [vmem:[#allocation8 + $0xc84] ss:$144 sps:$4 sm:$0xff]  }
 0x280   :  { %5690 = vmatpush1.bf16.msra.mxu0 %v15486_v55  ;;  %5721 = vmatprep.mubr.bf16.mxu0 %v17914_v20  ;;  %v15566_v55 = vld [vmem:[#allocation8 + $0xf04] ss:$144 sps:$4 sm:$0xff]  }
 0x281   :  { %5691 = vmatprep.subr.bf16.mxu0 %v15494_v56  ;;  %v15564_v56 = vld [vmem:[#allocation8 + $0xf00] ss:$144 sps:$4 sm:$0xff]  }
 0x282   :  { %4997 = vmatpush1.bf16.msra.mxu1 %v4616_v57  ;;  %v15569_v57 = vld [vmem:[#allocation8 + $0xda4] ss:$144 sps:$4 sm:$0xff]  }
 0x283   :  { %5033 = vmatprep.subr.bf16.mxu1 %v15497_v58  ;;  %v15567_v58 = vld [vmem:[#allocation8 + $0xda0] ss:$144 sps:$4 sm:$0xff]  }
 0x284   :  { %5692 = vmatpush1.bf16.msra.mxu0 %v15492_v59  ;;  %v15572_v59 = vld [vmem:[#allocation8 + $0x1024] ss:$144 sps:$4 sm:$0xff]  }
 0x285   :  { %13784 = vmatmul.mubr.msk.bf16.vlgmr.msra.gmra.mrb[16].mxu1 %vm4592_vm3, %v17921_v29  ;;  %5693 = vmatprep.subr.bf16.mxu0 %v15500_v60  ;;  %v15570_v60 = vld [vmem:[#allocation8 + $0x1020] ss:$144 sps:$4 sm:$0xff]  }
 0x286   :  { %5034 = vmatpush1.bf16.msra.mxu1 %v15495_v61  ;;  %5065 = vmatprep.mubr.bf16.mxu1 %v17914_v20  ;;  %v15575_v61 = vld [vmem:[#allocation8 + $0xec4] ss:$144 sps:$4 sm:$0xff]  }
 0x287   :  { %5035 = vmatprep.subr.bf16.mxu1 %v15503_v62  ;;  %v15573_v62 = vld [vmem:[#allocation8 + $0xec0] ss:$144 sps:$4 sm:$0xff]  }
 0x288   :  { %5694 = vmatpush1.bf16.msra.mxu0 %v15498_v0  ;;  %v15578_v0 = vld [vmem:[#allocation8 + $0x1144] ss:$144 sps:$4 sm:$0xff]  }
 0x289   :  { %5695 = vmatprep.subr.bf16.mxu0 %v15506_v4  ;;  %v15576_v4 = vld [vmem:[#allocation8 + $0x1140] ss:$144 sps:$4 sm:$0xff]  }
 0x28a   :  { %5036 = vmatpush1.bf16.msra.mxu1 %v15501_v6  ;;  %v15581_v6 = vld [vmem:[#allocation8 + $0xfe4] ss:$144 sps:$4 sm:$0xff]  }
 0x28b   :  { %5037 = vmatprep.subr.bf16.mxu1 %v15509_v7  ;;  %v15579_v7 = vld [vmem:[#allocation8 + $0xfe0] ss:$144 sps:$4 sm:$0xff]  }
 0x28c   :  { %5696 = vmatpush1.bf16.msra.mxu0 %v15504_v8  ;;  %v15584_v8 = vld [vmem:[#allocation8 + $0x1264] ss:$144 sps:$4 sm:$0xff]  }
 0x28d   :  { %5697 = vmatprep.subr.bf16.mxu0 %v15512_v9 }
 0x28e   :  { %5038 = vmatpush1.bf16.msra.mxu1 %v15507_v10  ;;  %v15582_v10 = vld [vmem:[#allocation8 + $0x1260] ss:$144 sps:$4 sm:$0xff]  }
 0x28f   :  { %5039 = vmatprep.subr.bf16.mxu1 %v15515_v13  ;;  %v15587_v13 = vld [vmem:[#allocation8 + $0x1104] ss:$144 sps:$4 sm:$0xff]  }
 0x290   :  { %5698 = vmatpush1.bf16.msra.mxu0 %v15510_v12 }
 0x291   :  { %5699 = vmatprep.subr.bf16.mxu0 %v15518_v14 }
 0x292   :  { %5040 = vmatpush1.bf16.msra.mxu1 %v15513_v15  ;;  %v15585_v15 = vld [vmem:[#allocation8 + $0x1100] ss:$144 sps:$4 sm:$0xff]  }
 0x293   :  { %5041 = vmatprep.subr.bf16.mxu1 %v15521_v16 }
 0x294   :  { %5700 = vmatpush1.bf16.msra.mxu0 %v15516_v17  ;;  %v15590_v17 = vld [vmem:[#allocation8 + $0x1384] ss:$144 sps:$4 sm:$0xff]  }
 0x295   :  { %5701 = vmatprep.subr.bf16.mxu0 %v15524_v21  ;;  %v15593_v21 = vld [vmem:[#allocation8 + $0x2c] ss:$144 sps:$4 sm:$0xff]  }
 0x296   :  { %5042 = vmatpush1.bf16.msra.mxu1 %v15519_v19  ;;  %v15588_v19 = vld [vmem:[#allocation8 + $0x1380] ss:$144 sps:$4 sm:$0xff]  }
 0x297   :  { %5043 = vmatprep.subr.bf16.mxu1 %v15527_v24  ;;  %v15594_v24 = vld [vmem:[#allocation8 + $0x14a4] ss:$144 sps:$4 sm:$0x3f]  }
 0x298   :  { %5702 = vmatpush1.bf16.msra.mxu0 %v15522_v23 }
 0x299   :  { %5703 = vmatprep.subr.bf16.mxu0 %v15530_v26  ;;  %v15596_v26 = vld [vmem:[#allocation8 + $0x14a0] ss:$144 sps:$4 sm:$0x3f]  }
 0x29a   :  { %5044 = vmatpush1.bf16.msra.mxu1 %v15525_v25 }
 0x29b   :  { %5045 = vmatprep.subr.bf16.mxu1 %v15533_v28  ;;  %v15591_v28 = vld [vmem:[#allocation8 + $0x28] ss:$144 sps:$4 sm:$0xff]  }
 0x29c   :  { %5704 = vmatpush1.bf16.msra.mxu0 %v15528_v27 }
 0x29d   :  { %5705 = vmatprep.subr.bf16.mxu0 %v15536_v31  ;;  %v15599_v31 = vld [vmem:[#allocation8 + $0x14c] ss:$144 sps:$4 sm:$0xff]  }
 0x29e   :  { %5046 = vmatpush1.bf16.msra.mxu1 %v15531_v30 }
 0x29f   :  { %5047 = vmatprep.subr.bf16.mxu1 %v15539_v35  ;;  %v15602_v35 = vld [vmem:[#allocation8 + $0x74] ss:$144 sps:$4 sm:$0xff]  }
 0x2a0   :  { %5706 = vmatpush1.bf16.msra.mxu0 %v15534_v33  ;;  %v4670_v33 = vsel %vm4596_vm2, %v15596_v26, 0  ;;  %v15662_v26 = vld [vmem:[#allocation8 + $0xbb4] ss:$144 sps:$4 sm:$0xff]  }
 0x2a1   :  { %5707 = vmatprep.subr.bf16.mxu0 %v15542_v37  ;;  %v15605_v37 = vld [vmem:[#allocation8 + $0x26c] ss:$144 sps:$4 sm:$0xff]  }
 0x2a2   :  { %5048 = vmatpush1.bf16.msra.mxu1 %v15537_v36  ;;  %v15597_v36 = vld [vmem:[#allocation8 + $0x148] ss:$144 sps:$4 sm:$0xff]  }
 0x2a3   :  { %5049 = vmatprep.subr.bf16.mxu1 %v15545_v39  ;;  %v15608_v39 = vld [vmem:[#allocation8 + $0x194] ss:$144 sps:$4 sm:$0xff]  }
 0x2a4   :  { %5708 = vmatpush1.bf16.msra.mxu0 %v15540_v38  ;;  %v15600_v38 = vld [vmem:[#allocation8 + $0x70] ss:$144 sps:$4 sm:$0xff]  }
 0x2a5   :  { %5709 = vmatprep.subr.bf16.mxu0 %v15548_v41  ;;  %v15611_v41 = vld [vmem:[#allocation8 + $0x38c] ss:$144 sps:$4 sm:$0xff]  }
 0x2a6   :  { %5050 = vmatpush1.bf16.msra.mxu1 %v15543_v40  ;;  %v15603_v40 = vld [vmem:[#allocation8 + $0x268] ss:$144 sps:$4 sm:$0xff]  }
 0x2a7   :  { %5051 = vmatprep.subr.bf16.mxu1 %v15551_v45  ;;  %v15614_v45 = vld [vmem:[#allocation8 + $0x2b4] ss:$144 sps:$4 sm:$0xff]  }
 0x2a8   :  { %5710 = vmatpush1.bf16.msra.mxu0 %v15546_v43  ;;  %v15606_v43 = vld [vmem:[#allocation8 + $0x190] ss:$144 sps:$4 sm:$0xff]  }
 0x2a9   :  { %5711 = vmatprep.subr.bf16.mxu0 %v15554_v47  ;;  %v15617_v47 = vld [vmem:[#allocation8 + $0x4ac] ss:$144 sps:$4 sm:$0xff]  }
 0x2aa   :  { %5052 = vmatpush1.bf16.msra.mxu1 %v15549_v46  ;;  %v15609_v46 = vld [vmem:[#allocation8 + $0x388] ss:$144 sps:$4 sm:$0xff]  }
 0x2ab   :  { %5053 = vmatprep.subr.bf16.mxu1 %v15557_v49  ;;  %v15620_v49 = vld [vmem:[#allocation8 + $0x3d4] ss:$144 sps:$4 sm:$0xff]  }
 0x2ac   :  { %5712 = vmatpush1.bf16.msra.mxu0 %v15552_v48  ;;  %v15612_v48 = vld [vmem:[#allocation8 + $0x2b0] ss:$144 sps:$4 sm:$0xff]  }
 0x2ad   :  { %5713 = vmatprep.subr.bf16.mxu0 %v15560_v51  ;;  %v15623_v51 = vld [vmem:[#allocation8 + $0x5cc] ss:$144 sps:$4 sm:$0xff]  }
 0x2ae   :  { %5054 = vmatpush1.bf16.msra.mxu1 %v15555_v50  ;;  %v15615_v50 = vld [vmem:[#allocation8 + $0x4a8] ss:$144 sps:$4 sm:$0xff]  }
 0x2af   :  { %5055 = vmatprep.subr.bf16.mxu1 %v15563_v53  ;;  %v15626_v53 = vld [vmem:[#allocation8 + $0x4f4] ss:$144 sps:$4 sm:$0xff]  }
 0x2b0   :  { %5714 = vmatpush1.bf16.msra.mxu0 %v15558_v52  ;;  %v15618_v52 = vld [vmem:[#allocation8 + $0x3d0] ss:$144 sps:$4 sm:$0xff]  }
 0x2b1   :  { %5715 = vmatprep.subr.bf16.mxu0 %v15566_v55  ;;  %v15624_v55 = vld [vmem:[#allocation8 + $0x4f0] ss:$144 sps:$4 sm:$0xff]  }
 0x2b2   :  { %5056 = vmatpush1.bf16.msra.mxu1 %v15561_v54  ;;  %v15621_v54 = vld [vmem:[#allocation8 + $0x5c8] ss:$144 sps:$4 sm:$0xff]  }
 0x2b3   :  { %5057 = vmatprep.subr.bf16.mxu1 %v15569_v57  ;;  %v15632_v57 = vld [vmem:[#allocation8 + $0x614] ss:$144 sps:$4 sm:$0xff]  }
 0x2b4   :  { %5716 = vmatpush1.bf16.msra.mxu0 %v15564_v56  ;;  %v15629_v56 = vld [vmem:[#allocation8 + $0x6ec] ss:$144 sps:$4 sm:$0xff]  }
 0x2b5   :  { %5717 = vmatprep.subr.bf16.mxu0 %v15572_v59  ;;  %v15635_v59 = vld [vmem:[#allocation8 + $0x80c] ss:$144 sps:$4 sm:$0xff]  }
 0x2b6   :  { %5058 = vmatpush1.bf16.msra.mxu1 %v15567_v58  ;;  %v15627_v58 = vld [vmem:[#allocation8 + $0x6e8] ss:$144 sps:$4 sm:$0xff]  }
 0x2b7   :  { %5059 = vmatprep.subr.bf16.mxu1 %v15575_v61  ;;  %v15633_v61 = vld [vmem:[#allocation8 + $0x808] ss:$144 sps:$4 sm:$0xff]  }
 0x2b8   :  { %5718 = vmatpush1.bf16.msra.mxu0 %v15570_v60  ;;  %v15630_v60 = vld [vmem:[#allocation8 + $0x610] ss:$144 sps:$4 sm:$0xff]  }
 0x2b9   :  { %5719 = vmatprep.subr.bf16.mxu0 %v15578_v0  ;;  %v15636_v0 = vld [vmem:[#allocation8 + $0x730] ss:$144 sps:$4 sm:$0xff]  }
 0x2ba   :  { %5060 = vmatpush1.bf16.msra.mxu1 %v15573_v62  ;;  %v17981_v9 = vpop.f32.mrb[4].mxu0  ;;  %v15638_v62 = vld [vmem:[#allocation8 + $0x734] ss:$144 sps:$4 sm:$0xff]  }
 0x2bb   :  { %v17983_v12 = vpop.f32.mrb[5].mxu0  ;;  %5061 = vmatprep.subr.bf16.mxu1 %v15581_v6  ;;  %v15639_v6 = vld [vmem:[#allocation8 + $0x928] ss:$144 sps:$4 sm:$0xff]  }
 0x2bc   :  { %v5276_v14 = vpop.f32.mrb[6].mxu0  ;;  %5720 = vmatpush1.bf16.msra.mxu0 %v15576_v4  ;;  %v15641_v4 = vld [vmem:[#allocation8 + $0x92c] ss:$144 sps:$4 sm:$0xff]  }
 0x2bd   :  { %v5277_v16 = vpop.f32.mrb[7].mxu0  ;;  %5730 = vmatprep.subr.bf16.mxu0 %v15584_v8  ;;  %v15642_v8 = vld [vmem:[#allocation8 + $0x850] ss:$144 sps:$4 sm:$0xff]   ;;  %v15645_v14 = vld [vmem:[#allocation8 + $0xa48] ss:$144 sps:$4 sm:$0xff]  }
 0x2be   :  { %5062 = vmatpush1.bf16.msra.mxu1 %v15579_v7  ;;  %v15644_v7 = vld [vmem:[#allocation8 + $0x854] ss:$144 sps:$4 sm:$0xff]   ;;  %v15653_v16 = vld [vmem:[#allocation8 + $0xb6c] ss:$144 sps:$4 sm:$0xff]  }
 0x2bf   :  { %5722 = vmatmul.mubr.bf16.vlgmr.msra.gmra.mrb[16].mxu0 %v17916_v22  ;;  %5063 = vmatprep.subr.bf16.mxu1 %v15587_v13  ;;  %v15650_v13 = vld [vmem:[#allocation8 + $0x974] ss:$144 sps:$4 sm:$0xff]  }
 0x2c0   :  { %v17986_v23 = vpop.f32.mrb[8].mxu1  ;;  %5731 = vmatpush1.bf16.msra.mxu0 %v15582_v10  ;;  %5762 = vmatprep.mubr.bf16.mxu0 %v17705_v63  ;;  %v15647_v10 = vld [vmem:[#allocation8 + $0xa4c] ss:$144 sps:$4 sm:$0xff]  }
 0x2c1   :  { %v17989_v25 = vpop.f32.mrb[9].mxu1  ;;  %5732 = vmatprep.subr.bf16.mxu0 %v15590_v17  ;;  %v15656_v17 = vld [vmem:[#allocation8 + $0xa94] ss:$144 sps:$4 sm:$0xff]  }
 0x2c2   :  { %v4866_v27 = vpop.f32.mrb[10].mxu1  ;;  %5064 = vmatpush1.bf16.msra.mxu1 %v15585_v15  ;;  %v15648_v15 = vld [vmem:[#allocation8 + $0x970] ss:$144 sps:$4 sm:$0xff]  }
 0x2c3   :  { %v4867_v30 = vpop.f32.mrb[11].mxu1  ;;  %5115 = vmatprep.subr.bf16.mxu1 %v15593_v21  ;;  %v15654_v21 = vld [vmem:[#allocation8 + $0xa90] ss:$144 sps:$4 sm:$0xff]   ;;  %v15657_v27 = vld [vmem:[#allocation8 + $0xc88] ss:$144 sps:$4 sm:$0xff]  }
 0x2c4   :  { %5733 = vmatpush1.bf16.msra.mxu0 %v15588_v19  ;;  %v15651_v19 = vld [vmem:[#allocation8 + $0xb68] ss:$144 sps:$4 sm:$0xff]   ;;  %v15665_v30 = vld [vmem:[#allocation8 + $0xdac] ss:$144 sps:$4 sm:$0xff]  }
 0x2c5   :  { %5066 = vmatmul.mubr.bf16.vlgmr.msra.gmra.mrb[20].mxu1 %v17916_v22  ;;  %13801 = vmatprep.subr.msk.bf16.mxu0 %vm4596_vm2, %v15594_v24  ;;  %v15659_v24 = vld [vmem:[#allocation8 + $0xc8c] ss:$144 sps:$4 sm:$0xff]  }
 0x2c6   :  { %5116 = vmatpush1.bf16.msra.mxu1 %v15591_v28  ;;  %5147 = vmatprep.mubr.bf16.mxu1 %v17914_v20  ;;  %v15660_v28 = vld [vmem:[#allocation8 + $0xbb0] ss:$144 sps:$4 sm:$0xff]  }
 0x2c7   :  { %5117 = vmatprep.subr.bf16.mxu1 %v15599_v31  ;;  %v15668_v31 = vld [vmem:[#allocation8 + $0xcd4] ss:$144 sps:$4 sm:$0xff]  }
 0x2c8   :  { %5735 = vmatpush1.bf16.msra.mxu0 %v4670_v33  ;;  %v15663_v33 = vld [vmem:[#allocation8 + $0xda8] ss:$144 sps:$4 sm:$0xff]  }
 0x2c9   :  { %5853 = vmatprep.subr.bf16.mxu0 %v15602_v35  ;;  %v15666_v35 = vld [vmem:[#allocation8 + $0xcd0] ss:$144 sps:$4 sm:$0xff]  }
 0x2ca   :  { %5118 = vmatpush1.bf16.msra.mxu1 %v15597_v36  ;;  %v15671_v36 = vld [vmem:[#allocation8 + $0xecc] ss:$144 sps:$4 sm:$0xff]  }
 0x2cb   :  { %13802 = vmatmul.mubr.msk.bf16.vlgmr.msra.gmra.mrb[16].mxu0 %vm4592_vm3, %v17921_v29  ;;  %5119 = vmatprep.subr.bf16.mxu1 %v15605_v37  ;;  %v15674_v37 = vld [vmem:[#allocation8 + $0xdf4] ss:$144 sps:$4 sm:$0xff]  }
 0x2cc   :  { %5854 = vmatpush1.bf16.msra.mxu0 %v15600_v38  ;;  %5885 = vmatprep.mubr.bf16.mxu0 %v17914_v20  ;;  %v15669_v38 = vld [vmem:[#allocation8 + $0xec8] ss:$144 sps:$4 sm:$0xff]  }
 0x2cd   :  { %5855 = vmatprep.subr.bf16.mxu0 %v15608_v39  ;;  %v15672_v39 = vld [vmem:[#allocation8 + $0xdf0] ss:$144 sps:$4 sm:$0xff]  }
 0x2ce   :  { %5120 = vmatpush1.bf16.msra.mxu1 %v15603_v40  ;;  %v15677_v40 = vld [vmem:[#allocation8 + $0xfec] ss:$144 sps:$4 sm:$0xff]  }
 0x2cf   :  { %5121 = vmatprep.subr.bf16.mxu1 %v15611_v41  ;;  %v15680_v41 = vld [vmem:[#allocation8 + $0xf14] ss:$144 sps:$4 sm:$0xff]  }
 0x2d0   :  { %5856 = vmatpush1.bf16.msra.mxu0 %v15606_v43  ;;  %v15675_v43 = vld [vmem:[#allocation8 + $0xfe8] ss:$144 sps:$4 sm:$0xff]  }
 0x2d1   :  { %5857 = vmatprep.subr.bf16.mxu0 %v15614_v45  ;;  %v15678_v45 = vld [vmem:[#allocation8 + $0xf10] ss:$144 sps:$4 sm:$0xff]  }
 0x2d2   :  { %5122 = vmatpush1.bf16.msra.mxu1 %v15609_v46  ;;  %v15683_v46 = vld [vmem:[#allocation8 + $0x110c] ss:$144 sps:$4 sm:$0xff]  }
 0x2d3   :  { %5123 = vmatprep.subr.bf16.mxu1 %v15617_v47  ;;  %v15686_v47 = vld [vmem:[#allocation8 + $0x1034] ss:$144 sps:$4 sm:$0xff]  }
 0x2d4   :  { %5858 = vmatpush1.bf16.msra.mxu0 %v15612_v48  ;;  %v15681_v48 = vld [vmem:[#allocation8 + $0x1108] ss:$144 sps:$4 sm:$0xff]  }
 0x2d5   :  { %5859 = vmatprep.subr.bf16.mxu0 %v15620_v49  ;;  %v15684_v49 = vld [vmem:[#allocation8 + $0x1030] ss:$144 sps:$4 sm:$0xff]  }
 0x2d6   :  { %5124 = vmatpush1.bf16.msra.mxu1 %v15615_v50  ;;  %v15689_v50 = vld [vmem:[#allocation8 + $0x122c] ss:$144 sps:$4 sm:$0xff]  }
 0x2d7   :  { %5125 = vmatprep.subr.bf16.mxu1 %v15623_v51  ;;  %v15692_v51 = vld [vmem:[#allocation8 + $0x1154] ss:$144 sps:$4 sm:$0xff]  }
 0x2d8   :  { %5860 = vmatpush1.bf16.msra.mxu0 %v15618_v52  ;;  %v15687_v52 = vld [vmem:[#allocation8 + $0x1228] ss:$144 sps:$4 sm:$0xff]  }
 0x2d9   :  { %5861 = vmatprep.subr.bf16.mxu0 %v15626_v53  ;;  %v15690_v53 = vld [vmem:[#allocation8 + $0x1150] ss:$144 sps:$4 sm:$0xff]  }
 0x2da   :  { %5126 = vmatpush1.bf16.msra.mxu1 %v15621_v54  ;;  %v15695_v54 = vld [vmem:[#allocation8 + $0x134c] ss:$144 sps:$4 sm:$0xff]  }
 0x2db   :  { %5127 = vmatprep.subr.bf16.mxu1 %v15629_v56  ;;  %v15693_v56 = vld [vmem:[#allocation8 + $0x1348] ss:$144 sps:$4 sm:$0xff]  }
 0x2dc   :  { %5862 = vmatpush1.bf16.msra.mxu0 %v15624_v55  ;;  %v15698_v55 = vld [vmem:[#allocation8 + $0x1274] ss:$144 sps:$4 sm:$0xff]  }
 0x2dd   :  { %5863 = vmatprep.subr.bf16.mxu0 %v15632_v57  ;;  %v15699_v57 = vld [vmem:[#allocation8 + $0x146c] ss:$144 sps:$4 sm:$0x3f]  }
 0x2de   :  { %5128 = vmatpush1.bf16.msra.mxu1 %v15627_v58 }
 0x2df   :  { %5129 = vmatprep.subr.bf16.mxu1 %v15635_v59  ;;  %v15696_v59 = vld [vmem:[#allocation8 + $0x1270] ss:$144 sps:$4 sm:$0xff]  }
 0x2e0   :  { %5864 = vmatpush1.bf16.msra.mxu0 %v15630_v60  ;;  %v15701_v60 = vld [vmem:[#allocation8 + $0x1468] ss:$144 sps:$4 sm:$0x3f]  }
 0x2e1   :  { %5865 = vmatprep.subr.bf16.mxu0 %v15638_v62  ;;  %v15704_v62 = vld [vmem:[#allocation8 + $0x1394] ss:$144 sps:$4 sm:$0xff]  }
 0x2e2   :  { %5130 = vmatpush1.bf16.msra.mxu1 %v15633_v61 }
 0x2e3   :  { %5131 = vmatprep.subr.bf16.mxu1 %v15641_v4 }
 0x2e4   :  { %5866 = vmatpush1.bf16.msra.mxu0 %v15636_v0 }
 0x2e5   :  { %5867 = vmatprep.subr.bf16.mxu0 %v15644_v7  ;;  %v15707_v7 = vld [vmem:[#allocation8 + $0x3c] ss:$144 sps:$4 sm:$0xff]  }
 0x2e6   :  { %5132 = vmatpush1.bf16.msra.mxu1 %v15639_v6  ;;  %v15702_v6 = vld [vmem:[#allocation8 + $0x1390] ss:$144 sps:$4 sm:$0xff]  }
 0x2e7   :  { %5133 = vmatprep.subr.bf16.mxu1 %v15647_v10  ;;  %v15708_v10 = vld [vmem:[#allocation8 + $0x14b4] ss:$144 sps:$4 sm:$0x3f]  }
 0x2e8   :  { %5868 = vmatpush1.bf16.msra.mxu0 %v15642_v8  ;;  %v4628_v8 = vsel %vm4596_vm2, %v15701_v60, 0  ;;  %v15758_v60 = vld [vmem:[#allocation8 + $0x864] ss:$144 sps:$4 sm:$0xff]  }
 0x2e9   :  { %5869 = vmatprep.subr.bf16.mxu0 %v15650_v13  ;;  %v15710_v13 = vld [vmem:[#allocation8 + $0x14b0] ss:$144 sps:$4 sm:$0x3f]  }
 0x2ea   :  { %5134 = vmatpush1.bf16.msra.mxu1 %v15645_v14 }
 0x2eb   :  { %5135 = vmatprep.subr.bf16.mxu1 %v15653_v16 }
 0x2ec   :  { %5870 = vmatpush1.bf16.msra.mxu0 %v15648_v15 }
 0x2ed   :  { %5871 = vmatprep.subr.bf16.mxu0 %v15656_v17  ;;  %v15705_v17 = vld [vmem:[#allocation8 + $0x38] ss:$144 sps:$4 sm:$0xff]  }
 0x2ee   :  { %5136 = vmatpush1.bf16.msra.mxu1 %v15651_v19  ;;  %v15713_v19 = vld [vmem:[#allocation8 + $0x15c] ss:$144 sps:$4 sm:$0xff]  }
 0x2ef   :  { %5137 = vmatprep.subr.bf16.mxu1 %v15659_v24  ;;  %v15716_v24 = vld [vmem:[#allocation8 + $0x84] ss:$144 sps:$4 sm:$0xff]  }
 0x2f0   :  { %5872 = vmatpush1.bf16.msra.mxu0 %v15654_v21 }
 0x2f1   :  { %5873 = vmatprep.subr.bf16.mxu0 %v15662_v26  ;;  %v15711_v26 = vld [vmem:[#allocation8 + $0x158] ss:$144 sps:$4 sm:$0xff]  }
 0x2f2   :  { %5138 = vmatpush1.bf16.msra.mxu1 %v15657_v27  ;;  %v4682_v27 = vsel %vm4596_vm2, %v15710_v13, 0  ;;  %v15770_v13 = vld [vmem:[#allocation8 + $0xaa4] ss:$144 sps:$4 sm:$0xff]  }
 0x2f3   :  { %5139 = vmatprep.subr.bf16.mxu1 %v15665_v30  ;;  %v15719_v30 = vld [vmem:[#allocation8 + $0x27c] ss:$144 sps:$4 sm:$0xff]  }
 0x2f4   :  { %5874 = vmatpush1.bf16.msra.mxu0 %v15660_v28  ;;  %v15714_v28 = vld [vmem:[#allocation8 + $0x80] ss:$144 sps:$4 sm:$0xff]  }
 0x2f5   :  { %5875 = vmatprep.subr.bf16.mxu0 %v15668_v31  ;;  %v15722_v31 = vld [vmem:[#allocation8 + $0x1a4] ss:$144 sps:$4 sm:$0xff]  }
 0x2f6   :  { %5140 = vmatpush1.bf16.msra.mxu1 %v15663_v33  ;;  %v15717_v33 = vld [vmem:[#allocation8 + $0x278] ss:$144 sps:$4 sm:$0xff]  }
 0x2f7   :  { %5141 = vmatprep.subr.bf16.mxu1 %v15671_v36  ;;  %v15725_v36 = vld [vmem:[#allocation8 + $0x39c] ss:$144 sps:$4 sm:$0xff]  }
 0x2f8   :  { %5876 = vmatpush1.bf16.msra.mxu0 %v15666_v35  ;;  %v15720_v35 = vld [vmem:[#allocation8 + $0x1a0] ss:$144 sps:$4 sm:$0xff]  }
 0x2f9   :  { %5877 = vmatprep.subr.bf16.mxu0 %v15674_v37  ;;  %v15723_v37 = vld [vmem:[#allocation8 + $0x398] ss:$144 sps:$4 sm:$0xff]  }
 0x2fa   :  { %5142 = vmatpush1.bf16.msra.mxu1 %v15669_v38  ;;  %v15728_v38 = vld [vmem:[#allocation8 + $0x2c4] ss:$144 sps:$4 sm:$0xff]  }
 0x2fb   :  { %5143 = vmatprep.subr.bf16.mxu1 %v15677_v40  ;;  %v15731_v40 = vld [vmem:[#allocation8 + $0x4bc] ss:$144 sps:$4 sm:$0xff]  }
 0x2fc   :  { %5878 = vmatpush1.bf16.msra.mxu0 %v15672_v39  ;;  %v15726_v39 = vld [vmem:[#allocation8 + $0x2c0] ss:$144 sps:$4 sm:$0xff]  }
 0x2fd   :  { %5879 = vmatprep.subr.bf16.mxu0 %v15680_v41  ;;  %v15729_v41 = vld [vmem:[#allocation8 + $0x4b8] ss:$144 sps:$4 sm:$0xff]  }
 0x2fe   :  { %5144 = vmatpush1.bf16.msra.mxu1 %v15675_v43  ;;  %v15734_v43 = vld [vmem:[#allocation8 + $0x3e4] ss:$144 sps:$4 sm:$0xff]  }
 0x2ff   :  { %5145 = vmatprep.subr.bf16.mxu1 %v15683_v46  ;;  %v15737_v46 = vld [vmem:[#allocation8 + $0x5dc] ss:$144 sps:$4 sm:$0xff]  }
 0x300   :  { %5880 = vmatpush1.bf16.msra.mxu0 %v15678_v45  ;;  %v15732_v45 = vld [vmem:[#allocation8 + $0x3e0] ss:$144 sps:$4 sm:$0xff]  }
 0x301   :  { %5881 = vmatprep.subr.bf16.mxu0 %v15686_v47  ;;  %v15735_v47 = vld [vmem:[#allocation8 + $0x5d8] ss:$144 sps:$4 sm:$0xff]  }
 0x302   :  { %5146 = vmatpush1.bf16.msra.mxu1 %v15681_v48  ;;  %v15740_v48 = vld [vmem:[#allocation8 + $0x504] ss:$144 sps:$4 sm:$0xff]  }
 0x303   :  { %5156 = vmatprep.subr.bf16.mxu1 %v15689_v50  ;;  %v15743_v50 = vld [vmem:[#allocation8 + $0x6fc] ss:$144 sps:$4 sm:$0xff]  }
 0x304   :  { %5882 = vmatpush1.bf16.msra.mxu0 %v15684_v49  ;;  %v15738_v49 = vld [vmem:[#allocation8 + $0x500] ss:$144 sps:$4 sm:$0xff]  }
 0x305   :  { %5148 = vmatmul.mubr.bf16.vlgmr.msra.gmra.mrb[24].mxu1 %v17916_v22  ;;  %5883 = vmatprep.subr.bf16.mxu0 %v15692_v51  ;;  %v15746_v51 = vld [vmem:[#allocation8 + $0x624] ss:$144 sps:$4 sm:$0xff]  }
 0x306   :  { %5157 = vmatpush1.bf16.msra.mxu1 %v15687_v52  ;;  %v17999_v58 = vpop.f32.mrb[8].mxu0  ;;  %5188 = vmatprep.mubr.bf16.mxu1 %v17705_v63  ;;  %v15741_v52 = vld [vmem:[#allocation8 + $0x6f8] ss:$144 sps:$4 sm:$0xff]  }
 0x307   :  { %v18002_v61 = vpop.f32.mrb[9].mxu0  ;;  %5158 = vmatprep.subr.bf16.mxu1 %v15695_v54  ;;  %v15749_v54 = vld [vmem:[#allocation8 + $0x81c] ss:$144 sps:$4 sm:$0xff]  }
 0x308   :  { %v5440_v0 = vpop.f32.mrb[10].mxu0  ;;  %5884 = vmatpush1.bf16.msra.mxu0 %v15690_v53  ;;  %v15744_v53 = vld [vmem:[#allocation8 + $0x620] ss:$144 sps:$4 sm:$0xff]  }
 0x309   :  { %v5441_v4 = vpop.f32.mrb[11].mxu0  ;;  %5894 = vmatprep.subr.bf16.mxu0 %v15698_v55  ;;  %v15747_v55 = vld [vmem:[#allocation8 + $0x818] ss:$144 sps:$4 sm:$0xff]   ;;  %v15756_v0 = vld [vmem:[#allocation8 + $0x860] ss:$144 sps:$4 sm:$0xff]  }
 0x30a   :  { %5159 = vmatpush1.bf16.msra.mxu1 %v15693_v56  ;;  %v15752_v56 = vld [vmem:[#allocation8 + $0x744] ss:$144 sps:$4 sm:$0xff]   ;;  %v15761_v4 = vld [vmem:[#allocation8 + $0xa5c] ss:$144 sps:$4 sm:$0xff]  }
 0x30b   :  { %5886 = vmatmul.mubr.bf16.vlgmr.msra.gmra.mrb[20].mxu0 %v17916_v22  ;;  %13787 = vmatprep.subr.msk.bf16.mxu1 %vm4596_vm2, %v15699_v57  ;;  %v15750_v57 = vld [vmem:[#allocation8 + $0x740] ss:$144 sps:$4 sm:$0xff]  }
 0x30c   :  { %v18007_v14 = vpop.f32.mrb[12].mxu1  ;;  %5895 = vmatpush1.bf16.msra.mxu0 %v15696_v59  ;;  %5926 = vmatprep.mubr.bf16.mxu0 %v17705_v63  ;;  %v15755_v59 = vld [vmem:[#allocation8 + $0x93c] ss:$144 sps:$4 sm:$0xff]  }
 0x30d   :  { %v18010_v15 = vpop.f32.mrb[13].mxu1  ;;  %5896 = vmatprep.subr.bf16.mxu0 %v15704_v62  ;;  %v15753_v62 = vld [vmem:[#allocation8 + $0x938] ss:$144 sps:$4 sm:$0xff]  }
 0x30e   :  { %v4948_v16 = vpop.f32.mrb[14].mxu1  ;;  %5161 = vmatpush1.bf16.msra.mxu1 %v4628_v8  ;;  %v15762_v8 = vld [vmem:[#allocation8 + $0x980] ss:$144 sps:$4 sm:$0xff]  }
 0x30f   :  { %v4949_v21 = vpop.f32.mrb[15].mxu1  ;;  %5279 = vmatprep.subr.bf16.mxu1 %v15707_v7  ;;  %v15759_v7 = vld [vmem:[#allocation8 + $0xa58] ss:$144 sps:$4 sm:$0xff]  }
 0x310   :  { %5897 = vmatpush1.bf16.msra.mxu0 %v15702_v6  ;;  %v15764_v6 = vld [vmem:[#allocation8 + $0x984] ss:$144 sps:$4 sm:$0xff]   ;;  %v15765_v16 = vld [vmem:[#allocation8 + $0xb78] ss:$144 sps:$4 sm:$0xff]  }
 0x311   :  { %13788 = vmatmul.mubr.msk.bf16.vlgmr.msra.gmra.mrb[24].mxu1 %vm4592_vm3, %v17921_v29  ;;  %13805 = vmatprep.subr.msk.bf16.mxu0 %vm4596_vm2, %v15708_v10  ;;  %v15767_v10 = vld [vmem:[#allocation8 + $0xb7c] ss:$144 sps:$4 sm:$0xff]   ;;  %v15776_v21 = vld [vmem:[#allocation8 + $0xbc4] ss:$144 sps:$4 sm:$0xff]  }
 0x312   :  { %5280 = vmatpush1.bf16.msra.mxu1 %v15705_v17  ;;  %5311 = vmatprep.mubr.bf16.mxu1 %v17914_v20  ;;  %v15768_v17 = vld [vmem:[#allocation8 + $0xaa0] ss:$144 sps:$4 sm:$0xff]  }
 0x313   :  { %5281 = vmatprep.subr.bf16.mxu1 %v15713_v19  ;;  %v15773_v19 = vld [vmem:[#allocation8 + $0xc9c] ss:$144 sps:$4 sm:$0xff]  }
 0x314   :  { %5899 = vmatpush1.bf16.msra.mxu0 %v4682_v27  ;;  %v15779_v27 = vld [vmem:[#allocation8 + $0xdbc] ss:$144 sps:$4 sm:$0xff]  }
 0x315   :  { %6017 = vmatprep.subr.bf16.mxu0 %v15716_v24  ;;  %v15771_v24 = vld [vmem:[#allocation8 + $0xc98] ss:$144 sps:$4 sm:$0xff]  }
 0x316   :  { %5282 = vmatpush1.bf16.msra.mxu1 %v15711_v26  ;;  %v15774_v26 = vld [vmem:[#allocation8 + $0xbc0] ss:$144 sps:$4 sm:$0xff]  }
 0x317   :  { %13806 = vmatmul.mubr.msk.bf16.vlgmr.msra.gmra.mrb[20].mxu0 %vm4592_vm3, %v17921_v29  ;;  %5283 = vmatprep.subr.bf16.mxu1 %v15719_v30  ;;  %v15777_v30 = vld [vmem:[#allocation8 + $0xdb8] ss:$144 sps:$4 sm:$0xff]  }
 0x318   :  { %6018 = vmatpush1.bf16.msra.mxu0 %v15714_v28  ;;  %6049 = vmatprep.mubr.bf16.mxu0 %v17914_v20  ;;  %v15782_v28 = vld [vmem:[#allocation8 + $0xce4] ss:$144 sps:$4 sm:$0xff]  }
 0x319   :  { %6019 = vmatprep.subr.bf16.mxu0 %v15722_v31  ;;  %v15780_v31 = vld [vmem:[#allocation8 + $0xce0] ss:$144 sps:$4 sm:$0xff]  }
 0x31a   :  { %5284 = vmatpush1.bf16.msra.mxu1 %v15717_v33  ;;  %v15785_v33 = vld [vmem:[#allocation8 + $0xedc] ss:$144 sps:$4 sm:$0xff]  }
 0x31b   :  { %5285 = vmatprep.subr.bf16.mxu1 %v15725_v36  ;;  %v15783_v36 = vld [vmem:[#allocation8 + $0xed8] ss:$144 sps:$4 sm:$0xff]  }
 0x31c   :  { %6020 = vmatpush1.bf16.msra.mxu0 %v15720_v35  ;;  %v15788_v35 = vld [vmem:[#allocation8 + $0xe04] ss:$144 sps:$4 sm:$0xff]  }
 0x31d   :  { %6021 = vmatprep.subr.bf16.mxu0 %v15728_v38  ;;  %v15791_v38 = vld [vmem:[#allocation8 + $0xffc] ss:$144 sps:$4 sm:$0xff]  }
 0x31e   :  { %5286 = vmatpush1.bf16.msra.mxu1 %v15723_v37  ;;  %v15786_v37 = vld [vmem:[#allocation8 + $0xe00] ss:$144 sps:$4 sm:$0xff]  }
 0x31f   :  { %5287 = vmatprep.subr.bf16.mxu1 %v15731_v40  ;;  %v15789_v40 = vld [vmem:[#allocation8 + $0xff8] ss:$144 sps:$4 sm:$0xff]  }
 0x320   :  { %6022 = vmatpush1.bf16.msra.mxu0 %v15726_v39  ;;  %v15794_v39 = vld [vmem:[#allocation8 + $0xf24] ss:$144 sps:$4 sm:$0xff]  }
 0x321   :  { %6023 = vmatprep.subr.bf16.mxu0 %v15734_v43  ;;  %v15797_v43 = vld [vmem:[#allocation8 + $0x111c] ss:$144 sps:$4 sm:$0xff]  }
 0x322   :  { %5288 = vmatpush1.bf16.msra.mxu1 %v15729_v41  ;;  %v15792_v41 = vld [vmem:[#allocation8 + $0xf20] ss:$144 sps:$4 sm:$0xff]  }
 0x323   :  { %5289 = vmatprep.subr.bf16.mxu1 %v15737_v46  ;;  %v15795_v46 = vld [vmem:[#allocation8 + $0x1118] ss:$144 sps:$4 sm:$0xff]  }
 0x324   :  { %6024 = vmatpush1.bf16.msra.mxu0 %v15732_v45  ;;  %v15800_v45 = vld [vmem:[#allocation8 + $0x1044] ss:$144 sps:$4 sm:$0xff]  }
 0x325   :  { %6025 = vmatprep.subr.bf16.mxu0 %v15740_v48  ;;  %v15803_v48 = vld [vmem:[#allocation8 + $0x123c] ss:$144 sps:$4 sm:$0xff]  }
 0x326   :  { %5290 = vmatpush1.bf16.msra.mxu1 %v15735_v47  ;;  %v15798_v47 = vld [vmem:[#allocation8 + $0x1040] ss:$144 sps:$4 sm:$0xff]  }
 0x327   :  { %5291 = vmatprep.subr.bf16.mxu1 %v15743_v50  ;;  %v18020_v50 = vld [vmem:[#allocation10] sm:$0xff] }
 0x328   :  { %6026 = vmatpush1.bf16.msra.mxu0 %v15738_v49  ;;  %v15806_v49 = vld [vmem:[#allocation8 + $0x1164] ss:$144 sps:$4 sm:$0xff]  }
 0x329   :  { %6027 = vmatprep.subr.bf16.mxu0 %v15746_v51  ;;  %v18023_v51 = vsub.s32 3, %v17900_v2 }
 0x32a   :  { %5292 = vmatpush1.bf16.msra.mxu1 %v15741_v52  ;;  %v1020_v52 = vld [vmem:[#allocation10 + $0x10] sm:$0xff] }
 0x32b   :  { %5293 = vmatprep.subr.bf16.mxu1 %v15749_v54  ;;  %v18026_v54 = vsub.s32 4, %v17900_v2 }
 0x32c   :  { %6028 = vmatpush1.bf16.msra.mxu0 %v15744_v53  ;;  %v15801_v53 = vld [vmem:[#allocation8 + $0x1238] ss:$144 sps:$4 sm:$0xff]  }
 0x32d   :  { %6029 = vmatprep.subr.bf16.mxu0 %v15752_v56  ;;  %v15804_v56 = vld [vmem:[#allocation8 + $0x1160] ss:$144 sps:$4 sm:$0xff]  }
 0x32e   :  { %5294 = vmatpush1.bf16.msra.mxu1 %v15747_v55  ;;  %v18029_v55 = vsub.s32 5, %v17900_v2 }
 0x32f   :  { %5295 = vmatprep.subr.bf16.mxu1 %v15755_v59  ;;  %v1039_v59 = vrot.slane %v18020_v50, %v17911_v11 }
 0x330   :  { %6030 = vmatpush1.bf16.msra.mxu0 %v15750_v57  ;;  %v15809_v57 = vld [vmem:[#allocation8 + $0x135c] ss:$144 sps:$4 sm:$0xff]  }
 0x331   :  { %6031 = vmatprep.subr.bf16.mxu0 %v15758_v60  ;;  %v1111_v60 = vrot.slane %v1020_v52, %v18026_v54 }
 0x332   :  { %5296 = vmatpush1.bf16.msra.mxu1 %v15753_v62  ;;  %v15812_v62 = vld [vmem:[#allocation8 + $0x1284] ss:$144 sps:$4 sm:$0xff]  }
 0x333   :  { %5297 = vmatprep.subr.bf16.mxu1 %v15761_v4  ;;  %v1115_v4 = vrot.slane %v1020_v52, %v18029_v55  ;;  %v15831_v52 = vld [vmem:[#allocation8 + $0x3a8] ss:$144 sps:$4 sm:$0xff]  }
 0x334   :  { %6032 = vmatpush1.bf16.msra.mxu0 %v15756_v0  ;;  %v1043_v0 = vrot.slane %v18020_v50, %v18023_v51 }
 0x335   :  { %6033 = vmatprep.subr.bf16.mxu0 %v15764_v6  ;;  %v15807_v6 = vld [vmem:[#allocation8 + $0x1358] ss:$144 sps:$4 sm:$0xff]  }
 0x336   :  { %5298 = vmatpush1.bf16.msra.mxu1 %v15759_v7  ;;  %v15813_v7 = vld [vmem:[#allocation8 + $0x147c] ss:$144 sps:$4 sm:$0x3f]  }
 0x337   :  { %5299 = vmatprep.subr.bf16.mxu1 %v15767_v10  ;;  %v15810_v10 = vld [vmem:[#allocation8 + $0x1280] ss:$144 sps:$4 sm:$0xff]  }
 0x338   :  { %6034 = vmatpush1.bf16.msra.mxu0 %v15762_v8 }
 0x339   :  { %6035 = vmatprep.subr.bf16.mxu0 %v15770_v13  ;;  %v15815_v13 = vld [vmem:[#allocation8 + $0x1478] ss:$144 sps:$4 sm:$0x3f]  }
 0x33a   :  { %5300 = vmatpush1.bf16.msra.mxu1 %v15765_v16  ;;  %v18040_v16 = vadd.f32 %v17986_v23, %v1039_v59  ;;  %v15837_v59 = vld [vmem:[#allocation8 + $0x5e8] ss:$144 sps:$4 sm:$0xff]  }
 0x33b   :  { %5301 = vmatprep.subr.bf16.mxu1 %v15773_v19 }
 0x33c   :  { %6036 = vmatpush1.bf16.msra.mxu0 %v15768_v17 }
 0x33d   :  { %6037 = vmatprep.subr.bf16.mxu0 %v15776_v21  ;;  %v15818_v21 = vld [vmem:[#allocation8 + $0x13a4] ss:$144 sps:$4 sm:$0xff]  }
 0x33e   :  { %5302 = vmatpush1.bf16.msra.mxu1 %v15771_v24  ;;  %v18045_v24 = vadd.f32 %v17989_v25, %v1043_v0  ;;  %v4640_v25 = vsel %vm4596_vm2, %v15815_v13, 0  ;;  %v15845_v0 = vld [vmem:[#allocation8 + $0x82c] ss:$144 sps:$4 sm:$0xff]  }
 0x33f   :  { %5303 = vmatprep.subr.bf16.mxu1 %v15779_v27  ;;  %v15854_v13 = vld [vmem:[#allocation8 + $0xb8c] ss:$144 sps:$4 sm:$0xff]  }
 0x340   :  { %6038 = vmatpush1.bf16.msra.mxu0 %v15774_v26 }
 0x341   :  { %6039 = vmatprep.subr.bf16.mxu0 %v15782_v28 }
 0x342   :  { %5304 = vmatpush1.bf16.msra.mxu1 %v15777_v30 }
 0x343   :  { %5305 = vmatprep.subr.bf16.mxu1 %v15785_v33  ;;  %v15821_v33 = vld [vmem:[#allocation8 + $0x4c] ss:$144 sps:$4 sm:$0xff]  }
 0x344   :  { %6040 = vmatpush1.bf16.msra.mxu0 %v15780_v31  ;;  %v15816_v31 = vld [vmem:[#allocation8 + $0x13a0] ss:$144 sps:$4 sm:$0xff]  }
 0x345   :  { %6041 = vmatprep.subr.bf16.mxu0 %v15788_v35  ;;  %v15822_v35 = vld [vmem:[#allocation8 + $0x14c4] ss:$144 sps:$4 sm:$0x3f]  }
 0x346   :  { %5306 = vmatpush1.bf16.msra.mxu1 %v15783_v36  ;;  %v15824_v36 = vld [vmem:[#allocation8 + $0x14c0] ss:$144 sps:$4 sm:$0x3f]  }
 0x347   :  { %5307 = vmatprep.subr.bf16.mxu1 %v15791_v38 }
 0x348   :  { %6042 = vmatpush1.bf16.msra.mxu0 %v15786_v37 }
 0x349   :  { %6043 = vmatprep.subr.bf16.mxu0 %v15794_v39 }
 0x34a   :  { %5308 = vmatpush1.bf16.msra.mxu1 %v15789_v40  ;;  %v15819_v40 = vld [vmem:[#allocation8 + $0x48] ss:$144 sps:$4 sm:$0xff]  }
 0x34b   :  { %5309 = vmatprep.subr.bf16.mxu1 %v15797_v43 }
 0x34c   :  { %6044 = vmatpush1.bf16.msra.mxu0 %v15792_v41  ;;  %v15827_v41 = vld [vmem:[#allocation8 + $0x16c] ss:$144 sps:$4 sm:$0xff]  }
 0x34d   :  { %6045 = vmatprep.subr.bf16.mxu0 %v15800_v45  ;;  %v4694_v45 = vsel %vm4596_vm2, %v15824_v36, 0  ;;  %v15864_v36 = vld [vmem:[#allocation8 + $0x1008] ss:$144 sps:$4 sm:$0xff]  }
 0x34e   :  { %5310 = vmatpush1.bf16.msra.mxu1 %v15795_v46  ;;  %v15825_v46 = vld [vmem:[#allocation8 + $0x168] ss:$144 sps:$4 sm:$0xff]  }
 0x34f   :  { %5320 = vmatprep.subr.bf16.mxu1 %v15803_v48  ;;  %v15828_v48 = vld [vmem:[#allocation8 + $0x288] ss:$144 sps:$4 sm:$0xff]  }
 0x350   :  { %6046 = vmatpush1.bf16.msra.mxu0 %v15798_v47  ;;  %v15830_v47 = vld [vmem:[#allocation8 + $0x28c] ss:$144 sps:$4 sm:$0xff]  }
 0x351   :  { %5312 = vmatmul.mubr.bf16.vlgmr.msra.gmra.mrb[28].mxu1 %v17916_v22  ;;  %6047 = vmatprep.subr.bf16.mxu0 %v15806_v49  ;;  %v15833_v49 = vld [vmem:[#allocation8 + $0x3ac] ss:$144 sps:$4 sm:$0xff]  }
 0x352   :  { %5321 = vmatpush1.bf16.msra.mxu1 %v15801_v53  ;;  %v5600_v8 = vpop.f32.mrb[12].mxu0  ;;  %5352 = vmatprep.mubr.bf16.mxu1 %v17705_v63  ;;  %v15836_v53 = vld [vmem:[#allocation8 + $0x4cc] ss:$144 sps:$4 sm:$0xff]  }
 0x353   :  { %v18042_v17 = vadd.f32 %v5600_v8, %v1111_v60  ;;  %v5602_v19 = vpop.f32.mrb[13].mxu0  ;;  %5322 = vmatprep.subr.bf16.mxu1 %v15809_v57  ;;  %v15839_v57 = vld [vmem:[#allocation8 + $0x5ec] ss:$144 sps:$4 sm:$0xff]  }
 0x354   :  { %v18047_v26 = vadd.f32 %v5602_v19, %v1115_v4  ;;  %v5604_v27 = vpop.f32.mrb[14].mxu0  ;;  %6048 = vmatpush1.bf16.msra.mxu0 %v15804_v56  ;;  %v15834_v56 = vld [vmem:[#allocation8 + $0x4c8] ss:$144 sps:$4 sm:$0xff]   ;;  %v15842_v60 = vld [vmem:[#allocation8 + $0x70c] ss:$144 sps:$4 sm:$0xff]  }
 0x355   :  { %v6183_v28 = vmax.f32 %v18040_v16, %v18042_v17  ;;  %v5605_v30 = vpop.f32.mrb[15].mxu0  ;;  %6058 = vmatprep.subr.bf16.mxu0 %v15812_v62  ;;  %v15840_v62 = vld [vmem:[#allocation8 + $0x708] ss:$144 sps:$4 sm:$0xff]   ;;  %v15851_v8 = vld [vmem:[#allocation8 + $0xa6c] ss:$144 sps:$4 sm:$0xff]  }
 0x356   :  { %v6184_v23 = vmax.f32 %v18045_v24, %v18047_v26  ;;  %5323 = vmatpush1.bf16.msra.mxu1 %v15807_v6  ;;  %v15843_v4 = vld [vmem:[#allocation8 + $0x828] ss:$144 sps:$4 sm:$0xff]   ;;  %v15848_v6 = vld [vmem:[#allocation8 + $0x94c] ss:$144 sps:$4 sm:$0xff]  }
 0x357   :  { %6050 = vmatmul.mubr.bf16.vlgmr.msra.gmra.mrb[24].mxu0 %v17916_v22  ;;  %13791 = vmatprep.subr.msk.bf16.mxu1 %vm4596_vm2, %v15813_v7  ;;  %v15846_v7 = vld [vmem:[#allocation8 + $0x948] ss:$144 sps:$4 sm:$0xff]   ;;  %v15860_v30 = vld [vmem:[#allocation8 + $0xdcc] ss:$144 sps:$4 sm:$0xff]  }
 0x358   :  { %v18056_v37 = vpop.f32.mrb[16].mxu1  ;;  %6059 = vmatpush1.bf16.msra.mxu0 %v15810_v10  ;;  %6090 = vmatprep.mubr.bf16.mxu0 %v17705_v63  ;;  %v15849_v10 = vld [vmem:[#allocation8 + $0xa68] ss:$144 sps:$4 sm:$0xff]   ;;  %v16106_v24 = vld [vmem:[#allocation8 + $0x8c] ss:$144 sps:$4 sm:$0xff]  }
 0x359   :  { %v18059_v38 = vpop.f32.mrb[17].mxu1  ;;  %6060 = vmatprep.subr.bf16.mxu0 %v15818_v21  ;;  %v15852_v19 = vld [vmem:[#allocation8 + $0xb88] ss:$144 sps:$4 sm:$0xff]   ;;  %v15857_v21 = vld [vmem:[#allocation8 + $0xcac] ss:$144 sps:$4 sm:$0xff]  }
 0x35a   :  { %v5030_v39 = vpop.f32.mrb[18].mxu1  ;;  %5325 = vmatpush1.bf16.msra.mxu1 %v4640_v25  ;;  %v15855_v27 = vld [vmem:[#allocation8 + $0xca8] ss:$144 sps:$4 sm:$0xff]   ;;  %v16101_v26 = vld [vmem:[#allocation11 + $0x330] ss:$24 sps:$4 sm:$0xff]  }
 0x35b   :  { %v5031_v43 = vpop.f32.mrb[19].mxu1  ;;  %5443 = vmatprep.subr.bf16.mxu1 %v15821_v33  ;;  %v15863_v33 = vld [vmem:[#allocation8 + $0xeec] ss:$144 sps:$4 sm:$0xff]   ;;  %v15861_v25 = vld [vmem:[#allocation8 + $0xee8] ss:$144 sps:$4 sm:$0xff]  }
 0x35c   :  { %6061 = vmatpush1.bf16.msra.mxu0 %v15816_v31  ;;  %v15858_v31 = vld [vmem:[#allocation8 + $0xdc8] ss:$144 sps:$4 sm:$0xff]   ;;  %v15869_v39 = vld [vmem:[#allocation8 + $0x112c] ss:$144 sps:$4 sm:$0xff]  }
 0x35d   :  { %13792 = vmatmul.mubr.msk.bf16.vlgmr.msra.gmra.mrb[28].mxu1 %vm4592_vm3, %v17921_v29  ;;  %13809 = vmatprep.subr.msk.bf16.mxu0 %vm4596_vm2, %v15822_v35  ;;  %v15866_v35 = vld [vmem:[#allocation8 + $0x100c] ss:$144 sps:$4 sm:$0xff]  }
 0x35e   :  { %5444 = vmatpush1.bf16.msra.mxu1 %v15819_v40  ;;  %5475 = vmatprep.mubr.bf16.mxu1 %v17914_v20  ;;  %v18068_v40 = vld [vmem:[#allocation10 + $0x8] sm:$0xff] }
 0x35f   :  { %5445 = vmatprep.subr.bf16.mxu1 %v15827_v41  ;;  %v1063_v41 = vrot.slane %v18068_v40, %v17903_v3  ;;  %v1067_v43 = vrot.slane %v18068_v40, %v17906_v5 }
 0x360   :  { %6063 = vmatpush1.bf16.msra.mxu0 %v4694_v45  ;;  %v15867_v45 = vld [vmem:[#allocation8 + $0x1128] ss:$144 sps:$4 sm:$0xff]  }
 0x362   :  { %5446 = vmatpush1.bf16.msra.mxu1 %v15825_v46  ;;  %v18075_v46 = vsub.s32 6, %v17900_v2 }
 0x363   :  { %13810 = vmatmul.mubr.msk.bf16.vlgmr.msra.gmra.mrb[24].mxu0 %vm4592_vm3, %v17921_v29  ;;  %5447 = vmatprep.subr.bf16.mxu1 %v15830_v47  ;;  %v15872_v47 = vld [vmem:[#allocation8 + $0x124c] ss:$144 sps:$4 sm:$0xff]  }
 0x366   :  { %5448 = vmatpush1.bf16.msra.mxu1 %v15828_v48  ;;  %v18078_v48 = vsub.s32 7, %v17900_v2 }
 0x367   :  { %5449 = vmatprep.subr.bf16.mxu1 %v15833_v49 }
 0x36a   :  { %5450 = vmatpush1.bf16.msra.mxu1 %v15831_v52  ;;  %v18080_v52 = vld [vmem:[#allocation10 + $0x18] sm:$0xff] }
 0x36b   :  { %5451 = vmatprep.subr.bf16.mxu1 %v15836_v53  ;;  %v1127_v2 = vrot.slane %v18080_v52, %v17903_v3 }
 0x36e   :  { %5452 = vmatpush1.bf16.msra.mxu1 %v15834_v56 }
 0x36f   :  { %5453 = vmatprep.subr.bf16.mxu1 %v15839_v57 }
 0x372   :  { %5454 = vmatpush1.bf16.msra.mxu1 %v15837_v59 }
 0x373   :  { %5455 = vmatprep.subr.bf16.mxu1 %v15842_v60  ;;  %v15870_v60 = vld [vmem:[#allocation8 + $0x1248] ss:$144 sps:$4 sm:$0xff]  }
 0x376   :  { %5456 = vmatpush1.bf16.msra.mxu1 %v15840_v62  ;;  %v1055_v62 = vrot.slane %v18020_v50, %v18075_v46 }
 0x377   :  { %5457 = vmatprep.subr.bf16.mxu1 %v15845_v0 }
 0x37a   :  { %5458 = vmatpush1.bf16.msra.mxu1 %v15843_v4 }
 0x37b   :  { %5459 = vmatprep.subr.bf16.mxu1 %v15848_v6  ;;  %v15875_v6 = vld [vmem:[#allocation8 + $0x136c] ss:$144 sps:$4 sm:$0xff]  }
 0x37e   :  { %5460 = vmatpush1.bf16.msra.mxu1 %v15846_v7  ;;  %v1059_v7 = vrot.slane %v18020_v50, %v18078_v48 }
 0x37f   :  { %5461 = vmatprep.subr.bf16.mxu1 %v15851_v8 }
 0x382   :  { %5462 = vmatpush1.bf16.msra.mxu1 %v15849_v10  ;;  %v1131_v10 = vrot.slane %v18080_v52, %v17906_v5 }
 0x383   :  { %5463 = vmatprep.subr.bf16.mxu1 %v15854_v13  ;;  %v15873_v13 = vld [vmem:[#allocation8 + $0x1368] ss:$144 sps:$4 sm:$0xff]  }
 0x386   :  { %5464 = vmatpush1.bf16.msra.mxu1 %v15852_v19  ;;  %v15876_v19 = vld [vmem:[#allocation8 + $0x148c] ss:$144 sps:$4 sm:$0x3f]  }
 0x387   :  { %5465 = vmatprep.subr.bf16.mxu1 %v15857_v21  ;;  %v18099_v21 = vadd.f32 %v18056_v37, %v1055_v62  ;;  %v15899_v62 = vld [vmem:[#allocation8 + $0x71c] ss:$144 sps:$4 sm:$0xff]  }
 0x38a   :  { %5466 = vmatpush1.bf16.msra.mxu1 %v15855_v27 }
 0x38b   :  { %5467 = vmatprep.subr.bf16.mxu1 %v15860_v30  ;;  %v18104_v30 = vadd.f32 %v18059_v38, %v1059_v7  ;;  %v15884_v38 = vld [vmem:[#allocation8 + $0x17c] ss:$144 sps:$4 sm:$0xff]  }
 0x38c   :  { %v15905_v7 = vld [vmem:[#allocation8 + $0x95c] ss:$144 sps:$4 sm:$0xff]  }
 0x38e   :  { %5468 = vmatpush1.bf16.msra.mxu1 %v15858_v31 }
 0x38f   :  { %5469 = vmatprep.subr.bf16.mxu1 %v15863_v33 }
 0x392   :  { %5470 = vmatpush1.bf16.msra.mxu1 %v15861_v25 }
 0x393   :  { %5471 = vmatprep.subr.bf16.mxu1 %v15866_v35 }
 0x396   :  { %5472 = vmatpush1.bf16.msra.mxu1 %v15864_v36 }
 0x397   :  { %5473 = vmatprep.subr.bf16.mxu1 %v15869_v39  ;;  %v15881_v39 = vld [vmem:[#allocation8 + $0x5c] ss:$144 sps:$4 sm:$0xff]  }
 0x398   :  { %v5067_v49 = vpop.f32.mrb[20].mxu1 }
 0x399   :  { %v5068_v53 = vadd.f32 %v5067_v49, %v1063_v41  ;;  %v5069_v56 = vpop.f32.mrb[21].mxu1  ;;  %v15879_v41 = vld [vmem:[#allocation8 + $0x58] ss:$144 sps:$4 sm:$0xff]   ;;  %v15890_v49 = vld [vmem:[#allocation8 + $0x3bc] ss:$144 sps:$4 sm:$0xff]  }
 0x39a   :  { %v5070_v57 = vadd.f32 %v5069_v56, %v1067_v43  ;;  %v5071_v59 = vpop.f32.mrb[22].mxu1  ;;  %5474 = vmatpush1.bf16.msra.mxu1 %v15867_v45  ;;  %v15882_v43 = vld [vmem:[#allocation8 + $0x178] ss:$144 sps:$4 sm:$0xff]   ;;  %v15887_v45 = vld [vmem:[#allocation8 + $0x29c] ss:$144 sps:$4 sm:$0xff]  }
 0x39b   :  { %v18085_v0 = vadd.f32 %v17959_v32, %v5068_v53  ;;  %v5072_v4 = vpop.f32.mrb[23].mxu1  ;;  %5484 = vmatprep.subr.bf16.mxu1 %v15872_v47  ;;  %v15885_v47 = vld [vmem:[#allocation8 + $0x298] ss:$144 sps:$4 sm:$0xff]   ;;  %v15893_v56 = vld [vmem:[#allocation8 + $0x4dc] ss:$144 sps:$4 sm:$0xff]  }
 0x39c   :  { %v18092_v8 = vadd.f32 %v17961_v34, %v5070_v57  ;;  %v15878_v34 = vld [vmem:[#allocation8 + $0x1488] ss:$144 sps:$4 sm:$0x3f]   ;;  %v15896_v59 = vld [vmem:[#allocation8 + $0x5fc] ss:$144 sps:$4 sm:$0xff]  }
 0x39d   :  { %5476 = vmatmul.mubr.bf16.vlgmr.msra.gmra.mrb[32].mxu1 %v17916_v22  ;;  %v4652_v37 = vsel %vm4596_vm2, %v15878_v34, 0  ;;  %v15888_v53 = vld [vmem:[#allocation8 + $0x3b8] ss:$144 sps:$4 sm:$0xff]   ;;  %v16005_v34 = vld [vmem:[#allocation11 + $0x30] ss:$24 sps:$4 sm:$0xff]  }
 0x39e   :  { %5485 = vmatpush1.bf16.msra.mxu1 %v15870_v60  ;;  %v5764_v32 = vpop.f32.mrb[16].mxu0  ;;  %5516 = vmatprep.mubr.bf16.mxu1 %v17705_v63  ;;  %v15891_v57 = vld [vmem:[#allocation8 + $0x4d8] ss:$144 sps:$4 sm:$0xff]  }
 0x39f   :  { %v18101_v27 = vadd.f32 %v5764_v32, %v1127_v2  ;;  %v5766_v50 = vpop.f32.mrb[17].mxu0  ;;  %5486 = vmatprep.subr.bf16.mxu1 %v15875_v6  ;;  %v15894_v60 = vld [vmem:[#allocation8 + $0x5f8] ss:$144 sps:$4 sm:$0xff]   ;;  %v15902_v2 = vld [vmem:[#allocation8 + $0x83c] ss:$144 sps:$4 sm:$0xff]  }
 0x3a0   :  { %v18106_v31 = vadd.f32 %v5766_v50, %v1131_v10  ;;  %v5768_v33 = vpop.f32.mrb[18].mxu0  ;;  %v15897_v4 = vld [vmem:[#allocation8 + $0x718] ss:$144 sps:$4 sm:$0xff]   ;;  %v15999_v32 = vld [vmem:[#allocation11] ss:$24 sps:$4 sm:$0xff]  }
 0x3a1   :  { %v6187_v25 = vmax.f32 %v18099_v21, %v18101_v27  ;;  %v5769_v35 = vpop.f32.mrb[19].mxu0  ;;  %v15900_v6 = vld [vmem:[#allocation8 + $0x838] ss:$144 sps:$4 sm:$0xff]   ;;  %v16386_v21 = vld [vmem:[#allocation11 + $0x548] ss:$24 sps:$4 sm:$0xff]  }
 0x3a2   :  { %v6188_v36 = vmax.f32 %v18104_v30, %v18106_v31  ;;  %5487 = vmatpush1.bf16.msra.mxu1 %v15873_v13  ;;  %v16001_v10 = vld [vmem:[#allocation11 + $0x4] ss:$24 sps:$4 sm:$0xff]   ;;  %v16007_v50 = vld [vmem:[#allocation11 + $0x34] ss:$24 sps:$4 sm:$0xff]   ;;  %v15911_v35 = vld [vmem:[#allocation8 + $0xb9c] ss:$144 sps:$4 sm:$0xff]  }
 0x3a3   :  { %13795 = vmatprep.subr.msk.bf16.mxu1 %vm4596_vm2, %v15876_v19  ;;  %v15903_v13 = vld [vmem:[#allocation8 + $0x958] ss:$144 sps:$4 sm:$0xff]   ;;  %11451 = vmatprep.subr.bf16.mxu0 %v16001_v10  ;;  %v15908_v19 = vld [vmem:[#allocation8 + $0xa7c] ss:$144 sps:$4 sm:$0xff]  }
 0x3a4   :  { %11452 = vmatpush1.bf16.msra.mxu0 %v15999_v32  ;;  %v15906_v33 = vld [vmem:[#allocation8 + $0xa78] ss:$144 sps:$4 sm:$0xff]   ;;  %v15926_v32 = vld [vmem:[#allocation8 + $0x113c] ss:$144 sps:$4 sm:$0xff]  }
 0x3a5   :  { %11453 = vmatprep.subr.bf16.mxu0 %v16007_v50  ;;  %v15921_v10 = vld [vmem:[#allocation8 + $0x1018] ss:$144 sps:$4 sm:$0xff]   ;;  %v16293_v30 = vld [vmem:[#allocation11 + $0x930] ss:$24 sps:$4 sm:$0xff]  }
 0x3a6   :  { %5489 = vmatpush1.bf16.msra.mxu1 %v4652_v37  ;;  %v16013_v37 = vld [vmem:[#allocation11 + $0x64] ss:$24 sps:$4 sm:$0xff]  }
 0x3a7   :  { %5607 = vmatprep.subr.bf16.mxu1 %v15881_v39  ;;  %v16011_v39 = vld [vmem:[#allocation11 + $0x60] ss:$24 sps:$4 sm:$0xff]   ;;  %v15924_v50 = vld [vmem:[#allocation8 + $0x1138] ss:$144 sps:$4 sm:$0xff]  }
 0x3a8   :  { %11454 = vmatpush1.bf16.msra.mxu0 %v16005_v34  ;;  %v15929_v34 = vld [vmem:[#allocation8 + $0x125c] ss:$144 sps:$4 sm:$0xff]   ;;  %v16301_v31 = vld [vmem:[#allocation11 + $0x964] ss:$24 sps:$4 sm:$0xff]  }
 0x3a9   :  { %13796 = vmatmul.mubr.msk.bf16.vlgmr.msra.gmra.mrb[32].mxu1 %vm4592_vm3, %v17921_v29  ;;  %11455 = vmatprep.subr.bf16.mxu0 %v16013_v37  ;;  %v16394_v27 = vld [vmem:[#allocation11 + $0x57c] ss:$24 sps:$4 sm:$0xff]  }
 0x3aa   :  { %5608 = vmatpush1.bf16.msra.mxu1 %v15879_v41  ;;  %5639 = vmatprep.mubr.bf16.mxu1 %v17914_v20  ;;  %v15909_v41 = vld [vmem:[#allocation8 + $0xb98] ss:$144 sps:$4 sm:$0xff]  }
 0x3ab   :  { %5609 = vmatprep.subr.bf16.mxu1 %v15884_v38  ;;  %v15914_v38 = vld [vmem:[#allocation8 + $0xcbc] ss:$144 sps:$4 sm:$0xff]  }
 0x3ac   :  { %11456 = vmatpush1.bf16.msra.mxu0 %v16011_v39  ;;  %v16047_v39 = vld [vmem:[#allocation11 + $0x180] ss:$24 sps:$4 sm:$0xff]  }
 0x3ae   :  { %5610 = vmatpush1.bf16.msra.mxu1 %v15882_v43  ;;  %v16019_v43 = vld [vmem:[#allocation11 + $0x94] ss:$24 sps:$4 sm:$0xff]  }
 0x3af   :  { %5611 = vmatprep.subr.bf16.mxu1 %v15887_v45  ;;  %v16017_v45 = vld [vmem:[#allocation11 + $0x90] ss:$24 sps:$4 sm:$0xff]   ;;  %11457 = vmatprep.subr.bf16.mxu0 %v16019_v43  ;;  %v1071_v43 = vrot.slane %v18068_v40, %v17911_v11 }
 0x3b0   :  { %11458 = vmatpush1.bf16.msra.mxu0 %v16017_v45 }
 0x3b2   :  { %5612 = vmatpush1.bf16.msra.mxu1 %v15885_v47  ;;  %v15912_v47 = vld [vmem:[#allocation8 + $0xcb8] ss:$144 sps:$4 sm:$0xff]  }
 0x3b3   :  { %5613 = vmatprep.subr.bf16.mxu1 %v15890_v49  ;;  %v15917_v49 = vld [vmem:[#allocation8 + $0xddc] ss:$144 sps:$4 sm:$0xff]  }
 0x3b6   :  { %5614 = vmatpush1.bf16.msra.mxu1 %v15888_v53  ;;  %v16025_v53 = vld [vmem:[#allocation11 + $0xc4] ss:$24 sps:$4 sm:$0xff]  }
 0x3b7   :  { %5615 = vmatprep.subr.bf16.mxu1 %v15893_v56  ;;  %v16023_v56 = vld [vmem:[#allocation11 + $0xc0] ss:$24 sps:$4 sm:$0xff]   ;;  %11459 = vmatprep.subr.bf16.mxu0 %v16025_v53  ;;  %v1075_v53 = vrot.slane %v18068_v40, %v18023_v51 }
 0x3b8   :  { %11460 = vmatpush1.bf16.msra.mxu0 %v16023_v56  ;;  %v1147_v56 = vrot.slane %v18080_v52, %v18029_v55 }
 0x3ba   :  { %5616 = vmatpush1.bf16.msra.mxu1 %v15891_v57  ;;  %v15915_v57 = vld [vmem:[#allocation8 + $0xdd8] ss:$144 sps:$4 sm:$0xff]  }
 0x3bb   :  { %5617 = vmatprep.subr.bf16.mxu1 %v15896_v59  ;;  %v15920_v59 = vld [vmem:[#allocation8 + $0xefc] ss:$144 sps:$4 sm:$0xff]  }
 0x3be   :  { %5618 = vmatpush1.bf16.msra.mxu1 %v15894_v60  ;;  %v16031_v60 = vld [vmem:[#allocation11 + $0xf4] ss:$24 sps:$4 sm:$0xff]  }
 0x3bf   :  { %5619 = vmatprep.subr.bf16.mxu1 %v15899_v62  ;;  %v16029_v62 = vld [vmem:[#allocation11 + $0xf0] ss:$24 sps:$4 sm:$0xff]   ;;  %11461 = vmatprep.subr.bf16.mxu0 %v16031_v60 }
 0x3c0   :  { %11462 = vmatpush1.bf16.msra.mxu0 %v16029_v62  ;;  %v15930_v62 = vld [vmem:[#allocation8 + $0x1378] ss:$144 sps:$4 sm:$0xff]  }
 0x3c2   :  { %5620 = vmatpush1.bf16.msra.mxu1 %v15897_v4  ;;  %v15918_v4 = vld [vmem:[#allocation8 + $0xef8] ss:$144 sps:$4 sm:$0xff]  }
 0x3c3   :  { %5621 = vmatprep.subr.bf16.mxu1 %v15902_v2  ;;  %v15923_v2 = vld [vmem:[#allocation8 + $0x101c] ss:$144 sps:$4 sm:$0xff]  }
 0x3c6   :  { %5622 = vmatpush1.bf16.msra.mxu1 %v15900_v6  ;;  %v16037_v6 = vld [vmem:[#allocation11 + $0x124] ss:$24 sps:$4 sm:$0xff]  }
 0x3c7   :  { %5623 = vmatprep.subr.bf16.mxu1 %v15905_v7  ;;  %v16035_v7 = vld [vmem:[#allocation11 + $0x120] ss:$24 sps:$4 sm:$0xff]   ;;  %11463 = vmatprep.subr.bf16.mxu0 %v16037_v6 }
 0x3c8   :  { %11464 = vmatpush1.bf16.msra.mxu0 %v16035_v7 }
 0x3ca   :  { %5624 = vmatpush1.bf16.msra.mxu1 %v15903_v13  ;;  %v16043_v13 = vld [vmem:[#allocation11 + $0x154] ss:$24 sps:$4 sm:$0xff]  }
 0x3cb   :  { %5625 = vmatprep.subr.bf16.mxu1 %v15908_v19  ;;  %v16041_v19 = vld [vmem:[#allocation11 + $0x150] ss:$24 sps:$4 sm:$0xff]   ;;  %11465 = vmatprep.subr.bf16.mxu0 %v16043_v13 }
 0x3cc   :  { %11466 = vmatpush1.bf16.msra.mxu0 %v16041_v19  ;;  %v16061_v19 = vld [vmem:[#allocation11 + $0x1e4] ss:$24 sps:$4 sm:$0xff]  }
 0x3ce   :  { %5626 = vmatpush1.bf16.msra.mxu1 %v15906_v33 }
 0x3cf   :  { %5627 = vmatprep.subr.bf16.mxu1 %v15911_v35  ;;  %v16049_v35 = vld [vmem:[#allocation11 + $0x184] ss:$24 sps:$4 sm:$0xff]  }
 0x3d0   :  { %11467 = vmatprep.subr.bf16.mxu0 %v16049_v35  ;;  %v16059_v35 = vld [vmem:[#allocation11 + $0x1e0] ss:$24 sps:$4 sm:$0xff]  }
 0x3d1   :  { %11468 = vmatpush1.bf16.msra.mxu0 %v16047_v39  ;;  %v15938_v39 = vld [vmem:[#allocation8 + $0x6c] ss:$144 sps:$4 sm:$0xff]  }
 0x3d2   :  { %5628 = vmatpush1.bf16.msra.mxu1 %v15909_v41 }
 0x3d3   :  { %5629 = vmatprep.subr.bf16.mxu1 %v15914_v38  ;;  %v15927_v38 = vld [vmem:[#allocation8 + $0x1258] ss:$144 sps:$4 sm:$0xff]  }
 0x3d6   :  { %5630 = vmatpush1.bf16.msra.mxu1 %v15912_v47  ;;  %v1143_v47 = vrot.slane %v18080_v52, %v18026_v54 }
 0x3d7   :  { %5631 = vmatprep.subr.bf16.mxu1 %v15917_v49  ;;  %v15932_v49 = vld [vmem:[#allocation8 + $0x137c] ss:$144 sps:$4 sm:$0xff]  }
 0x3da   :  { %5632 = vmatpush1.bf16.msra.mxu1 %v15915_v57  ;;  %v16055_v57 = vld [vmem:[#allocation11 + $0x1b4] ss:$24 sps:$4 sm:$0xff]  }
 0x3db   :  { %5633 = vmatprep.subr.bf16.mxu1 %v15920_v59  ;;  %v16053_v59 = vld [vmem:[#allocation11 + $0x1b0] ss:$24 sps:$4 sm:$0xff]   ;;  %11469 = vmatprep.subr.bf16.mxu0 %v16055_v57  ;;  %v16079_v57 = vld [vmem:[#allocation11 + $0x274] ss:$24 sps:$4 sm:$0xff]  }
 0x3dc   :  { %11470 = vmatpush1.bf16.msra.mxu0 %v16053_v59  ;;  %v16077_v59 = vld [vmem:[#allocation11 + $0x270] ss:$24 sps:$4 sm:$0xff]  }
 0x3dd   :  { %11471 = vmatprep.subr.bf16.mxu0 %v16061_v19  ;;  %v16091_v19 = vld [vmem:[#allocation11 + $0x2d4] ss:$24 sps:$4 sm:$0xff]  }
 0x3de   :  { %5634 = vmatpush1.bf16.msra.mxu1 %v15918_v4  ;;  %v15933_v4 = vld [vmem:[#allocation8 + $0x149c] ss:$144 sps:$4 sm:$0x3f]  }
 0x3df   :  { %5635 = vmatprep.subr.bf16.mxu1 %v15923_v2 }
 0x3e0   :  { %11472 = vmatpush1.bf16.msra.mxu0 %v16059_v35  ;;  %v15948_v35 = vld [vmem:[#allocation8 + $0x4e8] ss:$144 sps:$4 sm:$0xff]  }
 0x3e2   :  { %5636 = vmatpush1.bf16.msra.mxu1 %v15921_v10  ;;  %v15935_v10 = vld [vmem:[#allocation8 + $0x1498] ss:$144 sps:$4 sm:$0x3f]  }
 0x3e3   :  { %5637 = vmatprep.subr.bf16.mxu1 %v15926_v32 }
 0x3e4   :  { %v5190_v33 = vpop.f32.mrb[24].mxu1 }
 0x3e5   :  { %v5192_v37 = vpop.f32.mrb[25].mxu1  ;;  %v18127_v2 = vadd.f32 %v5190_v33, %v1071_v43  ;;  %v15936_v43 = vld [vmem:[#allocation8 + $0x68] ss:$144 sps:$4 sm:$0xff]  }
 0x3e6   :  { %v5194_v41 = vpop.f32.mrb[26].mxu1  ;;  %5638 = vmatpush1.bf16.msra.mxu1 %v15924_v50  ;;  %v18131_v32 = vadd.f32 %v5192_v37, %v1075_v53  ;;  %v4664_v37 = vsel %vm4596_vm2, %v15935_v10, 0  ;;  %v15939_v53 = vld [vmem:[#allocation8 + $0x188] ss:$144 sps:$4 sm:$0xff]  }
 0x3e7   :  { %v5195_v45 = vpop.f32.mrb[27].mxu1  ;;  %5648 = vmatprep.subr.bf16.mxu1 %v15929_v34  ;;  %v16067_v41 = vld [vmem:[#allocation11 + $0x214] ss:$24 sps:$4 sm:$0xff]  }
 0x3e8   :  { %11473 = vmatprep.subr.bf16.mxu0 %v16067_v41  ;;  %v15941_v45 = vld [vmem:[#allocation8 + $0x18c] ss:$144 sps:$4 sm:$0xff]   ;;  %v15945_v10 = vld [vmem:[#allocation8 + $0x3c8] ss:$144 sps:$4 sm:$0xff]  }
 0x3e9   :  { %5640 = vmatmul.mubr.bf16.vlgmr.msra.gmra.mrb[36].mxu1 %v17916_v22  ;;  %v15951_v41 = vld [vmem:[#allocation8 + $0x608] ss:$144 sps:$4 sm:$0xff]  }
 0x3ea   :  { %5649 = vmatpush1.bf16.msra.mxu1 %v15927_v38  ;;  %v5928_v60 = vpop.f32.mrb[20].mxu0  ;;  %5680 = vmatprep.mubr.bf16.mxu1 %v17705_v63  ;;  %v16065_v38 = vld [vmem:[#allocation11 + $0x210] ss:$24 sps:$4 sm:$0xff]  }
 0x3eb   :  { %v18129_v6 = vadd.f32 %v5928_v60, %v1143_v47  ;;  %v5930_v7 = vpop.f32.mrb[21].mxu0  ;;  %5650 = vmatprep.subr.bf16.mxu1 %v15932_v49  ;;  %11474 = vmatpush1.bf16.msra.mxu0 %v16065_v38  ;;  %v16073_v47 = vld [vmem:[#allocation11 + $0x244] ss:$24 sps:$4 sm:$0xff]   ;;  %v16071_v49 = vld [vmem:[#allocation11 + $0x240] ss:$24 sps:$4 sm:$0xff]  }
 0x3ec   :  { %v18133_v52 = vadd.f32 %v5930_v7, %v1147_v56  ;;  %v5932_v13 = vpop.f32.mrb[22].mxu0  ;;  %v15944_v56 = vld [vmem:[#allocation8 + $0x2ac] ss:$144 sps:$4 sm:$0xff]   ;;  %11475 = vmatprep.subr.bf16.mxu0 %v16073_v47  ;;  %v15942_v60 = vld [vmem:[#allocation8 + $0x2a8] ss:$144 sps:$4 sm:$0xff]  }
 0x3ed   :  { %v5933_v34 = vpop.f32.mrb[23].mxu0  ;;  %v16083_v7 = vld [vmem:[#allocation11 + $0x2a0] ss:$24 sps:$4 sm:$0xff]   ;;  %v15957_v47 = vld [vmem:[#allocation8 + $0x848] ss:$144 sps:$4 sm:$0xff]  }
 0x3ee   :  { %5651 = vmatpush1.bf16.msra.mxu1 %v15930_v62  ;;  %v15947_v62 = vld [vmem:[#allocation8 + $0x3cc] ss:$144 sps:$4 sm:$0xff]  }
 0x3ef   :  { %13799 = vmatprep.subr.msk.bf16.mxu1 %vm4596_vm2, %v15933_v4  ;;  %11476 = vmatpush1.bf16.msra.mxu0 %v16071_v49  ;;  %v16085_v4 = vld [vmem:[#allocation11 + $0x2a4] ss:$24 sps:$4 sm:$0xff]   ;;  %v15950_v13 = vld [vmem:[#allocation8 + $0x4ec] ss:$144 sps:$4 sm:$0xff]  }
 0x3f0   :  { %11477 = vmatprep.subr.bf16.mxu0 %v16079_v57  ;;  %v16089_v34 = vld [vmem:[#allocation11 + $0x2d0] ss:$24 sps:$4 sm:$0xff]   ;;  %v15963_v57 = vld [vmem:[#allocation8 + $0xa88] ss:$144 sps:$4 sm:$0xff]  }
 0x3f1   :  { %v15956_v38 = vld [vmem:[#allocation8 + $0x72c] ss:$144 sps:$4 sm:$0xff]  }
 0x3f2   :  { %5653 = vmatpush1.bf16.msra.mxu1 %v4664_v37  ;;  %v15953_v37 = vld [vmem:[#allocation8 + $0x60c] ss:$144 sps:$4 sm:$0xff]  }
 0x3f3   :  { %5771 = vmatprep.subr.bf16.mxu1 %v15938_v39  ;;  %11478 = vmatpush1.bf16.msra.mxu0 %v16077_v59  ;;  %v16097_v39 = vld [vmem:[#allocation11 + $0x304] ss:$24 sps:$4 sm:$0xff]   ;;  %v15962_v49 = vld [vmem:[#allocation8 + $0x96c] ss:$144 sps:$4 sm:$0xff]  }
 0x3f4   :  { %11479 = vmatprep.subr.bf16.mxu0 %v16085_v4  ;;  %v15968_v59 = vld [vmem:[#allocation8 + $0xbac] ss:$144 sps:$4 sm:$0xff]   ;;  %v15969_v4 = vld [vmem:[#allocation8 + $0xcc8] ss:$144 sps:$4 sm:$0xff]  }
 0x3f5   :  { %13800 = vmatmul.mubr.msk.bf16.vlgmr.msra.gmra.mrb[36].mxu1 %vm4592_vm3, %v17921_v29 }
 0x3f6   :  { %5772 = vmatpush1.bf16.msra.mxu1 %v15936_v43  ;;  %5803 = vmatprep.mubr.bf16.mxu1 %v17914_v20  ;;  %v15954_v43 = vld [vmem:[#allocation8 + $0x728] ss:$144 sps:$4 sm:$0xff]  }
 0x3f7   :  { %5773 = vmatprep.subr.bf16.mxu1 %v15941_v45  ;;  %11480 = vmatpush1.bf16.msra.mxu0 %v16083_v7  ;;  %v15959_v45 = vld [vmem:[#allocation8 + $0x84c] ss:$144 sps:$4 sm:$0xff]  }
 0x3f8   :  { %11481 = vmatprep.subr.bf16.mxu0 %v16091_v19  ;;  %v15974_v7 = vld [vmem:[#allocation8 + $0xdec] ss:$144 sps:$4 sm:$0xff]   ;;  %v15975_v19 = vld [vmem:[#allocation8 + $0xf08] ss:$144 sps:$4 sm:$0xff]  }
 0x3fa   :  { %5774 = vmatpush1.bf16.msra.mxu1 %v15939_v53  ;;  %v15960_v53 = vld [vmem:[#allocation8 + $0x968] ss:$144 sps:$4 sm:$0xff]  }
 0x3fb   :  { %5775 = vmatprep.subr.bf16.mxu1 %v15944_v56  ;;  %11482 = vmatpush1.bf16.msra.mxu0 %v16089_v34  ;;  %v15965_v56 = vld [vmem:[#allocation8 + $0xa8c] ss:$144 sps:$4 sm:$0xff]  }
 0x3fc   :  { %11492 = vmatprep.subr.bf16.mxu0 %v16097_v39  ;;  %v15980_v34 = vld [vmem:[#allocation8 + $0x102c] ss:$144 sps:$4 sm:$0xff]   ;;  %v15981_v39 = vld [vmem:[#allocation8 + $0x1148] ss:$144 sps:$4 sm:$0xff]  }
 0x3fe   :  { %5776 = vmatpush1.bf16.msra.mxu1 %v15942_v60  ;;  %v15966_v60 = vld [vmem:[#allocation8 + $0xba8] ss:$144 sps:$4 sm:$0xff]  }
 0x3ff   :  { %5777 = vmatprep.subr.bf16.mxu1 %v15947_v62  ;;  %v15971_v62 = vld [vmem:[#allocation8 + $0xccc] ss:$144 sps:$4 sm:$0xff]  }
 0x402   :  { %5778 = vmatpush1.bf16.msra.mxu1 %v15945_v10  ;;  %v15972_v10 = vld [vmem:[#allocation8 + $0xde8] ss:$144 sps:$4 sm:$0xff]  }
 0x403   :  { %5779 = vmatprep.subr.bf16.mxu1 %v15950_v13  ;;  %v15977_v13 = vld [vmem:[#allocation8 + $0xf0c] ss:$144 sps:$4 sm:$0xff]  }
 0x406   :  { %5780 = vmatpush1.bf16.msra.mxu1 %v15948_v35  ;;  %v15978_v35 = vld [vmem:[#allocation8 + $0x1028] ss:$144 sps:$4 sm:$0xff]  }
 0x407   :  { %5781 = vmatprep.subr.bf16.mxu1 %v15953_v37  ;;  %v15983_v37 = vld [vmem:[#allocation8 + $0x114c] ss:$144 sps:$4 sm:$0xff]  }
 0x40a   :  { %5782 = vmatpush1.bf16.msra.mxu1 %v15951_v41  ;;  %v15986_v41 = vld [vmem:[#allocation8 + $0x126c] ss:$144 sps:$4 sm:$0xff]  }
 0x40b   :  { %5783 = vmatprep.subr.bf16.mxu1 %v15956_v38 }
 0x40e   :  { %5784 = vmatpush1.bf16.msra.mxu1 %v15954_v43  ;;  %v1022_v43 = vld [vmem:[#allocation10 + $0x20] sm:$0xf] }
 0x40f   :  { %5785 = vmatprep.subr.bf16.mxu1 %v15959_v45 }
 0x412   :  { %5786 = vmatpush1.bf16.msra.mxu1 %v15957_v47 }
 0x413   :  { %5787 = vmatprep.subr.bf16.mxu1 %v15962_v49  ;;  %v15984_v49 = vld [vmem:[#allocation8 + $0x1268] ss:$144 sps:$4 sm:$0xff]  }
 0x416   :  { %5788 = vmatpush1.bf16.msra.mxu1 %v15960_v53  ;;  %v1087_v53 = vrot.slane %v18068_v40, %v18075_v46 }
 0x417   :  { %5789 = vmatprep.subr.bf16.mxu1 %v15965_v56 }
 0x41a   :  { %5790 = vmatpush1.bf16.msra.mxu1 %v15963_v57  ;;  %v1159_v57 = vrot.slane %v1022_v43, %v17903_v3 }
 0x41b   :  { %5791 = vmatprep.subr.bf16.mxu1 %v15968_v59  ;;  %v15989_v59 = vld [vmem:[#allocation8 + $0x138c] ss:$144 sps:$4 sm:$0xff]  }
 0x41e   :  { %5792 = vmatpush1.bf16.msra.mxu1 %v15966_v60  ;;  %v1091_v60 = vrot.slane %v18068_v40, %v18078_v48 }
 0x41f   :  { %5793 = vmatprep.subr.bf16.mxu1 %v15971_v62  ;;  %v1163_v62 = vrot.slane %v1022_v43, %v17906_v5 }
 0x422   :  { %5794 = vmatpush1.bf16.msra.mxu1 %v15969_v4 }
 0x423   :  { %5795 = vmatprep.subr.bf16.mxu1 %v15974_v7  ;;  %v15987_v7 = vld [vmem:[#allocation8 + $0x1388] ss:$144 sps:$4 sm:$0xff]  }
 0x426   :  { %5796 = vmatpush1.bf16.msra.mxu1 %v15972_v10  ;;  %v15990_v10 = vld [vmem:[#allocation8 + $0x14ac] ss:$144 sps:$4 sm:$0x3f]  }
 0x427   :  { %5797 = vmatprep.subr.bf16.mxu1 %v15977_v13 }
 0x42a   :  { %5798 = vmatpush1.bf16.msra.mxu1 %v15975_v19 }
 0x42b   :  { %5799 = vmatprep.subr.bf16.mxu1 %v15980_v34 }
 0x42e   :  { %5800 = vmatpush1.bf16.msra.mxu1 %v15978_v35  ;;  %v15992_v35 = vld [vmem:[#allocation8 + $0x14a8] ss:$144 sps:$4 sm:$0x3f]  }
 0x42f   :  { %5801 = vmatprep.subr.bf16.mxu1 %v15983_v37 }
 0x430   :  { %v5354_v38 = vpop.f32.mrb[28].mxu1 }
 0x431   :  { %v5356_v45 = vpop.f32.mrb[29].mxu1  ;;  %v18152_v13 = vadd.f32 %v5354_v38, %v1087_v53  ;;  %v4676_v38 = vsel %vm4596_vm2, %v15992_v35, 0  ;;  %v15993_v53 = vld [vmem:[#allocation8 + $0x78] ss:$144 sps:$4 sm:$0xff]   ;;  %v16028_v35 = vld [vmem:[#allocation8 + $0x73c] ss:$144 sps:$4 sm:$0xff]  }
 0x432   :  { %v5358_v47 = vpop.f32.mrb[30].mxu1  ;;  %5802 = vmatpush1.bf16.msra.mxu1 %v15981_v39  ;;  %v18156_v37 = vadd.f32 %v5356_v45, %v1091_v60  ;;  %v15998_v45 = vld [vmem:[#allocation8 + $0x19c] ss:$144 sps:$4 sm:$0xff]  }
 0x433   :  { %v5359_v56 = vpop.f32.mrb[31].mxu1  ;;  %5812 = vmatprep.subr.bf16.mxu1 %v15986_v41  ;;  %v16010_v60 = vld [vmem:[#allocation8 + $0x3dc] ss:$144 sps:$4 sm:$0xff]  }
 0x434   :  { %v15996_v56 = vld [vmem:[#allocation8 + $0x198] ss:$144 sps:$4 sm:$0xff]  }
 0x435   :  { %5804 = vmatmul.mubr.bf16.vlgmr.msra.gmra.mrb[40].mxu1 %v17916_v22 }
 0x436   :  { %5813 = vmatpush1.bf16.msra.mxu1 %v15984_v49  ;;  %v6092_v4 = vpop.f32.mrb[24].mxu0  ;;  %5844 = vmatprep.mubr.bf16.mxu1 %v17705_v63  ;;  %v15995_v49 = vld [vmem:[#allocation8 + $0x7c] ss:$144 sps:$4 sm:$0xff]  }
 0x437   :  { %v18154_v19 = vadd.f32 %v6092_v4, %v1159_v57  ;;  %v6094_v34 = vpop.f32.mrb[25].mxu0  ;;  %5814 = vmatprep.subr.bf16.mxu1 %v15989_v59  ;;  %v16004_v57 = vld [vmem:[#allocation8 + $0x2bc] ss:$144 sps:$4 sm:$0xff]   ;;  %v16002_v59 = vld [vmem:[#allocation8 + $0x2b8] ss:$144 sps:$4 sm:$0xff]  }
 0x438   :  { %v18158_v40 = vadd.f32 %v6094_v34, %v1163_v62  ;;  %v6096_v39 = vpop.f32.mrb[26].mxu0  ;;  %v16008_v62 = vld [vmem:[#allocation8 + $0x3d8] ss:$144 sps:$4 sm:$0xff]   ;;  %v16016_v4 = vld [vmem:[#allocation8 + $0x4fc] ss:$144 sps:$4 sm:$0xff]  }
 0x439   :  { %v6097_v43 = vpop.f32.mrb[27].mxu0  ;;  %v16020_v34 = vld [vmem:[#allocation8 + $0x618] ss:$144 sps:$4 sm:$0xff]  }
 0x43a   :  { %5815 = vmatpush1.bf16.msra.mxu1 %v15987_v7  ;;  %v16014_v7 = vld [vmem:[#allocation8 + $0x4f8] ss:$144 sps:$4 sm:$0xff]   ;;  %v16034_v43 = vld [vmem:[#allocation8 + $0x85c] ss:$144 sps:$4 sm:$0xff]  }
 0x43b   :  { %13803 = vmatprep.subr.msk.bf16.mxu1 %vm4596_vm2, %v15990_v10  ;;  %v16022_v10 = vld [vmem:[#allocation8 + $0x61c] ss:$144 sps:$4 sm:$0xff]   ;;  %v16026_v39 = vld [vmem:[#allocation8 + $0x738] ss:$144 sps:$4 sm:$0xff]  }
 0x43e   :  { %5817 = vmatpush1.bf16.msra.mxu1 %v4676_v38  ;;  %v16032_v38 = vld [vmem:[#allocation8 + $0x858] ss:$144 sps:$4 sm:$0xff]  }
 0x43f   :  { %5935 = vmatprep.subr.bf16.mxu1 %v15995_v49  ;;  %v16040_v49 = vld [vmem:[#allocation8 + $0x97c] ss:$144 sps:$4 sm:$0xff]  }
 0x441   :  { %13804 = vmatmul.mubr.msk.bf16.vlgmr.msra.gmra.mrb[40].mxu1 %vm4592_vm3, %v17921_v29 }
 0x442   :  { %5936 = vmatpush1.bf16.msra.mxu1 %v15993_v53  ;;  %5967 = vmatprep.mubr.bf16.mxu1 %v17914_v20  ;;  %v16038_v53 = vld [vmem:[#allocation8 + $0x978] ss:$144 sps:$4 sm:$0xff]  }
 0x443   :  { %5937 = vmatprep.subr.bf16.mxu1 %v15998_v45  ;;  %v16046_v45 = vld [vmem:[#allocation8 + $0xa9c] ss:$144 sps:$4 sm:$0xff]  }
 0x446   :  { %5938 = vmatpush1.bf16.msra.mxu1 %v15996_v56  ;;  %v16044_v56 = vld [vmem:[#allocation8 + $0xa98] ss:$144 sps:$4 sm:$0xff]  }
 0x447   :  { %5939 = vmatprep.subr.bf16.mxu1 %v16004_v57  ;;  %v16052_v57 = vld [vmem:[#allocation8 + $0xbbc] ss:$144 sps:$4 sm:$0xff]  }
 0x44a   :  { %5940 = vmatpush1.bf16.msra.mxu1 %v16002_v59  ;;  %v16050_v59 = vld [vmem:[#allocation8 + $0xbb8] ss:$144 sps:$4 sm:$0xff]  }
 0x44b   :  { %5941 = vmatprep.subr.bf16.mxu1 %v16010_v60  ;;  %v16058_v60 = vld [vmem:[#allocation8 + $0xcdc] ss:$144 sps:$4 sm:$0xff]  }
 0x44e   :  { %5942 = vmatpush1.bf16.msra.mxu1 %v16008_v62  ;;  %v16056_v62 = vld [vmem:[#allocation8 + $0xcd8] ss:$144 sps:$4 sm:$0xff]  }
 0x44f   :  { %5943 = vmatprep.subr.bf16.mxu1 %v16016_v4  ;;  %v16064_v4 = vld [vmem:[#allocation8 + $0xdfc] ss:$144 sps:$4 sm:$0xff]  }
 0x452   :  { %5944 = vmatpush1.bf16.msra.mxu1 %v16014_v7  ;;  %v16062_v7 = vld [vmem:[#allocation8 + $0xdf8] ss:$144 sps:$4 sm:$0xff]  }
 0x453   :  { %5945 = vmatprep.subr.bf16.mxu1 %v16022_v10  ;;  %v16070_v10 = vld [vmem:[#allocation8 + $0xf1c] ss:$144 sps:$4 sm:$0xff]  }
 0x456   :  { %5946 = vmatpush1.bf16.msra.mxu1 %v16020_v34  ;;  %v16068_v34 = vld [vmem:[#allocation8 + $0xf18] ss:$144 sps:$4 sm:$0xff]  }
 0x457   :  { %5947 = vmatprep.subr.bf16.mxu1 %v16028_v35  ;;  %v16076_v35 = vld [vmem:[#allocation8 + $0x103c] ss:$144 sps:$4 sm:$0xff]  }
 0x45a   :  { %5948 = vmatpush1.bf16.msra.mxu1 %v16026_v39  ;;  %v16074_v39 = vld [vmem:[#allocation8 + $0x1038] ss:$144 sps:$4 sm:$0xff]  }
 0x45b   :  { %5949 = vmatprep.subr.bf16.mxu1 %v16034_v43  ;;  %v16082_v43 = vld [vmem:[#allocation8 + $0x115c] ss:$144 sps:$4 sm:$0xff]  }
 0x45e   :  { %5950 = vmatpush1.bf16.msra.mxu1 %v16032_v38  ;;  %v18169_v38 = vld [vmem:[#allocation10] sm:$0xff] }
 0x45f   :  { %5951 = vmatprep.subr.bf16.mxu1 %v16040_v49  ;;  %v1031_v49 = vrot.slane %v18169_v38, %v17903_v3  ;;  %v1051_v16 = vrot.slane %v18169_v38, %v18029_v55 }
 0x462   :  { %5952 = vmatpush1.bf16.msra.mxu1 %v16038_v53  ;;  %v18173_v53 = vld [vmem:[#allocation10 + $0x10] sm:$0xff] }
 0x463   :  { %5953 = vmatprep.subr.bf16.mxu1 %v16046_v45  ;;  %v1103_v45 = vrot.slane %v18173_v53, %v17911_v11  ;;  %v1123_v17 = vrot.slane %v18173_v53, %v18078_v48 }
 0x466   :  { %5954 = vmatpush1.bf16.msra.mxu1 %v16044_v56  ;;  %v1035_v56 = vrot.slane %v18169_v38, %v17906_v5 }
 0x467   :  { %5955 = vmatprep.subr.bf16.mxu1 %v16052_v57  ;;  %v1107_v57 = vrot.slane %v18173_v53, %v18023_v51 }
 0x46a   :  { %5956 = vmatpush1.bf16.msra.mxu1 %v16050_v59  ;;  %v16080_v59 = vld [vmem:[#allocation8 + $0x1158] ss:$144 sps:$4 sm:$0xff]  }
 0x46b   :  { %5957 = vmatprep.subr.bf16.mxu1 %v16058_v60  ;;  %v16088_v60 = vld [vmem:[#allocation8 + $0x127c] ss:$144 sps:$4 sm:$0xff]  }
 0x46e   :  { %5958 = vmatpush1.bf16.msra.mxu1 %v16056_v62 }
 0x46f   :  { %5959 = vmatprep.subr.bf16.mxu1 %v16064_v4  ;;  %v14854_v4 = vadd.f32 %v17964_v42, %v1031_v49  ;;  %v6202_v42 = vmax.f32 %v6184_v23, 0.0  ;;  %v16092_v49 = vld [vmem:[#allocation8 + $0x1398] ss:$144 sps:$4 sm:$0xff]  }
 0x470   :  { %v16109_v23 = vld [vmem:[#allocation11 + $0x364] ss:$24 sps:$4 sm:$0xff]  }
 0x472   :  { %5960 = vmatpush1.bf16.msra.mxu1 %v16062_v7 }
 0x473   :  { %5961 = vmatprep.subr.bf16.mxu1 %v16070_v10 }
 0x476   :  { %5962 = vmatpush1.bf16.msra.mxu1 %v16068_v34  ;;  %v14855_v34 = vadd.f32 %v17967_v44, %v1035_v56  ;;  %v16100_v44 = vld [vmem:[#allocation8 + $0x14b8] ss:$144 sps:$4 sm:$0x3f]  }
 0x477   :  { %5963 = vmatprep.subr.bf16.mxu1 %v16076_v35 }
 0x47a   :  { %5964 = vmatpush1.bf16.msra.mxu1 %v16074_v39  ;;  %v16094_v39 = vld [vmem:[#allocation8 + $0x139c] ss:$144 sps:$4 sm:$0xff]  }
 0x47b   :  { %5965 = vmatprep.subr.bf16.mxu1 %v16082_v43 }
 0x47c   :  { %v5518_v62 = vpop.f32.mrb[32].mxu1 }
 0x47d   :  { %v14874_v7 = vadd.f32 %v5518_v62, %v1103_v45  ;;  %v5520_v10 = vpop.f32.mrb[33].mxu1  ;;  %v16110_v62 = vld [vmem:[#allocation8 + $0x1a8] ss:$144 sps:$4 sm:$0xff]  }
 0x47e   :  { %v14875_v35 = vadd.f32 %v5520_v10, %v1107_v57  ;;  %v5522_v1 = vpop.f32.mrb[34].mxu1  ;;  %5966 = vmatpush1.bf16.msra.mxu1 %v16080_v59  ;;  %v18192_v57 = vpack.c.bf16 %v6202_v42, %v6202_v42  ;;  %v16107_v59 = vld [vmem:[#allocation11 + $0x360] ss:$24 sps:$4 sm:$0xff]   ;;  %v16121_v10 = vld [vmem:[#allocation11 + $0x3c4] ss:$24 sps:$4 sm:$0xff]  }
 0x47f   :  { %v6181_v41 = vmax.f32 %v14854_v4, %v14874_v7  ;;  %v5523_v47 = vpop.f32.mrb[35].mxu1  ;;  %5976 = vmatprep.subr.bf16.mxu1 %v16088_v60  ;;  %v16098_v1 = vld [vmem:[#allocation8 + $0x14bc] ss:$144 sps:$4 sm:$0x3f]   ;;  %v16115_v60 = vld [vmem:[#allocation11 + $0x394] ss:$24 sps:$4 sm:$0xff]  }
 0x480   :  { %v6182_v50 = vmax.f32 %v14855_v34, %v14875_v35  ;;  %v16095_v47 = vld [vmem:[#allocation11 + $0x300] ss:$24 sps:$4 sm:$0xff]   ;;  %v16113_v7 = vld [vmem:[#allocation11 + $0x390] ss:$24 sps:$4 sm:$0xff]   ;;  %v16116_v34 = vld [vmem:[#allocation8 + $0x2c8] ss:$144 sps:$4 sm:$0xff]  }
 0x481   :  { %v6199_v33 = vmax.f32 %v6181_v41, 0.0  ;;  %5968 = vmatmul.mubr.bf16.vlgmr.msra.gmra.mrb[44].mxu1 %v17916_v22  ;;  %v16103_v41 = vld [vmem:[#allocation11 + $0x334] ss:$24 sps:$4 sm:$0xff]   ;;  %v16118_v4 = vld [vmem:[#allocation8 + $0x2cc] ss:$144 sps:$4 sm:$0xff]  }
 0x482   :  { %v6200_v43 = vmax.f32 %v6182_v50, 0.0  ;;  %5977 = vmatpush1.bf16.msra.mxu1 %v16086_v18  ;;  %6008 = vmatprep.mubr.bf16.mxu1 %v17705_v63  ;;  %v4688_v18 = vsel %vm4596_vm2, %v16100_v44, 0  ;;  %v16104_v50 = vld [vmem:[#allocation8 + $0x88] ss:$144 sps:$4 sm:$0xff]   ;;  %v16124_v35 = vld [vmem:[#allocation8 + $0x3ec] ss:$144 sps:$4 sm:$0xff]  }
 0x483   :  { %5978 = vmatprep.subr.bf16.mxu1 %v16094_v39  ;;  %v18190_v56 = vpack.c.bf16 %v6199_v33, %v6199_v33  ;;  %v16112_v33 = vld [vmem:[#allocation8 + $0x1ac] ss:$144 sps:$4 sm:$0xff]   ;;  %v16127_v42 = vld [vmem:[#allocation11 + $0x3f4] ss:$24 sps:$4 sm:$0xff]  }
 0x484   :  { %v18188_v45 = vpack.c.bf16 %v6200_v43, %v6200_v43  ;;  %v16119_v39 = vld [vmem:[#allocation11 + $0x3c0] ss:$24 sps:$4 sm:$0xff]   ;;  %v16122_v43 = vld [vmem:[#allocation8 + $0x3e8] ss:$144 sps:$4 sm:$0xff]  }
 0x485   :  { %v16128_v44 = vld [vmem:[#allocation8 + $0x508] ss:$144 sps:$4 sm:$0xff]  }
 0x486   :  { %5979 = vmatpush1.bf16.msra.mxu1 %v16092_v49  ;;  %11483 = vmatprep.mubr.bf16.mxu0 %v18188_v45  ;;  %v16130_v49 = vld [vmem:[#allocation8 + $0x50c] ss:$144 sps:$4 sm:$0xff]  }
 0x487   :  { %11484 = vmatmul.mubr.bf16.vlgmr.msra.gmra.mrb[28].mxu0 %v18190_v56  ;;  %13807 = vmatprep.subr.msk.bf16.mxu1 %vm4596_vm2, %v16098_v1  ;;  %v16133_v1 = vld [vmem:[#allocation11 + $0x424] ss:$24 sps:$4 sm:$0xff]  }
 0x488   :  { %11493 = vmatpush1.bf16.msra.mxu0 %v16095_v47  ;;  %11524 = vmatprep.mubr.bf16.mxu0 %v18192_v57  ;;  %v16136_v47 = vld [vmem:[#allocation8 + $0x62c] ss:$144 sps:$4 sm:$0xff]  }
 0x489   :  { %11494 = vmatprep.subr.bf16.mxu0 %v16103_v41  ;;  %v16131_v41 = vld [vmem:[#allocation11 + $0x420] ss:$24 sps:$4 sm:$0xff]  }
 0x48a   :  { %5981 = vmatpush1.bf16.msra.mxu1 %v4688_v18  ;;  %v16139_v18 = vld [vmem:[#allocation11 + $0x454] ss:$24 sps:$4 sm:$0xff]  }
 0x48b   :  { %6099 = vmatprep.subr.bf16.mxu1 %v16106_v24  ;;  %v16134_v24 = vld [vmem:[#allocation8 + $0x628] ss:$144 sps:$4 sm:$0xff]  }
 0x48c   :  { %11495 = vmatpush1.bf16.msra.mxu0 %v16101_v26  ;;  %v16142_v26 = vld [vmem:[#allocation8 + $0x74c] ss:$144 sps:$4 sm:$0xff]  }
 0x48d   :  { %13808 = vmatmul.mubr.msk.bf16.vlgmr.msra.gmra.mrb[44].mxu1 %vm4592_vm3, %v17921_v29  ;;  %11496 = vmatprep.subr.bf16.mxu0 %v16109_v23  ;;  %v16137_v23 = vld [vmem:[#allocation11 + $0x450] ss:$24 sps:$4 sm:$0xff]  }
 0x48e   :  { %6100 = vmatpush1.bf16.msra.mxu1 %v16104_v50  ;;  %6131 = vmatprep.mubr.bf16.mxu1 %v17914_v20  ;;  %v16125_v20 = vld [vmem:[#allocation11 + $0x3f0] ss:$24 sps:$4 sm:$0xff]   ;;  %v16145_v50 = vld [vmem:[#allocation11 + $0x484] ss:$24 sps:$4 sm:$0xff]  }
 0x48f   :  { %6101 = vmatprep.subr.bf16.mxu1 %v16112_v33  ;;  %v16140_v33 = vld [vmem:[#allocation8 + $0x748] ss:$144 sps:$4 sm:$0xff]  }
 0x490   :  { %11497 = vmatpush1.bf16.msra.mxu0 %v16107_v59  ;;  %v16148_v59 = vld [vmem:[#allocation8 + $0x86c] ss:$144 sps:$4 sm:$0xff]  }
 0x491   :  { %11498 = vmatprep.subr.bf16.mxu0 %v16115_v60  ;;  %v16143_v60 = vld [vmem:[#allocation11 + $0x480] ss:$24 sps:$4 sm:$0xff]  }
 0x492   :  { %6102 = vmatpush1.bf16.msra.mxu1 %v16110_v62  ;;  %v16151_v62 = vld [vmem:[#allocation11 + $0x4b4] ss:$24 sps:$4 sm:$0xff]  }
 0x493   :  { %6103 = vmatprep.subr.bf16.mxu1 %v16118_v4  ;;  %v16146_v4 = vld [vmem:[#allocation8 + $0x868] ss:$144 sps:$4 sm:$0xff]  }
 0x494   :  { %11499 = vmatpush1.bf16.msra.mxu0 %v16113_v7  ;;  %v16154_v7 = vld [vmem:[#allocation8 + $0x98c] ss:$144 sps:$4 sm:$0xff]  }
 0x495   :  { %11500 = vmatprep.subr.bf16.mxu0 %v16121_v10  ;;  %v16149_v10 = vld [vmem:[#allocation11 + $0x4b0] ss:$24 sps:$4 sm:$0xff]  }
 0x496   :  { %6104 = vmatpush1.bf16.msra.mxu1 %v16116_v34  ;;  %v16157_v34 = vld [vmem:[#allocation11 + $0x4e4] ss:$24 sps:$4 sm:$0xff]  }
 0x497   :  { %6105 = vmatprep.subr.bf16.mxu1 %v16124_v35  ;;  %v16152_v35 = vld [vmem:[#allocation8 + $0x988] ss:$144 sps:$4 sm:$0xff]  }
 0x498   :  { %11501 = vmatpush1.bf16.msra.mxu0 %v16119_v39  ;;  %v16160_v39 = vld [vmem:[#allocation8 + $0xaac] ss:$144 sps:$4 sm:$0xff]  }
 0x499   :  { %11502 = vmatprep.subr.bf16.mxu0 %v16127_v42  ;;  %v16155_v42 = vld [vmem:[#allocation11 + $0x4e0] ss:$24 sps:$4 sm:$0xff]  }
 0x49a   :  { %6106 = vmatpush1.bf16.msra.mxu1 %v16122_v43  ;;  %v16163_v43 = vld [vmem:[#allocation11 + $0x514] ss:$24 sps:$4 sm:$0xff]  }
 0x49b   :  { %6107 = vmatprep.subr.bf16.mxu1 %v16130_v49  ;;  %v16158_v49 = vld [vmem:[#allocation8 + $0xaa8] ss:$144 sps:$4 sm:$0xff]  }
 0x49c   :  { %11503 = vmatpush1.bf16.msra.mxu0 %v16125_v20  ;;  %v16166_v20 = vld [vmem:[#allocation8 + $0xbcc] ss:$144 sps:$4 sm:$0xff]  }
 0x49d   :  { %11504 = vmatprep.subr.bf16.mxu0 %v16133_v1  ;;  %v16161_v1 = vld [vmem:[#allocation11 + $0x510] ss:$24 sps:$4 sm:$0xff]  }
 0x49e   :  { %6108 = vmatpush1.bf16.msra.mxu1 %v16128_v44  ;;  %v16169_v44 = vld [vmem:[#allocation11 + $0x544] ss:$24 sps:$4 sm:$0xff]  }
 0x49f   :  { %6109 = vmatprep.subr.bf16.mxu1 %v16136_v47  ;;  %v16164_v47 = vld [vmem:[#allocation8 + $0xbc8] ss:$144 sps:$4 sm:$0xff]  }
 0x4a0   :  { %11505 = vmatpush1.bf16.msra.mxu0 %v16131_v41  ;;  %v16172_v41 = vld [vmem:[#allocation8 + $0xcec] ss:$144 sps:$4 sm:$0xff]  }
 0x4a1   :  { %11506 = vmatprep.subr.bf16.mxu0 %v16139_v18  ;;  %v16167_v18 = vld [vmem:[#allocation11 + $0x540] ss:$24 sps:$4 sm:$0xff]  }
 0x4a2   :  { %6110 = vmatpush1.bf16.msra.mxu1 %v16134_v24  ;;  %v16175_v24 = vld [vmem:[#allocation11 + $0x574] ss:$24 sps:$4 sm:$0xff]  }
 0x4a3   :  { %6111 = vmatprep.subr.bf16.mxu1 %v16142_v26  ;;  %v16170_v26 = vld [vmem:[#allocation8 + $0xce8] ss:$144 sps:$4 sm:$0xff]  }
 0x4a4   :  { %11507 = vmatpush1.bf16.msra.mxu0 %v16137_v23  ;;  %v16178_v23 = vld [vmem:[#allocation8 + $0xe0c] ss:$144 sps:$4 sm:$0xff]  }
 0x4a5   :  { %11508 = vmatprep.subr.bf16.mxu0 %v16145_v50  ;;  %v16173_v50 = vld [vmem:[#allocation11 + $0x570] ss:$24 sps:$4 sm:$0xff]  }
 0x4a6   :  { %6112 = vmatpush1.bf16.msra.mxu1 %v16140_v33  ;;  %v16181_v33 = vld [vmem:[#allocation11 + $0x5a4] ss:$24 sps:$4 sm:$0xff]  }
 0x4a7   :  { %6113 = vmatprep.subr.bf16.mxu1 %v16148_v59  ;;  %v16176_v59 = vld [vmem:[#allocation8 + $0xe08] ss:$144 sps:$4 sm:$0xff]  }
 0x4a8   :  { %11509 = vmatpush1.bf16.msra.mxu0 %v16143_v60  ;;  %v16184_v60 = vld [vmem:[#allocation8 + $0xf2c] ss:$144 sps:$4 sm:$0xff]  }
 0x4a9   :  { %11510 = vmatprep.subr.bf16.mxu0 %v16151_v62  ;;  %v16179_v62 = vld [vmem:[#allocation11 + $0x5a0] ss:$24 sps:$4 sm:$0xff]  }
 0x4aa   :  { %6114 = vmatpush1.bf16.msra.mxu1 %v16146_v4  ;;  %v16187_v4 = vld [vmem:[#allocation11 + $0x5d4] ss:$24 sps:$4 sm:$0xff]  }
 0x4ab   :  { %6115 = vmatprep.subr.bf16.mxu1 %v16154_v7  ;;  %v16182_v7 = vld [vmem:[#allocation8 + $0xf28] ss:$144 sps:$4 sm:$0xff]  }
 0x4ac   :  { %11511 = vmatpush1.bf16.msra.mxu0 %v16149_v10  ;;  %v16190_v10 = vld [vmem:[#allocation8 + $0x104c] ss:$144 sps:$4 sm:$0xff]  }
 0x4ad   :  { %11512 = vmatprep.subr.bf16.mxu0 %v16157_v34  ;;  %v16185_v34 = vld [vmem:[#allocation11 + $0x5d0] ss:$24 sps:$4 sm:$0xff]  }
 0x4ae   :  { %6116 = vmatpush1.bf16.msra.mxu1 %v16152_v35  ;;  %v6201_v35 = vmax.f32 %v6183_v28, 0.0  ;;  %v16194_v28 = vld [vmem:[#allocation8 + $0x1168] ss:$144 sps:$4 sm:$0xff]  }
 0x4af   :  { %6117 = vmatprep.subr.bf16.mxu1 %v16160_v39  ;;  %v16193_v39 = vld [vmem:[#allocation11 + $0x604] ss:$24 sps:$4 sm:$0xff]  }
 0x4b0   :  { %11513 = vmatpush1.bf16.msra.mxu0 %v16155_v42  ;;  %v16188_v42 = vld [vmem:[#allocation8 + $0x1048] ss:$144 sps:$4 sm:$0xff]  }
 0x4b1   :  { %11514 = vmatprep.subr.bf16.mxu0 %v16163_v43  ;;  %v16196_v43 = vld [vmem:[#allocation8 + $0x116c] ss:$144 sps:$4 sm:$0xff]  }
 0x4b2   :  { %6118 = vmatpush1.bf16.msra.mxu1 %v16158_v49  ;;  %v16191_v49 = vld [vmem:[#allocation11 + $0x600] ss:$24 sps:$4 sm:$0xff]  }
 0x4b3   :  { %6119 = vmatprep.subr.bf16.mxu1 %v16166_v20  ;;  %v1047_v20 = vrot.slane %v18169_v38, %v18026_v54  ;;  %v16205_v38 = vld [vmem:[#allocation11 + $0x664] ss:$24 sps:$4 sm:$0xff]  }
 0x4b4   :  { %11515 = vmatpush1.bf16.msra.mxu0 %v16161_v1  ;;  %v18207_v1 = vpack.c.bf16 %v6201_v35, %v6201_v35 }
 0x4b5   :  { %11516 = vmatprep.subr.bf16.mxu0 %v16169_v44  ;;  %v1119_v44 = vrot.slane %v18173_v53, %v18075_v46 }
 0x4b6   :  { %6120 = vmatpush1.bf16.msra.mxu1 %v16164_v47  ;;  %v16199_v47 = vld [vmem:[#allocation11 + $0x634] ss:$24 sps:$4 sm:$0xff]  }
 0x4b7   :  { %6121 = vmatprep.subr.bf16.mxu1 %v16172_v41  ;;  %v16202_v41 = vld [vmem:[#allocation8 + $0x128c] ss:$144 sps:$4 sm:$0xff]  }
 0x4b8   :  { %11517 = vmatpush1.bf16.msra.mxu0 %v16167_v18 }
 0x4b9   :  { %11518 = vmatprep.subr.bf16.mxu0 %v16175_v24  ;;  %v16197_v24 = vld [vmem:[#allocation11 + $0x630] ss:$24 sps:$4 sm:$0xff]  }
 0x4ba   :  { %6122 = vmatpush1.bf16.msra.mxu1 %v16170_v26  ;;  %v18217_v26 = vadd.f32 %v18007_v14, %v1047_v20  ;;  %v16203_v14 = vld [vmem:[#allocation11 + $0x660] ss:$24 sps:$4 sm:$0xff]   ;;  %v16217_v20 = vld [vmem:[#allocation11 + $0x6c4] ss:$24 sps:$4 sm:$0xff]  }
 0x4bb   :  { %6123 = vmatprep.subr.bf16.mxu1 %v16178_v23 }
 0x4bc   :  { %11519 = vmatpush1.bf16.msra.mxu0 %v16173_v50 }
 0x4bd   :  { %11520 = vmatprep.subr.bf16.mxu0 %v16181_v33  ;;  %v14859_v33 = vadd.f32 %v18010_v15, %v1051_v16  ;;  %v16206_v15 = vld [vmem:[#allocation8 + $0x13a8] ss:$144 sps:$4 sm:$0xff]   ;;  %v16218_v16 = vld [vmem:[#allocation11 + $0x8] ss:$24 sps:$4 sm:$0xff]  }
 0x4be   :  { %6124 = vmatpush1.bf16.msra.mxu1 %v16176_v59 }
 0x4bf   :  { %6125 = vmatprep.subr.bf16.mxu1 %v16184_v60  ;;  %v16200_v60 = vld [vmem:[#allocation8 + $0x1288] ss:$144 sps:$4 sm:$0xff]  }
 0x4c0   :  { %11521 = vmatpush1.bf16.msra.mxu0 %v16179_v62 }
 0x4c1   :  { %11522 = vmatprep.subr.bf16.mxu0 %v16187_v4 }
 0x4c2   :  { %6126 = vmatpush1.bf16.msra.mxu1 %v16182_v7  ;;  %v16208_v7 = vld [vmem:[#allocation8 + $0x13ac] ss:$144 sps:$4 sm:$0xff]  }
 0x4c3   :  { %6127 = vmatprep.subr.bf16.mxu1 %v16190_v10 }
 0x4c4   :  { %11523 = vmatpush1.bf16.msra.mxu0 %v16185_v34  ;;  %v16211_v34 = vld [vmem:[#allocation11 + $0x694] ss:$24 sps:$4 sm:$0xff]  }
 0x4c5   :  { %11533 = vmatprep.subr.bf16.mxu0 %v16193_v39  ;;  %v16212_v39 = vld [vmem:[#allocation8 + $0x14cc] ss:$144 sps:$4 sm:$0x3f]  }
 0x4c6   :  { %6128 = vmatpush1.bf16.msra.mxu1 %v16188_v42  ;;  %v16214_v42 = vld [vmem:[#allocation8 + $0x14c8] ss:$144 sps:$4 sm:$0x3f]  }
 0x4c7   :  { %11525 = vmatmul.mubr.bf16.vlgmr.msra.gmra.mrb[28].mxu0 %v18207_v1  ;;  %6129 = vmatprep.subr.bf16.mxu1 %v16196_v43 }
 0x4c8   :  { %11534 = vmatpush1.bf16.msra.mxu0 %v16191_v49  ;;  %v5682_v18 = vpop.f32.mrb[36].mxu1  ;;  %v16209_v49 = vld [vmem:[#allocation11 + $0x690] ss:$24 sps:$4 sm:$0xff]  }
 0x4c9   :  { %v18219_v23 = vadd.f32 %v5682_v18, %v1119_v44  ;;  %v5684_v50 = vpop.f32.mrb[37].mxu1  ;;  %11535 = vmatprep.subr.bf16.mxu0 %v16199_v47  ;;  %v16220_v44 = vld [vmem:[#allocation11 + $0xc] ss:$24 sps:$4 sm:$0xff]   ;;  %v16215_v47 = vld [vmem:[#allocation11 + $0x6c0] ss:$24 sps:$4 sm:$0xff]  }
 0x4ca   :  { %v14879_v59 = vadd.f32 %v5684_v50, %v1123_v17  ;;  %v5686_v53 = vpop.f32.mrb[38].mxu1  ;;  %6130 = vmatpush1.bf16.msra.mxu1 %v16194_v28  ;;  %v16226_v17 = vld [vmem:[#allocation11 + $0x3c] ss:$24 sps:$4 sm:$0xff]   ;;  %v16221_v28 = vld [vmem:[#allocation11 + $0x6f0] ss:$24 sps:$4 sm:$0xff]  }
 0x4cb   :  { %v6185_v62 = vmax.f32 %v18217_v26, %v18219_v23  ;;  %v5687_v4 = vpop.f32.mrb[39].mxu1  ;;  %6140 = vmatprep.subr.bf16.mxu1 %v16202_v41  ;;  %v16229_v41 = vld [vmem:[#allocation11 + $0x724] ss:$24 sps:$4 sm:$0xff]   ;;  %v16224_v18 = vld [vmem:[#allocation11 + $0x38] ss:$24 sps:$4 sm:$0xff]  }
 0x4cc   :  { %v6186_v10 = vmax.f32 %v14859_v33, %v14879_v59  ;;  %11536 = vmatpush1.bf16.msra.mxu0 %v16197_v24  ;;  %v16232_v24 = vld [vmem:[#allocation11 + $0x6c] ss:$24 sps:$4 sm:$0xff]   ;;  %v16227_v50 = vld [vmem:[#allocation11 + $0x720] ss:$24 sps:$4 sm:$0xff]   ;;  %v16238_v59 = vld [vmem:[#allocation11 + $0x9c] ss:$24 sps:$4 sm:$0xff]  }
 0x4cd   :  { %6132 = vmatmul.mubr.bf16.vlgmr.msra.gmra.mrb[48].mxu1 %v17916_v22  ;;  %11537 = vmatprep.subr.bf16.mxu0 %v16205_v38  ;;  %v4700_v22 = vsel %vm4596_vm2, %v16214_v42, 0  ;;  %v16235_v38 = vld [vmem:[#allocation11 + $0x754] ss:$24 sps:$4 sm:$0xff]   ;;  %v16230_v33 = vld [vmem:[#allocation11 + $0x68] ss:$24 sps:$4 sm:$0xff]  }
 0x4ce   :  { %v6204_v35 = vmax.f32 %v6186_v10, 0.0  ;;  %6141 = vmatpush1.bf16.msra.mxu1 %v16200_v60  ;;  %6172 = vmatprep.mubr.bf16.mxu1 %v17705_v63  ;;  %v16223_v63 = vld [vmem:[#allocation11 + $0x6f4] ss:$24 sps:$4 sm:$0xff]   ;;  %v16233_v53 = vld [vmem:[#allocation11 + $0x750] ss:$24 sps:$4 sm:$0xff]  }
 0x4cf   :  { %6142 = vmatprep.subr.bf16.mxu1 %v16208_v7  ;;  %v16236_v60 = vld [vmem:[#allocation11 + $0x98] ss:$24 sps:$4 sm:$0xff]   ;;  %v16244_v4 = vld [vmem:[#allocation11 + $0xcc] ss:$24 sps:$4 sm:$0xff]   ;;  %v16290_v26 = vld [vmem:[#allocation11 + $0x248] ss:$24 sps:$4 sm:$0xff]  }
 0x4d0   :  { %v18226_v43 = vpack.c.bf16 %v6204_v35, %v6204_v35  ;;  %11538 = vmatpush1.bf16.msra.mxu0 %v16203_v14  ;;  %v16239_v7 = vld [vmem:[#allocation11 + $0x780] ss:$24 sps:$4 sm:$0xff]   ;;  %v16247_v10 = vld [vmem:[#allocation11 + $0x7b4] ss:$24 sps:$4 sm:$0xff]   ;;  %v16245_v35 = vld [vmem:[#allocation11 + $0x7b0] ss:$24 sps:$4 sm:$0xff]  }
 0x4d1   :  { %11539 = vmatprep.subr.bf16.mxu0 %v16211_v34  ;;  %v16242_v14 = vld [vmem:[#allocation11 + $0xc8] ss:$24 sps:$4 sm:$0xff]   ;;  %v16250_v34 = vld [vmem:[#allocation11 + $0xfc] ss:$24 sps:$4 sm:$0xff]   ;;  %v16256_v42 = vld [vmem:[#allocation11 + $0x12c] ss:$24 sps:$4 sm:$0xff]  }
 0x4d2   :  { %6143 = vmatpush1.bf16.msra.mxu1 %v16206_v15  ;;  %11565 = vmatprep.mubr.bf16.mxu0 %v18226_v43  ;;  %v16253_v15 = vld [vmem:[#allocation11 + $0x7e4] ss:$24 sps:$4 sm:$0xff]  }
 0x4d3   :  { %13811 = vmatprep.subr.msk.bf16.mxu1 %vm4596_vm2, %v16212_v39  ;;  %v16248_v39 = vld [vmem:[#allocation11 + $0xf8] ss:$24 sps:$4 sm:$0xff]   ;;  %v16298_v23 = vld [vmem:[#allocation11 + $0x27c] ss:$24 sps:$4 sm:$0xff]  }
 0x4d4   :  { %11540 = vmatpush1.bf16.msra.mxu0 %v16209_v49  ;;  %v16251_v49 = vld [vmem:[#allocation11 + $0x7e0] ss:$24 sps:$4 sm:$0xff]  }
 0x4d5   :  { %11541 = vmatprep.subr.bf16.mxu0 %v16217_v20  ;;  %v16259_v20 = vld [vmem:[#allocation11 + $0x814] ss:$24 sps:$4 sm:$0xff]  }
 0x4d6   :  { %6145 = vmatpush1.bf16.msra.mxu1 %v4700_v22  ;;  %v16254_v22 = vld [vmem:[#allocation11 + $0x128] ss:$24 sps:$4 sm:$0xff]  }
 0x4d7   :  { %11820 = vmatprep.subr.bf16.mxu1 %v16220_v44  ;;  %v16262_v44 = vld [vmem:[#allocation11 + $0x15c] ss:$24 sps:$4 sm:$0xff]  }
 0x4d8   :  { %11542 = vmatpush1.bf16.msra.mxu0 %v16215_v47  ;;  %v16257_v47 = vld [vmem:[#allocation11 + $0x810] ss:$24 sps:$4 sm:$0xff]  }
 0x4d9   :  { %13812 = vmatmul.mubr.msk.bf16.vlgmr.msra.gmra.mrb[48].mxu1 %vm4592_vm3, %v17921_v29  ;;  %11543 = vmatprep.subr.bf16.mxu0 %v16223_v63  ;;  %v16241_v29 = vld [vmem:[#allocation11 + $0x784] ss:$24 sps:$4 sm:$0xff]  }
 0x4da   :  { %11821 = vmatpush1.bf16.msra.mxu1 %v16218_v16  ;;  %11852 = vmatprep.mubr.bf16.mxu1 %v18188_v45  ;;  %v16265_v63 = vld [vmem:[#allocation11 + $0x844] ss:$24 sps:$4 sm:$0xff]   ;;  %v16260_v16 = vld [vmem:[#allocation11 + $0x158] ss:$24 sps:$4 sm:$0xff]  }
 0x4db   :  { %11822 = vmatprep.subr.bf16.mxu1 %v16226_v17  ;;  %v16268_v17 = vld [vmem:[#allocation11 + $0x18c] ss:$24 sps:$4 sm:$0xff]  }
 0x4dc   :  { %11544 = vmatpush1.bf16.msra.mxu0 %v16221_v28  ;;  %v16263_v28 = vld [vmem:[#allocation11 + $0x840] ss:$24 sps:$4 sm:$0xff]  }
 0x4dd   :  { %11545 = vmatprep.subr.bf16.mxu0 %v16229_v41  ;;  %v16271_v41 = vld [vmem:[#allocation11 + $0x874] ss:$24 sps:$4 sm:$0xff]  }
 0x4de   :  { %11823 = vmatpush1.bf16.msra.mxu1 %v16224_v18  ;;  %v16266_v18 = vld [vmem:[#allocation11 + $0x188] ss:$24 sps:$4 sm:$0xff]  }
 0x4df   :  { %11824 = vmatprep.subr.bf16.mxu1 %v16232_v24  ;;  %v16274_v24 = vld [vmem:[#allocation11 + $0x1bc] ss:$24 sps:$4 sm:$0xff]  }
 0x4e0   :  { %11546 = vmatpush1.bf16.msra.mxu0 %v16227_v50  ;;  %v16269_v50 = vld [vmem:[#allocation11 + $0x870] ss:$24 sps:$4 sm:$0xff]  }
 0x4e1   :  { %11547 = vmatprep.subr.bf16.mxu0 %v16235_v38  ;;  %v16277_v38 = vld [vmem:[#allocation11 + $0x8a4] ss:$24 sps:$4 sm:$0xff]  }
 0x4e2   :  { %11825 = vmatpush1.bf16.msra.mxu1 %v16230_v33  ;;  %v16272_v33 = vld [vmem:[#allocation11 + $0x1b8] ss:$24 sps:$4 sm:$0xff]  }
 0x4e3   :  { %11826 = vmatprep.subr.bf16.mxu1 %v16238_v59  ;;  %v16280_v59 = vld [vmem:[#allocation11 + $0x1ec] ss:$24 sps:$4 sm:$0xff]  }
 0x4e4   :  { %11548 = vmatpush1.bf16.msra.mxu0 %v16233_v53  ;;  %v16275_v53 = vld [vmem:[#allocation11 + $0x8a0] ss:$24 sps:$4 sm:$0xff]  }
 0x4e5   :  { %11549 = vmatprep.subr.bf16.mxu0 %v16241_v29  ;;  %v16283_v29 = vld [vmem:[#allocation11 + $0x8d4] ss:$24 sps:$4 sm:$0xff]  }
 0x4e6   :  { %11827 = vmatpush1.bf16.msra.mxu1 %v16236_v60  ;;  %v16278_v60 = vld [vmem:[#allocation11 + $0x1e8] ss:$24 sps:$4 sm:$0xff]  }
 0x4e7   :  { %11828 = vmatprep.subr.bf16.mxu1 %v16244_v4  ;;  %v16286_v4 = vld [vmem:[#allocation11 + $0x21c] ss:$24 sps:$4 sm:$0xff]  }
 0x4e8   :  { %11550 = vmatpush1.bf16.msra.mxu0 %v16239_v7  ;;  %v16281_v7 = vld [vmem:[#allocation11 + $0x8d0] ss:$24 sps:$4 sm:$0xff]  }
 0x4e9   :  { %11551 = vmatprep.subr.bf16.mxu0 %v16247_v10  ;;  %v6203_v10 = vmax.f32 %v6185_v62, 0.0  ;;  %v16304_v62 = vld [vmem:[#allocation11 + $0x2ac] ss:$24 sps:$4 sm:$0xff]  }
 0x4ea   :  { %11829 = vmatpush1.bf16.msra.mxu1 %v16242_v14  ;;  %v16289_v14 = vld [vmem:[#allocation11 + $0x904] ss:$24 sps:$4 sm:$0xff]  }
 0x4eb   :  { %11830 = vmatprep.subr.bf16.mxu1 %v16250_v34  ;;  %v6206_v34 = vmax.f32 %v6188_v36, 0.0  ;;  %v16296_v36 = vld [vmem:[#allocation11 + $0x278] ss:$24 sps:$4 sm:$0xff]  }
 0x4ec   :  { %11552 = vmatpush1.bf16.msra.mxu0 %v16245_v35  ;;  %v16284_v35 = vld [vmem:[#allocation11 + $0x218] ss:$24 sps:$4 sm:$0xff]  }
 0x4ed   :  { %11553 = vmatprep.subr.bf16.mxu0 %v16253_v15  ;;  %v16292_v15 = vld [vmem:[#allocation11 + $0x24c] ss:$24 sps:$4 sm:$0xff]  }
 0x4ee   :  { %11831 = vmatpush1.bf16.msra.mxu1 %v16248_v39  ;;  %v16287_v39 = vld [vmem:[#allocation11 + $0x900] ss:$24 sps:$4 sm:$0xff]  }
 0x4ef   :  { %11832 = vmatprep.subr.bf16.mxu1 %v16256_v42  ;;  %v18240_v42 = vpack.c.bf16 %v6203_v10, %v6203_v10 }
 0x4f0   :  { %11554 = vmatpush1.bf16.msra.mxu0 %v16251_v49  ;;  %v16295_v49 = vld [vmem:[#allocation11 + $0x934] ss:$24 sps:$4 sm:$0xff]  }
 0x4f1   :  { %11555 = vmatprep.subr.bf16.mxu0 %v16259_v20  ;;  %v18242_v20 = vpack.c.bf16 %v6206_v34, %v6206_v34  ;;  %v16322_v34 = vld [vmem:[#allocation11 + $0x33c] ss:$24 sps:$4 sm:$0xff]  }
 0x4f2   :  { %11833 = vmatpush1.bf16.msra.mxu1 %v16254_v22  ;;  %v16299_v22 = vld [vmem:[#allocation11 + $0x960] ss:$24 sps:$4 sm:$0xff]  }
 0x4f3   :  { %11834 = vmatprep.subr.bf16.mxu1 %v16262_v44  ;;  %v16307_v44 = vld [vmem:[#allocation11 + $0x994] ss:$24 sps:$4 sm:$0xff]  }
 0x4f4   :  { %11556 = vmatpush1.bf16.msra.mxu0 %v16257_v47  ;;  %v16302_v47 = vld [vmem:[#allocation11 + $0x2a8] ss:$24 sps:$4 sm:$0xff]  }
 0x4f5   :  { %11557 = vmatprep.subr.bf16.mxu0 %v16265_v63  ;;  %v16310_v63 = vld [vmem:[#allocation11 + $0x2dc] ss:$24 sps:$4 sm:$0xff]  }
 0x4f6   :  { %11835 = vmatpush1.bf16.msra.mxu1 %v16260_v16  ;;  %v16305_v16 = vld [vmem:[#allocation11 + $0x990] ss:$24 sps:$4 sm:$0xff]  }
 0x4f7   :  { %11836 = vmatprep.subr.bf16.mxu1 %v16268_v17  ;;  %v18246_v17 = vld [vmem:[#allocation10 + $0x18] sm:$0xff] }
 0x4f8   :  { %11558 = vmatpush1.bf16.msra.mxu0 %v16263_v28  ;;  %v1135_v28 = vrot.slane %v18246_v17, %v17911_v11 }
 0x4f9   :  { %11559 = vmatprep.subr.bf16.mxu0 %v16271_v41  ;;  %v16313_v41 = vld [vmem:[#allocation11 + $0x9c4] ss:$24 sps:$4 sm:$0xff]  }
 0x4fa   :  { %11837 = vmatpush1.bf16.msra.mxu1 %v16266_v18  ;;  %v1139_v18 = vrot.slane %v18246_v17, %v18023_v51 }
 0x4fb   :  { %11838 = vmatprep.subr.bf16.mxu1 %v16274_v24  ;;  %v16308_v24 = vld [vmem:[#allocation11 + $0x2d8] ss:$24 sps:$4 sm:$0xff]  }
 0x4fc   :  { %11560 = vmatpush1.bf16.msra.mxu0 %v16269_v50  ;;  %v16316_v50 = vld [vmem:[#allocation11 + $0x30c] ss:$24 sps:$4 sm:$0xff]  }
 0x4fd   :  { %11561 = vmatprep.subr.bf16.mxu0 %v16277_v38 }
 0x4fe   :  { %11839 = vmatpush1.bf16.msra.mxu1 %v16272_v33  ;;  %v16311_v33 = vld [vmem:[#allocation11 + $0x9c0] ss:$24 sps:$4 sm:$0xff]  }
 0x4ff   :  { %11840 = vmatprep.subr.bf16.mxu1 %v16280_v59 }
 0x500   :  { %11562 = vmatpush1.bf16.msra.mxu0 %v16275_v53 }
 0x501   :  { %11563 = vmatprep.subr.bf16.mxu0 %v16283_v29  ;;  %v16319_v29 = vld [vmem:[#allocation11 + $0x9f4] ss:$24 sps:$4 sm:$0xff]  }
 0x502   :  { %11841 = vmatpush1.bf16.msra.mxu1 %v16278_v60 }
 0x503   :  { %11842 = vmatprep.subr.bf16.mxu1 %v16286_v4 }
 0x504   :  { %11564 = vmatpush1.bf16.msra.mxu0 %v16281_v7  ;;  %v16314_v7 = vld [vmem:[#allocation11 + $0x308] ss:$24 sps:$4 sm:$0xff]  }
 0x505   :  { %11574 = vmatprep.subr.bf16.mxu0 %v16289_v14 }
 0x506   :  { %11843 = vmatpush1.bf16.msra.mxu1 %v16284_v35 }
 0x507   :  { %11566 = vmatmul.mubr.bf16.vlgmr.msra.gmra.mrb[28].mxu0 %v18240_v42  ;;  %11844 = vmatprep.subr.bf16.mxu1 %v16292_v15  ;;  %v16317_v15 = vld [vmem:[#allocation11 + $0x9f0] ss:$24 sps:$4 sm:$0xff]  }
 0x508   :  { %11575 = vmatpush1.bf16.msra.mxu0 %v16287_v39  ;;  %11606 = vmatprep.mubr.bf16.mxu0 %v18242_v20  ;;  %v16325_v39 = vld [vmem:[#allocation11 + $0xa24] ss:$24 sps:$4 sm:$0xff]  }
 0x509   :  { %11576 = vmatprep.subr.bf16.mxu0 %v16295_v49  ;;  %v16320_v49 = vld [vmem:[#allocation11 + $0x338] ss:$24 sps:$4 sm:$0xff]  }
 0x50a   :  { %11845 = vmatpush1.bf16.msra.mxu1 %v16290_v26  ;;  %v16328_v26 = vld [vmem:[#allocation11 + $0x36c] ss:$24 sps:$4 sm:$0xff]  }
 0x50b   :  { %11846 = vmatprep.subr.bf16.mxu1 %v16298_v23  ;;  %v16323_v23 = vld [vmem:[#allocation11 + $0xa20] ss:$24 sps:$4 sm:$0xff]  }
 0x50c   :  { %11577 = vmatpush1.bf16.msra.mxu0 %v16293_v30  ;;  %v16331_v30 = vld [vmem:[#allocation11 + $0xa54] ss:$24 sps:$4 sm:$0xff]  }
 0x50d   :  { %11578 = vmatprep.subr.bf16.mxu0 %v16301_v31  ;;  %v16326_v31 = vld [vmem:[#allocation11 + $0x368] ss:$24 sps:$4 sm:$0xff]  }
 0x50e   :  { %11847 = vmatpush1.bf16.msra.mxu1 %v16296_v36  ;;  %v16334_v36 = vld [vmem:[#allocation11 + $0x39c] ss:$24 sps:$4 sm:$0xff]  }
 0x50f   :  { %11848 = vmatprep.subr.bf16.mxu1 %v16304_v62  ;;  %v16329_v62 = vld [vmem:[#allocation11 + $0xa50] ss:$24 sps:$4 sm:$0xff]  }
 0x510   :  { %11579 = vmatpush1.bf16.msra.mxu0 %v16299_v22  ;;  %v16337_v22 = vld [vmem:[#allocation11 + $0xa84] ss:$24 sps:$4 sm:$0xff]  }
 0x511   :  { %11580 = vmatprep.subr.bf16.mxu0 %v16307_v44  ;;  %v16332_v44 = vld [vmem:[#allocation11 + $0x398] ss:$24 sps:$4 sm:$0xff]  }
 0x512   :  { %11849 = vmatpush1.bf16.msra.mxu1 %v16302_v47  ;;  %v16340_v47 = vld [vmem:[#allocation11 + $0x3cc] ss:$24 sps:$4 sm:$0xff]  }
 0x513   :  { %11850 = vmatprep.subr.bf16.mxu1 %v16310_v63  ;;  %v16335_v63 = vld [vmem:[#allocation11 + $0xa80] ss:$24 sps:$4 sm:$0xff]  }
 0x514   :  { %11581 = vmatpush1.bf16.msra.mxu0 %v16305_v16  ;;  %v5846_v38 = vpop.f32.mrb[40].mxu1  ;;  %v16343_v16 = vld [vmem:[#allocation11 + $0xab4] ss:$24 sps:$4 sm:$0xff]  }
 0x515   :  { %v18252_v59 = vadd.f32 %v5846_v38, %v1135_v28  ;;  %v5848_v53 = vpop.f32.mrb[41].mxu1  ;;  %11582 = vmatprep.subr.bf16.mxu0 %v16313_v41  ;;  %v16338_v28 = vld [vmem:[#allocation11 + $0x3c8] ss:$24 sps:$4 sm:$0xff]   ;;  %v16346_v41 = vld [vmem:[#allocation11 + $0x3fc] ss:$24 sps:$4 sm:$0xff]  }
 0x516   :  { %v18254_v60 = vadd.f32 %v5848_v53, %v1139_v18  ;;  %v5850_v4 = vpop.f32.mrb[42].mxu1  ;;  %11851 = vmatpush1.bf16.msra.mxu1 %v16308_v24  ;;  %v16341_v18 = vld [vmem:[#allocation11 + $0xab0] ss:$24 sps:$4 sm:$0xff]   ;;  %v16349_v24 = vld [vmem:[#allocation11 + $0xae4] ss:$24 sps:$4 sm:$0xff]  }
 0x517   :  { %v6189_v10 = vmax.f32 %v18085_v0, %v18252_v59  ;;  %v5851_v14 = vpop.f32.mrb[43].mxu1  ;;  %11861 = vmatprep.subr.bf16.mxu1 %v16316_v50  ;;  %v16344_v50 = vld [vmem:[#allocation11 + $0x3f8] ss:$24 sps:$4 sm:$0xff]   ;;  %v16352_v38 = vld [vmem:[#allocation11 + $0x42c] ss:$24 sps:$4 sm:$0xff]  }
 0x518   :  { %v6190_v35 = vmax.f32 %v18092_v8, %v18254_v60  ;;  %11583 = vmatpush1.bf16.msra.mxu0 %v16311_v33  ;;  %v16347_v33 = vld [vmem:[#allocation11 + $0xae0] ss:$24 sps:$4 sm:$0xff]   ;;  %v16355_v53 = vld [vmem:[#allocation11 + $0xb14] ss:$24 sps:$4 sm:$0xff]   ;;  %v16361_v14 = vld [vmem:[#allocation11 + $0xb44] ss:$24 sps:$4 sm:$0xff]  }
 0x519   :  { %11853 = vmatmul.mubr.bf16.vlgmr.msra.gmra.mrb[52].mxu1 %v18190_v56  ;;  %11584 = vmatprep.subr.bf16.mxu0 %v16319_v29  ;;  %v16350_v29 = vld [vmem:[#allocation11 + $0x428] ss:$24 sps:$4 sm:$0xff]   ;;  %v16358_v4 = vld [vmem:[#allocation11 + $0x45c] ss:$24 sps:$4 sm:$0xff]   ;;  %v16392_v60 = vld [vmem:[#allocation11 + $0x578] ss:$24 sps:$4 sm:$0xff]  }
 0x51a   :  { %11862 = vmatpush1.bf16.msra.mxu1 %v16314_v7  ;;  %11893 = vmatprep.mubr.bf16.mxu1 %v18192_v57  ;;  %v16353_v7 = vld [vmem:[#allocation11 + $0xb10] ss:$24 sps:$4 sm:$0xff]   ;;  %v16490_v59 = vld [vmem:[#allocation11 + $0x87c] ss:$24 sps:$4 sm:$0xff]  }
 0x51b   :  { %11863 = vmatprep.subr.bf16.mxu1 %v16322_v34  ;;  %v16356_v34 = vld [vmem:[#allocation11 + $0x458] ss:$24 sps:$4 sm:$0xff]   ;;  %v16482_v0 = vld [vmem:[#allocation11 + $0x848] ss:$24 sps:$4 sm:$0xff]  }
 0x51c   :  { %11585 = vmatpush1.bf16.msra.mxu0 %v16317_v15  ;;  %v16364_v15 = vld [vmem:[#allocation11 + $0x48c] ss:$24 sps:$4 sm:$0xff]   ;;  %v16389_v8 = vld [vmem:[#allocation11 + $0xc30] ss:$24 sps:$4 sm:$0xff]  }
 0x51d   :  { %11586 = vmatprep.subr.bf16.mxu0 %v16325_v39  ;;  %v16359_v39 = vld [vmem:[#allocation11 + $0xb40] ss:$24 sps:$4 sm:$0xff]  }
 0x51e   :  { %11864 = vmatpush1.bf16.msra.mxu1 %v16320_v49  ;;  %v16367_v49 = vld [vmem:[#allocation11 + $0xb74] ss:$24 sps:$4 sm:$0xff]  }
 0x51f   :  { %11865 = vmatprep.subr.bf16.mxu1 %v16328_v26  ;;  %v16362_v26 = vld [vmem:[#allocation11 + $0x488] ss:$24 sps:$4 sm:$0xff]  }
 0x520   :  { %11587 = vmatpush1.bf16.msra.mxu0 %v16323_v23  ;;  %v16370_v23 = vld [vmem:[#allocation11 + $0x4bc] ss:$24 sps:$4 sm:$0xff]  }
 0x521   :  { %11588 = vmatprep.subr.bf16.mxu0 %v16331_v30  ;;  %v16365_v30 = vld [vmem:[#allocation11 + $0xb70] ss:$24 sps:$4 sm:$0xff]  }
 0x522   :  { %11866 = vmatpush1.bf16.msra.mxu1 %v16326_v31  ;;  %v16373_v31 = vld [vmem:[#allocation11 + $0xba4] ss:$24 sps:$4 sm:$0xff]  }
 0x523   :  { %11867 = vmatprep.subr.bf16.mxu1 %v16334_v36  ;;  %v16368_v36 = vld [vmem:[#allocation11 + $0x4b8] ss:$24 sps:$4 sm:$0xff]  }
 0x524   :  { %11589 = vmatpush1.bf16.msra.mxu0 %v16329_v62  ;;  %v16376_v62 = vld [vmem:[#allocation11 + $0x4ec] ss:$24 sps:$4 sm:$0xff]  }
 0x525   :  { %11590 = vmatprep.subr.bf16.mxu0 %v16337_v22  ;;  %v16371_v22 = vld [vmem:[#allocation11 + $0xba0] ss:$24 sps:$4 sm:$0xff]  }
 0x526   :  { %11868 = vmatpush1.bf16.msra.mxu1 %v16332_v44  ;;  %v16379_v44 = vld [vmem:[#allocation11 + $0xbd4] ss:$24 sps:$4 sm:$0xff]  }
 0x527   :  { %11869 = vmatprep.subr.bf16.mxu1 %v16340_v47  ;;  %v16374_v47 = vld [vmem:[#allocation11 + $0x4e8] ss:$24 sps:$4 sm:$0xff]  }
 0x528   :  { %11591 = vmatpush1.bf16.msra.mxu0 %v16335_v63  ;;  %v16382_v63 = vld [vmem:[#allocation11 + $0x51c] ss:$24 sps:$4 sm:$0xff]  }
 0x529   :  { %11592 = vmatprep.subr.bf16.mxu0 %v16343_v16  ;;  %v16377_v16 = vld [vmem:[#allocation11 + $0xbd0] ss:$24 sps:$4 sm:$0xff]  }
 0x52a   :  { %11870 = vmatpush1.bf16.msra.mxu1 %v16338_v28  ;;  %v6205_v28 = vmax.f32 %v6187_v25, 0.0  ;;  %v16397_v25 = vld [vmem:[#allocation11 + $0xc64] ss:$24 sps:$4 sm:$0xff]  }
 0x52b   :  { %11871 = vmatprep.subr.bf16.mxu1 %v16346_v41  ;;  %v16385_v41 = vld [vmem:[#allocation11 + $0xc04] ss:$24 sps:$4 sm:$0xff]  }
 0x52c   :  { %11593 = vmatpush1.bf16.msra.mxu0 %v16341_v18  ;;  %v6208_v18 = vmax.f32 %v6190_v35, 0.0  ;;  %v16400_v35 = vld [vmem:[#allocation11 + $0x5ac] ss:$24 sps:$4 sm:$0xff]  }
 0x52d   :  { %11594 = vmatprep.subr.bf16.mxu0 %v16349_v24  ;;  %v16380_v24 = vld [vmem:[#allocation11 + $0x518] ss:$24 sps:$4 sm:$0xff]  }
 0x52e   :  { %11872 = vmatpush1.bf16.msra.mxu1 %v16344_v50  ;;  %v16388_v50 = vld [vmem:[#allocation11 + $0x54c] ss:$24 sps:$4 sm:$0xff]  }
 0x52f   :  { %11873 = vmatprep.subr.bf16.mxu1 %v16352_v38  ;;  %v16383_v38 = vld [vmem:[#allocation11 + $0xc00] ss:$24 sps:$4 sm:$0xff]  }
 0x530   :  { %11595 = vmatpush1.bf16.msra.mxu0 %v16347_v33  ;;  %v18268_v33 = vpack.c.bf16 %v6205_v28, %v6205_v28 }
 0x531   :  { %11596 = vmatprep.subr.bf16.mxu0 %v16355_v53  ;;  %v16391_v53 = vld [vmem:[#allocation11 + $0xc34] ss:$24 sps:$4 sm:$0xff]  }
 0x532   :  { %11874 = vmatpush1.bf16.msra.mxu1 %v16350_v29  ;;  %v18270_v29 = vpack.c.bf16 %v6208_v18, %v6208_v18  ;;  %v16427_v18 = vld [vmem:[#allocation11 + $0xd54] ss:$24 sps:$4 sm:$0xff]  }
 0x533   :  { %11875 = vmatprep.subr.bf16.mxu1 %v16358_v4  ;;  %v16395_v4 = vld [vmem:[#allocation11 + $0xc60] ss:$24 sps:$4 sm:$0xff]  }
 0x534   :  { %11597 = vmatpush1.bf16.msra.mxu0 %v16353_v7  ;;  %v16403_v7 = vld [vmem:[#allocation11 + $0xc94] ss:$24 sps:$4 sm:$0xff]  }
 0x535   :  { %11598 = vmatprep.subr.bf16.mxu0 %v16361_v14  ;;  %v16398_v14 = vld [vmem:[#allocation11 + $0x5a8] ss:$24 sps:$4 sm:$0xff]  }
 0x536   :  { %11876 = vmatpush1.bf16.msra.mxu1 %v16356_v34  ;;  %v16406_v34 = vld [vmem:[#allocation11 + $0x5dc] ss:$24 sps:$4 sm:$0xff]  }
 0x537   :  { %11877 = vmatprep.subr.bf16.mxu1 %v16364_v15  ;;  %v16401_v15 = vld [vmem:[#allocation11 + $0xc90] ss:$24 sps:$4 sm:$0xff]  }
 0x538   :  { %11599 = vmatpush1.bf16.msra.mxu0 %v16359_v39  ;;  %v16409_v39 = vld [vmem:[#allocation11 + $0xcc4] ss:$24 sps:$4 sm:$0xff]  }
 0x539   :  { %11600 = vmatprep.subr.bf16.mxu0 %v16367_v49  ;;  %v16404_v49 = vld [vmem:[#allocation11 + $0x5d8] ss:$24 sps:$4 sm:$0xff]  }
 0x53a   :  { %11878 = vmatpush1.bf16.msra.mxu1 %v16362_v26  ;;  %v16412_v26 = vld [vmem:[#allocation11 + $0x60c] ss:$24 sps:$4 sm:$0xff]  }
 0x53b   :  { %11879 = vmatprep.subr.bf16.mxu1 %v16370_v23  ;;  %v16407_v23 = vld [vmem:[#allocation11 + $0xcc0] ss:$24 sps:$4 sm:$0xff]  }
 0x53c   :  { %11601 = vmatpush1.bf16.msra.mxu0 %v16365_v30  ;;  %v16415_v30 = vld [vmem:[#allocation11 + $0xcf4] ss:$24 sps:$4 sm:$0xff]  }
 0x53d   :  { %11602 = vmatprep.subr.bf16.mxu0 %v16373_v31  ;;  %v16410_v31 = vld [vmem:[#allocation11 + $0x608] ss:$24 sps:$4 sm:$0xff]  }
 0x53e   :  { %11880 = vmatpush1.bf16.msra.mxu1 %v16368_v36  ;;  %v16418_v36 = vld [vmem:[#allocation11 + $0x63c] ss:$24 sps:$4 sm:$0xff]  }
 0x53f   :  { %11881 = vmatprep.subr.bf16.mxu1 %v16376_v62  ;;  %v16413_v62 = vld [vmem:[#allocation11 + $0xcf0] ss:$24 sps:$4 sm:$0xff]  }
 0x540   :  { %11603 = vmatpush1.bf16.msra.mxu0 %v16371_v22  ;;  %v16421_v22 = vld [vmem:[#allocation11 + $0xd24] ss:$24 sps:$4 sm:$0xff]  }
 0x541   :  { %11604 = vmatprep.subr.bf16.mxu0 %v16379_v44  ;;  %v16416_v44 = vld [vmem:[#allocation11 + $0x638] ss:$24 sps:$4 sm:$0xff]  }
 0x542   :  { %11882 = vmatpush1.bf16.msra.mxu1 %v16374_v47  ;;  %v16424_v47 = vld [vmem:[#allocation11 + $0x66c] ss:$24 sps:$4 sm:$0xff]  }
 0x543   :  { %11883 = vmatprep.subr.bf16.mxu1 %v16382_v63  ;;  %v16419_v63 = vld [vmem:[#allocation11 + $0xd20] ss:$24 sps:$4 sm:$0xff]  }
 0x544   :  { %11605 = vmatpush1.bf16.msra.mxu0 %v16377_v16  ;;  %v17476_v16 = vld [vmem:[#allocation10 + $0x8] sm:$0xff] }
 0x545   :  { %11615 = vmatprep.subr.bf16.mxu0 %v16385_v41  ;;  %v1079_v28 = vrot.slane %v17476_v16, %v18026_v54  ;;  %v1151_v41 = vrot.slane %v18246_v17, %v18075_v46  ;;  %v16433_v46 = vld [vmem:[#allocation11 + $0xd84] ss:$24 sps:$4 sm:$0xff]  }
 0x546   :  { %11884 = vmatpush1.bf16.msra.mxu1 %v16380_v24  ;;  %v1083_v24 = vrot.slane %v17476_v16, %v18029_v55  ;;  %v16452_v16 = vld [vmem:[#allocation11 + $0x758] ss:$24 sps:$4 sm:$0xff]  }
 0x547   :  { %11607 = vmatmul.mubr.bf16.vlgmr.msra.gmra.mrb[28].mxu0 %v18268_v33  ;;  %11885 = vmatprep.subr.bf16.mxu1 %v16388_v50  ;;  %v1155_v50 = vrot.slane %v18246_v17, %v18078_v48  ;;  %v16428_v17 = vld [vmem:[#allocation11 + $0x698] ss:$24 sps:$4 sm:$0xff]  }
 0x548   :  { %11616 = vmatpush1.bf16.msra.mxu0 %v16383_v38  ;;  %11647 = vmatprep.mubr.bf16.mxu0 %v18270_v29  ;;  %v16422_v38 = vld [vmem:[#allocation11 + $0x668] ss:$24 sps:$4 sm:$0xff]  }
 0x549   :  { %11617 = vmatprep.subr.bf16.mxu0 %v16391_v53  ;;  %v16430_v53 = vld [vmem:[#allocation11 + $0x69c] ss:$24 sps:$4 sm:$0xff]  }
 0x54a   :  { %11886 = vmatpush1.bf16.msra.mxu1 %v16386_v21 }
 0x54b   :  { %11887 = vmatprep.subr.bf16.mxu1 %v16394_v27  ;;  %v16425_v27 = vld [vmem:[#allocation11 + $0xd50] ss:$24 sps:$4 sm:$0xff]  }
 0x54c   :  { %11618 = vmatpush1.bf16.msra.mxu0 %v16389_v8  ;;  %v18283_v8 = vadd.f32 %v17981_v9, %v1079_v28  ;;  %v16436_v9 = vld [vmem:[#allocation11 + $0x6cc] ss:$24 sps:$4 sm:$0xff]  }
 0x54d   :  { %11619 = vmatprep.subr.bf16.mxu0 %v16397_v25  ;;  %v16460_v28 = vld [vmem:[#allocation11 + $0x78c] ss:$24 sps:$4 sm:$0xff]  }
 0x54e   :  { %11888 = vmatpush1.bf16.msra.mxu1 %v16392_v60 }
 0x54f   :  { %11889 = vmatprep.subr.bf16.mxu1 %v16400_v35  ;;  %v18288_v35 = vadd.f32 %v17983_v12, %v1083_v24  ;;  %v16434_v12 = vld [vmem:[#allocation11 + $0x6c8] ss:$24 sps:$4 sm:$0xff]  }
 0x550   :  { %11620 = vmatpush1.bf16.msra.mxu0 %v16395_v4  ;;  %v16458_v24 = vld [vmem:[#allocation11 + $0x788] ss:$24 sps:$4 sm:$0xff]  }
 0x551   :  { %11621 = vmatprep.subr.bf16.mxu0 %v16403_v7 }
 0x552   :  { %11890 = vmatpush1.bf16.msra.mxu1 %v16398_v14 }
 0x553   :  { %11891 = vmatprep.subr.bf16.mxu1 %v16406_v34 }
 0x554   :  { %11622 = vmatpush1.bf16.msra.mxu0 %v16401_v15  ;;  %v16431_v15 = vld [vmem:[#allocation11 + $0xd80] ss:$24 sps:$4 sm:$0xff]  }
 0x555   :  { %11623 = vmatprep.subr.bf16.mxu0 %v16409_v39  ;;  %v16439_v39 = vld [vmem:[#allocation11 + $0xdb4] ss:$24 sps:$4 sm:$0xff]  }
 0x556   :  { %11892 = vmatpush1.bf16.msra.mxu1 %v16404_v49  ;;  %v16442_v49 = vld [vmem:[#allocation11 + $0x6fc] ss:$24 sps:$4 sm:$0xff]  }
 0x557   :  { %11902 = vmatprep.subr.bf16.mxu1 %v16412_v26  ;;  %v16437_v26 = vld [vmem:[#allocation11 + $0xdb0] ss:$24 sps:$4 sm:$0xff]  }
 0x558   :  { %11624 = vmatpush1.bf16.msra.mxu0 %v16407_v23  ;;  %v16445_v23 = vld [vmem:[#allocation11 + $0xde4] ss:$24 sps:$4 sm:$0xff]  }
 0x559   :  { %11894 = vmatmul.mubr.bf16.vlgmr.msra.gmra.mrb[52].mxu1 %v18207_v1  ;;  %11625 = vmatprep.subr.bf16.mxu0 %v16415_v30  ;;  %v16440_v30 = vld [vmem:[#allocation11 + $0x6f8] ss:$24 sps:$4 sm:$0xff]  }
 0x55a   :  { %11903 = vmatpush1.bf16.msra.mxu1 %v16410_v31  ;;  %11934 = vmatprep.mubr.bf16.mxu1 %v18226_v43  ;;  %v16448_v31 = vld [vmem:[#allocation11 + $0x72c] ss:$24 sps:$4 sm:$0xff]  }
 0x55b   :  { %11904 = vmatprep.subr.bf16.mxu1 %v16418_v36  ;;  %v16443_v36 = vld [vmem:[#allocation11 + $0xde0] ss:$24 sps:$4 sm:$0xff]  }
 0x55c   :  { %11626 = vmatpush1.bf16.msra.mxu0 %v16413_v62  ;;  %v16451_v62 = vld [vmem:[#allocation11 + $0xe14] ss:$24 sps:$4 sm:$0xff]  }
 0x55d   :  { %11627 = vmatprep.subr.bf16.mxu0 %v16421_v22  ;;  %v16446_v22 = vld [vmem:[#allocation11 + $0x728] ss:$24 sps:$4 sm:$0xff]  }
 0x55e   :  { %11905 = vmatpush1.bf16.msra.mxu1 %v16416_v44  ;;  %v16454_v44 = vld [vmem:[#allocation11 + $0x75c] ss:$24 sps:$4 sm:$0xff]  }
 0x55f   :  { %11906 = vmatprep.subr.bf16.mxu1 %v16424_v47  ;;  %v16449_v47 = vld [vmem:[#allocation11 + $0xe10] ss:$24 sps:$4 sm:$0xff]  }
 0x560   :  { %11628 = vmatpush1.bf16.msra.mxu0 %v16419_v63  ;;  %v6010_v21 = vpop.f32.mrb[44].mxu1  ;;  %v16457_v63 = vld [vmem:[#allocation11 + $0xe44] ss:$24 sps:$4 sm:$0xff]  }
 0x561   :  { %v18285_v25 = vadd.f32 %v6010_v21, %v1151_v41  ;;  %v6012_v60 = vpop.f32.mrb[45].mxu1  ;;  %11629 = vmatprep.subr.bf16.mxu0 %v16427_v18  ;;  %v16455_v41 = vld [vmem:[#allocation11 + $0xe40] ss:$24 sps:$4 sm:$0xff]   ;;  %v16463_v18 = vld [vmem:[#allocation11 + $0xe74] ss:$24 sps:$4 sm:$0xff]  }
 0x562   :  { %v18290_v4 = vadd.f32 %v6012_v60, %v1155_v50  ;;  %v6014_v48 = vpop.f32.mrb[46].mxu1  ;;  %11907 = vmatpush1.bf16.msra.mxu1 %v16422_v38  ;;  %v16466_v50 = vld [vmem:[#allocation11 + $0x7bc] ss:$24 sps:$4 sm:$0xff]   ;;  %v16461_v38 = vld [vmem:[#allocation11 + $0xe70] ss:$24 sps:$4 sm:$0xff]  }
 0x563   :  { %v6193_v7 = vmax.f32 %v18283_v8, %v18285_v25  ;;  %v6015_v14 = vpop.f32.mrb[47].mxu1  ;;  %11908 = vmatprep.subr.bf16.mxu1 %v16430_v53  ;;  %v16469_v53 = vld [vmem:[#allocation11 + $0xea4] ss:$24 sps:$4 sm:$0xff]   ;;  %v16464_v21 = vld [vmem:[#allocation11 + $0x7b8] ss:$24 sps:$4 sm:$0xff]  }
 0x564   :  { %v6194_v34 = vmax.f32 %v18288_v35, %v18290_v4  ;;  %11630 = vmatpush1.bf16.msra.mxu0 %v16425_v27  ;;  %v16472_v27 = vld [vmem:[#allocation11 + $0x7ec] ss:$24 sps:$4 sm:$0xff]   ;;  %v16467_v60 = vld [vmem:[#allocation11 + $0xea0] ss:$24 sps:$4 sm:$0xff]   ;;  %v16473_v14 = vld [vmem:[#allocation11 + $0xed0] ss:$24 sps:$4 sm:$0xff]  }
 0x565   :  { %11631 = vmatprep.subr.bf16.mxu0 %v16433_v46  ;;  %v16475_v46 = vld [vmem:[#allocation11 + $0xed4] ss:$24 sps:$4 sm:$0xff]   ;;  %v16470_v48 = vld [vmem:[#allocation11 + $0x7e8] ss:$24 sps:$4 sm:$0xff]   ;;  %v16589_v4 = vld [vmem:[#allocation11 + $0x1264] ss:$24 sps:$4 sm:$0xff]  }
 0x566   :  { %11909 = vmatpush1.bf16.msra.mxu1 %v16428_v17  ;;  %v16478_v17 = vld [vmem:[#allocation11 + $0x81c] ss:$24 sps:$4 sm:$0xff]   ;;  %v16581_v35 = vld [vmem:[#allocation11 + $0x1230] ss:$24 sps:$4 sm:$0xff]  }
 0x567   :  { %11910 = vmatprep.subr.bf16.mxu1 %v16436_v9  ;;  %v6207_v9 = vmax.f32 %v6189_v10, 0.0  ;;  %v16488_v10 = vld [vmem:[#allocation11 + $0x878] ss:$24 sps:$4 sm:$0xff]   ;;  %v16674_v8 = vld [vmem:[#allocation11 + $0xe48] ss:$24 sps:$4 sm:$0xff]  }
 0x568   :  { %11632 = vmatpush1.bf16.msra.mxu0 %v16431_v15  ;;  %v16481_v15 = vld [vmem:[#allocation11 + $0xf04] ss:$24 sps:$4 sm:$0xff]  }
 0x569   :  { %11633 = vmatprep.subr.bf16.mxu0 %v16439_v39  ;;  %v18516_v39 = vmax.f32 %v18131_v32, %v18133_v52  ;;  %v16485_v32 = vld [vmem:[#allocation11 + $0xf30] ss:$24 sps:$4 sm:$0xff]   ;;  %v16493_v52 = vld [vmem:[#allocation11 + $0xf64] ss:$24 sps:$4 sm:$0xff]  }
 0x56a   :  { %11911 = vmatpush1.bf16.msra.mxu1 %v16434_v12  ;;  %v16682_v25 = vld [vmem:[#allocation11 + $0xe7c] ss:$24 sps:$4 sm:$0xff]  }
 0x56b   :  { %11912 = vmatprep.subr.bf16.mxu1 %v16442_v49  ;;  %v6210_v12 = vmax.f32 %v18516_v39, 0.0  ;;  %v16476_v49 = vld [vmem:[#allocation11 + $0x818] ss:$24 sps:$4 sm:$0xff]   ;;  %v16529_v39 = vld [vmem:[#allocation11 + $0x1084] ss:$24 sps:$4 sm:$0xff]  }
 0x56c   :  { %11634 = vmatpush1.bf16.msra.mxu0 %v16437_v26  ;;  %v16484_v26 = vld [vmem:[#allocation11 + $0x84c] ss:$24 sps:$4 sm:$0xff]  }
 0x56d   :  { %11635 = vmatprep.subr.bf16.mxu0 %v16445_v23  ;;  %v16479_v23 = vld [vmem:[#allocation11 + $0xf00] ss:$24 sps:$4 sm:$0xff]  }
 0x56e   :  { %11913 = vmatpush1.bf16.msra.mxu1 %v16440_v30  ;;  %v18302_v30 = vpack.c.bf16 %v6207_v9, %v6207_v9  ;;  %v16526_v9 = vld [vmem:[#allocation11 + $0x99c] ss:$24 sps:$4 sm:$0xff]  }
 0x56f   :  { %11914 = vmatprep.subr.bf16.mxu1 %v16448_v31  ;;  %v16487_v31 = vld [vmem:[#allocation11 + $0xf34] ss:$24 sps:$4 sm:$0xff]  }
 0x570   :  { %11636 = vmatpush1.bf16.msra.mxu0 %v16443_v36  ;;  %v18304_v36 = vpack.c.bf16 %v6210_v12, %v6210_v12  ;;  %v16524_v12 = vld [vmem:[#allocation11 + $0x998] ss:$24 sps:$4 sm:$0xff]  }
 0x571   :  { %11637 = vmatprep.subr.bf16.mxu0 %v16451_v62  ;;  %v16496_v62 = vld [vmem:[#allocation11 + $0x8ac] ss:$24 sps:$4 sm:$0xff]  }
 0x572   :  { %11915 = vmatpush1.bf16.msra.mxu1 %v16446_v22  ;;  %v16491_v22 = vld [vmem:[#allocation11 + $0xf60] ss:$24 sps:$4 sm:$0xff]  }
 0x573   :  { %11916 = vmatprep.subr.bf16.mxu1 %v16454_v44  ;;  %v16499_v44 = vld [vmem:[#allocation11 + $0xf94] ss:$24 sps:$4 sm:$0xff]  }
 0x574   :  { %11638 = vmatpush1.bf16.msra.mxu0 %v16449_v47  ;;  %v16494_v47 = vld [vmem:[#allocation11 + $0x8a8] ss:$24 sps:$4 sm:$0xff]  }
 0x575   :  { %11639 = vmatprep.subr.bf16.mxu0 %v16457_v63  ;;  %v16502_v63 = vld [vmem:[#allocation11 + $0x8dc] ss:$24 sps:$4 sm:$0xff]  }
 0x576   :  { %11917 = vmatpush1.bf16.msra.mxu1 %v16452_v16  ;;  %v16497_v16 = vld [vmem:[#allocation11 + $0xf90] ss:$24 sps:$4 sm:$0xff]  }
 0x577   :  { %11918 = vmatprep.subr.bf16.mxu1 %v16460_v28  ;;  %v16505_v28 = vld [vmem:[#allocation11 + $0xfc4] ss:$24 sps:$4 sm:$0xff]  }
 0x578   :  { %11640 = vmatpush1.bf16.msra.mxu0 %v16455_v41  ;;  %v16500_v41 = vld [vmem:[#allocation11 + $0x8d8] ss:$24 sps:$4 sm:$0xff]  }
 0x579   :  { %11641 = vmatprep.subr.bf16.mxu0 %v16463_v18  ;;  %v16508_v18 = vld [vmem:[#allocation11 + $0x90c] ss:$24 sps:$4 sm:$0xff]  }
 0x57a   :  { %11919 = vmatpush1.bf16.msra.mxu1 %v16458_v24  ;;  %v16503_v24 = vld [vmem:[#allocation11 + $0xfc0] ss:$24 sps:$4 sm:$0xff]  }
 0x57b   :  { %11920 = vmatprep.subr.bf16.mxu1 %v16466_v50  ;;  %v16511_v50 = vld [vmem:[#allocation11 + $0xff4] ss:$24 sps:$4 sm:$0xff]  }
 0x57c   :  { %11642 = vmatpush1.bf16.msra.mxu0 %v16461_v38  ;;  %v16506_v38 = vld [vmem:[#allocation11 + $0x908] ss:$24 sps:$4 sm:$0xff]  }
 0x57d   :  { %11643 = vmatprep.subr.bf16.mxu0 %v16469_v53  ;;  %v16514_v53 = vld [vmem:[#allocation11 + $0x93c] ss:$24 sps:$4 sm:$0xff]  }
 0x57e   :  { %11921 = vmatpush1.bf16.msra.mxu1 %v16464_v21  ;;  %v16509_v21 = vld [vmem:[#allocation11 + $0xff0] ss:$24 sps:$4 sm:$0xff]  }
 0x57f   :  { %11922 = vmatprep.subr.bf16.mxu1 %v16472_v27  ;;  %v16517_v27 = vld [vmem:[#allocation11 + $0x1024] ss:$24 sps:$4 sm:$0xff]  }
 0x580   :  { %11644 = vmatpush1.bf16.msra.mxu0 %v16467_v60  ;;  %v16512_v60 = vld [vmem:[#allocation11 + $0x938] ss:$24 sps:$4 sm:$0xff]  }
 0x581   :  { %11645 = vmatprep.subr.bf16.mxu0 %v16475_v46  ;;  %v16520_v46 = vld [vmem:[#allocation11 + $0x96c] ss:$24 sps:$4 sm:$0xff]  }
 0x582   :  { %11923 = vmatpush1.bf16.msra.mxu1 %v16470_v48  ;;  %v16515_v48 = vld [vmem:[#allocation11 + $0x1020] ss:$24 sps:$4 sm:$0xff]  }
 0x583   :  { %11924 = vmatprep.subr.bf16.mxu1 %v16478_v17  ;;  %v16523_v17 = vld [vmem:[#allocation11 + $0x1054] ss:$24 sps:$4 sm:$0xff]  }
 0x584   :  { %11646 = vmatpush1.bf16.msra.mxu0 %v16473_v14  ;;  %v16518_v14 = vld [vmem:[#allocation11 + $0x968] ss:$24 sps:$4 sm:$0xff]  }
 0x585   :  { %11656 = vmatprep.subr.bf16.mxu0 %v16481_v15  ;;  %v16521_v15 = vld [vmem:[#allocation11 + $0x1050] ss:$24 sps:$4 sm:$0xff]  }
 0x586   :  { %11925 = vmatpush1.bf16.msra.mxu1 %v16476_v49  ;;  %v16532_v49 = vld [vmem:[#allocation11 + $0x9cc] ss:$24 sps:$4 sm:$0xff]  }
 0x587   :  { %11648 = vmatmul.mubr.bf16.vlgmr.msra.gmra.mrb[28].mxu0 %v18302_v30  ;;  %11926 = vmatprep.subr.bf16.mxu1 %v16484_v26  ;;  %v16527_v26 = vld [vmem:[#allocation11 + $0x1080] ss:$24 sps:$4 sm:$0xff]  }
 0x588   :  { %11657 = vmatpush1.bf16.msra.mxu0 %v16479_v23  ;;  %11688 = vmatprep.mubr.bf16.mxu0 %v18304_v36  ;;  %v16535_v23 = vld [vmem:[#allocation11 + $0x10b4] ss:$24 sps:$4 sm:$0xff]  }
 0x589   :  { %11658 = vmatprep.subr.bf16.mxu0 %v16487_v31  ;;  %v16530_v31 = vld [vmem:[#allocation11 + $0x9c8] ss:$24 sps:$4 sm:$0xff]  }
 0x58a   :  { %11927 = vmatpush1.bf16.msra.mxu1 %v16482_v0  ;;  %v16538_v0 = vld [vmem:[#allocation11 + $0x9fc] ss:$24 sps:$4 sm:$0xff]  }
 0x58b   :  { %11928 = vmatprep.subr.bf16.mxu1 %v16490_v59  ;;  %v16533_v59 = vld [vmem:[#allocation11 + $0x10b0] ss:$24 sps:$4 sm:$0xff]  }
 0x58c   :  { %11659 = vmatpush1.bf16.msra.mxu0 %v16485_v32  ;;  %v17477_v32 = vld [vmem:[#allocation10 + $0x10] sm:$0xff] }
 0x58d   :  { %11660 = vmatprep.subr.bf16.mxu0 %v16493_v52  ;;  %v1095_v52 = vrot.slane %v17477_v32, %v17903_v3 }
 0x58e   :  { %11929 = vmatpush1.bf16.msra.mxu1 %v16488_v10  ;;  %v17478_v10 = vld [vmem:[#allocation10 + $0x20] sm:$0xf] }
 0x58f   :  { %11930 = vmatprep.subr.bf16.mxu1 %v16496_v62  ;;  %v1167_v62 = vrot.slane %v17478_v10, %v17911_v11 }
 0x590   :  { %11661 = vmatpush1.bf16.msra.mxu0 %v16491_v22  ;;  %v16541_v22 = vld [vmem:[#allocation11 + $0x10e4] ss:$24 sps:$4 sm:$0xff]  }
 0x591   :  { %11662 = vmatprep.subr.bf16.mxu0 %v16499_v44  ;;  %v1099_v44 = vrot.slane %v17477_v32, %v17906_v5  ;;  %v16563_v32 = vld [vmem:[#allocation11 + $0x11a0] ss:$24 sps:$4 sm:$0xff]  }
 0x592   :  { %11931 = vmatpush1.bf16.msra.mxu1 %v16494_v47  ;;  %v1171_v47 = vrot.slane %v17478_v10, %v18023_v51  ;;  %v16566_v10 = vld [vmem:[#allocation11 + $0xae8] ss:$24 sps:$4 sm:$0xff]  }
 0x593   :  { %11932 = vmatprep.subr.bf16.mxu1 %v16502_v63  ;;  %v16536_v63 = vld [vmem:[#allocation11 + $0x9f8] ss:$24 sps:$4 sm:$0xff]  }
 0x594   :  { %11663 = vmatpush1.bf16.msra.mxu0 %v16497_v16  ;;  %v16544_v16 = vld [vmem:[#allocation11 + $0xa2c] ss:$24 sps:$4 sm:$0xff]  }
 0x595   :  { %11664 = vmatprep.subr.bf16.mxu0 %v16505_v28 }
 0x596   :  { %11933 = vmatpush1.bf16.msra.mxu1 %v16500_v41  ;;  %v16539_v41 = vld [vmem:[#allocation11 + $0x10e0] ss:$24 sps:$4 sm:$0xff]  }
 0x597   :  { %11943 = vmatprep.subr.bf16.mxu1 %v16508_v18  ;;  %v18315_v18 = vadd.f32 %v17999_v58, %v1095_v52  ;;  %v16550_v58 = vld [vmem:[#allocation11 + $0xa5c] ss:$24 sps:$4 sm:$0xff]  }
 0x598   :  { %11665 = vmatpush1.bf16.msra.mxu0 %v16503_v24  ;;  %v16571_v52 = vld [vmem:[#allocation11 + $0x11d4] ss:$24 sps:$4 sm:$0xff]  }
 0x599   :  { %11935 = vmatmul.mubr.bf16.vlgmr.msra.gmra.mrb[52].mxu1 %v18240_v42  ;;  %11666 = vmatprep.subr.bf16.mxu0 %v16511_v50 }
 0x59a   :  { %11944 = vmatpush1.bf16.msra.mxu1 %v16506_v38  ;;  %11975 = vmatprep.mubr.bf16.mxu1 %v18242_v20  ;;  %v16547_v38 = vld [vmem:[#allocation11 + $0x1114] ss:$24 sps:$4 sm:$0xff]  }
 0x59b   :  { %11945 = vmatprep.subr.bf16.mxu1 %v16514_v53  ;;  %v18320_v53 = vadd.f32 %v18002_v61, %v1099_v44  ;;  %v16548_v61 = vld [vmem:[#allocation11 + $0xa58] ss:$24 sps:$4 sm:$0xff]   ;;  %v18517_v44 = vmax.f32 %v18127_v2, %v18129_v6  ;;  %v16578_v2 = vld [vmem:[#allocation11 + $0xb48] ss:$24 sps:$4 sm:$0xff]   ;;  %v16586_v6 = vld [vmem:[#allocation11 + $0xb7c] ss:$24 sps:$4 sm:$0xff]  }
 0x59c   :  { %11667 = vmatpush1.bf16.msra.mxu0 %v16509_v21 }
 0x59d   :  { %11668 = vmatprep.subr.bf16.mxu0 %v16517_v27 }
 0x59e   :  { %11946 = vmatpush1.bf16.msra.mxu1 %v16512_v60  ;;  %v16542_v60 = vld [vmem:[#allocation11 + $0xa28] ss:$24 sps:$4 sm:$0xff]  }
 0x59f   :  { %11947 = vmatprep.subr.bf16.mxu1 %v16520_v46 }
 0x5a0   :  { %11669 = vmatpush1.bf16.msra.mxu0 %v16515_v48 }
 0x5a1   :  { %11670 = vmatprep.subr.bf16.mxu0 %v16523_v17 }
 0x5a2   :  { %11948 = vmatpush1.bf16.msra.mxu1 %v16518_v14  ;;  %v16545_v14 = vld [vmem:[#allocation11 + $0x1110] ss:$24 sps:$4 sm:$0xff]  }
 0x5a3   :  { %11949 = vmatprep.subr.bf16.mxu1 %v16526_v9  ;;  %v16553_v9 = vld [vmem:[#allocation11 + $0x1144] ss:$24 sps:$4 sm:$0xff]  }
 0x5a4   :  { %11671 = vmatpush1.bf16.msra.mxu0 %v16521_v15  ;;  %v16556_v15 = vld [vmem:[#allocation11 + $0xa8c] ss:$24 sps:$4 sm:$0xff]  }
 0x5a5   :  { %11672 = vmatprep.subr.bf16.mxu0 %v16529_v39  ;;  %v16551_v39 = vld [vmem:[#allocation11 + $0x1140] ss:$24 sps:$4 sm:$0xff]  }
 0x5a6   :  { %11950 = vmatpush1.bf16.msra.mxu1 %v16524_v12  ;;  %v16559_v12 = vld [vmem:[#allocation11 + $0x1174] ss:$24 sps:$4 sm:$0xff]  }
 0x5a7   :  { %11951 = vmatprep.subr.bf16.mxu1 %v16532_v49  ;;  %v16554_v49 = vld [vmem:[#allocation11 + $0xa88] ss:$24 sps:$4 sm:$0xff]  }
 0x5a8   :  { %11673 = vmatpush1.bf16.msra.mxu0 %v16527_v26  ;;  %v16562_v26 = vld [vmem:[#allocation11 + $0xabc] ss:$24 sps:$4 sm:$0xff]  }
 0x5a9   :  { %11674 = vmatprep.subr.bf16.mxu0 %v16535_v23  ;;  %v16557_v23 = vld [vmem:[#allocation11 + $0x1170] ss:$24 sps:$4 sm:$0xff]  }
 0x5aa   :  { %11952 = vmatpush1.bf16.msra.mxu1 %v16530_v31  ;;  %v16565_v31 = vld [vmem:[#allocation11 + $0x11a4] ss:$24 sps:$4 sm:$0xff]  }
 0x5ab   :  { %11953 = vmatprep.subr.bf16.mxu1 %v16538_v0  ;;  %v16560_v0 = vld [vmem:[#allocation11 + $0xab8] ss:$24 sps:$4 sm:$0xff]  }
 0x5ac   :  { %11675 = vmatpush1.bf16.msra.mxu0 %v16533_v59  ;;  %v6174_v28 = vpop.f32.mrb[48].mxu1  ;;  %v16568_v59 = vld [vmem:[#allocation11 + $0xaec] ss:$24 sps:$4 sm:$0xff]  }
 0x5ad   :  { %v18317_v24 = vadd.f32 %v6174_v28, %v1167_v62  ;;  %v6176_v50 = vpop.f32.mrb[49].mxu1  ;;  %11676 = vmatprep.subr.bf16.mxu0 %v16541_v22  ;;  %v16574_v62 = vld [vmem:[#allocation11 + $0xb1c] ss:$24 sps:$4 sm:$0xff]   ;;  %v16569_v22 = vld [vmem:[#allocation11 + $0x11d0] ss:$24 sps:$4 sm:$0xff]  }
 0x5ae   :  { %v18322_v21 = vadd.f32 %v6176_v50, %v1171_v47  ;;  %v6178_v27 = vpop.f32.mrb[50].mxu1  ;;  %11954 = vmatpush1.bf16.msra.mxu1 %v16536_v63  ;;  %v6209_v47 = vmax.f32 %v18517_v44, 0.0  ;;  %v16577_v63 = vld [vmem:[#allocation11 + $0x1204] ss:$24 sps:$4 sm:$0xff]   ;;  %v16572_v28 = vld [vmem:[#allocation11 + $0xb18] ss:$24 sps:$4 sm:$0xff]  }
 0x5af   :  { %v6197_v46 = vmax.f32 %v18315_v18, %v18317_v24  ;;  %v6179_v48 = vpop.f32.mrb[51].mxu1  ;;  %11955 = vmatprep.subr.bf16.mxu1 %v16544_v16  ;;  %v6212_v16 = vmax.f32 %v6194_v34, 0.0  ;;  %v16575_v50 = vld [vmem:[#allocation11 + $0x1200] ss:$24 sps:$4 sm:$0xff]   ;;  %v16583_v27 = vld [vmem:[#allocation11 + $0x1234] ss:$24 sps:$4 sm:$0xff]  }
 0x5b0   :  { %v6198_v17 = vmax.f32 %v18320_v53, %v18322_v21  ;;  %11677 = vmatpush1.bf16.msra.mxu0 %v16539_v41  ;;  %v16580_v41 = vld [vmem:[#allocation11 + $0xb4c] ss:$24 sps:$4 sm:$0xff]   ;;  %v16584_v34 = vld [vmem:[#allocation11 + $0xb78] ss:$24 sps:$4 sm:$0xff]   ;;  %v16614_v44 = vld [vmem:[#allocation11 + $0xc68] ss:$24 sps:$4 sm:$0xff]  }
 0x5b1   :  { %11678 = vmatprep.subr.bf16.mxu0 %v16547_v38  ;;  %v18334_v38 = vpack.c.bf16 %v6209_v47, %v6209_v47  ;;  %v16592_v48 = vld [vmem:[#allocation11 + $0xbac] ss:$24 sps:$4 sm:$0xff]   ;;  %v16622_v47 = vld [vmem:[#allocation11 + $0xc9c] ss:$24 sps:$4 sm:$0xff]   ;;  %v16773_v53 = vld [vmem:[#allocation11 + $0x1830] ss:$24 sps:$4 sm:$0xff]  }
 0x5b2   :  { %11956 = vmatpush1.bf16.msra.mxu1 %v16542_v60  ;;  %v18336_v60 = vpack.c.bf16 %v6212_v16, %v6212_v16  ;;  %v16625_v16 = vld [vmem:[#allocation11 + $0x1384] ss:$24 sps:$4 sm:$0xff]   ;;  %v16869_v18 = vld [vmem:[#allocation11 + $0x40] ss:$24 sps:$4 sm:$0xff]   ;;  %v16877_v24 = vld [vmem:[#allocation11 + $0x74] ss:$24 sps:$4 sm:$0xff]  }
 0x5b3   :  { %11957 = vmatprep.subr.bf16.mxu1 %v16550_v58  ;;  %v16587_v58 = vld [vmem:[#allocation11 + $0x1260] ss:$24 sps:$4 sm:$0xff]   ;;  %v16781_v21 = vld [vmem:[#allocation11 + $0x1864] ss:$24 sps:$4 sm:$0xff]  }
 0x5b4   :  { %11679 = vmatpush1.bf16.msra.mxu0 %v16545_v14  ;;  %v16595_v14 = vld [vmem:[#allocation11 + $0x1294] ss:$24 sps:$4 sm:$0xff]  }
 0x5b5   :  { %11680 = vmatprep.subr.bf16.mxu0 %v16553_v9  ;;  %v16590_v9 = vld [vmem:[#allocation11 + $0xba8] ss:$24 sps:$4 sm:$0xff]  }
 0x5b6   :  { %11958 = vmatpush1.bf16.msra.mxu1 %v16548_v61  ;;  %v16598_v61 = vld [vmem:[#allocation11 + $0xbdc] ss:$24 sps:$4 sm:$0xff]  }
 0x5b7   :  { %11959 = vmatprep.subr.bf16.mxu1 %v16556_v15  ;;  %v16593_v15 = vld [vmem:[#allocation11 + $0x1290] ss:$24 sps:$4 sm:$0xff]  }
 0x5b8   :  { %11681 = vmatpush1.bf16.msra.mxu0 %v16551_v39  ;;  %v16601_v39 = vld [vmem:[#allocation11 + $0x12c4] ss:$24 sps:$4 sm:$0xff]  }
 0x5b9   :  { %11682 = vmatprep.subr.bf16.mxu0 %v16559_v12  ;;  %v16596_v12 = vld [vmem:[#allocation11 + $0xbd8] ss:$24 sps:$4 sm:$0xff]  }
 0x5ba   :  { %11960 = vmatpush1.bf16.msra.mxu1 %v16554_v49  ;;  %v16604_v49 = vld [vmem:[#allocation11 + $0xc0c] ss:$24 sps:$4 sm:$0xff]  }
 0x5bb   :  { %11961 = vmatprep.subr.bf16.mxu1 %v16562_v26  ;;  %v16599_v26 = vld [vmem:[#allocation11 + $0x12c0] ss:$24 sps:$4 sm:$0xff]  }
 0x5bc   :  { %11683 = vmatpush1.bf16.msra.mxu0 %v16557_v23  ;;  %v16607_v23 = vld [vmem:[#allocation11 + $0x12f4] ss:$24 sps:$4 sm:$0xff]  }
 0x5bd   :  { %11684 = vmatprep.subr.bf16.mxu0 %v16565_v31  ;;  %v16602_v31 = vld [vmem:[#allocation11 + $0xc08] ss:$24 sps:$4 sm:$0xff]  }
 0x5be   :  { %11962 = vmatpush1.bf16.msra.mxu1 %v16560_v0  ;;  %v16610_v0 = vld [vmem:[#allocation11 + $0xc3c] ss:$24 sps:$4 sm:$0xff]  }
 0x5bf   :  { %11963 = vmatprep.subr.bf16.mxu1 %v16568_v59  ;;  %v16605_v59 = vld [vmem:[#allocation11 + $0x12f0] ss:$24 sps:$4 sm:$0xff]  }
 0x5c0   :  { %11685 = vmatpush1.bf16.msra.mxu0 %v16563_v32  ;;  %v16613_v32 = vld [vmem:[#allocation11 + $0x1324] ss:$24 sps:$4 sm:$0xff]  }
 0x5c1   :  { %11686 = vmatprep.subr.bf16.mxu0 %v16571_v52  ;;  %v16608_v52 = vld [vmem:[#allocation11 + $0xc38] ss:$24 sps:$4 sm:$0xff]  }
 0x5c2   :  { %11964 = vmatpush1.bf16.msra.mxu1 %v16566_v10  ;;  %v16616_v10 = vld [vmem:[#allocation11 + $0xc6c] ss:$24 sps:$4 sm:$0xff]  }
 0x5c3   :  { %11965 = vmatprep.subr.bf16.mxu1 %v16574_v62  ;;  %v16611_v62 = vld [vmem:[#allocation11 + $0x1320] ss:$24 sps:$4 sm:$0xff]  }
 0x5c4   :  { %11687 = vmatpush1.bf16.msra.mxu0 %v16569_v22  ;;  %v16619_v22 = vld [vmem:[#allocation11 + $0x1354] ss:$24 sps:$4 sm:$0xff]  }
 0x5c5   :  { %11697 = vmatprep.subr.bf16.mxu0 %v16577_v63  ;;  %v16617_v63 = vld [vmem:[#allocation11 + $0x1350] ss:$24 sps:$4 sm:$0xff]  }
 0x5c6   :  { %11966 = vmatpush1.bf16.msra.mxu1 %v16572_v28  ;;  %v16620_v28 = vld [vmem:[#allocation11 + $0xc98] ss:$24 sps:$4 sm:$0xff]  }
 0x5c7   :  { %11689 = vmatmul.mubr.bf16.vlgmr.msra.gmra.mrb[28].mxu0 %v18334_v38  ;;  %11967 = vmatprep.subr.bf16.mxu1 %v16580_v41  ;;  %v16628_v41 = vld [vmem:[#allocation11 + $0xccc] ss:$24 sps:$4 sm:$0xff]  }
 0x5c8   :  { %11698 = vmatpush1.bf16.msra.mxu0 %v16575_v50  ;;  %11729 = vmatprep.mubr.bf16.mxu0 %v18336_v60  ;;  %v16623_v50 = vld [vmem:[#allocation11 + $0x1380] ss:$24 sps:$4 sm:$0xff]  }
 0x5c9   :  { %11699 = vmatprep.subr.bf16.mxu0 %v16583_v27  ;;  %v16631_v27 = vld [vmem:[#allocation11 + $0x13b4] ss:$24 sps:$4 sm:$0xff]  }
 0x5ca   :  { %11968 = vmatpush1.bf16.msra.mxu1 %v16578_v2  ;;  %v16626_v2 = vld [vmem:[#allocation11 + $0xcc8] ss:$24 sps:$4 sm:$0xff]  }
 0x5cb   :  { %11969 = vmatprep.subr.bf16.mxu1 %v16586_v6  ;;  %v16634_v6 = vld [vmem:[#allocation11 + $0xcfc] ss:$24 sps:$4 sm:$0xff]  }
 0x5cc   :  { %11700 = vmatpush1.bf16.msra.mxu0 %v16581_v35  ;;  %v16629_v35 = vld [vmem:[#allocation11 + $0x13b0] ss:$24 sps:$4 sm:$0xff]  }
 0x5cd   :  { %11701 = vmatprep.subr.bf16.mxu0 %v16589_v4  ;;  %v16637_v4 = vld [vmem:[#allocation11 + $0x13e4] ss:$24 sps:$4 sm:$0xff]  }
 0x5ce   :  { %11970 = vmatpush1.bf16.msra.mxu1 %v16584_v34  ;;  %v16632_v34 = vld [vmem:[#allocation11 + $0xcf8] ss:$24 sps:$4 sm:$0xff]  }
 0x5cf   :  { %11971 = vmatprep.subr.bf16.mxu1 %v16592_v48  ;;  %v16640_v48 = vld [vmem:[#allocation11 + $0xd2c] ss:$24 sps:$4 sm:$0xff]  }
 0x5d0   :  { %11702 = vmatpush1.bf16.msra.mxu0 %v16587_v58  ;;  %v16635_v58 = vld [vmem:[#allocation11 + $0x13e0] ss:$24 sps:$4 sm:$0xff]  }
 0x5d1   :  { %11703 = vmatprep.subr.bf16.mxu0 %v16595_v14  ;;  %v16643_v14 = vld [vmem:[#allocation11 + $0x1414] ss:$24 sps:$4 sm:$0xff]  }
 0x5d2   :  { %11972 = vmatpush1.bf16.msra.mxu1 %v16590_v9  ;;  %v16638_v9 = vld [vmem:[#allocation11 + $0xd28] ss:$24 sps:$4 sm:$0xff]  }
 0x5d3   :  { %11973 = vmatprep.subr.bf16.mxu1 %v16598_v61  ;;  %v16646_v61 = vld [vmem:[#allocation11 + $0xd5c] ss:$24 sps:$4 sm:$0xff]  }
 0x5d4   :  { %11704 = vmatpush1.bf16.msra.mxu0 %v16593_v15  ;;  %v16641_v15 = vld [vmem:[#allocation11 + $0x1410] ss:$24 sps:$4 sm:$0xff]  }
 0x5d5   :  { %11705 = vmatprep.subr.bf16.mxu0 %v16601_v39  ;;  %v16649_v39 = vld [vmem:[#allocation11 + $0x1444] ss:$24 sps:$4 sm:$0xff]  }
 0x5d6   :  { %11974 = vmatpush1.bf16.msra.mxu1 %v16596_v12  ;;  %v16644_v12 = vld [vmem:[#allocation11 + $0xd58] ss:$24 sps:$4 sm:$0xff]  }
 0x5d7   :  { %11984 = vmatprep.subr.bf16.mxu1 %v16604_v49  ;;  %v16652_v49 = vld [vmem:[#allocation11 + $0xd8c] ss:$24 sps:$4 sm:$0xff]  }
 0x5d8   :  { %11706 = vmatpush1.bf16.msra.mxu0 %v16599_v26  ;;  %v16647_v26 = vld [vmem:[#allocation11 + $0x1440] ss:$24 sps:$4 sm:$0xff]  }
 0x5d9   :  { %11976 = vmatmul.mubr.bf16.vlgmr.msra.gmra.mrb[52].mxu1 %v18268_v33  ;;  %11707 = vmatprep.subr.bf16.mxu0 %v16607_v23  ;;  %v16655_v23 = vld [vmem:[#allocation11 + $0x1474] ss:$24 sps:$4 sm:$0xff]  }
 0x5da   :  { %11985 = vmatpush1.bf16.msra.mxu1 %v16602_v31  ;;  %12016 = vmatprep.mubr.bf16.mxu1 %v18270_v29  ;;  %v16650_v31 = vld [vmem:[#allocation11 + $0xd88] ss:$24 sps:$4 sm:$0xff]  }
 0x5db   :  { %11986 = vmatprep.subr.bf16.mxu1 %v16610_v0  ;;  %v16658_v0 = vld [vmem:[#allocation11 + $0xdbc] ss:$24 sps:$4 sm:$0xff]  }
 0x5dc   :  { %11708 = vmatpush1.bf16.msra.mxu0 %v16605_v59  ;;  %v16653_v59 = vld [vmem:[#allocation11 + $0x1470] ss:$24 sps:$4 sm:$0xff]  }
 0x5dd   :  { %11709 = vmatprep.subr.bf16.mxu0 %v16613_v32  ;;  %v16661_v32 = vld [vmem:[#allocation11 + $0x14a4] ss:$24 sps:$4 sm:$0xff]  }
 0x5de   :  { %11987 = vmatpush1.bf16.msra.mxu1 %v16608_v52  ;;  %v16656_v52 = vld [vmem:[#allocation11 + $0xdb8] ss:$24 sps:$4 sm:$0xff]  }
 0x5df   :  { %11988 = vmatprep.subr.bf16.mxu1 %v16616_v10  ;;  %v16664_v10 = vld [vmem:[#allocation11 + $0xdec] ss:$24 sps:$4 sm:$0xff]  }
 0x5e0   :  { %11710 = vmatpush1.bf16.msra.mxu0 %v16611_v62  ;;  %v16659_v62 = vld [vmem:[#allocation11 + $0x14a0] ss:$24 sps:$4 sm:$0xff]  }
 0x5e1   :  { %11711 = vmatprep.subr.bf16.mxu0 %v16619_v22  ;;  %v16667_v22 = vld [vmem:[#allocation11 + $0x14d4] ss:$24 sps:$4 sm:$0xff]  }
 0x5e2   :  { %11989 = vmatpush1.bf16.msra.mxu1 %v16614_v44  ;;  %v16662_v44 = vld [vmem:[#allocation11 + $0xde8] ss:$24 sps:$4 sm:$0xff]  }
 0x5e3   :  { %11990 = vmatprep.subr.bf16.mxu1 %v16622_v47  ;;  %v16670_v47 = vld [vmem:[#allocation11 + $0xe1c] ss:$24 sps:$4 sm:$0xff]  }
 0x5e4   :  { %11712 = vmatpush1.bf16.msra.mxu0 %v16617_v63  ;;  %v16665_v63 = vld [vmem:[#allocation11 + $0x14d0] ss:$24 sps:$4 sm:$0xff]  }
 0x5e5   :  { %11713 = vmatprep.subr.bf16.mxu0 %v16625_v16  ;;  %v6211_v16 = vmax.f32 %v6193_v7, 0.0  ;;  %v16680_v7 = vld [vmem:[#allocation11 + $0xe78] ss:$24 sps:$4 sm:$0xff]  }
 0x5e6   :  { %11991 = vmatpush1.bf16.msra.mxu1 %v16620_v28  ;;  %v16673_v28 = vld [vmem:[#allocation11 + $0x1504] ss:$24 sps:$4 sm:$0xff]  }
 0x5e7   :  { %11992 = vmatprep.subr.bf16.mxu1 %v16628_v41  ;;  %v18518_v41 = vmax.f32 %v18156_v37, %v18158_v40  ;;  %v16677_v37 = vld [vmem:[#allocation11 + $0x1530] ss:$24 sps:$4 sm:$0xff]   ;;  %v16685_v40 = vld [vmem:[#allocation11 + $0x1564] ss:$24 sps:$4 sm:$0xff]  }
 0x5e8   :  { %11714 = vmatpush1.bf16.msra.mxu0 %v16623_v50 }
 0x5e9   :  { %11715 = vmatprep.subr.bf16.mxu0 %v16631_v27  ;;  %v6214_v50 = vmax.f32 %v18518_v41, 0.0  ;;  %v16668_v27 = vld [vmem:[#allocation11 + $0xe18] ss:$24 sps:$4 sm:$0xff]   ;;  %v16724_v41 = vld [vmem:[#allocation11 + $0xfcc] ss:$24 sps:$4 sm:$0xff]  }
 0x5ea   :  { %11993 = vmatpush1.bf16.msra.mxu1 %v16626_v2  ;;  %v16676_v2 = vld [vmem:[#allocation11 + $0xe4c] ss:$24 sps:$4 sm:$0xff]  }
 0x5eb   :  { %11994 = vmatprep.subr.bf16.mxu1 %v16634_v6  ;;  %v16671_v6 = vld [vmem:[#allocation11 + $0x1500] ss:$24 sps:$4 sm:$0xff]  }
 0x5ec   :  { %11716 = vmatpush1.bf16.msra.mxu0 %v16629_v35  ;;  %v18348_v35 = vpack.c.bf16 %v6211_v16, %v6211_v16  ;;  %v16721_v16 = vld [vmem:[#allocation11 + $0x1684] ss:$24 sps:$4 sm:$0xff]  }
 0x5ed   :  { %11717 = vmatprep.subr.bf16.mxu0 %v16637_v4  ;;  %v16679_v4 = vld [vmem:[#allocation11 + $0x1534] ss:$24 sps:$4 sm:$0xff]  }
 0x5ee   :  { %11995 = vmatpush1.bf16.msra.mxu1 %v16632_v34  ;;  %v18350_v34 = vpack.c.bf16 %v6214_v50, %v6214_v50  ;;  %v16719_v50 = vld [vmem:[#allocation11 + $0x1680] ss:$24 sps:$4 sm:$0xff]  }
 0x5ef   :  { %11996 = vmatprep.subr.bf16.mxu1 %v16640_v48  ;;  %v16688_v48 = vld [vmem:[#allocation11 + $0xeac] ss:$24 sps:$4 sm:$0xff]  }
 0x5f0   :  { %11718 = vmatpush1.bf16.msra.mxu0 %v16635_v58  ;;  %v16683_v58 = vld [vmem:[#allocation11 + $0x1560] ss:$24 sps:$4 sm:$0xff]  }
 0x5f1   :  { %11719 = vmatprep.subr.bf16.mxu0 %v16643_v14  ;;  %v16691_v14 = vld [vmem:[#allocation11 + $0x1594] ss:$24 sps:$4 sm:$0xff]  }
 0x5f2   :  { %11997 = vmatpush1.bf16.msra.mxu1 %v16638_v9  ;;  %v16686_v9 = vld [vmem:[#allocation11 + $0xea8] ss:$24 sps:$4 sm:$0xff]  }
 0x5f3   :  { %11998 = vmatprep.subr.bf16.mxu1 %v16646_v61  ;;  %v16694_v61 = vld [vmem:[#allocation11 + $0xedc] ss:$24 sps:$4 sm:$0xff]  }
 0x5f4   :  { %11720 = vmatpush1.bf16.msra.mxu0 %v16641_v15  ;;  %v16689_v15 = vld [vmem:[#allocation11 + $0x1590] ss:$24 sps:$4 sm:$0xff]  }
 0x5f5   :  { %11721 = vmatprep.subr.bf16.mxu0 %v16649_v39  ;;  %v16697_v39 = vld [vmem:[#allocation11 + $0x15c4] ss:$24 sps:$4 sm:$0xff]  }
 0x5f6   :  { %11999 = vmatpush1.bf16.msra.mxu1 %v16644_v12  ;;  %v16692_v12 = vld [vmem:[#allocation11 + $0xed8] ss:$24 sps:$4 sm:$0xff]  }
 0x5f7   :  { %12000 = vmatprep.subr.bf16.mxu1 %v16652_v49  ;;  %v16700_v49 = vld [vmem:[#allocation11 + $0xf0c] ss:$24 sps:$4 sm:$0xff]  }
 0x5f8   :  { %11722 = vmatpush1.bf16.msra.mxu0 %v16647_v26  ;;  %v16695_v26 = vld [vmem:[#allocation11 + $0x15c0] ss:$24 sps:$4 sm:$0xff]  }
 0x5f9   :  { %11723 = vmatprep.subr.bf16.mxu0 %v16655_v23  ;;  %v16703_v23 = vld [vmem:[#allocation11 + $0x15f4] ss:$24 sps:$4 sm:$0xff]  }
 0x5fa   :  { %12001 = vmatpush1.bf16.msra.mxu1 %v16650_v31  ;;  %v16698_v31 = vld [vmem:[#allocation11 + $0xf08] ss:$24 sps:$4 sm:$0xff]  }
 0x5fb   :  { %12002 = vmatprep.subr.bf16.mxu1 %v16658_v0  ;;  %v16706_v0 = vld [vmem:[#allocation11 + $0xf3c] ss:$24 sps:$4 sm:$0xff]  }
 0x5fc   :  { %11724 = vmatpush1.bf16.msra.mxu0 %v16653_v59  ;;  %v16701_v59 = vld [vmem:[#allocation11 + $0x15f0] ss:$24 sps:$4 sm:$0xff]  }
 0x5fd   :  { %11725 = vmatprep.subr.bf16.mxu0 %v16661_v32  ;;  %v16709_v32 = vld [vmem:[#allocation11 + $0x1624] ss:$24 sps:$4 sm:$0xff]  }
 0x5fe   :  { %12003 = vmatpush1.bf16.msra.mxu1 %v16656_v52  ;;  %v16704_v52 = vld [vmem:[#allocation11 + $0xf38] ss:$24 sps:$4 sm:$0xff]  }
 0x5ff   :  { %12004 = vmatprep.subr.bf16.mxu1 %v16664_v10  ;;  %v16712_v10 = vld [vmem:[#allocation11 + $0xf6c] ss:$24 sps:$4 sm:$0xff]  }
 0x600   :  { %11726 = vmatpush1.bf16.msra.mxu0 %v16659_v62  ;;  %v16707_v62 = vld [vmem:[#allocation11 + $0x1620] ss:$24 sps:$4 sm:$0xff]  }
 0x601   :  { %11727 = vmatprep.subr.bf16.mxu0 %v16667_v22  ;;  %v16715_v22 = vld [vmem:[#allocation11 + $0x1654] ss:$24 sps:$4 sm:$0xff]  }
 0x602   :  { %12005 = vmatpush1.bf16.msra.mxu1 %v16662_v44  ;;  %v16710_v44 = vld [vmem:[#allocation11 + $0xf68] ss:$24 sps:$4 sm:$0xff]  }
 0x603   :  { %12006 = vmatprep.subr.bf16.mxu1 %v16670_v47  ;;  %v16718_v47 = vld [vmem:[#allocation11 + $0xf9c] ss:$24 sps:$4 sm:$0xff]  }
 0x604   :  { %11728 = vmatpush1.bf16.msra.mxu0 %v16665_v63  ;;  %v16713_v63 = vld [vmem:[#allocation11 + $0x1650] ss:$24 sps:$4 sm:$0xff]  }
 0x605   :  { %11738 = vmatprep.subr.bf16.mxu0 %v16673_v28  ;;  %v16716_v28 = vld [vmem:[#allocation11 + $0xf98] ss:$24 sps:$4 sm:$0xff]  }
 0x606   :  { %12007 = vmatpush1.bf16.msra.mxu1 %v16668_v27  ;;  %v16727_v27 = vld [vmem:[#allocation11 + $0x16b4] ss:$24 sps:$4 sm:$0xff]  }
 0x607   :  { %11730 = vmatmul.mubr.bf16.vlgmr.msra.gmra.mrb[28].mxu0 %v18348_v35  ;;  %12008 = vmatprep.subr.bf16.mxu1 %v16676_v2  ;;  %v16722_v2 = vld [vmem:[#allocation11 + $0xfc8] ss:$24 sps:$4 sm:$0xff]  }
 0x608   :  { %11739 = vmatpush1.bf16.msra.mxu0 %v16671_v6  ;;  %11770 = vmatprep.mubr.bf16.mxu0 %v18350_v34  ;;  %v16730_v6 = vld [vmem:[#allocation11 + $0xffc] ss:$24 sps:$4 sm:$0xff]  }
 0x609   :  { %11740 = vmatprep.subr.bf16.mxu0 %v16679_v4  ;;  %v16725_v4 = vld [vmem:[#allocation11 + $0x16b0] ss:$24 sps:$4 sm:$0xff]  }
 0x60a   :  { %12009 = vmatpush1.bf16.msra.mxu1 %v16674_v8  ;;  %v16733_v8 = vld [vmem:[#allocation11 + $0x16e4] ss:$24 sps:$4 sm:$0xff]  }
 0x60b   :  { %12010 = vmatprep.subr.bf16.mxu1 %v16682_v25  ;;  %v16728_v25 = vld [vmem:[#allocation11 + $0xff8] ss:$24 sps:$4 sm:$0xff]  }
 0x60c   :  { %11741 = vmatpush1.bf16.msra.mxu0 %v16677_v37  ;;  %v16736_v37 = vld [vmem:[#allocation11 + $0x102c] ss:$24 sps:$4 sm:$0xff]  }
 0x60d   :  { %11742 = vmatprep.subr.bf16.mxu0 %v16685_v40  ;;  %v16731_v40 = vld [vmem:[#allocation11 + $0x16e0] ss:$24 sps:$4 sm:$0xff]  }
 0x60e   :  { %12011 = vmatpush1.bf16.msra.mxu1 %v16680_v7  ;;  %v16739_v7 = vld [vmem:[#allocation11 + $0x1714] ss:$24 sps:$4 sm:$0xff]  }
 0x60f   :  { %12012 = vmatprep.subr.bf16.mxu1 %v16688_v48  ;;  %v16734_v48 = vld [vmem:[#allocation11 + $0x1028] ss:$24 sps:$4 sm:$0xff]  }
 0x610   :  { %11743 = vmatpush1.bf16.msra.mxu0 %v16683_v58  ;;  %v16742_v58 = vld [vmem:[#allocation11 + $0x105c] ss:$24 sps:$4 sm:$0xff]  }
 0x611   :  { %11744 = vmatprep.subr.bf16.mxu0 %v16691_v14  ;;  %v16737_v14 = vld [vmem:[#allocation11 + $0x1710] ss:$24 sps:$4 sm:$0xff]  }
 0x612   :  { %12013 = vmatpush1.bf16.msra.mxu1 %v16686_v9  ;;  %v16745_v9 = vld [vmem:[#allocation11 + $0x1744] ss:$24 sps:$4 sm:$0xff]  }
 0x613   :  { %12014 = vmatprep.subr.bf16.mxu1 %v16694_v61  ;;  %v16740_v61 = vld [vmem:[#allocation11 + $0x1058] ss:$24 sps:$4 sm:$0xff]  }
 0x614   :  { %11745 = vmatpush1.bf16.msra.mxu0 %v16689_v15  ;;  %v16748_v15 = vld [vmem:[#allocation11 + $0x108c] ss:$24 sps:$4 sm:$0xff]  }
 0x615   :  { %11746 = vmatprep.subr.bf16.mxu0 %v16697_v39  ;;  %v16743_v39 = vld [vmem:[#allocation11 + $0x1740] ss:$24 sps:$4 sm:$0xff]  }
 0x616   :  { %12015 = vmatpush1.bf16.msra.mxu1 %v16692_v12  ;;  %v16751_v12 = vld [vmem:[#allocation11 + $0x1774] ss:$24 sps:$4 sm:$0xff]  }
 0x617   :  { %12025 = vmatprep.subr.bf16.mxu1 %v16700_v49  ;;  %v16746_v49 = vld [vmem:[#allocation11 + $0x1088] ss:$24 sps:$4 sm:$0xff]  }
 0x618   :  { %11747 = vmatpush1.bf16.msra.mxu0 %v16695_v26  ;;  %v16754_v26 = vld [vmem:[#allocation11 + $0x10bc] ss:$24 sps:$4 sm:$0xff]  }
 0x619   :  { %12017 = vmatmul.mubr.bf16.vlgmr.msra.gmra.mrb[52].mxu1 %v18302_v30  ;;  %11748 = vmatprep.subr.bf16.mxu0 %v16703_v23  ;;  %v16749_v23 = vld [vmem:[#allocation11 + $0x1770] ss:$24 sps:$4 sm:$0xff]  }
 0x61a   :  { %12026 = vmatpush1.bf16.msra.mxu1 %v16698_v31  ;;  %12057 = vmatprep.mubr.bf16.mxu1 %v18304_v36  ;;  %v16757_v31 = vld [vmem:[#allocation11 + $0x17a4] ss:$24 sps:$4 sm:$0xff]  }
 0x61b   :  { %12027 = vmatprep.subr.bf16.mxu1 %v16706_v0  ;;  %v16752_v0 = vld [vmem:[#allocation11 + $0x10b8] ss:$24 sps:$4 sm:$0xff]  }
 0x61c   :  { %11749 = vmatpush1.bf16.msra.mxu0 %v16701_v59  ;;  %v16760_v59 = vld [vmem:[#allocation11 + $0x10ec] ss:$24 sps:$4 sm:$0xff]  }
 0x61d   :  { %11750 = vmatprep.subr.bf16.mxu0 %v16709_v32  ;;  %v16755_v32 = vld [vmem:[#allocation11 + $0x17a0] ss:$24 sps:$4 sm:$0xff]  }
 0x61e   :  { %12028 = vmatpush1.bf16.msra.mxu1 %v16704_v52  ;;  %v16763_v52 = vld [vmem:[#allocation11 + $0x17d4] ss:$24 sps:$4 sm:$0xff]  }
 0x61f   :  { %12029 = vmatprep.subr.bf16.mxu1 %v16712_v10  ;;  %v16758_v10 = vld [vmem:[#allocation11 + $0x10e8] ss:$24 sps:$4 sm:$0xff]  }
 0x620   :  { %11751 = vmatpush1.bf16.msra.mxu0 %v16707_v62  ;;  %v16766_v62 = vld [vmem:[#allocation11 + $0x111c] ss:$24 sps:$4 sm:$0xff]  }
 0x621   :  { %11752 = vmatprep.subr.bf16.mxu0 %v16715_v22  ;;  %v16761_v22 = vld [vmem:[#allocation11 + $0x17d0] ss:$24 sps:$4 sm:$0xff]  }
 0x622   :  { %12030 = vmatpush1.bf16.msra.mxu1 %v16710_v44  ;;  %v18519_v44 = vmax.f32 %v18152_v13, %v18154_v19  ;;  %v16770_v13 = vld [vmem:[#allocation11 + $0x1148] ss:$24 sps:$4 sm:$0xff]   ;;  %v16778_v19 = vld [vmem:[#allocation11 + $0x117c] ss:$24 sps:$4 sm:$0xff]  }
 0x623   :  { %12031 = vmatprep.subr.bf16.mxu1 %v16718_v47 }
 0x624   :  { %11753 = vmatpush1.bf16.msra.mxu0 %v16713_v63  ;;  %v6213_v47 = vmax.f32 %v18519_v44, 0.0  ;;  %v16769_v63 = vld [vmem:[#allocation11 + $0x1804] ss:$24 sps:$4 sm:$0xff]   ;;  %v16815_v44 = vld [vmem:[#allocation11 + $0x1980] ss:$24 sps:$4 sm:$0xff]  }
 0x625   :  { %11754 = vmatprep.subr.bf16.mxu0 %v16721_v16  ;;  %v6216_v16 = vmax.f32 %v6198_v17, 0.0  ;;  %v16776_v17 = vld [vmem:[#allocation11 + $0x1178] ss:$24 sps:$4 sm:$0xff]  }
 0x626   :  { %12032 = vmatpush1.bf16.msra.mxu1 %v16716_v28  ;;  %v16764_v28 = vld [vmem:[#allocation11 + $0x1118] ss:$24 sps:$4 sm:$0xff]  }
 0x627   :  { %12033 = vmatprep.subr.bf16.mxu1 %v16724_v41  ;;  %v16772_v41 = vld [vmem:[#allocation11 + $0x114c] ss:$24 sps:$4 sm:$0xff]  }
 0x628   :  { %11755 = vmatpush1.bf16.msra.mxu0 %v16719_v50  ;;  %v16767_v50 = vld [vmem:[#allocation11 + $0x1800] ss:$24 sps:$4 sm:$0xff]  }
 0x629   :  { %11756 = vmatprep.subr.bf16.mxu0 %v16727_v27  ;;  %v18362_v27 = vpack.c.bf16 %v6213_v47, %v6213_v47  ;;  %v16823_v47 = vld [vmem:[#allocation11 + $0x19b4] ss:$24 sps:$4 sm:$0xff]  }
 0x62a   :  { %12034 = vmatpush1.bf16.msra.mxu1 %v16722_v2  ;;  %v16775_v2 = vld [vmem:[#allocation11 + $0x1834] ss:$24 sps:$4 sm:$0xff]  }
 0x62b   :  { %12035 = vmatprep.subr.bf16.mxu1 %v16730_v6  ;;  %v18364_v6 = vpack.c.bf16 %v6216_v16, %v6216_v16  ;;  %v16826_v16 = vld [vmem:[#allocation11 + $0x12fc] ss:$24 sps:$4 sm:$0xff]  }
 0x62c   :  { %11757 = vmatpush1.bf16.msra.mxu0 %v16725_v4  ;;  %v16784_v4 = vld [vmem:[#allocation11 + $0x11ac] ss:$24 sps:$4 sm:$0xff]  }
 0x62d   :  { %11758 = vmatprep.subr.bf16.mxu0 %v16733_v8  ;;  %v16779_v8 = vld [vmem:[#allocation11 + $0x1860] ss:$24 sps:$4 sm:$0xff]  }
 0x62e   :  { %12036 = vmatpush1.bf16.msra.mxu1 %v16728_v25  ;;  %v16787_v25 = vld [vmem:[#allocation11 + $0x1894] ss:$24 sps:$4 sm:$0xff]  }
 0x62f   :  { %12037 = vmatprep.subr.bf16.mxu1 %v16736_v37  ;;  %v16782_v37 = vld [vmem:[#allocation11 + $0x11a8] ss:$24 sps:$4 sm:$0xff]  }
 0x630   :  { %11759 = vmatpush1.bf16.msra.mxu0 %v16731_v40  ;;  %v16790_v40 = vld [vmem:[#allocation11 + $0x11dc] ss:$24 sps:$4 sm:$0xff]  }
 0x631   :  { %11760 = vmatprep.subr.bf16.mxu0 %v16739_v7  ;;  %v16785_v7 = vld [vmem:[#allocation11 + $0x1890] ss:$24 sps:$4 sm:$0xff]  }
 0x632   :  { %12038 = vmatpush1.bf16.msra.mxu1 %v16734_v48  ;;  %v16793_v48 = vld [vmem:[#allocation11 + $0x18c4] ss:$24 sps:$4 sm:$0xff]  }
 0x633   :  { %12039 = vmatprep.subr.bf16.mxu1 %v16742_v58  ;;  %v16788_v58 = vld [vmem:[#allocation11 + $0x11d8] ss:$24 sps:$4 sm:$0xff]  }
 0x634   :  { %11761 = vmatpush1.bf16.msra.mxu0 %v16737_v14  ;;  %v16796_v14 = vld [vmem:[#allocation11 + $0x120c] ss:$24 sps:$4 sm:$0xff]  }
 0x635   :  { %11762 = vmatprep.subr.bf16.mxu0 %v16745_v9  ;;  %v16791_v9 = vld [vmem:[#allocation11 + $0x18c0] ss:$24 sps:$4 sm:$0xff]  }
 0x636   :  { %12040 = vmatpush1.bf16.msra.mxu1 %v16740_v61  ;;  %v16799_v61 = vld [vmem:[#allocation11 + $0x18f4] ss:$24 sps:$4 sm:$0xff]  }
 0x637   :  { %12041 = vmatprep.subr.bf16.mxu1 %v16748_v15  ;;  %v16794_v15 = vld [vmem:[#allocation11 + $0x1208] ss:$24 sps:$4 sm:$0xff]  }
 0x638   :  { %11763 = vmatpush1.bf16.msra.mxu0 %v16743_v39  ;;  %v16802_v39 = vld [vmem:[#allocation11 + $0x123c] ss:$24 sps:$4 sm:$0xff]  }
 0x639   :  { %11764 = vmatprep.subr.bf16.mxu0 %v16751_v12  ;;  %v16797_v12 = vld [vmem:[#allocation11 + $0x18f0] ss:$24 sps:$4 sm:$0xff]  }
 0x63a   :  { %12042 = vmatpush1.bf16.msra.mxu1 %v16746_v49  ;;  %v16805_v49 = vld [vmem:[#allocation11 + $0x1924] ss:$24 sps:$4 sm:$0xff]  }
 0x63b   :  { %12043 = vmatprep.subr.bf16.mxu1 %v16754_v26  ;;  %v16800_v26 = vld [vmem:[#allocation11 + $0x1238] ss:$24 sps:$4 sm:$0xff]  }
 0x63c   :  { %11765 = vmatpush1.bf16.msra.mxu0 %v16749_v23  ;;  %v16808_v23 = vld [vmem:[#allocation11 + $0x126c] ss:$24 sps:$4 sm:$0xff]  }
 0x63d   :  { %11766 = vmatprep.subr.bf16.mxu0 %v16757_v31  ;;  %v16803_v31 = vld [vmem:[#allocation11 + $0x1920] ss:$24 sps:$4 sm:$0xff]  }
 0x63e   :  { %12044 = vmatpush1.bf16.msra.mxu1 %v16752_v0  ;;  %v16811_v0 = vld [vmem:[#allocation11 + $0x1954] ss:$24 sps:$4 sm:$0xff]  }
 0x63f   :  { %12045 = vmatprep.subr.bf16.mxu1 %v16760_v59  ;;  %v16806_v59 = vld [vmem:[#allocation11 + $0x1268] ss:$24 sps:$4 sm:$0xff]  }
 0x640   :  { %11767 = vmatpush1.bf16.msra.mxu0 %v16755_v32  ;;  %v16814_v32 = vld [vmem:[#allocation11 + $0x129c] ss:$24 sps:$4 sm:$0xff]  }
 0x641   :  { %11768 = vmatprep.subr.bf16.mxu0 %v16763_v52  ;;  %v16809_v52 = vld [vmem:[#allocation11 + $0x1950] ss:$24 sps:$4 sm:$0xff]  }
 0x642   :  { %12046 = vmatpush1.bf16.msra.mxu1 %v16758_v10  ;;  %v16817_v10 = vld [vmem:[#allocation11 + $0x1984] ss:$24 sps:$4 sm:$0xff]  }
 0x643   :  { %12047 = vmatprep.subr.bf16.mxu1 %v16766_v62  ;;  %v16812_v62 = vld [vmem:[#allocation11 + $0x1298] ss:$24 sps:$4 sm:$0xff]  }
 0x644   :  { %11769 = vmatpush1.bf16.msra.mxu0 %v16761_v22  ;;  %v16820_v22 = vld [vmem:[#allocation11 + $0x12cc] ss:$24 sps:$4 sm:$0xff]  }
 0x645   :  { %11779 = vmatprep.subr.bf16.mxu0 %v16769_v63  ;;  %v16818_v63 = vld [vmem:[#allocation11 + $0x12c8] ss:$24 sps:$4 sm:$0xff]  }
 0x646   :  { %12048 = vmatpush1.bf16.msra.mxu1 %v16764_v28  ;;  %v16821_v28 = vld [vmem:[#allocation11 + $0x19b0] ss:$24 sps:$4 sm:$0xff]  }
 0x647   :  { %11771 = vmatmul.mubr.bf16.vlgmr.msra.gmra.mrb[28].mxu0 %v18362_v27  ;;  %12049 = vmatprep.subr.bf16.mxu1 %v16772_v41  ;;  %v16829_v41 = vld [vmem:[#allocation11 + $0x19e4] ss:$24 sps:$4 sm:$0xff]  }
 0x648   :  { %11780 = vmatpush1.bf16.msra.mxu0 %v16767_v50  ;;  %11811 = vmatprep.mubr.bf16.mxu0 %v18364_v6  ;;  %v16824_v50 = vld [vmem:[#allocation11 + $0x12f8] ss:$24 sps:$4 sm:$0xff]  }
 0x649   :  { %11781 = vmatprep.subr.bf16.mxu0 %v16775_v2  ;;  %v16832_v2 = vld [vmem:[#allocation11 + $0x132c] ss:$24 sps:$4 sm:$0xff]  }
 0x64a   :  { %12050 = vmatpush1.bf16.msra.mxu1 %v16770_v13  ;;  %v16827_v13 = vld [vmem:[#allocation11 + $0x19e0] ss:$24 sps:$4 sm:$0xff]  }
 0x64b   :  { %12051 = vmatprep.subr.bf16.mxu1 %v16778_v19  ;;  %v16835_v19 = vld [vmem:[#allocation11 + $0x1a14] ss:$24 sps:$4 sm:$0xff]  }
 0x64c   :  { %11782 = vmatpush1.bf16.msra.mxu0 %v16773_v53  ;;  %v16830_v53 = vld [vmem:[#allocation11 + $0x1328] ss:$24 sps:$4 sm:$0xff]  }
 0x64d   :  { %11783 = vmatprep.subr.bf16.mxu0 %v16781_v21  ;;  %v16838_v21 = vld [vmem:[#allocation11 + $0x135c] ss:$24 sps:$4 sm:$0xff]  }
 0x64e   :  { %12052 = vmatpush1.bf16.msra.mxu1 %v16776_v17  ;;  %v16833_v17 = vld [vmem:[#allocation11 + $0x1a10] ss:$24 sps:$4 sm:$0xff]  }
 0x64f   :  { %12053 = vmatprep.subr.bf16.mxu1 %v16784_v4  ;;  %v16841_v4 = vld [vmem:[#allocation11 + $0x1a44] ss:$24 sps:$4 sm:$0xff]  }
 0x650   :  { %11784 = vmatpush1.bf16.msra.mxu0 %v16779_v8  ;;  %v16836_v8 = vld [vmem:[#allocation11 + $0x1358] ss:$24 sps:$4 sm:$0xff]  }
 0x651   :  { %11785 = vmatprep.subr.bf16.mxu0 %v16787_v25  ;;  %v16844_v25 = vld [vmem:[#allocation11 + $0x138c] ss:$24 sps:$4 sm:$0xff]  }
 0x652   :  { %12054 = vmatpush1.bf16.msra.mxu1 %v16782_v37  ;;  %v16839_v37 = vld [vmem:[#allocation11 + $0x1a40] ss:$24 sps:$4 sm:$0xff]  }
 0x653   :  { %12055 = vmatprep.subr.bf16.mxu1 %v16790_v40  ;;  %v16847_v40 = vld [vmem:[#allocation11 + $0x1a74] ss:$24 sps:$4 sm:$0xff]  }
 0x654   :  { %11786 = vmatpush1.bf16.msra.mxu0 %v16785_v7  ;;  %v16842_v7 = vld [vmem:[#allocation11 + $0x1388] ss:$24 sps:$4 sm:$0xff]  }
 0x655   :  { %11787 = vmatprep.subr.bf16.mxu0 %v16793_v48  ;;  %v16850_v48 = vld [vmem:[#allocation11 + $0x13bc] ss:$24 sps:$4 sm:$0xff]  }
 0x656   :  { %12056 = vmatpush1.bf16.msra.mxu1 %v16788_v58  ;;  %v16845_v58 = vld [vmem:[#allocation11 + $0x1a70] ss:$24 sps:$4 sm:$0xff]  }
 0x657   :  { %12066 = vmatprep.subr.bf16.mxu1 %v16796_v14  ;;  %v16853_v14 = vld [vmem:[#allocation11 + $0x1aa4] ss:$24 sps:$4 sm:$0xff]  }
 0x658   :  { %11788 = vmatpush1.bf16.msra.mxu0 %v16791_v9  ;;  %v16848_v9 = vld [vmem:[#allocation11 + $0x13b8] ss:$24 sps:$4 sm:$0xff]  }
 0x659   :  { %12058 = vmatmul.mubr.bf16.vlgmr.msra.gmra.mrb[52].mxu1 %v18334_v38  ;;  %11789 = vmatprep.subr.bf16.mxu0 %v16799_v61  ;;  %v16856_v61 = vld [vmem:[#allocation11 + $0x13ec] ss:$24 sps:$4 sm:$0xff]  }
 0x65a   :  { %12067 = vmatpush1.bf16.msra.mxu1 %v16794_v15  ;;  %12098 = vmatprep.mubr.bf16.mxu1 %v18336_v60  ;;  %v16851_v15 = vld [vmem:[#allocation11 + $0x1aa0] ss:$24 sps:$4 sm:$0xff]  }
 0x65b   :  { %12068 = vmatprep.subr.bf16.mxu1 %v16802_v39  ;;  %v16859_v39 = vld [vmem:[#allocation11 + $0x1ad4] ss:$24 sps:$4 sm:$0xff]  }
 0x65c   :  { %11790 = vmatpush1.bf16.msra.mxu0 %v16797_v12  ;;  %v16854_v12 = vld [vmem:[#allocation11 + $0x13e8] ss:$24 sps:$4 sm:$0xff]  }
 0x65d   :  { %11791 = vmatprep.subr.bf16.mxu0 %v16805_v49  ;;  %v16862_v49 = vld [vmem:[#allocation11 + $0x141c] ss:$24 sps:$4 sm:$0xff]  }
 0x65e   :  { %12069 = vmatpush1.bf16.msra.mxu1 %v16800_v26  ;;  %v16857_v26 = vld [vmem:[#allocation11 + $0x1ad0] ss:$24 sps:$4 sm:$0xff]  }
 0x65f   :  { %12070 = vmatprep.subr.bf16.mxu1 %v16808_v23  ;;  %v6215_v23 = vmax.f32 %v6197_v46, 0.0  ;;  %v16872_v46 = vld [vmem:[#allocation11 + $0x1478] ss:$24 sps:$4 sm:$0xff]  }
 0x660   :  { %11792 = vmatpush1.bf16.msra.mxu0 %v16803_v31  ;;  %v16865_v31 = vld [vmem:[#allocation11 + $0x14] ss:$24 sps:$4 sm:$0xff]  }
 0x661   :  { %11793 = vmatprep.subr.bf16.mxu0 %v16811_v0  ;;  %v16860_v0 = vld [vmem:[#allocation11 + $0x1418] ss:$24 sps:$4 sm:$0xff]  }
 0x662   :  { %12071 = vmatpush1.bf16.msra.mxu1 %v16806_v59  ;;  %v16868_v59 = vld [vmem:[#allocation11 + $0x144c] ss:$24 sps:$4 sm:$0xff]  }
 0x663   :  { %12072 = vmatprep.subr.bf16.mxu1 %v16814_v32  ;;  %v16863_v32 = vld [vmem:[#allocation11 + $0x10] ss:$24 sps:$4 sm:$0xff]  }
 0x664   :  { %11794 = vmatpush1.bf16.msra.mxu0 %v16809_v52  ;;  %v18373_v52 = vpack.c.bf16 %v6215_v23, %v6215_v23  ;;  %v16925_v23 = vld [vmem:[#allocation11 + $0x1f4] ss:$24 sps:$4 sm:$0xff]  }
 0x665   :  { %11795 = vmatprep.subr.bf16.mxu0 %v16817_v10  ;;  %v16871_v10 = vld [vmem:[#allocation11 + $0x44] ss:$24 sps:$4 sm:$0xff]  }
 0x666   :  { %12073 = vmatpush1.bf16.msra.mxu1 %v16812_v62  ;;  %v16866_v62 = vld [vmem:[#allocation11 + $0x1448] ss:$24 sps:$4 sm:$0xff]  }
 0x667   :  { %12074 = vmatprep.subr.bf16.mxu1 %v16820_v22  ;;  %v16874_v22 = vld [vmem:[#allocation11 + $0x147c] ss:$24 sps:$4 sm:$0xff]  }
 0x668   :  { %11796 = vmatpush1.bf16.msra.mxu0 %v16815_v44  ;;  %v16880_v44 = vld [vmem:[#allocation11 + $0x14ac] ss:$24 sps:$4 sm:$0xff]  }
 0x669   :  { %11797 = vmatprep.subr.bf16.mxu0 %v16823_v47  ;;  %v16875_v47 = vld [vmem:[#allocation11 + $0x70] ss:$24 sps:$4 sm:$0xff]  }
 0x66a   :  { %12075 = vmatpush1.bf16.msra.mxu1 %v16818_v63  ;;  %v16883_v63 = vld [vmem:[#allocation11 + $0xa4] ss:$24 sps:$4 sm:$0xff]  }
 0x66b   :  { %12076 = vmatprep.subr.bf16.mxu1 %v16826_v16  ;;  %v16878_v16 = vld [vmem:[#allocation11 + $0x14a8] ss:$24 sps:$4 sm:$0xff]  }
 0x66c   :  { %11798 = vmatpush1.bf16.msra.mxu0 %v16821_v28  ;;  %v16886_v28 = vld [vmem:[#allocation11 + $0x14dc] ss:$24 sps:$4 sm:$0xff]  }
 0x66d   :  { %11799 = vmatprep.subr.bf16.mxu0 %v16829_v41  ;;  %v16881_v41 = vld [vmem:[#allocation11 + $0xa0] ss:$24 sps:$4 sm:$0xff]  }
 0x66e   :  { %12077 = vmatpush1.bf16.msra.mxu1 %v16824_v50  ;;  %v16889_v50 = vld [vmem:[#allocation11 + $0xd4] ss:$24 sps:$4 sm:$0xff]  }
 0x66f   :  { %12078 = vmatprep.subr.bf16.mxu1 %v16832_v2  ;;  %v16892_v2 = vld [vmem:[#allocation11 + $0x150c] ss:$24 sps:$4 sm:$0xff]  }
 0x670   :  { %11800 = vmatpush1.bf16.msra.mxu0 %v16827_v13  ;;  %v16887_v13 = vld [vmem:[#allocation11 + $0xd0] ss:$24 sps:$4 sm:$0xff]  }
 0x671   :  { %11801 = vmatprep.subr.bf16.mxu0 %v16835_v19  ;;  %v16895_v19 = vld [vmem:[#allocation11 + $0x104] ss:$24 sps:$4 sm:$0xff]  }
 0x672   :  { %12079 = vmatpush1.bf16.msra.mxu1 %v16830_v53  ;;  %v16890_v53 = vld [vmem:[#allocation11 + $0x1508] ss:$24 sps:$4 sm:$0xff]  }
 0x673   :  { %12080 = vmatprep.subr.bf16.mxu1 %v16838_v21  ;;  %v16898_v21 = vld [vmem:[#allocation11 + $0x153c] ss:$24 sps:$4 sm:$0xff]  }
 0x674   :  { %11802 = vmatpush1.bf16.msra.mxu0 %v16833_v17  ;;  %v16893_v17 = vld [vmem:[#allocation11 + $0x100] ss:$24 sps:$4 sm:$0xff]  }
 0x675   :  { %11803 = vmatprep.subr.bf16.mxu0 %v16841_v4  ;;  %v16901_v4 = vld [vmem:[#allocation11 + $0x134] ss:$24 sps:$4 sm:$0xff]  }
 0x676   :  { %12081 = vmatpush1.bf16.msra.mxu1 %v16836_v8  ;;  %v16896_v8 = vld [vmem:[#allocation11 + $0x1538] ss:$24 sps:$4 sm:$0xff]  }
 0x677   :  { %12082 = vmatprep.subr.bf16.mxu1 %v16844_v25  ;;  %v16904_v25 = vld [vmem:[#allocation11 + $0x156c] ss:$24 sps:$4 sm:$0xff]  }
 0x678   :  { %11804 = vmatpush1.bf16.msra.mxu0 %v16839_v37  ;;  %v16899_v37 = vld [vmem:[#allocation11 + $0x130] ss:$24 sps:$4 sm:$0xff]  }
 0x679   :  { %11805 = vmatprep.subr.bf16.mxu0 %v16847_v40  ;;  %v16907_v40 = vld [vmem:[#allocation11 + $0x164] ss:$24 sps:$4 sm:$0xff]  }
 0x67a   :  { %12083 = vmatpush1.bf16.msra.mxu1 %v16842_v7  ;;  %v16902_v7 = vld [vmem:[#allocation11 + $0x1568] ss:$24 sps:$4 sm:$0xff]  }
 0x67b   :  { %12084 = vmatprep.subr.bf16.mxu1 %v16850_v48  ;;  %v16910_v48 = vld [vmem:[#allocation11 + $0x159c] ss:$24 sps:$4 sm:$0xff]  }
 0x67c   :  { %11806 = vmatpush1.bf16.msra.mxu0 %v16845_v58  ;;  %v16905_v58 = vld [vmem:[#allocation11 + $0x160] ss:$24 sps:$4 sm:$0xff]  }
 0x67d   :  { %11807 = vmatprep.subr.bf16.mxu0 %v16853_v14  ;;  %v16913_v14 = vld [vmem:[#allocation11 + $0x194] ss:$24 sps:$4 sm:$0xff]  }
 0x67e   :  { %12085 = vmatpush1.bf16.msra.mxu1 %v16848_v9  ;;  %v16908_v9 = vld [vmem:[#allocation11 + $0x1598] ss:$24 sps:$4 sm:$0xff]  }
 0x67f   :  { %12086 = vmatprep.subr.bf16.mxu1 %v16856_v61  ;;  %v16916_v61 = vld [vmem:[#allocation11 + $0x15cc] ss:$24 sps:$4 sm:$0xff]  }
 0x680   :  { %11808 = vmatpush1.bf16.msra.mxu0 %v16851_v15  ;;  %v16911_v15 = vld [vmem:[#allocation11 + $0x190] ss:$24 sps:$4 sm:$0xff]  }
 0x681   :  { %11809 = vmatprep.subr.bf16.mxu0 %v16859_v39  ;;  %v16919_v39 = vld [vmem:[#allocation11 + $0x1c4] ss:$24 sps:$4 sm:$0xff]  }
 0x682   :  { %12087 = vmatpush1.bf16.msra.mxu1 %v16854_v12  ;;  %v16914_v12 = vld [vmem:[#allocation11 + $0x15c8] ss:$24 sps:$4 sm:$0xff]  }
 0x683   :  { %12088 = vmatprep.subr.bf16.mxu1 %v16862_v49  ;;  %v16922_v49 = vld [vmem:[#allocation11 + $0x15fc] ss:$24 sps:$4 sm:$0xff]  }
 0x684   :  { %11810 = vmatpush1.bf16.msra.mxu0 %v16857_v26  ;;  %v16917_v26 = vld [vmem:[#allocation11 + $0x1c0] ss:$24 sps:$4 sm:$0xff]  }
 0x685   :  { %12189 = vmatprep.subr.bf16.mxu0 %v16865_v31  ;;  %v16920_v31 = vld [vmem:[#allocation11 + $0x15f8] ss:$24 sps:$4 sm:$0xff]  }
 0x686   :  { %12089 = vmatpush1.bf16.msra.mxu1 %v16860_v0  ;;  %v16928_v0 = vld [vmem:[#allocation11 + $0x162c] ss:$24 sps:$4 sm:$0xff]  }
 0x687   :  { %11812 = vmatmul.mubr.bf16.vlgmr.msra.gmra.mrb[28].mxu0 %v18373_v52  ;;  %12090 = vmatprep.subr.bf16.mxu1 %v16868_v59  ;;  %v16923_v59 = vld [vmem:[#allocation11 + $0x1f0] ss:$24 sps:$4 sm:$0xff]  }
 0x688   :  { %12190 = vmatpush1.bf16.msra.mxu0 %v16863_v32  ;;  %12221 = vmatprep.mubr.bf16.mxu0 %v18188_v45  ;;  %v16884_v45 = vld [vmem:[#allocation11 + $0x14d8] ss:$24 sps:$4 sm:$0xff]   ;;  %v16931_v32 = vld [vmem:[#allocation11 + $0x224] ss:$24 sps:$4 sm:$0xff]  }
 0x689   :  { %12191 = vmatprep.subr.bf16.mxu0 %v16871_v10  ;;  %v16926_v10 = vld [vmem:[#allocation11 + $0x1628] ss:$24 sps:$4 sm:$0xff]  }
 0x68a   :  { %12091 = vmatpush1.bf16.msra.mxu1 %v16866_v62  ;;  %v16934_v62 = vld [vmem:[#allocation11 + $0x165c] ss:$24 sps:$4 sm:$0xff]  }
 0x68b   :  { %12092 = vmatprep.subr.bf16.mxu1 %v16874_v22  ;;  %v16929_v22 = vld [vmem:[#allocation11 + $0x220] ss:$24 sps:$4 sm:$0xff]  }
 0x68c   :  { %12192 = vmatpush1.bf16.msra.mxu0 %v16869_v18  ;;  %v16937_v18 = vld [vmem:[#allocation11 + $0x254] ss:$24 sps:$4 sm:$0xff]  }
 0x68d   :  { %12193 = vmatprep.subr.bf16.mxu0 %v16877_v24  ;;  %v16932_v24 = vld [vmem:[#allocation11 + $0x1658] ss:$24 sps:$4 sm:$0xff]  }
 0x68e   :  { %12093 = vmatpush1.bf16.msra.mxu1 %v16872_v46  ;;  %v16940_v46 = vld [vmem:[#allocation11 + $0x168c] ss:$24 sps:$4 sm:$0xff]  }
 0x68f   :  { %12094 = vmatprep.subr.bf16.mxu1 %v16880_v44  ;;  %v16935_v44 = vld [vmem:[#allocation11 + $0x250] ss:$24 sps:$4 sm:$0xff]  }
 0x690   :  { %12194 = vmatpush1.bf16.msra.mxu0 %v16875_v47  ;;  %v16943_v47 = vld [vmem:[#allocation11 + $0x284] ss:$24 sps:$4 sm:$0xff]  }
 0x691   :  { %12195 = vmatprep.subr.bf16.mxu0 %v16883_v63  ;;  %v16938_v63 = vld [vmem:[#allocation11 + $0x1688] ss:$24 sps:$4 sm:$0xff]  }
 0x692   :  { %12095 = vmatpush1.bf16.msra.mxu1 %v16878_v16  ;;  %v16946_v16 = vld [vmem:[#allocation11 + $0x16bc] ss:$24 sps:$4 sm:$0xff]  }
 0x693   :  { %12096 = vmatprep.subr.bf16.mxu1 %v16886_v28  ;;  %v16941_v28 = vld [vmem:[#allocation11 + $0x280] ss:$24 sps:$4 sm:$0xff]  }
 0x694   :  { %12196 = vmatpush1.bf16.msra.mxu0 %v16881_v41  ;;  %v16949_v41 = vld [vmem:[#allocation11 + $0x2b4] ss:$24 sps:$4 sm:$0xff]  }
 0x695   :  { %12197 = vmatprep.subr.bf16.mxu0 %v16889_v50  ;;  %v16944_v50 = vld [vmem:[#allocation11 + $0x16b8] ss:$24 sps:$4 sm:$0xff]  }
 0x696   :  { %12097 = vmatpush1.bf16.msra.mxu1 %v16884_v45  ;;  %v16952_v45 = vld [vmem:[#allocation11 + $0x16ec] ss:$24 sps:$4 sm:$0xff]  }
 0x697   :  { %12107 = vmatprep.subr.bf16.mxu1 %v16892_v2  ;;  %v16947_v2 = vld [vmem:[#allocation11 + $0x2b0] ss:$24 sps:$4 sm:$0xff]  }
 0x698   :  { %12198 = vmatpush1.bf16.msra.mxu0 %v16887_v13  ;;  %v16955_v13 = vld [vmem:[#allocation11 + $0x2e4] ss:$24 sps:$4 sm:$0xff]  }
 0x699   :  { %12099 = vmatmul.mubr.bf16.vlgmr.msra.gmra.mrb[52].mxu1 %v18348_v35  ;;  %12199 = vmatprep.subr.bf16.mxu0 %v16895_v19  ;;  %v16950_v19 = vld [vmem:[#allocation11 + $0x16e8] ss:$24 sps:$4 sm:$0xff]  }
 0x69a   :  { %12108 = vmatpush1.bf16.msra.mxu1 %v16890_v53  ;;  %12139 = vmatprep.mubr.bf16.mxu1 %v18350_v34  ;;  %v16958_v53 = vld [vmem:[#allocation11 + $0x171c] ss:$24 sps:$4 sm:$0xff]  }
 0x69b   :  { %12109 = vmatprep.subr.bf16.mxu1 %v16898_v21  ;;  %v16953_v21 = vld [vmem:[#allocation11 + $0x2e0] ss:$24 sps:$4 sm:$0xff]  }
 0x69c   :  { %12200 = vmatpush1.bf16.msra.mxu0 %v16893_v17  ;;  %v16961_v17 = vld [vmem:[#allocation11 + $0x314] ss:$24 sps:$4 sm:$0xff]  }
 0x69d   :  { %12201 = vmatprep.subr.bf16.mxu0 %v16901_v4  ;;  %v16956_v4 = vld [vmem:[#allocation11 + $0x1718] ss:$24 sps:$4 sm:$0xff]  }
 0x69e   :  { %12110 = vmatpush1.bf16.msra.mxu1 %v16896_v8  ;;  %v16964_v8 = vld [vmem:[#allocation11 + $0x174c] ss:$24 sps:$4 sm:$0xff]  }
 0x69f   :  { %12111 = vmatprep.subr.bf16.mxu1 %v16904_v25  ;;  %v16959_v25 = vld [vmem:[#allocation11 + $0x310] ss:$24 sps:$4 sm:$0xff]  }
 0x6a0   :  { %12202 = vmatpush1.bf16.msra.mxu0 %v16899_v37  ;;  %v16967_v37 = vld [vmem:[#allocation11 + $0x344] ss:$24 sps:$4 sm:$0xff]  }
 0x6a1   :  { %12203 = vmatprep.subr.bf16.mxu0 %v16907_v40  ;;  %v16962_v40 = vld [vmem:[#allocation11 + $0x1748] ss:$24 sps:$4 sm:$0xff]  }
 0x6a2   :  { %12112 = vmatpush1.bf16.msra.mxu1 %v16902_v7  ;;  %v16970_v7 = vld [vmem:[#allocation11 + $0x177c] ss:$24 sps:$4 sm:$0xff]  }
 0x6a3   :  { %12113 = vmatprep.subr.bf16.mxu1 %v16910_v48  ;;  %v16965_v48 = vld [vmem:[#allocation11 + $0x340] ss:$24 sps:$4 sm:$0xff]  }
 0x6a4   :  { %12204 = vmatpush1.bf16.msra.mxu0 %v16905_v58  ;;  %v16973_v58 = vld [vmem:[#allocation11 + $0x374] ss:$24 sps:$4 sm:$0xff]  }
 0x6a5   :  { %12205 = vmatprep.subr.bf16.mxu0 %v16913_v14  ;;  %v16968_v14 = vld [vmem:[#allocation11 + $0x1778] ss:$24 sps:$4 sm:$0xff]  }
 0x6a6   :  { %12114 = vmatpush1.bf16.msra.mxu1 %v16908_v9  ;;  %v16976_v9 = vld [vmem:[#allocation11 + $0x17ac] ss:$24 sps:$4 sm:$0xff]  }
 0x6a7   :  { %12115 = vmatprep.subr.bf16.mxu1 %v16916_v61  ;;  %v16971_v61 = vld [vmem:[#allocation11 + $0x370] ss:$24 sps:$4 sm:$0xff]  }
 0x6a8   :  { %12206 = vmatpush1.bf16.msra.mxu0 %v16911_v15  ;;  %v16979_v15 = vld [vmem:[#allocation11 + $0x3a4] ss:$24 sps:$4 sm:$0xff]  }
 0x6a9   :  { %12207 = vmatprep.subr.bf16.mxu0 %v16919_v39  ;;  %v16974_v39 = vld [vmem:[#allocation11 + $0x17a8] ss:$24 sps:$4 sm:$0xff]  }
 0x6aa   :  { %12116 = vmatpush1.bf16.msra.mxu1 %v16914_v12  ;;  %v16977_v12 = vld [vmem:[#allocation11 + $0x3a0] ss:$24 sps:$4 sm:$0xff]  }
 0x6ab   :  { %12117 = vmatprep.subr.bf16.mxu1 %v16922_v49  ;;  %v16985_v49 = vld [vmem:[#allocation11 + $0x3d4] ss:$24 sps:$4 sm:$0xff]  }
 0x6ac   :  { %12208 = vmatpush1.bf16.msra.mxu0 %v16917_v26  ;;  %v16988_v26 = vld [vmem:[#allocation11 + $0x180c] ss:$24 sps:$4 sm:$0xff]  }
 0x6ad   :  { %12209 = vmatprep.subr.bf16.mxu0 %v16925_v23  ;;  %v16983_v23 = vld [vmem:[#allocation11 + $0x3d0] ss:$24 sps:$4 sm:$0xff]  }
 0x6ae   :  { %12118 = vmatpush1.bf16.msra.mxu1 %v16920_v31  ;;  %v16991_v31 = vld [vmem:[#allocation11 + $0x404] ss:$24 sps:$4 sm:$0xff]  }
 0x6af   :  { %12119 = vmatprep.subr.bf16.mxu1 %v16928_v0  ;;  %v16986_v0 = vld [vmem:[#allocation11 + $0x1808] ss:$24 sps:$4 sm:$0xff]  }
 0x6b0   :  { %12210 = vmatpush1.bf16.msra.mxu0 %v16923_v59  ;;  %v16994_v59 = vld [vmem:[#allocation11 + $0x183c] ss:$24 sps:$4 sm:$0xff]  }
 0x6b1   :  { %12211 = vmatprep.subr.bf16.mxu0 %v16931_v32  ;;  %v16989_v32 = vld [vmem:[#allocation11 + $0x400] ss:$24 sps:$4 sm:$0xff]  }
 0x6b2   :  { %12120 = vmatpush1.bf16.msra.mxu1 %v16926_v10  ;;  %v16997_v10 = vld [vmem:[#allocation11 + $0x434] ss:$24 sps:$4 sm:$0xff]  }
 0x6b3   :  { %12121 = vmatprep.subr.bf16.mxu1 %v16934_v62  ;;  %v16992_v62 = vld [vmem:[#allocation11 + $0x1838] ss:$24 sps:$4 sm:$0xff]  }
 0x6b4   :  { %12212 = vmatpush1.bf16.msra.mxu0 %v16929_v22  ;;  %v17000_v22 = vld [vmem:[#allocation11 + $0x186c] ss:$24 sps:$4 sm:$0xff]  }
 0x6b5   :  { %12213 = vmatprep.subr.bf16.mxu0 %v16937_v18  ;;  %v16995_v18 = vld [vmem:[#allocation11 + $0x430] ss:$24 sps:$4 sm:$0xff]  }
 0x6b6   :  { %12122 = vmatpush1.bf16.msra.mxu1 %v16932_v24  ;;  %v17003_v24 = vld [vmem:[#allocation11 + $0x464] ss:$24 sps:$4 sm:$0xff]  }
 0x6b7   :  { %12123 = vmatprep.subr.bf16.mxu1 %v16940_v46  ;;  %v16998_v46 = vld [vmem:[#allocation11 + $0x1868] ss:$24 sps:$4 sm:$0xff]  }
 0x6b8   :  { %12214 = vmatpush1.bf16.msra.mxu0 %v16935_v44  ;;  %v17006_v44 = vld [vmem:[#allocation11 + $0x189c] ss:$24 sps:$4 sm:$0xff]  }
 0x6b9   :  { %12215 = vmatprep.subr.bf16.mxu0 %v16943_v47  ;;  %v17001_v47 = vld [vmem:[#allocation11 + $0x460] ss:$24 sps:$4 sm:$0xff]  }
 0x6ba   :  { %12124 = vmatpush1.bf16.msra.mxu1 %v16938_v63  ;;  %v17009_v63 = vld [vmem:[#allocation11 + $0x494] ss:$24 sps:$4 sm:$0xff]  }
 0x6bb   :  { %12125 = vmatprep.subr.bf16.mxu1 %v16946_v16  ;;  %v17004_v16 = vld [vmem:[#allocation11 + $0x1898] ss:$24 sps:$4 sm:$0xff]  }
 0x6bc   :  { %12216 = vmatpush1.bf16.msra.mxu0 %v16941_v28  ;;  %v17012_v28 = vld [vmem:[#allocation11 + $0x18cc] ss:$24 sps:$4 sm:$0xff]  }
 0x6bd   :  { %12217 = vmatprep.subr.bf16.mxu0 %v16949_v41  ;;  %v17007_v41 = vld [vmem:[#allocation11 + $0x490] ss:$24 sps:$4 sm:$0xff]  }
 0x6be   :  { %12126 = vmatpush1.bf16.msra.mxu1 %v16944_v50  ;;  %v17015_v50 = vld [vmem:[#allocation11 + $0x4c4] ss:$24 sps:$4 sm:$0xff]  }
 0x6bf   :  { %12127 = vmatprep.subr.bf16.mxu1 %v16952_v45  ;;  %v17010_v45 = vld [vmem:[#allocation11 + $0x18c8] ss:$24 sps:$4 sm:$0xff]  }
 0x6c0   :  { %12218 = vmatpush1.bf16.msra.mxu0 %v16947_v2  ;;  %v17018_v2 = vld [vmem:[#allocation11 + $0x18fc] ss:$24 sps:$4 sm:$0xff]  }
 0x6c1   :  { %12219 = vmatprep.subr.bf16.mxu0 %v16955_v13  ;;  %v17013_v13 = vld [vmem:[#allocation11 + $0x4c0] ss:$24 sps:$4 sm:$0xff]  }
 0x6c2   :  { %12128 = vmatpush1.bf16.msra.mxu1 %v16950_v19  ;;  %v17021_v19 = vld [vmem:[#allocation11 + $0x4f4] ss:$24 sps:$4 sm:$0xff]  }
 0x6c3   :  { %12129 = vmatprep.subr.bf16.mxu1 %v16958_v53  ;;  %v17016_v53 = vld [vmem:[#allocation11 + $0x18f8] ss:$24 sps:$4 sm:$0xff]  }
 0x6c4   :  { %12220 = vmatpush1.bf16.msra.mxu0 %v16953_v21  ;;  %v17024_v21 = vld [vmem:[#allocation11 + $0x192c] ss:$24 sps:$4 sm:$0xff]  }
 0x6c5   :  { %12230 = vmatprep.subr.bf16.mxu0 %v16961_v17  ;;  %v17019_v17 = vld [vmem:[#allocation11 + $0x4f0] ss:$24 sps:$4 sm:$0xff]  }
 0x6c6   :  { %12130 = vmatpush1.bf16.msra.mxu1 %v16956_v4  ;;  %v17027_v4 = vld [vmem:[#allocation11 + $0x524] ss:$24 sps:$4 sm:$0xff]  }
 0x6c7   :  { %12222 = vmatmul.mubr.bf16.vlgmr.msra.gmra.mrb[32].mxu0 %v18190_v56  ;;  %12131 = vmatprep.subr.bf16.mxu1 %v16964_v8  ;;  %v16982_v56 = vld [vmem:[#allocation11 + $0x17dc] ss:$24 sps:$4 sm:$0xff]   ;;  %v17022_v8 = vld [vmem:[#allocation11 + $0x1928] ss:$24 sps:$4 sm:$0xff]  }
 0x6c8   :  { %12231 = vmatpush1.bf16.msra.mxu0 %v16959_v25  ;;  %12262 = vmatprep.mubr.bf16.mxu0 %v18192_v57  ;;  %v16980_v57 = vld [vmem:[#allocation11 + $0x17d8] ss:$24 sps:$4 sm:$0xff]   ;;  %v17030_v25 = vld [vmem:[#allocation11 + $0x195c] ss:$24 sps:$4 sm:$0xff]  }
 0x6c9   :  { %12232 = vmatprep.subr.bf16.mxu0 %v16967_v37  ;;  %v17025_v37 = vld [vmem:[#allocation11 + $0x520] ss:$24 sps:$4 sm:$0xff]  }
 0x6ca   :  { %12132 = vmatpush1.bf16.msra.mxu1 %v16962_v40  ;;  %v17033_v40 = vld [vmem:[#allocation11 + $0x554] ss:$24 sps:$4 sm:$0xff]  }
 0x6cb   :  { %12133 = vmatprep.subr.bf16.mxu1 %v16970_v7  ;;  %v17028_v7 = vld [vmem:[#allocation11 + $0x1958] ss:$24 sps:$4 sm:$0xff]  }
 0x6cc   :  { %12233 = vmatpush1.bf16.msra.mxu0 %v16965_v48  ;;  %v17036_v48 = vld [vmem:[#allocation11 + $0x198c] ss:$24 sps:$4 sm:$0xff]  }
 0x6cd   :  { %12234 = vmatprep.subr.bf16.mxu0 %v16973_v58  ;;  %v17031_v58 = vld [vmem:[#allocation11 + $0x550] ss:$24 sps:$4 sm:$0xff]  }
 0x6ce   :  { %12134 = vmatpush1.bf16.msra.mxu1 %v16968_v14  ;;  %v17039_v14 = vld [vmem:[#allocation11 + $0x584] ss:$24 sps:$4 sm:$0xff]  }
 0x6cf   :  { %12135 = vmatprep.subr.bf16.mxu1 %v16976_v9  ;;  %v17034_v9 = vld [vmem:[#allocation11 + $0x1988] ss:$24 sps:$4 sm:$0xff]  }
 0x6d0   :  { %12235 = vmatpush1.bf16.msra.mxu0 %v16971_v61  ;;  %v17042_v61 = vld [vmem:[#allocation11 + $0x19bc] ss:$24 sps:$4 sm:$0xff]  }
 0x6d1   :  { %12236 = vmatprep.subr.bf16.mxu0 %v16979_v15  ;;  %v17037_v15 = vld [vmem:[#allocation11 + $0x580] ss:$24 sps:$4 sm:$0xff]  }
 0x6d2   :  { %12136 = vmatpush1.bf16.msra.mxu1 %v16974_v39  ;;  %v17045_v39 = vld [vmem:[#allocation11 + $0x5b4] ss:$24 sps:$4 sm:$0xff]  }
 0x6d3   :  { %12137 = vmatprep.subr.bf16.mxu1 %v16982_v56  ;;  %v17040_v56 = vld [vmem:[#allocation11 + $0x19b8] ss:$24 sps:$4 sm:$0xff]  }
 0x6d4   :  { %12237 = vmatpush1.bf16.msra.mxu0 %v16977_v12  ;;  %v17048_v12 = vld [vmem:[#allocation11 + $0x19ec] ss:$24 sps:$4 sm:$0xff]  }
 0x6d5   :  { %12238 = vmatprep.subr.bf16.mxu0 %v16985_v49  ;;  %v17043_v49 = vld [vmem:[#allocation11 + $0x5b0] ss:$24 sps:$4 sm:$0xff]  }
 0x6d6   :  { %12138 = vmatpush1.bf16.msra.mxu1 %v16980_v57  ;;  %v17051_v57 = vld [vmem:[#allocation11 + $0x5e4] ss:$24 sps:$4 sm:$0xff]  }
 0x6d7   :  { %12148 = vmatprep.subr.bf16.mxu1 %v16988_v26  ;;  %v17046_v26 = vld [vmem:[#allocation11 + $0x19e8] ss:$24 sps:$4 sm:$0xff]  }
 0x6d8   :  { %12239 = vmatpush1.bf16.msra.mxu0 %v16983_v23  ;;  %v17054_v23 = vld [vmem:[#allocation11 + $0x1a1c] ss:$24 sps:$4 sm:$0xff]  }
 0x6d9   :  { %12140 = vmatmul.mubr.bf16.vlgmr.msra.gmra.mrb[52].mxu1 %v18362_v27  ;;  %12240 = vmatprep.subr.bf16.mxu0 %v16991_v31  ;;  %v17049_v31 = vld [vmem:[#allocation11 + $0x5e0] ss:$24 sps:$4 sm:$0xff]  }
 0x6da   :  { %12149 = vmatpush1.bf16.msra.mxu1 %v16986_v0  ;;  %12180 = vmatprep.mubr.bf16.mxu1 %v18364_v6  ;;  %v17057_v0 = vld [vmem:[#allocation11 + $0x614] ss:$24 sps:$4 sm:$0xff]  }
 0x6db   :  { %12150 = vmatprep.subr.bf16.mxu1 %v16994_v59  ;;  %v17052_v59 = vld [vmem:[#allocation11 + $0x1a18] ss:$24 sps:$4 sm:$0xff]  }
 0x6dc   :  { %12241 = vmatpush1.bf16.msra.mxu0 %v16989_v32  ;;  %v17060_v32 = vld [vmem:[#allocation11 + $0x1a4c] ss:$24 sps:$4 sm:$0xff]  }
 0x6dd   :  { %12242 = vmatprep.subr.bf16.mxu0 %v16997_v10  ;;  %v17055_v10 = vld [vmem:[#allocation11 + $0x610] ss:$24 sps:$4 sm:$0xff]  }
 0x6de   :  { %12151 = vmatpush1.bf16.msra.mxu1 %v16992_v62  ;;  %v17063_v62 = vld [vmem:[#allocation11 + $0x644] ss:$24 sps:$4 sm:$0xff]  }
 0x6df   :  { %12152 = vmatprep.subr.bf16.mxu1 %v17000_v22  ;;  %v17058_v22 = vld [vmem:[#allocation11 + $0x1a48] ss:$24 sps:$4 sm:$0xff]  }
 0x6e0   :  { %12243 = vmatpush1.bf16.msra.mxu0 %v16995_v18  ;;  %v17066_v18 = vld [vmem:[#allocation11 + $0x1a7c] ss:$24 sps:$4 sm:$0xff]  }
 0x6e1   :  { %12244 = vmatprep.subr.bf16.mxu0 %v17003_v24  ;;  %v17061_v24 = vld [vmem:[#allocation11 + $0x640] ss:$24 sps:$4 sm:$0xff]  }
 0x6e2   :  { %12153 = vmatpush1.bf16.msra.mxu1 %v16998_v46  ;;  %v17069_v46 = vld [vmem:[#allocation11 + $0x674] ss:$24 sps:$4 sm:$0xff]  }
 0x6e3   :  { %12154 = vmatprep.subr.bf16.mxu1 %v17006_v44  ;;  %v17064_v44 = vld [vmem:[#allocation11 + $0x1a78] ss:$24 sps:$4 sm:$0xff]  }
 0x6e4   :  { %12245 = vmatpush1.bf16.msra.mxu0 %v17001_v47  ;;  %v17072_v47 = vld [vmem:[#allocation11 + $0x1aac] ss:$24 sps:$4 sm:$0xff]  }
 0x6e5   :  { %12246 = vmatprep.subr.bf16.mxu0 %v17009_v63  ;;  %v17067_v63 = vld [vmem:[#allocation11 + $0x670] ss:$24 sps:$4 sm:$0xff]  }
 0x6e6   :  { %12155 = vmatpush1.bf16.msra.mxu1 %v17004_v16  ;;  %v17075_v16 = vld [vmem:[#allocation11 + $0x6a4] ss:$24 sps:$4 sm:$0xff]  }
 0x6e7   :  { %12156 = vmatprep.subr.bf16.mxu1 %v17012_v28  ;;  %v17070_v28 = vld [vmem:[#allocation11 + $0x1aa8] ss:$24 sps:$4 sm:$0xff]  }
 0x6e8   :  { %12247 = vmatpush1.bf16.msra.mxu0 %v17007_v41  ;;  %v17073_v41 = vld [vmem:[#allocation11 + $0x6a0] ss:$24 sps:$4 sm:$0xff]  }
 0x6e9   :  { %12248 = vmatprep.subr.bf16.mxu0 %v17015_v50  ;;  %v17081_v50 = vld [vmem:[#allocation11 + $0x6d4] ss:$24 sps:$4 sm:$0xff]  }
 0x6ea   :  { %12157 = vmatpush1.bf16.msra.mxu1 %v17010_v45  ;;  %v17079_v45 = vld [vmem:[#allocation11 + $0x6d0] ss:$24 sps:$4 sm:$0xff]  }
 0x6eb   :  { %12158 = vmatprep.subr.bf16.mxu1 %v17018_v2  ;;  %v17084_v2 = vld [vmem:[#allocation11 + $0x704] ss:$24 sps:$4 sm:$0xff]  }
 0x6ec   :  { %12249 = vmatpush1.bf16.msra.mxu0 %v17013_v13  ;;  %v17082_v13 = vld [vmem:[#allocation11 + $0x700] ss:$24 sps:$4 sm:$0xff]  }
 0x6ed   :  { %12250 = vmatprep.subr.bf16.mxu0 %v17021_v19  ;;  %v17087_v19 = vld [vmem:[#allocation11 + $0x734] ss:$24 sps:$4 sm:$0xff]  }
 0x6ee   :  { %12159 = vmatpush1.bf16.msra.mxu1 %v17016_v53  ;;  %v17085_v53 = vld [vmem:[#allocation11 + $0x730] ss:$24 sps:$4 sm:$0xff]  }
 0x6ef   :  { %12160 = vmatprep.subr.bf16.mxu1 %v17024_v21  ;;  %v17090_v21 = vld [vmem:[#allocation11 + $0x764] ss:$24 sps:$4 sm:$0xff]  }
 0x6f0   :  { %12251 = vmatpush1.bf16.msra.mxu0 %v17019_v17  ;;  %v17088_v17 = vld [vmem:[#allocation11 + $0x760] ss:$24 sps:$4 sm:$0xff]  }
 0x6f1   :  { %12252 = vmatprep.subr.bf16.mxu0 %v17027_v4  ;;  %v17093_v4 = vld [vmem:[#allocation11 + $0x794] ss:$24 sps:$4 sm:$0xff]  }
 0x6f2   :  { %12161 = vmatpush1.bf16.msra.mxu1 %v17022_v8  ;;  %v17091_v8 = vld [vmem:[#allocation11 + $0x790] ss:$24 sps:$4 sm:$0xff]  }
 0x6f3   :  { %12162 = vmatprep.subr.bf16.mxu1 %v17030_v25  ;;  %v17096_v25 = vld [vmem:[#allocation11 + $0x7c4] ss:$24 sps:$4 sm:$0xff]  }
 0x6f4   :  { %12253 = vmatpush1.bf16.msra.mxu0 %v17025_v37  ;;  %v17094_v37 = vld [vmem:[#allocation11 + $0x7c0] ss:$24 sps:$4 sm:$0xff]  }
 0x6f5   :  { %12254 = vmatprep.subr.bf16.mxu0 %v17033_v40  ;;  %v17099_v40 = vld [vmem:[#allocation11 + $0x7f4] ss:$24 sps:$4 sm:$0xff]  }
 0x6f6   :  { %12163 = vmatpush1.bf16.msra.mxu1 %v17028_v7  ;;  %v17097_v7 = vld [vmem:[#allocation11 + $0x7f0] ss:$24 sps:$4 sm:$0xff]  }
 0x6f7   :  { %12164 = vmatprep.subr.bf16.mxu1 %v17036_v48  ;;  %v17102_v48 = vld [vmem:[#allocation11 + $0x824] ss:$24 sps:$4 sm:$0xff]  }
 0x6f8   :  { %12255 = vmatpush1.bf16.msra.mxu0 %v17031_v58  ;;  %v17100_v58 = vld [vmem:[#allocation11 + $0x820] ss:$24 sps:$4 sm:$0xff]  }
 0x6f9   :  { %12256 = vmatprep.subr.bf16.mxu0 %v17039_v14  ;;  %v17105_v14 = vld [vmem:[#allocation11 + $0x854] ss:$24 sps:$4 sm:$0xff]  }
 0x6fa   :  { %12165 = vmatpush1.bf16.msra.mxu1 %v17034_v9  ;;  %v17103_v9 = vld [vmem:[#allocation11 + $0x850] ss:$24 sps:$4 sm:$0xff]  }
 0x6fb   :  { %12166 = vmatprep.subr.bf16.mxu1 %v17042_v61  ;;  %v17108_v61 = vld [vmem:[#allocation11 + $0x884] ss:$24 sps:$4 sm:$0xff]  }
 0x6fc   :  { %12257 = vmatpush1.bf16.msra.mxu0 %v17037_v15  ;;  %v17106_v15 = vld [vmem:[#allocation11 + $0x880] ss:$24 sps:$4 sm:$0xff]  }
 0x6fd   :  { %12258 = vmatprep.subr.bf16.mxu0 %v17045_v39  ;;  %v17111_v39 = vld [vmem:[#allocation11 + $0x8b4] ss:$24 sps:$4 sm:$0xff]  }
 0x6fe   :  { %12167 = vmatpush1.bf16.msra.mxu1 %v17040_v56  ;;  %v17109_v56 = vld [vmem:[#allocation11 + $0x8b0] ss:$24 sps:$4 sm:$0xff]  }
 0x6ff   :  { %12168 = vmatprep.subr.bf16.mxu1 %v17048_v12  ;;  %v17114_v12 = vld [vmem:[#allocation11 + $0x8e4] ss:$24 sps:$4 sm:$0xff]  }
 0x700   :  { %12259 = vmatpush1.bf16.msra.mxu0 %v17043_v49  ;;  %v17112_v49 = vld [vmem:[#allocation11 + $0x8e0] ss:$24 sps:$4 sm:$0xff]  }
 0x701   :  { %12260 = vmatprep.subr.bf16.mxu0 %v17051_v57  ;;  %v17117_v57 = vld [vmem:[#allocation11 + $0x914] ss:$24 sps:$4 sm:$0xff]  }
 0x702   :  { %12169 = vmatpush1.bf16.msra.mxu1 %v17046_v26  ;;  %v17115_v26 = vld [vmem:[#allocation11 + $0x910] ss:$24 sps:$4 sm:$0xff]  }
 0x703   :  { %12170 = vmatprep.subr.bf16.mxu1 %v17054_v23  ;;  %v17120_v23 = vld [vmem:[#allocation11 + $0x944] ss:$24 sps:$4 sm:$0xff]  }
 0x704   :  { %12261 = vmatpush1.bf16.msra.mxu0 %v17049_v31  ;;  %v17118_v31 = vld [vmem:[#allocation11 + $0x940] ss:$24 sps:$4 sm:$0xff]  }
 0x705   :  { %12271 = vmatprep.subr.bf16.mxu0 %v17057_v0  ;;  %v17123_v0 = vld [vmem:[#allocation11 + $0x974] ss:$24 sps:$4 sm:$0xff]  }
 0x706   :  { %12171 = vmatpush1.bf16.msra.mxu1 %v17052_v59  ;;  %v17121_v59 = vld [vmem:[#allocation11 + $0x970] ss:$24 sps:$4 sm:$0xff]  }
 0x707   :  { %12263 = vmatmul.mubr.bf16.vlgmr.msra.gmra.mrb[32].mxu0 %v18207_v1  ;;  %12172 = vmatprep.subr.bf16.mxu1 %v17060_v32  ;;  %v17078_v1 = vld [vmem:[#allocation11 + $0x1adc] ss:$24 sps:$4 sm:$0xff]  }
 0x708   :  { %12272 = vmatpush1.bf16.msra.mxu0 %v17055_v10  ;;  %12303 = vmatprep.mubr.bf16.mxu0 %v18226_v43  ;;  %v17076_v43 = vld [vmem:[#allocation11 + $0x1ad8] ss:$24 sps:$4 sm:$0xff]   ;;  %v17126_v32 = vld [vmem:[#allocation11 + $0x9a4] ss:$24 sps:$4 sm:$0xff]  }
 0x709   :  { %12273 = vmatprep.subr.bf16.mxu0 %v17063_v62  ;;  %v17124_v10 = vld [vmem:[#allocation11 + $0x9a0] ss:$24 sps:$4 sm:$0xff]   ;;  %v17129_v62 = vld [vmem:[#allocation11 + $0x9d4] ss:$24 sps:$4 sm:$0xff]  }
 0x70a   :  { %12173 = vmatpush1.bf16.msra.mxu1 %v17058_v22  ;;  %v17127_v22 = vld [vmem:[#allocation11 + $0x9d0] ss:$24 sps:$4 sm:$0xff]  }
 0x70b   :  { %12174 = vmatprep.subr.bf16.mxu1 %v17066_v18  ;;  %v17132_v18 = vld [vmem:[#allocation11 + $0xa04] ss:$24 sps:$4 sm:$0xff]  }
 0x70c   :  { %12274 = vmatpush1.bf16.msra.mxu0 %v17061_v24  ;;  %v17135_v24 = vld [vmem:[#allocation11 + $0xa34] ss:$24 sps:$4 sm:$0xff]  }
 0x70d   :  { %12275 = vmatprep.subr.bf16.mxu0 %v17069_v46 }
 0x70e   :  { %12175 = vmatpush1.bf16.msra.mxu1 %v17064_v44 }
 0x70f   :  { %12176 = vmatprep.subr.bf16.mxu1 %v17072_v47  ;;  %v17133_v47 = vld [vmem:[#allocation11 + $0xa30] ss:$24 sps:$4 sm:$0xff]  }
 0x710   :  { %12276 = vmatpush1.bf16.msra.mxu0 %v17067_v63 }
 0x711   :  { %12277 = vmatprep.subr.bf16.mxu0 %v17075_v16  ;;  %v17138_v16 = vld [vmem:[#allocation11 + $0xa64] ss:$24 sps:$4 sm:$0xff]  }
 0x712   :  { %12177 = vmatpush1.bf16.msra.mxu1 %v17070_v28  ;;  %v17136_v28 = vld [vmem:[#allocation11 + $0xa60] ss:$24 sps:$4 sm:$0xff]  }
 0x713   :  { %12178 = vmatprep.subr.bf16.mxu1 %v17078_v1  ;;  %v17141_v1 = vld [vmem:[#allocation11 + $0xa94] ss:$24 sps:$4 sm:$0xff]  }
 0x714   :  { %12278 = vmatpush1.bf16.msra.mxu0 %v17073_v41  ;;  %v17139_v41 = vld [vmem:[#allocation11 + $0xa90] ss:$24 sps:$4 sm:$0xff]  }
 0x715   :  { %12279 = vmatprep.subr.bf16.mxu0 %v17081_v50  ;;  %v17144_v50 = vld [vmem:[#allocation11 + $0xac4] ss:$24 sps:$4 sm:$0xff]  }
 0x716   :  { %12179 = vmatpush1.bf16.msra.mxu1 %v17076_v43  ;;  %v17142_v43 = vld [vmem:[#allocation11 + $0xac0] ss:$24 sps:$4 sm:$0xff]  }
 0x718   :  { %12280 = vmatpush1.bf16.msra.mxu0 %v17079_v45  ;;  %v17147_v45 = vld [vmem:[#allocation11 + $0xaf4] ss:$24 sps:$4 sm:$0xff]  }
 0x719   :  { %12181 = vmatmul.mubr.bf16.vlgmr.msra.gmra.mrb[52].mxu1 %v18373_v52  ;;  %12281 = vmatprep.subr.bf16.mxu0 %v17084_v2  ;;  %v17145_v2 = vld [vmem:[#allocation11 + $0xaf0] ss:$24 sps:$4 sm:$0xff]  }
 0x71c   :  { %12282 = vmatpush1.bf16.msra.mxu0 %v17082_v13  ;;  %v17150_v13 = vld [vmem:[#allocation11 + $0xb24] ss:$24 sps:$4 sm:$0xff]  }
 0x71d   :  { %12283 = vmatprep.subr.bf16.mxu0 %v17087_v19  ;;  %v17148_v19 = vld [vmem:[#allocation11 + $0xb20] ss:$24 sps:$4 sm:$0xff]  }
 0x720   :  { %12284 = vmatpush1.bf16.msra.mxu0 %v17085_v53  ;;  %v17153_v53 = vld [vmem:[#allocation11 + $0xb54] ss:$24 sps:$4 sm:$0xff]  }
 0x721   :  { %12285 = vmatprep.subr.bf16.mxu0 %v17090_v21  ;;  %v17151_v21 = vld [vmem:[#allocation11 + $0xb50] ss:$24 sps:$4 sm:$0xff]  }
 0x724   :  { %12286 = vmatpush1.bf16.msra.mxu0 %v17088_v17  ;;  %v17156_v17 = vld [vmem:[#allocation11 + $0xb84] ss:$24 sps:$4 sm:$0xff]  }
 0x725   :  { %12287 = vmatprep.subr.bf16.mxu0 %v17093_v4  ;;  %v17154_v4 = vld [vmem:[#allocation11 + $0xb80] ss:$24 sps:$4 sm:$0xff]  }
 0x728   :  { %12288 = vmatpush1.bf16.msra.mxu0 %v17091_v8  ;;  %v17159_v8 = vld [vmem:[#allocation11 + $0xbb4] ss:$24 sps:$4 sm:$0xff]  }
 0x729   :  { %12289 = vmatprep.subr.bf16.mxu0 %v17096_v25  ;;  %v17157_v25 = vld [vmem:[#allocation11 + $0xbb0] ss:$24 sps:$4 sm:$0xff]  }
 0x72c   :  { %12290 = vmatpush1.bf16.msra.mxu0 %v17094_v37  ;;  %v17162_v37 = vld [vmem:[#allocation11 + $0xbe4] ss:$24 sps:$4 sm:$0xff]  }
 0x72d   :  { %12291 = vmatprep.subr.bf16.mxu0 %v17099_v40  ;;  %v17160_v40 = vld [vmem:[#allocation11 + $0xbe0] ss:$24 sps:$4 sm:$0xff]  }
 0x730   :  { %12292 = vmatpush1.bf16.msra.mxu0 %v17097_v7  ;;  %v17165_v7 = vld [vmem:[#allocation11 + $0xc14] ss:$24 sps:$4 sm:$0xff]  }
 0x731   :  { %12293 = vmatprep.subr.bf16.mxu0 %v17102_v48  ;;  %v17163_v48 = vld [vmem:[#allocation11 + $0xc10] ss:$24 sps:$4 sm:$0xff]  }
 0x734   :  { %12294 = vmatpush1.bf16.msra.mxu0 %v17100_v58  ;;  %v17168_v58 = vld [vmem:[#allocation11 + $0xc44] ss:$24 sps:$4 sm:$0xff]  }
 0x735   :  { %12295 = vmatprep.subr.bf16.mxu0 %v17105_v14  ;;  %v17166_v14 = vld [vmem:[#allocation11 + $0xc40] ss:$24 sps:$4 sm:$0xff]  }
 0x738   :  { %12296 = vmatpush1.bf16.msra.mxu0 %v17103_v9  ;;  %v17171_v9 = vld [vmem:[#allocation11 + $0xc74] ss:$24 sps:$4 sm:$0xff]  }
 0x739   :  { %12297 = vmatprep.subr.bf16.mxu0 %v17108_v61  ;;  %v17169_v61 = vld [vmem:[#allocation11 + $0xc70] ss:$24 sps:$4 sm:$0xff]  }
 0x73c   :  { %12298 = vmatpush1.bf16.msra.mxu0 %v17106_v15  ;;  %v17174_v15 = vld [vmem:[#allocation11 + $0xca4] ss:$24 sps:$4 sm:$0xff]  }
 0x73d   :  { %12299 = vmatprep.subr.bf16.mxu0 %v17111_v39  ;;  %v17172_v39 = vld [vmem:[#allocation11 + $0xca0] ss:$24 sps:$4 sm:$0xff]  }
 0x740   :  { %12300 = vmatpush1.bf16.msra.mxu0 %v17109_v56  ;;  %v17177_v56 = vld [vmem:[#allocation11 + $0xcd4] ss:$24 sps:$4 sm:$0xff]  }
 0x741   :  { %12301 = vmatprep.subr.bf16.mxu0 %v17114_v12  ;;  %v17175_v12 = vld [vmem:[#allocation11 + $0xcd0] ss:$24 sps:$4 sm:$0xff]  }
 0x744   :  { %12302 = vmatpush1.bf16.msra.mxu0 %v17112_v49  ;;  %v17180_v49 = vld [vmem:[#allocation11 + $0xd04] ss:$24 sps:$4 sm:$0xff]  }
 0x745   :  { %12312 = vmatprep.subr.bf16.mxu0 %v17117_v57  ;;  %v17183_v57 = vld [vmem:[#allocation11 + $0xd34] ss:$24 sps:$4 sm:$0xff]  }
 0x747   :  { %12304 = vmatmul.mubr.bf16.vlgmr.msra.gmra.mrb[32].mxu0 %v18240_v42  ;;  %v17130_v42 = vld [vmem:[#allocation11 + $0xa00] ss:$24 sps:$4 sm:$0xff]  }
 0x748   :  { %12313 = vmatpush1.bf16.msra.mxu0 %v17115_v26  ;;  %12344 = vmatprep.mubr.bf16.mxu0 %v18242_v20  ;;  %v17186_v26 = vld [vmem:[#allocation11 + $0xd64] ss:$24 sps:$4 sm:$0xff]  }
 0x749   :  { %12314 = vmatprep.subr.bf16.mxu0 %v17120_v23  ;;  %v17184_v23 = vld [vmem:[#allocation11 + $0xd60] ss:$24 sps:$4 sm:$0xff]  }
 0x74c   :  { %12315 = vmatpush1.bf16.msra.mxu0 %v17118_v31  ;;  %v17189_v31 = vld [vmem:[#allocation11 + $0xd94] ss:$24 sps:$4 sm:$0xff]  }
 0x74d   :  { %12316 = vmatprep.subr.bf16.mxu0 %v17123_v0  ;;  %v17187_v0 = vld [vmem:[#allocation11 + $0xd90] ss:$24 sps:$4 sm:$0xff]  }
 0x750   :  { %12317 = vmatpush1.bf16.msra.mxu0 %v17121_v59  ;;  %v17192_v59 = vld [vmem:[#allocation11 + $0xdc4] ss:$24 sps:$4 sm:$0xff]  }
 0x751   :  { %12318 = vmatprep.subr.bf16.mxu0 %v17126_v32  ;;  %v17190_v32 = vld [vmem:[#allocation11 + $0xdc0] ss:$24 sps:$4 sm:$0xff]  }
 0x754   :  { %12319 = vmatpush1.bf16.msra.mxu0 %v17124_v10  ;;  %v17195_v10 = vld [vmem:[#allocation11 + $0xdf4] ss:$24 sps:$4 sm:$0xff]  }
 0x755   :  { %12320 = vmatprep.subr.bf16.mxu0 %v17129_v62  ;;  %v17193_v62 = vld [vmem:[#allocation11 + $0xdf0] ss:$24 sps:$4 sm:$0xff]  }
 0x758   :  { %12321 = vmatpush1.bf16.msra.mxu0 %v17127_v22  ;;  %v17198_v22 = vld [vmem:[#allocation11 + $0xe24] ss:$24 sps:$4 sm:$0xff]  }
 0x759   :  { %12322 = vmatprep.subr.bf16.mxu0 %v17132_v18  ;;  %v17196_v18 = vld [vmem:[#allocation11 + $0xe20] ss:$24 sps:$4 sm:$0xff]  }
 0x75a   :  { %v18388_v20 = vpop.f32.mrb[28].mxu0 }
 0x75b   :  { %v18390_v46 = vpop.f32.mrb[29].mxu0 }
 0x75c   :  { %v11817_v44 = vpop.f32.mrb[30].mxu0  ;;  %12323 = vmatpush1.bf16.msra.mxu0 %v17130_v42  ;;  %v17201_v42 = vld [vmem:[#allocation11 + $0xe54] ss:$24 sps:$4 sm:$0xff]  }
 0x75d   :  { %v11818_v63 = vpop.f32.mrb[31].mxu0  ;;  %12324 = vmatprep.subr.bf16.mxu0 %v17135_v24  ;;  %v17199_v24 = vld [vmem:[#allocation11 + $0xe50] ss:$24 sps:$4 sm:$0xff]   ;;  %v17204_v44 = vld [vmem:[#allocation11 + $0xe84] ss:$24 sps:$4 sm:$0xff]  }
 0x75e   :  { %v17207_v63 = vld [vmem:[#allocation11 + $0xeb4] ss:$24 sps:$4 sm:$0xff]  }
 0x760   :  { %12325 = vmatpush1.bf16.msra.mxu0 %v17133_v47  ;;  %v17202_v47 = vld [vmem:[#allocation11 + $0xe80] ss:$24 sps:$4 sm:$0xff]  }
 0x761   :  { %12326 = vmatprep.subr.bf16.mxu0 %v17138_v16  ;;  %v17205_v16 = vld [vmem:[#allocation11 + $0xeb0] ss:$24 sps:$4 sm:$0xff]  }
 0x764   :  { %12327 = vmatpush1.bf16.msra.mxu0 %v17136_v28  ;;  %v17210_v28 = vld [vmem:[#allocation11 + $0xee4] ss:$24 sps:$4 sm:$0xff]  }
 0x765   :  { %12328 = vmatprep.subr.bf16.mxu0 %v17141_v1  ;;  %v17208_v1 = vld [vmem:[#allocation11 + $0xee0] ss:$24 sps:$4 sm:$0xff]  }
 0x768   :  { %12329 = vmatpush1.bf16.msra.mxu0 %v17139_v41  ;;  %v17213_v41 = vld [vmem:[#allocation11 + $0xf14] ss:$24 sps:$4 sm:$0xff]  }
 0x769   :  { %12330 = vmatprep.subr.bf16.mxu0 %v17144_v50  ;;  %v17211_v50 = vld [vmem:[#allocation11 + $0xf10] ss:$24 sps:$4 sm:$0xff]  }
 0x76c   :  { %12331 = vmatpush1.bf16.msra.mxu0 %v17142_v43  ;;  %v17216_v43 = vld [vmem:[#allocation11 + $0xf44] ss:$24 sps:$4 sm:$0xff]  }
 0x76d   :  { %12332 = vmatprep.subr.bf16.mxu0 %v17147_v45  ;;  %v17214_v45 = vld [vmem:[#allocation11 + $0xf40] ss:$24 sps:$4 sm:$0xff]  }
 0x770   :  { %12333 = vmatpush1.bf16.msra.mxu0 %v17145_v2  ;;  %v17219_v2 = vld [vmem:[#allocation11 + $0xf74] ss:$24 sps:$4 sm:$0xff]  }
 0x771   :  { %12334 = vmatprep.subr.bf16.mxu0 %v17150_v13  ;;  %v17217_v13 = vld [vmem:[#allocation11 + $0xf70] ss:$24 sps:$4 sm:$0xff]  }
 0x774   :  { %12335 = vmatpush1.bf16.msra.mxu0 %v17148_v19  ;;  %v17222_v19 = vld [vmem:[#allocation11 + $0xfa4] ss:$24 sps:$4 sm:$0xff]  }
 0x775   :  { %12336 = vmatprep.subr.bf16.mxu0 %v17153_v53  ;;  %v17220_v53 = vld [vmem:[#allocation11 + $0xfa0] ss:$24 sps:$4 sm:$0xff]  }
 0x778   :  { %12337 = vmatpush1.bf16.msra.mxu0 %v17151_v21  ;;  %v17225_v21 = vld [vmem:[#allocation11 + $0xfd4] ss:$24 sps:$4 sm:$0xff]  }
 0x779   :  { %12338 = vmatprep.subr.bf16.mxu0 %v17156_v17  ;;  %v17223_v17 = vld [vmem:[#allocation11 + $0xfd0] ss:$24 sps:$4 sm:$0xff]  }
 0x77c   :  { %12339 = vmatpush1.bf16.msra.mxu0 %v17154_v4  ;;  %v17228_v4 = vld [vmem:[#allocation11 + $0x1004] ss:$24 sps:$4 sm:$0xff]  }
 0x77d   :  { %12340 = vmatprep.subr.bf16.mxu0 %v17159_v8  ;;  %v17231_v8 = vld [vmem:[#allocation11 + $0x1034] ss:$24 sps:$4 sm:$0xff]  }
 0x780   :  { %12341 = vmatpush1.bf16.msra.mxu0 %v17157_v25  ;;  %v17234_v25 = vld [vmem:[#allocation11 + $0x1064] ss:$24 sps:$4 sm:$0xff]  }
 0x781   :  { %12342 = vmatprep.subr.bf16.mxu0 %v17162_v37  ;;  %v17232_v37 = vld [vmem:[#allocation11 + $0x1060] ss:$24 sps:$4 sm:$0xff]  }
 0x784   :  { %12343 = vmatpush1.bf16.msra.mxu0 %v17160_v40  ;;  %v17237_v40 = vld [vmem:[#allocation11 + $0x1094] ss:$24 sps:$4 sm:$0xff]  }
 0x785   :  { %12353 = vmatprep.subr.bf16.mxu0 %v17165_v7  ;;  %v17235_v7 = vld [vmem:[#allocation11 + $0x1090] ss:$24 sps:$4 sm:$0xff]  }
 0x787   :  { %12345 = vmatmul.mubr.bf16.vlgmr.msra.gmra.mrb[32].mxu0 %v18268_v33  ;;  %v17178_v33 = vld [vmem:[#allocation11 + $0xd00] ss:$24 sps:$4 sm:$0xff]  }
 0x788   :  { %12354 = vmatpush1.bf16.msra.mxu0 %v17163_v48  ;;  %12385 = vmatprep.mubr.bf16.mxu0 %v18270_v29  ;;  %v17181_v29 = vld [vmem:[#allocation11 + $0xd30] ss:$24 sps:$4 sm:$0xff]   ;;  %v17240_v48 = vld [vmem:[#allocation11 + $0x10c4] ss:$24 sps:$4 sm:$0xff]  }
 0x789   :  { %12355 = vmatprep.subr.bf16.mxu0 %v17168_v58  ;;  %v18396_v58 = vld [vmem:[#allocation13] sm:$0x3f] }
 0x78c   :  { %12356 = vmatpush1.bf16.msra.mxu0 %v17166_v14  ;;  %v17238_v14 = vld [vmem:[#allocation11 + $0x10c0] ss:$24 sps:$4 sm:$0xff]  }
 0x78d   :  { %12357 = vmatprep.subr.bf16.mxu0 %v17171_v9  ;;  %v7104_v9 = vrot.slane %v18396_v58, %v17903_v3 }
 0x790   :  { %12358 = vmatpush1.bf16.msra.mxu0 %v17169_v61  ;;  %v7112_v61 = vrot.slane %v18396_v58, %v17911_v11 }
 0x791   :  { %12359 = vmatprep.subr.bf16.mxu0 %v17174_v15  ;;  %v17243_v15 = vld [vmem:[#allocation11 + $0x10f4] ss:$24 sps:$4 sm:$0xff]  }
 0x794   :  { %12360 = vmatpush1.bf16.msra.mxu0 %v17172_v39  ;;  %v7108_v39 = vrot.slane %v18396_v58, %v17906_v5 }
 0x795   :  { %12361 = vmatprep.subr.bf16.mxu0 %v17177_v56  ;;  %v7116_v56 = vrot.slane %v18396_v58, %v18023_v51 }
 0x798   :  { %12362 = vmatpush1.bf16.msra.mxu0 %v17175_v12 }
 0x799   :  { %12363 = vmatprep.subr.bf16.mxu0 %v17180_v49  ;;  %v17241_v49 = vld [vmem:[#allocation11 + $0x10f0] ss:$24 sps:$4 sm:$0xff]  }
 0x79c   :  { %12364 = vmatpush1.bf16.msra.mxu0 %v17178_v33  ;;  %v18407_v33 = vadd.f32 %v18388_v20, %v7104_v9  ;;  %v17244_v20 = vld [vmem:[#allocation11 + $0x1120] ss:$24 sps:$4 sm:$0xff]  }
 0x79d   :  { %12365 = vmatprep.subr.bf16.mxu0 %v17183_v57  ;;  %v17298_v9 = vld [vmem:[#allocation11 + $0x1480] ss:$24 sps:$4 sm:$0xff]  }
 0x7a0   :  { %12366 = vmatpush1.bf16.msra.mxu0 %v17181_v29 }
 0x7a1   :  { %12367 = vmatprep.subr.bf16.mxu0 %v17186_v26  ;;  %v17246_v26 = vld [vmem:[#allocation11 + $0x1124] ss:$24 sps:$4 sm:$0xff]  }
 0x7a4   :  { %12368 = vmatpush1.bf16.msra.mxu0 %v17184_v23  ;;  %v18412_v23 = vadd.f32 %v18390_v46, %v7108_v39  ;;  %v17250_v46 = vld [vmem:[#allocation11 + $0x1180] ss:$24 sps:$4 sm:$0xff]   ;;  %v17306_v39 = vld [vmem:[#allocation11 + $0x14e4] ss:$24 sps:$4 sm:$0xff]  }
 0x7a5   :  { %12369 = vmatprep.subr.bf16.mxu0 %v17189_v31 }
 0x7a8   :  { %12370 = vmatpush1.bf16.msra.mxu0 %v17187_v0 }
 0x7a9   :  { %12371 = vmatprep.subr.bf16.mxu0 %v17192_v59 }
 0x7ac   :  { %12372 = vmatpush1.bf16.msra.mxu0 %v17190_v32 }
 0x7ad   :  { %12373 = vmatprep.subr.bf16.mxu0 %v17195_v10  ;;  %v17249_v10 = vld [vmem:[#allocation11 + $0x1154] ss:$24 sps:$4 sm:$0xff]  }
 0x7b0   :  { %12374 = vmatpush1.bf16.msra.mxu0 %v17193_v62  ;;  %v17247_v62 = vld [vmem:[#allocation11 + $0x1150] ss:$24 sps:$4 sm:$0xff]  }
 0x7b1   :  { %12375 = vmatprep.subr.bf16.mxu0 %v17198_v22  ;;  %v17252_v22 = vld [vmem:[#allocation11 + $0x1184] ss:$24 sps:$4 sm:$0xff]  }
 0x7b4   :  { %12376 = vmatpush1.bf16.msra.mxu0 %v17196_v18  ;;  %v17255_v18 = vld [vmem:[#allocation11 + $0x11b4] ss:$24 sps:$4 sm:$0xff]  }
 0x7b5   :  { %12377 = vmatprep.subr.bf16.mxu0 %v17201_v42  ;;  %v17253_v42 = vld [vmem:[#allocation11 + $0x11b0] ss:$24 sps:$4 sm:$0xff]  }
 0x7b8   :  { %12378 = vmatpush1.bf16.msra.mxu0 %v17199_v24  ;;  %v17258_v24 = vld [vmem:[#allocation11 + $0x11e4] ss:$24 sps:$4 sm:$0xff]  }
 0x7b9   :  { %12379 = vmatprep.subr.bf16.mxu0 %v17204_v44  ;;  %v17256_v44 = vld [vmem:[#allocation11 + $0x11e0] ss:$24 sps:$4 sm:$0xff]  }
 0x7bc   :  { %12380 = vmatpush1.bf16.msra.mxu0 %v17202_v47  ;;  %v17261_v47 = vld [vmem:[#allocation11 + $0x1214] ss:$24 sps:$4 sm:$0xff]  }
 0x7bd   :  { %12381 = vmatprep.subr.bf16.mxu0 %v17207_v63  ;;  %v17259_v63 = vld [vmem:[#allocation11 + $0x1210] ss:$24 sps:$4 sm:$0xff]  }
 0x7c0   :  { %12382 = vmatpush1.bf16.msra.mxu0 %v17205_v16  ;;  %v17264_v16 = vld [vmem:[#allocation11 + $0x1244] ss:$24 sps:$4 sm:$0xff]  }
 0x7c1   :  { %12383 = vmatprep.subr.bf16.mxu0 %v17210_v28  ;;  %v17262_v28 = vld [vmem:[#allocation11 + $0x1240] ss:$24 sps:$4 sm:$0xff]  }
 0x7c4   :  { %12384 = vmatpush1.bf16.msra.mxu0 %v17208_v1  ;;  %v17267_v1 = vld [vmem:[#allocation11 + $0x1274] ss:$24 sps:$4 sm:$0xff]  }
 0x7c5   :  { %12394 = vmatprep.subr.bf16.mxu0 %v17213_v41  ;;  %v17265_v41 = vld [vmem:[#allocation11 + $0x1270] ss:$24 sps:$4 sm:$0xff]  }
 0x7c7   :  { %12386 = vmatmul.mubr.bf16.vlgmr.msra.gmra.mrb[32].mxu0 %v18302_v30  ;;  %v17226_v30 = vld [vmem:[#allocation11 + $0x1000] ss:$24 sps:$4 sm:$0xff]  }
 0x7c8   :  { %12395 = vmatpush1.bf16.msra.mxu0 %v17211_v50  ;;  %12426 = vmatprep.mubr.bf16.mxu0 %v18304_v36  ;;  %v17229_v36 = vld [vmem:[#allocation11 + $0x1030] ss:$24 sps:$4 sm:$0xff]   ;;  %v17270_v50 = vld [vmem:[#allocation11 + $0x12a4] ss:$24 sps:$4 sm:$0xff]  }
 0x7c9   :  { %12396 = vmatprep.subr.bf16.mxu0 %v17216_v43  ;;  %v17268_v43 = vld [vmem:[#allocation11 + $0x12a0] ss:$24 sps:$4 sm:$0xff]  }
 0x7cc   :  { %12397 = vmatpush1.bf16.msra.mxu0 %v17214_v45  ;;  %v17273_v45 = vld [vmem:[#allocation11 + $0x12d4] ss:$24 sps:$4 sm:$0xff]  }
 0x7cd   :  { %12398 = vmatprep.subr.bf16.mxu0 %v17219_v2  ;;  %v17271_v2 = vld [vmem:[#allocation11 + $0x12d0] ss:$24 sps:$4 sm:$0xff]  }
 0x7d0   :  { %12399 = vmatpush1.bf16.msra.mxu0 %v17217_v13  ;;  %v17276_v13 = vld [vmem:[#allocation11 + $0x1304] ss:$24 sps:$4 sm:$0xff]  }
 0x7d1   :  { %12400 = vmatprep.subr.bf16.mxu0 %v17222_v19  ;;  %v17279_v19 = vld [vmem:[#allocation11 + $0x1334] ss:$24 sps:$4 sm:$0xff]  }
 0x7d4   :  { %12401 = vmatpush1.bf16.msra.mxu0 %v17220_v53  ;;  %v17282_v53 = vld [vmem:[#allocation11 + $0x1364] ss:$24 sps:$4 sm:$0xff]  }
 0x7d5   :  { %12402 = vmatprep.subr.bf16.mxu0 %v17225_v21  ;;  %v17280_v21 = vld [vmem:[#allocation11 + $0x1360] ss:$24 sps:$4 sm:$0xff]  }
 0x7d8   :  { %12403 = vmatpush1.bf16.msra.mxu0 %v17223_v17  ;;  %v17285_v17 = vld [vmem:[#allocation11 + $0x1394] ss:$24 sps:$4 sm:$0xff]  }
 0x7d9   :  { %12404 = vmatprep.subr.bf16.mxu0 %v17228_v4  ;;  %v17283_v4 = vld [vmem:[#allocation11 + $0x1390] ss:$24 sps:$4 sm:$0xff]  }
 0x7dc   :  { %12405 = vmatpush1.bf16.msra.mxu0 %v17226_v30  ;;  %v17288_v30 = vld [vmem:[#allocation11 + $0x13c4] ss:$24 sps:$4 sm:$0xff]  }
 0x7dd   :  { %12406 = vmatprep.subr.bf16.mxu0 %v17231_v8  ;;  %v17286_v8 = vld [vmem:[#allocation11 + $0x13c0] ss:$24 sps:$4 sm:$0xff]  }
 0x7e0   :  { %12407 = vmatpush1.bf16.msra.mxu0 %v17229_v36  ;;  %v17291_v36 = vld [vmem:[#allocation11 + $0x13f4] ss:$24 sps:$4 sm:$0xff]  }
 0x7e1   :  { %12408 = vmatprep.subr.bf16.mxu0 %v17234_v25  ;;  %v17289_v25 = vld [vmem:[#allocation11 + $0x13f0] ss:$24 sps:$4 sm:$0xff]  }
 0x7e4   :  { %12409 = vmatpush1.bf16.msra.mxu0 %v17232_v37  ;;  %v17294_v37 = vld [vmem:[#allocation11 + $0x1424] ss:$24 sps:$4 sm:$0xff]  }
 0x7e5   :  { %12410 = vmatprep.subr.bf16.mxu0 %v17237_v40  ;;  %v17292_v40 = vld [vmem:[#allocation11 + $0x1420] ss:$24 sps:$4 sm:$0xff]  }
 0x7e8   :  { %12411 = vmatpush1.bf16.msra.mxu0 %v17235_v7  ;;  %v17297_v7 = vld [vmem:[#allocation11 + $0x1454] ss:$24 sps:$4 sm:$0xff]  }
 0x7e9   :  { %12412 = vmatprep.subr.bf16.mxu0 %v17240_v48  ;;  %v17295_v48 = vld [vmem:[#allocation11 + $0x1450] ss:$24 sps:$4 sm:$0xff]  }
 0x7ec   :  { %12413 = vmatpush1.bf16.msra.mxu0 %v17238_v14  ;;  %v12182_v12 = vpop.f32.mrb[52].mxu1  ;;  %v17300_v14 = vld [vmem:[#allocation11 + $0x1484] ss:$24 sps:$4 sm:$0xff]  }
 0x7ed   :  { %v18409_v57 = vadd.f32 %v12182_v12, %v7112_v61  ;;  %v12184_v29 = vpop.f32.mrb[53].mxu1  ;;  %12414 = vmatprep.subr.bf16.mxu0 %v17243_v15  ;;  %v17303_v61 = vld [vmem:[#allocation11 + $0x14b4] ss:$24 sps:$4 sm:$0xff]   ;;  %v17301_v15 = vld [vmem:[#allocation11 + $0x14b0] ss:$24 sps:$4 sm:$0xff]  }
 0x7ee   :  { %v18414_v31 = vadd.f32 %v12184_v29, %v7116_v56  ;;  %v12186_v0 = vpop.f32.mrb[54].mxu1  ;;  %v17304_v56 = vld [vmem:[#allocation11 + $0x14e0] ss:$24 sps:$4 sm:$0xff]   ;;  %v17309_v12 = vld [vmem:[#allocation11 + $0x1514] ss:$24 sps:$4 sm:$0xff]  }
 0x7ef   :  { %v12558_v51 = vmax.f32 %v18407_v33, %v18409_v57  ;;  %v12187_v59 = vpop.f32.mrb[55].mxu1  ;;  %v17312_v29 = vld [vmem:[#allocation11 + $0x1544] ss:$24 sps:$4 sm:$0xff]   ;;  %v17405_v0 = vld [vmem:[#allocation14 + $0x4] ss:$12 sps:$4 sm:$0xff]  }
 0x7f0   :  { %v12559_v32 = vmax.f32 %v18412_v23, %v18414_v31  ;;  %12415 = vmatpush1.bf16.msra.mxu0 %v17241_v49  ;;  %v17307_v49 = vld [vmem:[#allocation11 + $0x1510] ss:$24 sps:$4 sm:$0xff]   ;;  %v17310_v59 = vld [vmem:[#allocation11 + $0x1540] ss:$24 sps:$4 sm:$0xff]   ;;  %12903 = vmatprep.subr.bf16.mxu1 %v17405_v0 }
 0x7f1   :  { %12416 = vmatprep.subr.bf16.mxu0 %v17246_v26  ;;  %v17403_v26 = vld [vmem:[#allocation14] ss:$12 sps:$4 sm:$0xff]   ;;  %v17444_v0 = vld [vmem:[#allocation14 + $0x13c] ss:$12 sps:$4 sm:$0xff]   ;;  %v17456_v33 = vld [vmem:[#allocation14 + $0x38] ss:$12 sps:$4 sm:$0xff]  }
 0x7f2   :  { %12904 = vmatpush1.bf16.msra.mxu1 %v17403_v26  ;;  %v17439_v26 = vld [vmem:[#allocation14 + $0x120] ss:$12 sps:$4 sm:$0xff]   ;;  %v17457_v57 = vld [vmem:[#allocation14 + $0x110] ss:$12 sps:$4 sm:$0xff]   ;;  %v17459_v31 = vld [vmem:[#allocation14 + $0x128] ss:$12 sps:$4 sm:$0xff]  }
 0x7f3   :  { %v17458_v23 = vld [vmem:[#allocation14 + $0x50] ss:$12 sps:$4 sm:$0xff]  }
 0x7f4   :  { %12417 = vmatpush1.bf16.msra.mxu0 %v17244_v20  ;;  %v17408_v20 = vld [vmem:[#allocation14 + $0x1c] ss:$12 sps:$4 sm:$0xff]  }
 0x7f5   :  { %12418 = vmatprep.subr.bf16.mxu0 %v17249_v10  ;;  %v17315_v10 = vld [vmem:[#allocation11 + $0x1574] ss:$24 sps:$4 sm:$0xff]   ;;  %12905 = vmatprep.subr.bf16.mxu1 %v17408_v20 }
 0x7f6   :  { %v17351_v20 = vld [vmem:[#allocation11 + $0x17b4] ss:$24 sps:$4 sm:$0xff]  }
 0x7f8   :  { %12419 = vmatpush1.bf16.msra.mxu0 %v17247_v62  ;;  %v17406_v62 = vld [vmem:[#allocation14 + $0x18] ss:$12 sps:$4 sm:$0xff]  }
 0x7f9   :  { %12420 = vmatprep.subr.bf16.mxu0 %v17252_v22  ;;  %v17411_v22 = vld [vmem:[#allocation14 + $0x34] ss:$12 sps:$4 sm:$0xff]   ;;  %12906 = vmatpush1.bf16.msra.mxu1 %v17406_v62 }
 0x7fa   :  { %12907 = vmatprep.subr.bf16.mxu1 %v17411_v22  ;;  %v17349_v62 = vld [vmem:[#allocation11 + $0x17b0] ss:$24 sps:$4 sm:$0xff]   ;;  %v17354_v22 = vld [vmem:[#allocation11 + $0x17e4] ss:$24 sps:$4 sm:$0xff]  }
 0x7fc   :  { %12421 = vmatpush1.bf16.msra.mxu0 %v17250_v46  ;;  %v17313_v46 = vld [vmem:[#allocation11 + $0x1570] ss:$24 sps:$4 sm:$0xff]  }
 0x7fd   :  { %12422 = vmatprep.subr.bf16.mxu0 %v17255_v18  ;;  %v17318_v18 = vld [vmem:[#allocation11 + $0x15a4] ss:$24 sps:$4 sm:$0xff]  }
 0x800   :  { %12423 = vmatpush1.bf16.msra.mxu0 %v17253_v42  ;;  %v17414_v42 = vld [vmem:[#allocation14 + $0x4c] ss:$12 sps:$4 sm:$0xff]  }
 0x801   :  { %12424 = vmatprep.subr.bf16.mxu0 %v17258_v24  ;;  %v17316_v24 = vld [vmem:[#allocation11 + $0x15a0] ss:$24 sps:$4 sm:$0xff]  }
 0x804   :  { %12425 = vmatpush1.bf16.msra.mxu0 %v17256_v44  ;;  %v17412_v44 = vld [vmem:[#allocation14 + $0x48] ss:$12 sps:$4 sm:$0xff]  }
 0x805   :  { %12435 = vmatprep.subr.bf16.mxu0 %v17261_v47  ;;  %v17417_v47 = vld [vmem:[#allocation14 + $0x64] ss:$12 sps:$4 sm:$0xff]  }
 0x807   :  { %12427 = vmatmul.mubr.bf16.vlgmr.msra.gmra.mrb[32].mxu0 %v18334_v38  ;;  %v17274_v38 = vld [vmem:[#allocation11 + $0x1300] ss:$24 sps:$4 sm:$0xff]  }
 0x808   :  { %12436 = vmatpush1.bf16.msra.mxu0 %v17259_v63  ;;  %12467 = vmatprep.mubr.bf16.mxu0 %v18336_v60  ;;  %v17277_v60 = vld [vmem:[#allocation11 + $0x1330] ss:$24 sps:$4 sm:$0xff]  }
 0x809   :  { %12437 = vmatprep.subr.bf16.mxu0 %v17264_v16  ;;  %v17319_v63 = vld [vmem:[#allocation11 + $0x15d0] ss:$24 sps:$4 sm:$0xff]   ;;  %v17324_v16 = vld [vmem:[#allocation11 + $0x1604] ss:$24 sps:$4 sm:$0xff]  }
 0x80c   :  { %12438 = vmatpush1.bf16.msra.mxu0 %v17262_v28  ;;  %v17415_v28 = vld [vmem:[#allocation14 + $0x60] ss:$12 sps:$4 sm:$0xff]  }
 0x80d   :  { %12439 = vmatprep.subr.bf16.mxu0 %v17267_v1  ;;  %v17420_v1 = vld [vmem:[#allocation14 + $0x7c] ss:$12 sps:$4 sm:$0xff]  }
 0x810   :  { %12440 = vmatpush1.bf16.msra.mxu0 %v17265_v41  ;;  %v17322_v41 = vld [vmem:[#allocation11 + $0x1600] ss:$24 sps:$4 sm:$0xff]  }
 0x811   :  { %12441 = vmatprep.subr.bf16.mxu0 %v17270_v50  ;;  %v17327_v50 = vld [vmem:[#allocation11 + $0x1634] ss:$24 sps:$4 sm:$0xff]  }
 0x814   :  { %12442 = vmatpush1.bf16.msra.mxu0 %v17268_v43  ;;  %v17418_v43 = vld [vmem:[#allocation14 + $0x78] ss:$12 sps:$4 sm:$0xff]  }
 0x815   :  { %12443 = vmatprep.subr.bf16.mxu0 %v17273_v45  ;;  %v17423_v45 = vld [vmem:[#allocation14 + $0x94] ss:$12 sps:$4 sm:$0xff]  }
 0x818   :  { %12444 = vmatpush1.bf16.msra.mxu0 %v17271_v2  ;;  %v17325_v2 = vld [vmem:[#allocation11 + $0x1630] ss:$24 sps:$4 sm:$0xff]  }
 0x819   :  { %12445 = vmatprep.subr.bf16.mxu0 %v17276_v13  ;;  %v17330_v13 = vld [vmem:[#allocation11 + $0x1664] ss:$24 sps:$4 sm:$0xff]  }
 0x81c   :  { %12446 = vmatpush1.bf16.msra.mxu0 %v17274_v38  ;;  %v17421_v38 = vld [vmem:[#allocation14 + $0x90] ss:$12 sps:$4 sm:$0xff]  }
 0x81d   :  { %12447 = vmatprep.subr.bf16.mxu0 %v17279_v19  ;;  %v17426_v19 = vld [vmem:[#allocation14 + $0xac] ss:$12 sps:$4 sm:$0xff]  }
 0x820   :  { %12448 = vmatpush1.bf16.msra.mxu0 %v17277_v60  ;;  %v17328_v60 = vld [vmem:[#allocation11 + $0x1660] ss:$24 sps:$4 sm:$0xff]  }
 0x821   :  { %12449 = vmatprep.subr.bf16.mxu0 %v17282_v53  ;;  %v17333_v53 = vld [vmem:[#allocation11 + $0x1694] ss:$24 sps:$4 sm:$0xff]  }
 0x824   :  { %12450 = vmatpush1.bf16.msra.mxu0 %v17280_v21  ;;  %v17424_v21 = vld [vmem:[#allocation14 + $0xa8] ss:$12 sps:$4 sm:$0xff]  }
 0x825   :  { %12451 = vmatprep.subr.bf16.mxu0 %v17285_v17  ;;  %v17429_v17 = vld [vmem:[#allocation14 + $0xc4] ss:$12 sps:$4 sm:$0xff]  }
 0x828   :  { %12452 = vmatpush1.bf16.msra.mxu0 %v17283_v4  ;;  %v17331_v4 = vld [vmem:[#allocation11 + $0x1690] ss:$24 sps:$4 sm:$0xff]  }
 0x829   :  { %12453 = vmatprep.subr.bf16.mxu0 %v17288_v30  ;;  %v17336_v30 = vld [vmem:[#allocation11 + $0x16c4] ss:$24 sps:$4 sm:$0xff]  }
 0x82c   :  { %12454 = vmatpush1.bf16.msra.mxu0 %v17286_v8  ;;  %v17427_v8 = vld [vmem:[#allocation14 + $0xc0] ss:$12 sps:$4 sm:$0xff]  }
 0x82d   :  { %12455 = vmatprep.subr.bf16.mxu0 %v17291_v36  ;;  %v17432_v36 = vld [vmem:[#allocation14 + $0xdc] ss:$12 sps:$4 sm:$0xff]  }
 0x830   :  { %12456 = vmatpush1.bf16.msra.mxu0 %v17289_v25  ;;  %v17334_v25 = vld [vmem:[#allocation11 + $0x16c0] ss:$24 sps:$4 sm:$0xff]  }
 0x831   :  { %12457 = vmatprep.subr.bf16.mxu0 %v17294_v37  ;;  %v17339_v37 = vld [vmem:[#allocation11 + $0x16f4] ss:$24 sps:$4 sm:$0xff]  }
 0x834   :  { %12458 = vmatpush1.bf16.msra.mxu0 %v17292_v40  ;;  %v17430_v40 = vld [vmem:[#allocation14 + $0xd8] ss:$12 sps:$4 sm:$0xff]  }
 0x835   :  { %12459 = vmatprep.subr.bf16.mxu0 %v17297_v7  ;;  %v17435_v7 = vld [vmem:[#allocation14 + $0xf4] ss:$12 sps:$4 sm:$0xff]  }
 0x838   :  { %12460 = vmatpush1.bf16.msra.mxu0 %v17295_v48  ;;  %v17337_v48 = vld [vmem:[#allocation11 + $0x16f0] ss:$24 sps:$4 sm:$0xff]  }
 0x839   :  { %12461 = vmatprep.subr.bf16.mxu0 %v17300_v14  ;;  %v17342_v14 = vld [vmem:[#allocation11 + $0x1724] ss:$24 sps:$4 sm:$0xff]  }
 0x83c   :  { %12462 = vmatpush1.bf16.msra.mxu0 %v17298_v9  ;;  %v17433_v9 = vld [vmem:[#allocation14 + $0xf0] ss:$12 sps:$4 sm:$0xff]  }
 0x83d   :  { %12463 = vmatprep.subr.bf16.mxu0 %v17303_v61  ;;  %v17438_v61 = vld [vmem:[#allocation14 + $0x10c] ss:$12 sps:$4 sm:$0xff]  }
 0x840   :  { %12464 = vmatpush1.bf16.msra.mxu0 %v17301_v15  ;;  %v17340_v15 = vld [vmem:[#allocation11 + $0x1720] ss:$24 sps:$4 sm:$0xff]  }
 0x841   :  { %12465 = vmatprep.subr.bf16.mxu0 %v17306_v39  ;;  %v17345_v39 = vld [vmem:[#allocation11 + $0x1754] ss:$24 sps:$4 sm:$0xff]  }
 0x844   :  { %12466 = vmatpush1.bf16.msra.mxu0 %v17304_v56  ;;  %v17436_v56 = vld [vmem:[#allocation14 + $0x108] ss:$12 sps:$4 sm:$0xff]  }
 0x845   :  { %12476 = vmatprep.subr.bf16.mxu0 %v17309_v12  ;;  %v17441_v12 = vld [vmem:[#allocation14 + $0x124] ss:$12 sps:$4 sm:$0xff]  }
 0x847   :  { %12468 = vmatmul.mubr.bf16.vlgmr.msra.gmra.mrb[32].mxu0 %v18348_v35  ;;  %v17409_v35 = vld [vmem:[#allocation14 + $0x30] ss:$12 sps:$4 sm:$0xff]  }
 0x848   :  { %12477 = vmatpush1.bf16.msra.mxu0 %v17307_v49  ;;  %12508 = vmatprep.mubr.bf16.mxu0 %v18350_v34  ;;  %v17321_v34 = vld [vmem:[#allocation11 + $0x15d4] ss:$24 sps:$4 sm:$0xff]   ;;  %v17343_v49 = vld [vmem:[#allocation11 + $0x1750] ss:$24 sps:$4 sm:$0xff]  }
 0x849   :  { %12478 = vmatprep.subr.bf16.mxu0 %v17312_v29  ;;  %12908 = vmatpush1.bf16.msra.mxu1 %v17409_v35  ;;  %v17348_v29 = vld [vmem:[#allocation11 + $0x1784] ss:$24 sps:$4 sm:$0xff]   ;;  %v17355_v35 = vld [vmem:[#allocation11 + $0x1810] ss:$24 sps:$4 sm:$0xff]  }
 0x84a   :  { %12909 = vmatprep.subr.bf16.mxu1 %v17414_v42  ;;  %v17360_v42 = vld [vmem:[#allocation11 + $0x1844] ss:$24 sps:$4 sm:$0xff]  }
 0x84c   :  { %12479 = vmatpush1.bf16.msra.mxu0 %v17310_v59  ;;  %v17346_v59 = vld [vmem:[#allocation11 + $0x1780] ss:$24 sps:$4 sm:$0xff]  }
 0x84d   :  { %12480 = vmatprep.subr.bf16.mxu0 %v17315_v10  ;;  %12910 = vmatpush1.bf16.msra.mxu1 %v17412_v44  ;;  %v17442_v10 = vld [vmem:[#allocation14 + $0x138] ss:$12 sps:$4 sm:$0xff]  }
 0x84e   :  { %12911 = vmatprep.subr.bf16.mxu1 %v17417_v47  ;;  %v17361_v44 = vld [vmem:[#allocation11 + $0x1870] ss:$24 sps:$4 sm:$0xff]   ;;  %v17366_v47 = vld [vmem:[#allocation11 + $0x18a4] ss:$24 sps:$4 sm:$0xff]  }
 0x850   :  { %12481 = vmatpush1.bf16.msra.mxu0 %v17313_v46  ;;  %v17352_v46 = vld [vmem:[#allocation11 + $0x17e0] ss:$24 sps:$4 sm:$0xff]  }
 0x851   :  { %12482 = vmatprep.subr.bf16.mxu0 %v17318_v18  ;;  %12912 = vmatpush1.bf16.msra.mxu1 %v17415_v28  ;;  %v17357_v18 = vld [vmem:[#allocation11 + $0x1814] ss:$24 sps:$4 sm:$0xff]   ;;  %v17367_v28 = vld [vmem:[#allocation11 + $0x18d0] ss:$24 sps:$4 sm:$0xff]  }
 0x852   :  { %12913 = vmatprep.subr.bf16.mxu1 %v17420_v1  ;;  %v17372_v1 = vld [vmem:[#allocation11 + $0x1904] ss:$24 sps:$4 sm:$0xff]  }
 0x854   :  { %12483 = vmatpush1.bf16.msra.mxu0 %v17316_v24  ;;  %v17358_v24 = vld [vmem:[#allocation11 + $0x1840] ss:$24 sps:$4 sm:$0xff]  }
 0x855   :  { %12484 = vmatprep.subr.bf16.mxu0 %v17321_v34  ;;  %12914 = vmatpush1.bf16.msra.mxu1 %v17418_v43  ;;  %v17363_v34 = vld [vmem:[#allocation11 + $0x1874] ss:$24 sps:$4 sm:$0xff]   ;;  %v17376_v43 = vld [vmem:[#allocation11 + $0x1960] ss:$24 sps:$4 sm:$0xff]  }
 0x856   :  { %12915 = vmatprep.subr.bf16.mxu1 %v17423_v45  ;;  %v17381_v45 = vld [vmem:[#allocation11 + $0x1994] ss:$24 sps:$4 sm:$0xff]  }
 0x858   :  { %12485 = vmatpush1.bf16.msra.mxu0 %v17319_v63  ;;  %v17364_v63 = vld [vmem:[#allocation11 + $0x18a0] ss:$24 sps:$4 sm:$0xff]  }
 0x859   :  { %12486 = vmatprep.subr.bf16.mxu0 %v17324_v16  ;;  %12916 = vmatpush1.bf16.msra.mxu1 %v17421_v38  ;;  %v17369_v16 = vld [vmem:[#allocation11 + $0x18d4] ss:$24 sps:$4 sm:$0xff]   ;;  %v17382_v38 = vld [vmem:[#allocation11 + $0x19c0] ss:$24 sps:$4 sm:$0xff]  }
 0x85a   :  { %12917 = vmatprep.subr.bf16.mxu1 %v17426_v19  ;;  %v17387_v19 = vld [vmem:[#allocation11 + $0x19f4] ss:$24 sps:$4 sm:$0xff]  }
 0x85c   :  { %12487 = vmatpush1.bf16.msra.mxu0 %v17322_v41  ;;  %v17375_v41 = vld [vmem:[#allocation11 + $0x1934] ss:$24 sps:$4 sm:$0xff]  }
 0x85d   :  { %12488 = vmatprep.subr.bf16.mxu0 %v17327_v50  ;;  %12918 = vmatpush1.bf16.msra.mxu1 %v17424_v21  ;;  %v17378_v50 = vld [vmem:[#allocation11 + $0x1964] ss:$24 sps:$4 sm:$0xff]   ;;  %v17388_v21 = vld [vmem:[#allocation11 + $0x1a20] ss:$24 sps:$4 sm:$0xff]  }
 0x85e   :  { %12919 = vmatprep.subr.bf16.mxu1 %v17429_v17  ;;  %v17393_v17 = vld [vmem:[#allocation11 + $0x1a54] ss:$24 sps:$4 sm:$0xff]  }
 0x860   :  { %12489 = vmatpush1.bf16.msra.mxu0 %v17325_v2  ;;  %v17379_v2 = vld [vmem:[#allocation11 + $0x1990] ss:$24 sps:$4 sm:$0xff]  }
 0x861   :  { %12490 = vmatprep.subr.bf16.mxu0 %v17330_v13  ;;  %12920 = vmatpush1.bf16.msra.mxu1 %v17427_v8  ;;  %v17384_v13 = vld [vmem:[#allocation11 + $0x19c4] ss:$24 sps:$4 sm:$0xff]   ;;  %v17394_v8 = vld [vmem:[#allocation11 + $0x1a80] ss:$24 sps:$4 sm:$0xff]  }
 0x862   :  { %12921 = vmatprep.subr.bf16.mxu1 %v17432_v36  ;;  %v17399_v36 = vld [vmem:[#allocation11 + $0x1ab4] ss:$24 sps:$4 sm:$0xff]  }
 0x864   :  { %12491 = vmatpush1.bf16.msra.mxu0 %v17328_v60  ;;  %v17385_v60 = vld [vmem:[#allocation11 + $0x19f0] ss:$24 sps:$4 sm:$0xff]  }
 0x865   :  { %12492 = vmatprep.subr.bf16.mxu0 %v17333_v53  ;;  %12922 = vmatpush1.bf16.msra.mxu1 %v17430_v40  ;;  %v17390_v53 = vld [vmem:[#allocation11 + $0x1a24] ss:$24 sps:$4 sm:$0xff]   ;;  %v17400_v40 = vld [vmem:[#allocation11 + $0x1ae0] ss:$24 sps:$4 sm:$0xff]  }
 0x866   :  { %12923 = vmatprep.subr.bf16.mxu1 %v17435_v7  ;;  %v17447_v7 = vld [vmem:[#allocation14 + $0x154] ss:$12 sps:$4 sm:$0xff]  }
 0x868   :  { %12493 = vmatpush1.bf16.msra.mxu0 %v17331_v4  ;;  %v17391_v4 = vld [vmem:[#allocation11 + $0x1a50] ss:$24 sps:$4 sm:$0xff]  }
 0x869   :  { %12494 = vmatprep.subr.bf16.mxu0 %v17336_v30  ;;  %12924 = vmatpush1.bf16.msra.mxu1 %v17433_v9  ;;  %v17396_v30 = vld [vmem:[#allocation11 + $0x1a84] ss:$24 sps:$4 sm:$0xff]  }
 0x86a   :  { %12925 = vmatprep.subr.bf16.mxu1 %v17438_v61  ;;  %v17448_v9 = vld [vmem:[#allocation14 + $0x168] ss:$12 sps:$4 sm:$0xff]  }
 0x86b   :  { %v17451_v61 = vld [vmem:[#allocation14 + $0xc8] ss:$12 sps:$4 sm:$0xff]  }
 0x86c   :  { %12495 = vmatpush1.bf16.msra.mxu0 %v17334_v25  ;;  %v17397_v25 = vld [vmem:[#allocation11 + $0x1ab0] ss:$24 sps:$4 sm:$0xff]  }
 0x86d   :  { %12496 = vmatprep.subr.bf16.mxu0 %v17339_v37  ;;  %12926 = vmatpush1.bf16.msra.mxu1 %v17436_v56  ;;  %v17402_v37 = vld [vmem:[#allocation11 + $0x1ae4] ss:$24 sps:$4 sm:$0xff]  }
 0x86e   :  { %12927 = vmatprep.subr.bf16.mxu1 %v17441_v12 }
 0x870   :  { %12497 = vmatpush1.bf16.msra.mxu0 %v17337_v48  ;;  %v17445_v48 = vld [vmem:[#allocation14 + $0x150] ss:$12 sps:$4 sm:$0xff]  }
 0x871   :  { %12498 = vmatprep.subr.bf16.mxu0 %v17342_v14  ;;  %12928 = vmatpush1.bf16.msra.mxu1 %v17439_v26  ;;  %v17450_v14 = vld [vmem:[#allocation14 + $0x16c] ss:$12 sps:$4 sm:$0xff]  }
 0x872   :  { %12929 = vmatprep.subr.bf16.mxu1 %v17444_v0 }
 0x874   :  { %12499 = vmatpush1.bf16.msra.mxu0 %v17340_v15  ;;  %v7120_v15 = vrot.slane %v18396_v58, %v18026_v54 }
 0x875   :  { %12500 = vmatprep.subr.bf16.mxu0 %v17345_v39  ;;  %12930 = vmatpush1.bf16.msra.mxu1 %v17442_v10  ;;  %v7124_v39 = vrot.slane %v18396_v58, %v18029_v55  ;;  %v17453_v55 = vld [vmem:[#allocation14 + $0xe0] ss:$12 sps:$4 sm:$0xff]  }
 0x876   :  { %12931 = vmatprep.subr.bf16.mxu1 %v17447_v7  ;;  %v17454_v58 = vld [vmem:[#allocation14 + $0x20] ss:$12 sps:$4 sm:$0xff]  }
 0x878   :  { %12501 = vmatpush1.bf16.msra.mxu0 %v17343_v49 }
 0x879   :  { %12502 = vmatprep.subr.bf16.mxu0 %v17348_v29  ;;  %12932 = vmatpush1.bf16.msra.mxu1 %v17445_v48 }
 0x87a   :  { %12933 = vmatprep.subr.bf16.mxu1 %v17450_v14 }
 0x87c   :  { %12503 = vmatpush1.bf16.msra.mxu0 %v17346_v59 }
 0x87d   :  { %12504 = vmatprep.subr.bf16.mxu0 %v17351_v20  ;;  %12934 = vmatpush1.bf16.msra.mxu1 %v17448_v9 }
 0x87e   :  { %14731 = vmatprep.subr.bf16.mxu1 %v17451_v61 }
 0x880   :  { %12505 = vmatpush1.bf16.msra.mxu0 %v17349_v62  ;;  %v17452_v62 = vld [vmem:[#allocation14 + $0x8] ss:$12 sps:$4 sm:$0xff]  }
 0x881   :  { %12506 = vmatprep.subr.bf16.mxu0 %v17354_v22 }
 0x884   :  { %12507 = vmatpush1.bf16.msra.mxu0 %v17352_v46  ;;  %v17455_v46 = vld [vmem:[#allocation14 + $0xf8] ss:$12 sps:$4 sm:$0xff]  }
 0x885   :  { %12517 = vmatprep.subr.bf16.mxu0 %v17357_v18  ;;  %v17462_v18 = vld [vmem:[#allocation14 + $0x80] ss:$12 sps:$4 sm:$0xff]  }
 0x887   :  { %12509 = vmatmul.mubr.bf16.vlgmr.msra.gmra.mrb[32].mxu0 %v18362_v27  ;;  %v17370_v27 = vld [vmem:[#allocation11 + $0x1900] ss:$24 sps:$4 sm:$0xff]  }
 0x888   :  { %12518 = vmatpush1.bf16.msra.mxu0 %v17355_v35  ;;  %12549 = vmatprep.mubr.bf16.mxu0 %v18364_v6  ;;  %v17373_v6 = vld [vmem:[#allocation11 + $0x1930] ss:$24 sps:$4 sm:$0xff]  }
 0x889   :  { %12519 = vmatprep.subr.bf16.mxu0 %v17360_v42  ;;  %v17463_v35 = vld [vmem:[#allocation14 + $0x158] ss:$12 sps:$4 sm:$0xff]  }
 0x88a   :  { %v17464_v42 = vld [vmem:[#allocation14 + $0x98] ss:$12 sps:$4 sm:$0xff]  }
 0x88c   :  { %12520 = vmatpush1.bf16.msra.mxu0 %v17358_v24  ;;  %v17465_v24 = vld [vmem:[#allocation14 + $0x170] ss:$12 sps:$4 sm:$0xff]  }
 0x88d   :  { %12521 = vmatprep.subr.bf16.mxu0 %v17363_v34  ;;  %v17466_v34 = vld [vmem:[#allocation14 + $0xb0] ss:$12 sps:$4 sm:$0xff]  }
 0x890   :  { %12522 = vmatpush1.bf16.msra.mxu0 %v17361_v44  ;;  %v18520_v44 = vmov 0.0|0.0  }
 0x891   :  { %12523 = vmatprep.subr.bf16.mxu0 %v17366_v47  ;;  %v18521_v47 = vmov 0.0  }
 0x894   :  { %12524 = vmatpush1.bf16.msra.mxu0 %v17364_v63  ;;  %v12987_v63 = vld [vmem:[%s18510_s9] sm:$0xff] }
 0x895   :  { %12525 = vmatprep.subr.bf16.mxu0 %v17369_v16  ;;  %v12988_v16 = vld [vmem:[%s18510_s9 + $0x8] sm:$0xff] }
 0x898   :  { %12526 = vmatpush1.bf16.msra.mxu0 %v17367_v28  ;;  %v12989_v28 = vld [vmem:[%s18510_s9 + $0x10] sm:$0xff] }
 0x899   :  { %12527 = vmatprep.subr.bf16.mxu0 %v17372_v1  ;;  %v14831_v1 = vpack.c.bf16 %v12988_v16, %v12987_v63 }
 0x89c   :  { %12528 = vmatpush1.bf16.msra.mxu0 %v17370_v27  ;;  %v12990_v27 = vld [vmem:[%s18510_s9 + $0x18] sm:$0xff] }
 0x89d   :  { %12529 = vmatprep.subr.bf16.mxu0 %v17375_v41  ;;  %v14834_v41 = vpack.c.bf16 %v12990_v27, %v12989_v28 }
 0x8a0   :  { %12530 = vmatpush1.bf16.msra.mxu0 %v17373_v6  ;;  %v12991_v6 = vld [vmem:[%s18510_s9 + $0x20] sm:$0xff] }
 0x8a1   :  { %12531 = vmatprep.subr.bf16.mxu0 %v17378_v50  ;;  %v12992_v50 = vld [vmem:[%s18510_s9 + $0x28] sm:$0xff] }
 0x8a4   :  { %12532 = vmatpush1.bf16.msra.mxu0 %v17376_v43  ;;  %v14837_v43 = vpack.c.bf16 %v12992_v50, %v12991_v6 }
 0x8a5   :  { %12533 = vmatprep.subr.bf16.mxu0 %v17381_v45  ;;  %v12993_v45 = vld [vmem:[%s18510_s9 + $0x30] sm:$0xff] }
 0x8a8   :  { %12534 = vmatpush1.bf16.msra.mxu0 %v17379_v2  ;;  %v12994_v2 = vld [vmem:[%s18510_s9 + $0x38] sm:$0xff] }
 0x8a9   :  { %12535 = vmatprep.subr.bf16.mxu0 %v17384_v13  ;;  %v14840_v13 = vpack.c.bf16 %v12994_v2, %v12993_v45 }
 0x8ac   :  { %12536 = vmatpush1.bf16.msra.mxu0 %v17382_v38  ;;  %v12995_v38 = vld [vmem:[%s18510_s9 + $0x40] sm:$0xff] }
 0x8ad   :  { %12537 = vmatprep.subr.bf16.mxu0 %v17387_v19  ;;  %v12996_v19 = vld [vmem:[%s18510_s9 + $0x48] sm:$0xff] }
 0x8b0   :  { %12538 = vmatpush1.bf16.msra.mxu0 %v17385_v60  ;;  %v14843_v60 = vpack.c.bf16 %v12996_v19, %v12995_v38 }
 0x8b1   :  { %12539 = vmatprep.subr.bf16.mxu0 %v17390_v53  ;;  %v12997_v53 = vld [vmem:[%s18510_s9 + $0x50] sm:$0xff] }
 0x8b4   :  { %12540 = vmatpush1.bf16.msra.mxu0 %v17388_v21  ;;  %v12998_v21 = vld [vmem:[%s18510_s9 + $0x58] sm:$0xff] }
 0x8b5   :  { %12541 = vmatprep.subr.bf16.mxu0 %v17393_v17  ;;  %v14846_v17 = vpack.c.bf16 %v12998_v21, %v12997_v53 }
 0x8b8   :  { %12542 = vmatpush1.bf16.msra.mxu0 %v17391_v4  ;;  %v12999_v4 = vld [vmem:[%s18510_s9 + $0x60] sm:$0xff] }
 0x8b9   :  { %12543 = vmatprep.subr.bf16.mxu0 %v17396_v30  ;;  %v13000_v30 = vld [vmem:[%s18510_s9 + $0x68] sm:$0xff] }
 0x8bc   :  { %12544 = vmatpush1.bf16.msra.mxu0 %v17394_v8  ;;  %v14849_v8 = vpack.c.bf16 %v13000_v30, %v12999_v4 }
 0x8bd   :  { %12545 = vmatprep.subr.bf16.mxu0 %v17399_v36  ;;  %v13001_v36 = vld [vmem:[%s18510_s9 + $0x70] sm:$0xff] }
 0x8c0   :  { %12546 = vmatpush1.bf16.msra.mxu0 %v17397_v25  ;;  %v13002_v25 = vld [vmem:[%s18510_s9 + $0x78] sm:$0xff] }
 0x8c1   :  { %12547 = vmatprep.subr.bf16.mxu0 %v17402_v37  ;;  %v14852_v37 = vpack.c.bf16 %v13002_v25, %v13001_v36 }
 0x8c4   :  { %12548 = vmatpush1.bf16.msra.mxu0 %v17400_v40  ;;  %v12630_v40 = vld [vmem:[#allocation16] sm:$0x7] }
 0x8c5   :  { %v12635_v7 = vrot.slane %v12630_v40, %v17903_v3  ;;  %v12639_v48 = vrot.slane %v12630_v40, %v17906_v5  ;;  %v14725_v3 = vld [vmem:[#allocation2] ss:$0 sm:$0xff] }
 0x8c7   :  { %12550 = vmatmul.mubr.bf16.vlgmr.msra.gmra.mrb[32].mxu0 %v18373_v52 }
 0x99a   :  { %v12551_v56 = vpop.f32.mrb[32].mxu0 }
 0x99b   :  { %v14896_v12 = vadd.f32 %v12551_v56, %v7120_v15  ;;  %v12553_v49 = vpop.f32.mrb[33].mxu0 }
 0x99c   :  { %v14897_v52 = vadd.f32 %v12553_v49, %v7124_v39  ;;  %v12555_v29 = vpop.f32.mrb[34].mxu0 }
 0x99d   :  { %v12560_v26 = vmax.f32 %v12558_v51, %v14896_v12  ;;  %v12556_v0 = vpop.f32.mrb[35].mxu0  ;;  %v17460_v51 = vld [vmem:[#allocation14 + $0x68] ss:$12 sps:$4 sm:$0xff]  }
 0x99e   :  { %v12561_v59 = vmax.f32 %v12559_v32, %v14897_v52  ;;  %v17461_v32 = vld [vmem:[#allocation14 + $0x140] ss:$12 sps:$4 sm:$0xff]   ;;  %v12643_v52 = vrot.slane %v12630_v40, %v17911_v11 }
 0x99f   :  { %v12562_v20 = vmax.f32 %v12560_v26, 0.0 }
 0x9a0   :  { %v12563_v10 = vmax.f32 %v12561_v59, 0.0 }
 0x9a1   :  { %v12564_v22 = vpack.c.bf16 %v12562_v20, %v12562_v20 }
 0x9a2   :  { %v12565_v54 = vpack.c.bf16 %v12563_v10, %v12563_v10 }
 0x9a4   :  { %12935 = vmatprep.mubr.bf16.mxu1 %v12565_v54 }
 0x9a5   :  { %12936 = vmatmul.mubr.bf16.vlgmr.msra.gmra.mrb[56].mxu1 %v12564_v22 }
 0x9a6   :  { %14732 = vmatpush3.bf16.msra.mxu1 %v17452_v62  ;;  %12976 = vmatprep.mubr.bf16.mxu1 %v12565_v54 }
 0x9a7   :  { %14733 = vmatprep.subr.bf16.mxu1 %v17453_v55 }
 0x9aa   :  { %14734 = vmatpush3.bf16.msra.mxu1 %v17454_v58 }
 0x9ab   :  { %14735 = vmatprep.subr.bf16.mxu1 %v17455_v46 }
 0x9ae   :  { %14736 = vmatpush3.bf16.msra.mxu1 %v17456_v33 }
 0x9af   :  { %14737 = vmatprep.subr.bf16.mxu1 %v17457_v57 }
 0x9b2   :  { %14738 = vmatpush3.bf16.msra.mxu1 %v17458_v23 }
 0x9b3   :  { %14739 = vmatprep.subr.bf16.mxu1 %v17459_v31 }
 0x9b6   :  { %14740 = vmatpush3.bf16.msra.mxu1 %v17460_v51 }
 0x9b7   :  { %14741 = vmatprep.subr.bf16.mxu1 %v17461_v32 }
 0x9ba   :  { %14742 = vmatpush3.bf16.msra.mxu1 %v17462_v18 }
 0x9bb   :  { %14743 = vmatprep.subr.bf16.mxu1 %v17463_v35 }
 0x9be   :  { %14744 = vmatpush3.bf16.msra.mxu1 %v17464_v42 }
 0x9bf   :  { %14745 = vmatprep.subr.bf16.mxu1 %v17465_v24 }
 0x9c2   :  { %14746 = vmatpush3.bf16.msra.mxu1 %v17466_v34 }
 0x9c3   :  { %14830 = vmatprep.subr.bf16.mxu1 %v18520_v44 }
 0x9c5   :  { %12977 = vmatmul.mubr.bf16.vlgmr.msra.gmra.mrb[60].mxu1 %v12564_v22 }
 0x9c6   :  { %14813 = vmatprep.mubr.msk.f32.mxu1 %vm17704_vm1, %v18521_v47  ;;  %14832 = vmatpush3.bf16.msra.mxu1 %v14831_v1 }
 0x9c7   :  { %14833 = vmatprep.subr.bf16.mxu1 %v18520_v44 }
 0x9ca   :  { %14835 = vmatpush3.bf16.msra.mxu1 %v14834_v41 }
 0x9cb   :  { %14836 = vmatprep.subr.bf16.mxu1 %v18520_v44 }
 0x9ce   :  { %14838 = vmatpush3.bf16.msra.mxu1 %v14837_v43 }
 0x9cf   :  { %14839 = vmatprep.subr.bf16.mxu1 %v18520_v44 }
 0x9d2   :  { %14841 = vmatpush3.bf16.msra.mxu1 %v14840_v13 }
 0x9d3   :  { %14842 = vmatprep.subr.bf16.mxu1 %v18520_v44 }
 0x9d6   :  { %14844 = vmatpush3.bf16.msra.mxu1 %v14843_v60 }
 0x9d7   :  { %14845 = vmatprep.subr.bf16.mxu1 %v18520_v44 }
 0x9da   :  { %14847 = vmatpush3.bf16.msra.mxu1 %v14846_v17 }
 0x9db   :  { %14848 = vmatprep.subr.bf16.mxu1 %v18520_v44 }
 0x9de   :  { %14850 = vmatpush3.bf16.msra.mxu1 %v14849_v8 }
 0x9df   :  { %14851 = vmatprep.subr.bf16.mxu1 %v18520_v44 }
 0x9e2   :  { %14853 = vmatpush3.bf16.msra.mxu1 %v14852_v37 }
 0xa78   :  { %v12937_v14 = vpop.f32.mrb[56].mxu1 }
 0xa79   :  { %v12938_v9 = vadd.f32 %v12937_v14, %v12635_v7  ;;  %v12939_v61 = vpop.f32.mrb[57].mxu1 }
 0xa7a   :  { %v12940_v15 = vadd.f32 %v12939_v61, %v12639_v48  ;;  %v12941_v39 = vpop.f32.mrb[58].mxu1 }
 0xa7b   :  { %v12942_v56 = vpop.f32.mrb[59].mxu1 }
 0xa7c   :  { %v12984_v12 = vmax.f32 %v12938_v9, %v12940_v15 }
 0xa98   :  { %v14747_v49 = vpop.f32.mrb[60].mxu1 }
 0xa99   :  { %v14748_v29 = vpop.f32.mrb[61].mxu1 }
 0xa9a   :  { %v14749_v26 = vadd.f32 %v14748_v29, %v14747_v49  ;;  %v14750_v0 = vpop.f32.mrb[62].mxu1 }
 0xa9b   :  { %v14751_v59 = vpop.f32.mrb[63].mxu1 }
 0xa9c   :  { %v12979_v20 = vadd.f32 %v14749_v26, %v12643_v52 }
 0xa9e   :  { %v12985_v10 = vmax.f32 %v12984_v12, %v12979_v20 }
 0xaa0   :  { %v12986_v54 = vmax.f32 %v12985_v10, 0.0 }
 0xaa2   :  { %14814 = vmatmul.mubr.f32.vlgmr.msra.gmra.mrb[64].mxu1 %v12986_v54 }
 0xb75   :  { %v13076_v5 = vpop.f32.mrb[64].mxu1 }
 0xb76   :  { %v13077_v62 = vadd.f32 %v14725_v3, %v13076_v5  ;;  %v14815_v22 = vpop.f32.mrb[65].mxu1 }
 0xb78   :  { %13081 = vst.msk [vmem:[%s18512_s11] sm:$0xff] %vm13080_vm4, %v13077_v62 }
 0xb79   :  { %13086 = vsyncpa [#allocation4], 1 }
 0xb7a   :  { %13087 = vsyncpa [#allocation6], 1 }
 0xb7b   :  { %13088 = vsyncpa [#allocation9], 1 }
 0xb7c   :  { %13089 = vsyncpa [#allocation12], 1 }
 0xb7d   :  { %13090 = vsyncpa [#allocation15], 1 }

</bundles_post_ra>
